<compile_context>
chip_gen: v6e
topology: v6e:2x2x1
jax: 0.10.0
libtpu: 0.0.40
codegen_flags: <defaults>
</compile_context>

<pallas_src>
import functools
import math

import jax
import jax.numpy as jnp
from jax.experimental import pallas as pl
from jax.experimental.pallas import tpu as pltpu


_VMEM_LIMIT = 48 * 1024 * 1024  # <= v7x's 64 MiB physical VMEM, with headroom.


def _round_up(x, m):
    return (x + m - 1) // m * m


# ----------------------------------------------------------------------------
# Fused conv(im2col matmul) + bias + ReLU + 2x2 pool kernel.
# p_ref holds the im2col rows of the 4 conv-output pixels of each pooling
# window on a leading axis of size 4; the pool reduction happens in-register,
# so the un-pooled conv feature map never touches HBM.
# ----------------------------------------------------------------------------
def _conv_pool_kernel(p_ref, w_ref, b_ref, o_ref, *, pool):
    w = w_ref[...]
    bias = b_ref[...]                      # (1, tn) float32
    if pool == "max":
        # ReLU is monotone and the bias is shared across the window, so
        # max_q relu(y_q + b) == relu(max_q y_q + b): hoist the epilogue.
        acc = jnp.dot(p_ref[0], w, preferred_element_type=jnp.float32)
        for q in range(1, 4):              # unrolled at trace time
            acc = jnp.maximum(acc, jnp.dot(p_ref[q], w,
                                           preferred_element_type=jnp.float32))
        acc = jnp.maximum(acc + bias, 0.0)
    else:                                  # "avg": ReLU applies per window position
        acc = None
        for q in range(4):
            y = jnp.dot(p_ref[q], w, preferred_element_type=jnp.float32)
            y = jnp.maximum(y + bias, 0.0)
            acc = y if acc is None else acc + y
        acc = acc * 0.25
    o_ref[...] = acc.astype(o_ref.dtype)


def _conv_pool_call(q, w, b, *, pool, tm_cap=512, out_dtype=jnp.bfloat16):
    """q: (4, M, K) pooled-window patches, w: (K, N), b: (N,) -> (M, N)."""
    _, M, K = q.shape
    Kw, N = w.shape
    assert K == Kw

    # Pad K to a multiple of 16 (bf16 sublane packing; zeros are exact).
    K_pad = _round_up(K, 16)
    if K_pad != K:
        q = jnp.pad(q, ((0, 0), (0, 0), (0, K_pad - K)))
        w = jnp.pad(w, ((0, K_pad - K), (0, 0)))

    # Pad N to a multiple of 128 so the kernel's output stores are lane-dense
    # (unmasked vst).  Padded columns (zero weight, zero bias) are sliced off.
    N_pad = _round_up(N, 128)
    if N_pad != N:
        w = jnp.pad(w, ((0, 0), (0, N_pad - N)))
        b = jnp.pad(b, (0, N_pad - N))

    # M tiling: full M when small (legal: block dim == full dim), capped tiles otherwise.
    if M <= tm_cap:
        tm, M_pad = M, M
    else:
        tm = tm_cap
        M_pad = _round_up(M, tm)
        q = jnp.pad(q, ((0, 0), (0, M_pad - M), (0, 0)))

    # N tiling: lane-dense blocks; >1 block when possible (v7x megacore).
    tn = 256 if N_pad % 256 == 0 else 128

    q = q.astype(jnp.bfloat16)
    w = w.astype(jnp.bfloat16)
    bias = b.astype(jnp.float32).reshape(1, N_pad)

    grid = (M_pad // tm, N_pad // tn)
    out = pl.pallas_call(
        functools.partial(_conv_pool_kernel, pool=pool),
        out_shape=jax.ShapeDtypeStruct((M_pad, N_pad), out_dtype),
        grid_spec=pltpu.PrefetchScalarGridSpec(
            num_scalar_prefetch=0,
            grid=grid,
            in_specs=[
                pl.BlockSpec((4, tm, K_pad), lambda i, j: (0, i, 0)),
                pl.BlockSpec((K_pad, tn), lambda i, j: (0, j)),
                pl.BlockSpec((1, tn), lambda i, j: (0, j)),
            ],
            out_specs=pl.BlockSpec((tm, tn), lambda i, j: (i, j)),
        ),
        compiler_params=pltpu.CompilerParams(
            dimension_semantics=("parallel", "parallel"),
            vmem_limit_bytes=_VMEM_LIMIT,
        ),
    )(q, w, bias)
    return out[:M, :N]


def _im2col_3x3_same(x_nhwc):
    """(B,H,W,C) -> (B,H,W,9*C) patches for a 3x3 'same' conv, (kh,kw,cin) order."""
    B, H, W, C = x_nhwc.shape
    xp = jnp.pad(x_nhwc, ((0, 0), (1, 1), (1, 1), (0, 0)))
    cols = [xp[:, kh:kh + H, kw:kw + W, :] for kh in range(3) for kw in range(3)]
    return jnp.concatenate(cols, axis=-1)


def conv3x3_relu_pool2x2(x_nhwc, w_hwio, b, *, pool):
    """Conv2d(k=3,s=1,p=1) + ReLU + 2x2 {max,avg} pool, fused in one Pallas kernel."""
    B, H, W, C = x_nhwc.shape
    Cout = w_hwio.shape[-1]
    Hp, Wp = H // 2, W // 2
    patches = _im2col_3x3_same(x_nhwc)                               # (B,H,W,9C)
    # Group the 4 conv-output pixels of each 2x2 pooling window on a leading axis.
    q = jnp.stack(
        [patches[:, dh::2, dw::2, :] for dh in (0, 1) for dw in (0, 1)], axis=0
    ).reshape(4, B * Hp * Wp, 9 * C)
    w2d = w_hwio.reshape(9 * C, Cout)                                # (kh,kw,cin) order
    y = _conv_pool_call(q, w2d, b, pool=pool)                        # (B*Hp*Wp, Cout)
    return y.reshape(B, Hp, Wp, Cout)


# ----------------------------------------------------------------------------
# Fused classifier kernel: fc1 (K-tiled, f32 accumulate) -> bias+ReLU ->
# fc2 -> bias+ReLU, all in one pallas_call.  The fc1 activation never
# touches HBM; the tiny fc2 weight/bias stay resident across K steps.
# Dropout is identity at inference.
# TODO(synk): training-mode dropout masking not implemented.
# ----------------------------------------------------------------------------
def _classifier_kernel(x_ref, w1_ref, b1_ref, w2_ref, b2_ref, o_ref, acc_ref):
    k = pl.program_id(0)

    @pl.when(k == 0)
    def _():
        acc_ref[...] = jnp.zeros_like(acc_ref)

    acc_ref[...] += jnp.dot(x_ref[...], w1_ref[...],
                            preferred_element_type=jnp.float32)

    @pl.when(k == pl.num_programs(0) - 1)
    def _():
        h = jnp.maximum(acc_ref[...] + b1_ref[...], 0.0)             # fc1 epilogue (f32)
        y = jnp.dot(h.astype(w2_ref.dtype), w2_ref[...],
                    preferred_element_type=jnp.float32)
        o_ref[...] = jnp.maximum(y + b2_ref[...], 0.0).astype(o_ref.dtype)


def classifier_fused(x, w1, b1, w2, b2, *, tk=6272, out_dtype=jnp.float32):
    """relu(relu(x @ w1 + b1) @ w2 + b2); x:(M,K), w1:(K,N1), w2:(N1,N2)."""
    M, K = x.shape
    K1, N1 = w1.shape
    N1b, N2 = w2.shape
    assert K == K1 and N1 == N1b

    tk = min(tk, K)
    K_pad = _round_up(K, tk)
    if K_pad != K:
        x = jnp.pad(x, ((0, 0), (0, K_pad - K)))
        w1 = jnp.pad(w1, ((0, K_pad - K), (0, 0)))
    nk = K_pad // tk

    x = x.astype(jnp.bfloat16)
    w1 = w1.astype(jnp.bfloat16)
    w2 = w2.astype(jnp.bfloat16)
    b1 = b1.astype(jnp.float32).reshape(1, N1)
    b2 = b2.astype(jnp.float32).reshape(1, N2)

    return pl.pallas_call(
        _classifier_kernel,
        out_shape=jax.ShapeDtypeStruct((M, N2), out_dtype),
        grid_spec=pltpu.PrefetchScalarGridSpec(
            num_scalar_prefetch=0,
            grid=(nk,),
            in_specs=[
                pl.BlockSpec((M, tk), lambda k: (0, k)),
                pl.BlockSpec((tk, N1), lambda k: (k, 0)),
                pl.BlockSpec((1, N1), lambda k: (0, 0)),
                pl.BlockSpec((N1, N2), lambda k: (0, 0)),
                pl.BlockSpec((1, N2), lambda k: (0, 0)),
            ],
            out_specs=pl.BlockSpec((M, N2), lambda k: (0, 0)),
            scratch_shapes=[pltpu.VMEM((M, N1), jnp.float32)],
        ),
        compiler_params=pltpu.CompilerParams(
            dimension_semantics=("arbitrary",),
            vmem_limit_bytes=_VMEM_LIMIT,
        ),
    )(x, w1, b1, w2, b2)


# ----------------------------------------------------------------------------
# Full forward pass of ModelBasedExtractor.
# ----------------------------------------------------------------------------
def model_based_extractor_forward(x_nchw, params):
    # NCHW in (PyTorch convention) -> NHWC internally (channels on lanes).
    x = jnp.transpose(x_nchw, (0, 2, 3, 1)).astype(jnp.bfloat16)        # (B,28,28,3)

    # features: conv1+ReLU with the MaxPool2x2 fused into the same kernel.
    x = conv3x3_relu_pool2x2(x, params["conv1_w"], params["conv1_b"], pool="max")   # (B,14,14,64)
    # conv2+ReLU with the AdaptiveAvgPool2d((7,7)) (== exact 2x2 avg pool on 14x14) fused.
    x = conv3x3_relu_pool2x2(x, params["conv2_w"], params["conv2_b"], pool="avg")   # (B,7,7,512)

    # .view(-1, 512*7*7) in NCHW order, exactly as PyTorch.
    x = jnp.transpose(x, (0, 3, 1, 2)).reshape(-1, 512 * 7 * 7)         # (B, 25088)

    # linear = classifier minus last layer: Linear -> ReLU -> Dropout -> Linear -> ReLU -> Dropout,
    # fused into a single Pallas kernel (Dropout is identity at inference).
    return classifier_fused(x, params["fc1_w"], params["fc1_b"],
                            params["fc2_w"], params["fc2_b"],
                            tk=6272, out_dtype=jnp.float32)             # (B, 128)


def init_params(key):
    ks = jax.random.split(key, 6)

    def nrm(k, shape, fan_in, dtype):
        return (jax.random.normal(k, shape, jnp.float32) / math.sqrt(fan_in)).astype(dtype)

    # Weights stored in bf16 (MXU-native; halves HBM streaming of the dominant fc1 weight).
    # Conv weights HWIO (kh,kw,Cin,Cout); linear weights (in,out). PyTorch checkpoints
    # (OIHW / (out,in)) would need explicit transposes when loading real weights.
    return {
        "conv1_w": nrm(ks[0], (3, 3, 3, 64), 3 * 9, jnp.bfloat16),
        "conv1_b": jnp.zeros((64,), jnp.float32),
        "conv2_w": nrm(ks[1], (3, 3, 64, 512), 64 * 9, jnp.bfloat16),
        "conv2_b": jnp.zeros((512,), jnp.float32),
        "fc1_w": nrm(ks[2], (512 * 7 * 7, 256), 512 * 7 * 7, jnp.bfloat16),
        "fc1_b": jnp.zeros((256,), jnp.float32),
        "fc2_w": nrm(ks[3], (256, 128), 256, jnp.bfloat16),
        "fc2_b": jnp.zeros((128,), jnp.float32),
    }


if __name__ == "__main__":
    key = jax.random.PRNGKey(0)
    k_x, k_p = jax.random.split(key)

    # Small, VGG-consistent shapes: batch=2, 3 input channels, 28x28 spatial so the
    # feature map ends at (512, 14, 14) and adaptive-avg-pools to (512, 7, 7).
    x = jax.random.normal(k_x, (2, 3, 28, 28), jnp.float32)
    params = init_params(k_p)

    out = jax.jit(model_based_extractor_forward)(x, params)
    out = jax.block_until_ready(out)

    assert out.shape == (2, 128), out.shape
    assert jnp.all(jnp.isfinite(out))
    print("KERNEL_OK")
</pallas_src>

<mosaic_0001>
module attributes {stable_mosaic.version = 11 : i64} {
  func.func @_conv_pool_kernel(%arg0: i32, %arg1: i32, %arg2: memref<4x392x32xbf16, #tpu.memory_space<vmem>>, %arg3: memref<32x128xbf16, #tpu.memory_space<vmem>>, %arg4: memref<1x128xf32, #tpu.memory_space<vmem>>, %arg5: memref<392x128xbf16, #tpu.memory_space<vmem>>) attributes {dimension_semantics = [#tpu.dimension_semantics<parallel>, #tpu.dimension_semantics<parallel>], iteration_bounds = array<i64: 1, 1>, scalar_prefetch = 0 : i64, scratch_operands = 0 : i64, tpu.core_type = #tpu.core_type<tc>, window_params = [{transform_indices = @transform_0, window_bounds = array<i64: 4, 392, 32>}, {transform_indices = @transform_1, window_bounds = array<i64: 32, 128>}, {transform_indices = @transform_2, window_bounds = array<i64: 1, 128>}, {transform_indices = @transform_3, window_bounds = array<i64: 392, 128>}]} {
    %c0 = arith.constant 0 : index
    %c0_0 = arith.constant 0 : index
    %0 = vector.load %arg3[%c0, %c0_0] : memref<32x128xbf16, #tpu.memory_space<vmem>>, vector<32x128xbf16>
    %c0_1 = arith.constant 0 : index
    %c0_2 = arith.constant 0 : index
    %1 = vector.load %arg4[%c0_1, %c0_2] : memref<1x128xf32, #tpu.memory_space<vmem>>, vector<1x128xf32>
    %c0_3 = arith.constant 0 : index
    %c0_4 = arith.constant 0 : index
    %c0_5 = arith.constant 0 : index
    %2 = vector.load %arg2[%c0_3, %c0_4, %c0_5] : memref<4x392x32xbf16, #tpu.memory_space<vmem>>, vector<1x392x32xbf16>
    %3 = vector.shape_cast %2 : vector<1x392x32xbf16> to vector<392x32xbf16>
    %cst = arith.constant dense<0.000000e+00> : vector<392x128xf32>
    %4 = tpu.matmul %3, %0, %cst {dimension_numbers = #tpu.dot_dimension_numbers<[1], [0], [0], [1], [0, 0, 1, 1], [], []>} : vector<392x32xbf16>, vector<32x128xbf16>, vector<392x128xf32> -> vector<392x128xf32>
    %c1 = arith.constant 1 : index
    %c0_6 = arith.constant 0 : index
    %c0_7 = arith.constant 0 : index
    %5 = vector.load %arg2[%c1, %c0_6, %c0_7] : memref<4x392x32xbf16, #tpu.memory_space<vmem>>, vector<1x392x32xbf16>
    %6 = vector.shape_cast %5 : vector<1x392x32xbf16> to vector<392x32xbf16>
    %cst_8 = arith.constant dense<0.000000e+00> : vector<392x128xf32>
    %7 = tpu.matmul %6, %0, %cst_8 {dimension_numbers = #tpu.dot_dimension_numbers<[1], [0], [0], [1], [0, 0, 1, 1], [], []>} : vector<392x32xbf16>, vector<32x128xbf16>, vector<392x128xf32> -> vector<392x128xf32>
    %8 = arith.maximumf %4, %7 : vector<392x128xf32>
    %c2 = arith.constant 2 : index
    %c0_9 = arith.constant 0 : index
    %c0_10 = arith.constant 0 : index
    %9 = vector.load %arg2[%c2, %c0_9, %c0_10] : memref<4x392x32xbf16, #tpu.memory_space<vmem>>, vector<1x392x32xbf16>
    %10 = vector.shape_cast %9 : vector<1x392x32xbf16> to vector<392x32xbf16>
    %cst_11 = arith.constant dense<0.000000e+00> : vector<392x128xf32>
    %11 = tpu.matmul %10, %0, %cst_11 {dimension_numbers = #tpu.dot_dimension_numbers<[1], [0], [0], [1], [0, 0, 1, 1], [], []>} : vector<392x32xbf16>, vector<32x128xbf16>, vector<392x128xf32> -> vector<392x128xf32>
    %12 = arith.maximumf %8, %11 : vector<392x128xf32>
    %c3 = arith.constant 3 : index
    %c0_12 = arith.constant 0 : index
    %c0_13 = arith.constant 0 : index
    %13 = vector.load %arg2[%c3, %c0_12, %c0_13] : memref<4x392x32xbf16, #tpu.memory_space<vmem>>, vector<1x392x32xbf16>
    %14 = vector.shape_cast %13 : vector<1x392x32xbf16> to vector<392x32xbf16>
    %cst_14 = arith.constant dense<0.000000e+00> : vector<392x128xf32>
    %15 = tpu.matmul %14, %0, %cst_14 {dimension_numbers = #tpu.dot_dimension_numbers<[1], [0], [0], [1], [0, 0, 1, 1], [], []>} : vector<392x32xbf16>, vector<32x128xbf16>, vector<392x128xf32> -> vector<392x128xf32>
    %16 = arith.maximumf %12, %15 : vector<392x128xf32>
    %17 = vector.broadcast %1 : vector<1x128xf32> to vector<392x128xf32>
    %18 = arith.addf %16, %17 : vector<392x128xf32>
    %cst_15 = arith.constant 0.000000e+00 : f32
    %19 = vector.broadcast %cst_15 : f32 to vector<392x128xf32>
    %20 = arith.maximumf %18, %19 : vector<392x128xf32>
    %21 = arith.truncf %20 : vector<392x128xf32> to vector<392x128xbf16>
    %c0_16 = arith.constant 0 : index
    %c0_17 = arith.constant 0 : index
    %22 = vector.load %arg5[%c0_16, %c0_17] : memref<392x128xbf16, #tpu.memory_space<vmem>>, vector<392x128xbf16>
    tpu.vector_store %arg5[%c0_16, %c0_17], %21 {strides = array<i32>} : memref<392x128xbf16, #tpu.memory_space<vmem>>, vector<392x128xbf16>,
    return
  }
  func.func @transform_0(%arg0: i32, %arg1: i32) -> (i32, i32, i32) {
    %c0_i32 = arith.constant 0 : i32
    %c0_i32_0 = arith.constant 0 : i32
    %c0_i32_1 = arith.constant 0 : i32
    return %c0_i32, %arg0, %c0_i32_0 : i32, i32, i32
  }
  func.func @transform_1(%arg0: i32, %arg1: i32) -> (i32, i32) {
    %c0_i32 = arith.constant 0 : i32
    %c0_i32_0 = arith.constant 0 : i32
    return %c0_i32, %arg1 : i32, i32
  }
  func.func @transform_2(%arg0: i32, %arg1: i32) -> (i32, i32) {
    %c0_i32 = arith.constant 0 : i32
    %c0_i32_0 = arith.constant 0 : i32
    return %c0_i32, %arg1 : i32, i32
  }
  func.func @transform_3(%arg0: i32, %arg1: i32) -> (i32, i32) {
    %c0_i32 = arith.constant 0 : i32
    return %arg0, %arg1 : i32, i32
  }
}

module attributes {stable_mosaic.version = 11 : i64} {
  func.func @_conv_pool_kernel(%arg0: i32, %arg1: i32, %arg2: memref<4x98x576xbf16, #tpu.memory_space<vmem>>, %arg3: memref<576x256xbf16, #tpu.memory_space<vmem>>, %arg4: memref<1x256xf32, #tpu.memory_space<vmem>>, %arg5: memref<98x256xbf16, #tpu.memory_space<vmem>>) attributes {dimension_semantics = [#tpu.dimension_semantics<parallel>, #tpu.dimension_semantics<parallel>], iteration_bounds = array<i64: 1, 2>, scalar_prefetch = 0 : i64, scratch_operands = 0 : i64, tpu.core_type = #tpu.core_type<tc>, window_params = [{transform_indices = @transform_0, window_bounds = array<i64: 4, 98, 576>}, {transform_indices = @transform_1, window_bounds = array<i64: 576, 256>}, {transform_indices = @transform_2, window_bounds = array<i64: 1, 256>}, {transform_indices = @transform_3, window_bounds = array<i64: 98, 256>}]} {
    %c0 = arith.constant 0 : index
    %c0_0 = arith.constant 0 : index
    %0 = vector.load %arg3[%c0, %c0_0] : memref<576x256xbf16, #tpu.memory_space<vmem>>, vector<576x256xbf16>
    %c0_1 = arith.constant 0 : index
    %c0_2 = arith.constant 0 : index
    %1 = vector.load %arg4[%c0_1, %c0_2] : memref<1x256xf32, #tpu.memory_space<vmem>>, vector<1x256xf32>
    %c0_3 = arith.constant 0 : index
    %c0_4 = arith.constant 0 : index
    %c0_5 = arith.constant 0 : index
    %2 = vector.load %arg2[%c0_3, %c0_4, %c0_5] : memref<4x98x576xbf16, #tpu.memory_space<vmem>>, vector<1x98x576xbf16>
    %3 = vector.shape_cast %2 : vector<1x98x576xbf16> to vector<98x576xbf16>
    %cst = arith.constant dense<0.000000e+00> : vector<98x256xf32>
    %4 = tpu.matmul %3, %0, %cst {dimension_numbers = #tpu.dot_dimension_numbers<[1], [0], [0], [1], [0, 0, 1, 1], [], []>} : vector<98x576xbf16>, vector<576x256xbf16>, vector<98x256xf32> -> vector<98x256xf32>
    %5 = vector.broadcast %1 : vector<1x256xf32> to vector<98x256xf32>
    %6 = arith.addf %4, %5 : vector<98x256xf32>
    %cst_6 = arith.constant 0.000000e+00 : f32
    %7 = vector.broadcast %cst_6 : f32 to vector<98x256xf32>
    %8 = arith.maximumf %6, %7 : vector<98x256xf32>
    %c1 = arith.constant 1 : index
    %c0_7 = arith.constant 0 : index
    %c0_8 = arith.constant 0 : index
    %9 = vector.load %arg2[%c1, %c0_7, %c0_8] : memref<4x98x576xbf16, #tpu.memory_space<vmem>>, vector<1x98x576xbf16>
    %10 = vector.shape_cast %9 : vector<1x98x576xbf16> to vector<98x576xbf16>
    %cst_9 = arith.constant dense<0.000000e+00> : vector<98x256xf32>
    %11 = tpu.matmul %10, %0, %cst_9 {dimension_numbers = #tpu.dot_dimension_numbers<[1], [0], [0], [1], [0, 0, 1, 1], [], []>} : vector<98x576xbf16>, vector<576x256xbf16>, vector<98x256xf32> -> vector<98x256xf32>
    %12 = vector.broadcast %1 : vector<1x256xf32> to vector<98x256xf32>
    %13 = arith.addf %11, %12 : vector<98x256xf32>
    %cst_10 = arith.constant 0.000000e+00 : f32
    %14 = vector.broadcast %cst_10 : f32 to vector<98x256xf32>
    %15 = arith.maximumf %13, %14 : vector<98x256xf32>
    %16 = arith.addf %8, %15 : vector<98x256xf32>
    %c2 = arith.constant 2 : index
    %c0_11 = arith.constant 0 : index
    %c0_12 = arith.constant 0 : index
    %17 = vector.load %arg2[%c2, %c0_11, %c0_12] : memref<4x98x576xbf16, #tpu.memory_space<vmem>>, vector<1x98x576xbf16>
    %18 = vector.shape_cast %17 : vector<1x98x576xbf16> to vector<98x576xbf16>
    %cst_13 = arith.constant dense<0.000000e+00> : vector<98x256xf32>
    %19 = tpu.matmul %18, %0, %cst_13 {dimension_numbers = #tpu.dot_dimension_numbers<[1], [0], [0], [1], [0, 0, 1, 1], [], []>} : vector<98x576xbf16>, vector<576x256xbf16>, vector<98x256xf32> -> vector<98x256xf32>
    %20 = vector.broadcast %1 : vector<1x256xf32> to vector<98x256xf32>
    %21 = arith.addf %19, %20 : vector<98x256xf32>
    %cst_14 = arith.constant 0.000000e+00 : f32
    %22 = vector.broadcast %cst_14 : f32 to vector<98x256xf32>
    %23 = arith.maximumf %21, %22 : vector<98x256xf32>
    %24 = arith.addf %16, %23 : vector<98x256xf32>
    %c3 = arith.constant 3 : index
    %c0_15 = arith.constant 0 : index
    %c0_16 = arith.constant 0 : index
    %25 = vector.load %arg2[%c3, %c0_15, %c0_16] : memref<4x98x576xbf16, #tpu.memory_space<vmem>>, vector<1x98x576xbf16>
    %26 = vector.shape_cast %25 : vector<1x98x576xbf16> to vector<98x576xbf16>
    %cst_17 = arith.constant dense<0.000000e+00> : vector<98x256xf32>
    %27 = tpu.matmul %26, %0, %cst_17 {dimension_numbers = #tpu.dot_dimension_numbers<[1], [0], [0], [1], [0, 0, 1, 1], [], []>} : vector<98x576xbf16>, vector<576x256xbf16>, vector<98x256xf32> -> vector<98x256xf32>
    %28 = vector.broadcast %1 : vector<1x256xf32> to vector<98x256xf32>
    %29 = arith.addf %27, %28 : vector<98x256xf32>
    %cst_18 = arith.constant 0.000000e+00 : f32
    %30 = vector.broadcast %cst_18 : f32 to vector<98x256xf32>
    %31 = arith.maximumf %29, %30 : vector<98x256xf32>
    %32 = arith.addf %24, %31 : vector<98x256xf32>
    %cst_19 = arith.constant 2.500000e-01 : f32
    %33 = vector.broadcast %cst_19 : f32 to vector<98x256xf32>
    %34 = arith.mulf %32, %33 : vector<98x256xf32>
    %35 = arith.truncf %34 : vector<98x256xf32> to vector<98x256xbf16>
    %c0_20 = arith.constant 0 : index
    %c0_21 = arith.constant 0 : index
    %36 = vector.load %arg5[%c0_20, %c0_21] : memref<98x256xbf16, #tpu.memory_space<vmem>>, vector<98x256xbf16>
    tpu.vector_store %arg5[%c0_20, %c0_21], %35 {strides = array<i32>} : memref<98x256xbf16, #tpu.memory_space<vmem>>, vector<98x256xbf16>,
    return
  }
  func.func @transform_0(%arg0: i32, %arg1: i32) -> (i32, i32, i32) {
    %c0_i32 = arith.constant 0 : i32
    %c0_i32_0 = arith.constant 0 : i32
    %c0_i32_1 = arith.constant 0 : i32
    return %c0_i32, %arg0, %c0_i32_0 : i32, i32, i32
  }
  func.func @transform_1(%arg0: i32, %arg1: i32) -> (i32, i32) {
    %c0_i32 = arith.constant 0 : i32
    %c0_i32_0 = arith.constant 0 : i32
    return %c0_i32, %arg1 : i32, i32
  }
  func.func @transform_2(%arg0: i32, %arg1: i32) -> (i32, i32) {
    %c0_i32 = arith.constant 0 : i32
    %c0_i32_0 = arith.constant 0 : i32
    return %c0_i32, %arg1 : i32, i32
  }
  func.func @transform_3(%arg0: i32, %arg1: i32) -> (i32, i32) {
    %c0_i32 = arith.constant 0 : i32
    return %arg0, %arg1 : i32, i32
  }
}

module attributes {stable_mosaic.version = 11 : i64} {
  func.func @_classifier_kernel(%arg0: i32, %arg1: memref<2x6272xbf16, #tpu.memory_space<vmem>>, %arg2: memref<6272x256xbf16, #tpu.memory_space<vmem>>, %arg3: memref<1x256xf32, #tpu.memory_space<vmem>>, %arg4: memref<256x128xbf16, #tpu.memory_space<vmem>>, %arg5: memref<1x128xf32, #tpu.memory_space<vmem>>, %arg6: memref<2x128xf32, #tpu.memory_space<vmem>>, %arg7: memref<2x256xf32, #tpu.memory_space<vmem>>) attributes {dimension_semantics = [#tpu.dimension_semantics<arbitrary>], iteration_bounds = array<i64: 4>, scalar_prefetch = 0 : i64, scratch_operands = 1 : i64, tpu.core_type = #tpu.core_type<tc>, window_params = [{transform_indices = @transform_0, window_bounds = array<i64: 2, 6272>}, {transform_indices = @transform_1, window_bounds = array<i64: 6272, 256>}, {pipeline_mode = #tpu.pipeline_mode<synchronous>, transform_indices = @transform_2, window_bounds = array<i64: 1, 256>}, {pipeline_mode = #tpu.pipeline_mode<synchronous>, transform_indices = @transform_3, window_bounds = array<i64: 256, 128>}, {pipeline_mode = #tpu.pipeline_mode<synchronous>, transform_indices = @transform_4, window_bounds = array<i64: 1, 128>}, {pipeline_mode = #tpu.pipeline_mode<synchronous>, transform_indices = @transform_5, window_bounds = array<i64: 2, 128>}]} {
    %c0_i32 = arith.constant 0 : i32
    %0 = arith.cmpi eq, %arg0, %c0_i32 : i32
    %1 = arith.extui %0 : i1 to i32
    %c0_i32_0 = arith.constant 0 : i32
    %2 = arith.cmpi ne, %1, %c0_i32_0 : i32
    scf.if %2 {
      %cst_9 = arith.constant 0.000000e+00 : f32
      %12 = vector.broadcast %cst_9 : f32 to vector<2x256xf32>
      %c0_10 = arith.constant 0 : index
      %c0_11 = arith.constant 0 : index
      %13 = vector.load %arg7[%c0_10, %c0_11] : memref<2x256xf32, #tpu.memory_space<vmem>>, vector<2x256xf32>
      tpu.vector_store %arg7[%c0_10, %c0_11], %12 {strides = array<i32>} : memref<2x256xf32, #tpu.memory_space<vmem>>, vector<2x256xf32>,
    } else {
    }
    %c0 = arith.constant 0 : index
    %c0_1 = arith.constant 0 : index
    %3 = vector.load %arg7[%c0, %c0_1] : memref<2x256xf32, #tpu.memory_space<vmem>>, vector<2x256xf32>
    %c0_2 = arith.constant 0 : index
    %c0_3 = arith.constant 0 : index
    %4 = vector.load %arg1[%c0_2, %c0_3] : memref<2x6272xbf16, #tpu.memory_space<vmem>>, vector<2x6272xbf16>
    %c0_4 = arith.constant 0 : index
    %c0_5 = arith.constant 0 : index
    %5 = vector.load %arg2[%c0_4, %c0_5] : memref<6272x256xbf16, #tpu.memory_space<vmem>>, vector<6272x256xbf16>
    %cst = arith.constant dense<0.000000e+00> : vector<2x256xf32>
    %6 = tpu.matmul %4, %5, %cst {dimension_numbers = #tpu.dot_dimension_numbers<[1], [0], [0], [1], [0, 0, 1, 1], [], []>} : vector<2x6272xbf16>, vector<6272x256xbf16>, vector<2x256xf32> -> vector<2x256xf32>
    %7 = arith.addf %3, %6 : vector<2x256xf32>
    %c0_6 = arith.constant 0 : index
    %c0_7 = arith.constant 0 : index
    %8 = vector.load %arg7[%c0_6, %c0_7] : memref<2x256xf32, #tpu.memory_space<vmem>>, vector<2x256xf32>
    tpu.vector_store %arg7[%c0_6, %c0_7], %7 {strides = array<i32>} : memref<2x256xf32, #tpu.memory_space<vmem>>, vector<2x256xf32>,
    %c3_i32 = arith.constant 3 : i32
    %9 = arith.cmpi eq, %arg0, %c3_i32 : i32
    %10 = arith.extui %9 : i1 to i32
    %c0_i32_8 = arith.constant 0 : i32
    %11 = arith.cmpi ne, %10, %c0_i32_8 : i32
    scf.if %11 {
      %c0_9 = arith.constant 0 : index
      %c0_10 = arith.constant 0 : index
      %12 = vector.load %arg7[%c0_9, %c0_10] : memref<2x256xf32, #tpu.memory_space<vmem>>, vector<2x256xf32>
      %c0_11 = arith.constant 0 : index
      %c0_12 = arith.constant 0 : index
      %13 = vector.load %arg3[%c0_11, %c0_12] : memref<1x256xf32, #tpu.memory_space<vmem>>, vector<1x256xf32>
      %14 = vector.broadcast %13 : vector<1x256xf32> to vector<2x256xf32>
      %15 = arith.addf %12, %14 : vector<2x256xf32>
      %cst_13 = arith.constant 0.000000e+00 : f32
      %16 = vector.broadcast %cst_13 : f32 to vector<2x256xf32>
      %17 = arith.maximumf %15, %16 : vector<2x256xf32>
      %18 = arith.truncf %17 : vector<2x256xf32> to vector<2x256xbf16>
      %c0_14 = arith.constant 0 : index
      %c0_15 = arith.constant 0 : index
      %19 = vector.load %arg4[%c0_14, %c0_15] : memref<256x128xbf16, #tpu.memory_space<vmem>>, vector<256x128xbf16>
      %cst_16 = arith.constant dense<0.000000e+00> : vector<2x128xf32>
      %20 = tpu.matmul %18, %19, %cst_16 {dimension_numbers = #tpu.dot_dimension_numbers<[1], [0], [0], [1], [0, 0, 1, 1], [], []>} : vector<2x256xbf16>, vector<256x128xbf16>, vector<2x128xf32> -> vector<2x128xf32>
      %c0_17 = arith.constant 0 : index
      %c0_18 = arith.constant 0 : index
      %21 = vector.load %arg5[%c0_17, %c0_18] : memref<1x128xf32, #tpu.memory_space<vmem>>, vector<1x128xf32>
      %22 = vector.broadcast %21 : vector<1x128xf32> to vector<2x128xf32>
      %23 = arith.addf %20, %22 : vector<2x128xf32>
      %cst_19 = arith.constant 0.000000e+00 : f32
      %24 = vector.broadcast %cst_19 : f32 to vector<2x128xf32>
      %25 = arith.maximumf %23, %24 : vector<2x128xf32>
      %c0_20 = arith.constant 0 : index
      %c0_21 = arith.constant 0 : index
      %26 = vector.load %arg6[%c0_20, %c0_21] : memref<2x128xf32, #tpu.memory_space<vmem>>, vector<2x128xf32>
      tpu.vector_store %arg6[%c0_20, %c0_21], %25 {strides = array<i32>} : memref<2x128xf32, #tpu.memory_space<vmem>>, vector<2x128xf32>,
    } else {
    }
    return
  }
  func.func @transform_0(%arg0: i32) -> (i32, i32) {
    %c0_i32 = arith.constant 0 : i32
    %c0_i32_0 = arith.constant 0 : i32
    return %c0_i32, %arg0 : i32, i32
  }
  func.func @transform_1(%arg0: i32) -> (i32, i32) {
    %c0_i32 = arith.constant 0 : i32
    %c0_i32_0 = arith.constant 0 : i32
    return %arg0, %c0_i32 : i32, i32
  }
  func.func @transform_2(%arg0: i32) -> (i32, i32) {
    %c0_i32 = arith.constant 0 : i32
    %c0_i32_0 = arith.constant 0 : i32
    %c0_i32_1 = arith.constant 0 : i32
    return %c0_i32, %c0_i32_0 : i32, i32
  }
  func.func @transform_3(%arg0: i32) -> (i32, i32) {
    %c0_i32 = arith.constant 0 : i32
    %c0_i32_0 = arith.constant 0 : i32
    %c0_i32_1 = arith.constant 0 : i32
    return %c0_i32, %c0_i32_0 : i32, i32
  }
  func.func @transform_4(%arg0: i32) -> (i32, i32) {
    %c0_i32 = arith.constant 0 : i32
    %c0_i32_0 = arith.constant 0 : i32
    %c0_i32_1 = arith.constant 0 : i32
    return %c0_i32, %c0_i32_0 : i32, i32
  }
  func.func @transform_5(%arg0: i32) -> (i32, i32) {
    %c0_i32 = arith.constant 0 : i32
    %c0_i32_0 = arith.constant 0 : i32
    %c0_i32_1 = arith.constant 0 : i32
    return %c0_i32, %c0_i32_0 : i32, i32
  }
}

</mosaic_0001>

<bundles_post_ra>
// kernel: model_based_extractor_forward.3
= control target key start
LH: loop header
LB: loop body
LE: loop exit
PB: predicated region body
PF: predicated region fallthrough
CT: control target
= control target key end

     0   :  { %v4882_v0 = vmov 0.0   ;;  %vm3673_vm0 = vmmov 0   ;;  %vm204_vm1 = vcmask 261120   ;;  %s4878_s1 = inlined_call_operand.vmem [shape: bf16[32,128], index: 1, kind: input, shape index: {}]   ;;  %s4879_s0 = inlined_call_operand.vmem [shape: bf16[4,392,32], index: 0, kind: input, shape index: {}]   ;;  %s4880_s2 = inlined_call_operand.vmem [shape: f32[1,128], index: 2, kind: input, shape index: {}]   ;;  %s4881_s3 = inlined_call_operand.vmem [shape: bf16[392,128], index: 3, kind: output, shape index: {}]  }
   0x1   :  { %3152 = vmatprep.subr.bf16.mxu0 %v4882_v0  ;;  %3256 = vmatprep.subr.bf16.mxu1 %v4882_v0  ;;  %v3570_v1 = vld [vmem:[%s4878_s1 + $0x8] sm:$0xff]   ;;  %v3571_v2 = vld [vmem:[%s4878_s1] sm:$0xff]   ;;  %v3576_v7 = vld [vmem:[%s4879_s0 + $0x10] sm:$0xff]  }
   0x2   :  { %3156 = vmatprep.mubr.msk.bf16.mxu0 %vm3673_vm0, %v4882_v0  ;;  %3260 = vmatprep.mubr.msk.bf16.mxu1 %vm3673_vm0, %v4882_v0  ;;  %v3572_v3 = vld [vmem:[%s4879_s0] sm:$0xff]   ;;  %v3574_v5 = vld [vmem:[%s4879_s0 + $0x8] sm:$0xff]   ;;  %v3577_v8 = vld [vmem:[%s4879_s0 + $0xd4] sm:$0xff]  }
   0x3   :  { %3153 = vmatpush3.bf16.msra.mxu0 %v3570_v1  ;;  %3257 = vmatpush3.bf16.msra.mxu1 %v3570_v1  ;;  %v3573_v4 = vld [vmem:[%s4879_s0 + $0xc4] sm:$0xff]   ;;  %v3575_v6 = vld [vmem:[%s4879_s0 + $0xcc] sm:$0xff]   ;;  %v3578_v9 = vld [vmem:[%s4879_s0 + $0x18] sm:$0xff]  }
   0x4   :  { %3154 = vmatprep.subr.bf16.mxu0 %v4882_v0  ;;  %3258 = vmatprep.subr.bf16.mxu1 %v4882_v0  ;;  %v3579_v10 = vld [vmem:[%s4879_s0 + $0xdc] sm:$0xff]   ;;  %v3581_v12 = vld [vmem:[%s4879_s0 + $0xe4] sm:$0xff]   ;;  %v3583_v14 = vld [vmem:[%s4879_s0 + $0xec] sm:$0xff]  }
   0x5   :  { %v3580_v11 = vld [vmem:[%s4879_s0 + $0x20] sm:$0xff]   ;;  %v3582_v13 = vld [vmem:[%s4879_s0 + $0x28] sm:$0xff]   ;;  %v3584_v15 = vld [vmem:[%s4879_s0 + $0x30] sm:$0xff]  }
   0x6   :  { %v3585_v16 = vld [vmem:[%s4879_s0 + $0xf4] sm:$0xff]   ;;  %v3587_v18 = vld [vmem:[%s4879_s0 + $0xfc] sm:$0xff]   ;;  %v3589_v20 = vld [vmem:[%s4879_s0 + $0x104] sm:$0xff]  }
   0x7   :  { %3155 = vmatpush3.bf16.msra.mxu0 %v3571_v2  ;;  %3259 = vmatpush3.bf16.msra.mxu1 %v3571_v2  ;;  %v3586_v17 = vld [vmem:[%s4879_s0 + $0x38] sm:$0xff]   ;;  %v3588_v19 = vld [vmem:[%s4879_s0 + $0x40] sm:$0xff]   ;;  %v3590_v21 = vld [vmem:[%s4879_s0 + $0x48] sm:$0xff]  }
   0x8   :  { %3360 = vmatprep.subr.bf16.mxu0 %v4882_v0  ;;  %3464 = vmatprep.subr.bf16.mxu1 %v4882_v0  ;;  %v3591_v22 = vld [vmem:[%s4879_s0 + $0x10c] sm:$0xff]   ;;  %v3593_v24 = vld [vmem:[%s4879_s0 + $0x114] sm:$0xff]   ;;  %v3595_v26 = vld [vmem:[%s4879_s0 + $0x11c] sm:$0xff]  }
   0x9   :  { %v3592_v23 = vld [vmem:[%s4879_s0 + $0x50] sm:$0xff]   ;;  %v3594_v25 = vld [vmem:[%s4879_s0 + $0x58] sm:$0xff]   ;;  %v3596_v27 = vld [vmem:[%s4879_s0 + $0x60] sm:$0xff]  }
   0xa   :  { %3157 = vmatmul.mubr.msk.bf16.vlgmr.msra.gmra.mxu0 %vm204_vm1, %v3572_v3  ;;  %3261 = vmatmul.mubr.msk.bf16.vlgmr.msra.gmra.mxu1 %vm204_vm1, %v3573_v4  ;;  %v3597_v28 = vld [vmem:[%s4879_s0 + $0x124] sm:$0xff]   ;;  %v3599_v30 = vld [vmem:[%s4879_s0 + $0x12c] sm:$0xff]   ;;  %v3601_v32 = vld [vmem:[%s4879_s0 + $0x134] sm:$0xff]  }
   0xb   :  { %3361 = vmatpush3.bf16.msra.mxu0 %v3570_v1  ;;  %3465 = vmatpush3.bf16.msra.mxu1 %v3570_v1  ;;  %v3598_v29 = vld [vmem:[%s4879_s0 + $0x68] sm:$0xff]   ;;  %v3600_v31 = vld [vmem:[%s4879_s0 + $0x70] sm:$0xff]   ;;  %v3602_v33 = vld [vmem:[%s4879_s0 + $0x78] sm:$0xff]  }
   0xc   :  { %3160 = vmatprep.mubr.msk.bf16.mxu0 %vm3673_vm0, %v4882_v0  ;;  %3264 = vmatprep.mubr.msk.bf16.mxu1 %vm3673_vm0, %v4882_v0  ;;  %v3603_v34 = vld [vmem:[%s4879_s0 + $0x13c] sm:$0xff]   ;;  %v3605_v36 = vld [vmem:[%s4879_s0 + $0x144] sm:$0xff]   ;;  %v3607_v38 = vld [vmem:[%s4879_s0 + $0x14c] sm:$0xff]  }
   0xd   :  { %3362 = vmatprep.subr.bf16.mxu0 %v4882_v0  ;;  %3466 = vmatprep.subr.bf16.mxu1 %v4882_v0  ;;  %v3604_v35 = vld [vmem:[%s4879_s0 + $0x80] sm:$0xff]   ;;  %v3606_v37 = vld [vmem:[%s4879_s0 + $0x88] sm:$0xff]   ;;  %v3608_v39 = vld [vmem:[%s4879_s0 + $0x90] sm:$0xff]  }
   0xe   :  { %v3609_v40 = vld [vmem:[%s4879_s0 + $0x154] sm:$0xff]   ;;  %v3611_v42 = vld [vmem:[%s4879_s0 + $0x15c] sm:$0xff]   ;;  %v3613_v44 = vld [vmem:[%s4879_s0 + $0x164] sm:$0xff]  }
   0xf   :  { %3363 = vmatpush3.bf16.msra.mxu0 %v3571_v2  ;;  %3467 = vmatpush3.bf16.msra.mxu1 %v3571_v2  ;;  %v3610_v41 = vld [vmem:[%s4879_s0 + $0x98] sm:$0xff]   ;;  %v3612_v43 = vld [vmem:[%s4879_s0 + $0xa0] sm:$0xff]   ;;  %v3614_v45 = vld [vmem:[%s4879_s0 + $0xa8] sm:$0xff]  }
  0x10   :  { %v3615_v46 = vld [vmem:[%s4879_s0 + $0x16c] sm:$0xff]   ;;  %v3617_v48 = vld [vmem:[%s4879_s0 + $0x174] sm:$0xff]   ;;  %v3619_v50 = vld [vmem:[%s4879_s0 + $0x17c] sm:$0xff]  }
  0x11   :  { %v3616_v47 = vld [vmem:[%s4879_s0 + $0xb0] sm:$0xff]   ;;  %v3618_v49 = vld [vmem:[%s4879_s0 + $0xb8] sm:$0xff]   ;;  %v3620_v51 = vld [vmem:[%s4879_s0 + $0xc0] ss:$0 sps:$4 sm:$0xff]  }
  0x12   :  { %3161 = vmatmul.mubr.msk.bf16.gmra.mxu0 %vm204_vm1, %v3574_v5  ;;  %3265 = vmatmul.mubr.msk.bf16.gmra.mxu1 %vm204_vm1, %v3575_v6  ;;  %v3621_v52 = vld [vmem:[%s4879_s0 + $0x184] ss:$0 sps:$4 sm:$0xff]   ;;  %v3622_v60 = vld [vmem:[%s4879_s0 + $0x188] sm:$0xff]  }
  0x13   :  { %3164 = vmatprep.mubr.msk.bf16.mxu0 %vm3673_vm0, %v4882_v0  ;;  %3268 = vmatprep.mubr.msk.bf16.mxu1 %vm3673_vm0, %v4882_v0  ;;  %v3623_v61 = vld [vmem:[%s4879_s0 + $0x24c] sm:$0xff]  }
  0x1a   :  { %3165 = vmatmul.mubr.msk.bf16.gmra.mxu0 %vm204_vm1, %v3576_v7  ;;  %3269 = vmatmul.mubr.msk.bf16.gmra.mxu1 %vm204_vm1, %v3577_v8 }
  0x1b   :  { %3168 = vmatprep.mubr.msk.bf16.mxu0 %vm3673_vm0, %v4882_v0  ;;  %3272 = vmatprep.mubr.msk.bf16.mxu1 %vm3673_vm0, %v4882_v0 }
  0x22   :  { %3169 = vmatmul.mubr.msk.bf16.gmra.mxu0 %vm204_vm1, %v3578_v9  ;;  %3273 = vmatmul.mubr.msk.bf16.gmra.mxu1 %vm204_vm1, %v3579_v10  ;;  %v3624_v9 = vld [vmem:[%s4879_s0 + $0x190] sm:$0xff]  }
  0x23   :  { %3172 = vmatprep.mubr.msk.bf16.mxu0 %vm3673_vm0, %v4882_v0  ;;  %3276 = vmatprep.mubr.msk.bf16.mxu1 %vm3673_vm0, %v4882_v0  ;;  %v3625_v10 = vld [vmem:[%s4879_s0 + $0x254] sm:$0xff]  }
  0x2a   :  { %3173 = vmatmul.mubr.msk.bf16.gmra.mxu0 %vm204_vm1, %v3580_v11  ;;  %3277 = vmatmul.mubr.msk.bf16.gmra.mxu1 %vm204_vm1, %v3581_v12 }
  0x2b   :  { %3176 = vmatprep.mubr.msk.bf16.mxu0 %vm3673_vm0, %v4882_v0  ;;  %3280 = vmatprep.mubr.msk.bf16.mxu1 %vm3673_vm0, %v4882_v0 }
  0x32   :  { %3177 = vmatmul.mubr.msk.bf16.gmra.mxu0 %vm204_vm1, %v3582_v13  ;;  %3281 = vmatmul.mubr.msk.bf16.gmra.mxu1 %vm204_vm1, %v3583_v14 }
  0x33   :  { %3180 = vmatprep.mubr.msk.bf16.mxu0 %vm3673_vm0, %v4882_v0  ;;  %3284 = vmatprep.mubr.msk.bf16.mxu1 %vm3673_vm0, %v4882_v0 }
  0x3a   :  { %3181 = vmatmul.mubr.msk.bf16.gmra.mxu0 %vm204_vm1, %v3584_v15  ;;  %3285 = vmatmul.mubr.msk.bf16.gmra.mxu1 %vm204_vm1, %v3585_v16 }
  0x3b   :  { %3184 = vmatprep.mubr.msk.bf16.mxu0 %vm3673_vm0, %v4882_v0  ;;  %3288 = vmatprep.mubr.msk.bf16.mxu1 %vm3673_vm0, %v4882_v0 }
  0x42   :  { %3185 = vmatmul.mubr.msk.bf16.gmra.mxu0 %vm204_vm1, %v3586_v17  ;;  %3289 = vmatmul.mubr.msk.bf16.gmra.mxu1 %vm204_vm1, %v3587_v18 }
  0x43   :  { %3188 = vmatprep.mubr.msk.bf16.mxu0 %vm3673_vm0, %v4882_v0  ;;  %3292 = vmatprep.mubr.msk.bf16.mxu1 %vm3673_vm0, %v4882_v0 }
  0x4a   :  { %3189 = vmatmul.mubr.msk.bf16.gmra.mxu0 %vm204_vm1, %v3588_v19  ;;  %3293 = vmatmul.mubr.msk.bf16.gmra.mxu1 %vm204_vm1, %v3589_v20 }
  0x4b   :  { %3192 = vmatprep.mubr.msk.bf16.mxu0 %vm3673_vm0, %v4882_v0  ;;  %3296 = vmatprep.mubr.msk.bf16.mxu1 %vm3673_vm0, %v4882_v0 }
  0x52   :  { %3193 = vmatmul.mubr.msk.bf16.gmra.mxu0 %vm204_vm1, %v3590_v21  ;;  %3297 = vmatmul.mubr.msk.bf16.gmra.mxu1 %vm204_vm1, %v3591_v22  ;;  %v3626_v21 = vld [vmem:[%s4879_s0 + $0x198] sm:$0xff]  }
  0x53   :  { %3196 = vmatprep.mubr.msk.bf16.mxu0 %vm3673_vm0, %v4882_v0  ;;  %3300 = vmatprep.mubr.msk.bf16.mxu1 %vm3673_vm0, %v4882_v0  ;;  %v3627_v22 = vld [vmem:[%s4879_s0 + $0x25c] sm:$0xff]  }
  0x5a   :  { %3197 = vmatmul.mubr.msk.bf16.gmra.mxu0 %vm204_vm1, %v3592_v23  ;;  %3301 = vmatmul.mubr.msk.bf16.gmra.mxu1 %vm204_vm1, %v3593_v24 }
  0x5b   :  { %3200 = vmatprep.mubr.msk.bf16.mxu0 %vm3673_vm0, %v4882_v0  ;;  %3304 = vmatprep.mubr.msk.bf16.mxu1 %vm3673_vm0, %v4882_v0 }
  0x62   :  { %3201 = vmatmul.mubr.msk.bf16.gmra.mxu0 %vm204_vm1, %v3594_v25  ;;  %3305 = vmatmul.mubr.msk.bf16.gmra.mxu1 %vm204_vm1, %v3595_v26 }
  0x63   :  { %3204 = vmatprep.mubr.msk.bf16.mxu0 %vm3673_vm0, %v4882_v0  ;;  %3308 = vmatprep.mubr.msk.bf16.mxu1 %vm3673_vm0, %v4882_v0 }
  0x6a   :  { %3205 = vmatmul.mubr.msk.bf16.gmra.mxu0 %vm204_vm1, %v3596_v27  ;;  %3309 = vmatmul.mubr.msk.bf16.gmra.mxu1 %vm204_vm1, %v3597_v28 }
  0x6b   :  { %3208 = vmatprep.mubr.msk.bf16.mxu0 %vm3673_vm0, %v4882_v0  ;;  %3312 = vmatprep.mubr.msk.bf16.mxu1 %vm3673_vm0, %v4882_v0 }
  0x72   :  { %3209 = vmatmul.mubr.msk.bf16.gmra.mxu0 %vm204_vm1, %v3598_v29  ;;  %3313 = vmatmul.mubr.msk.bf16.gmra.mxu1 %vm204_vm1, %v3599_v30 }
  0x73   :  { %3212 = vmatprep.mubr.msk.bf16.mxu0 %vm3673_vm0, %v4882_v0  ;;  %3316 = vmatprep.mubr.msk.bf16.mxu1 %vm3673_vm0, %v4882_v0 }
  0x7a   :  { %3213 = vmatmul.mubr.msk.bf16.gmra.mxu0 %vm204_vm1, %v3600_v31  ;;  %3317 = vmatmul.mubr.msk.bf16.gmra.mxu1 %vm204_vm1, %v3601_v32 }
  0x7b   :  { %3216 = vmatprep.mubr.msk.bf16.mxu0 %vm3673_vm0, %v4882_v0  ;;  %3320 = vmatprep.mubr.msk.bf16.mxu1 %vm3673_vm0, %v4882_v0 }
  0x82   :  { %3217 = vmatmul.mubr.msk.bf16.gmra.mxu0 %vm204_vm1, %v3602_v33  ;;  %3321 = vmatmul.mubr.msk.bf16.gmra.mxu1 %vm204_vm1, %v3603_v34  ;;  %v3628_v33 = vld [vmem:[%s4879_s0 + $0x1a0] sm:$0xff]  }
  0x83   :  { %3220 = vmatprep.mubr.msk.bf16.mxu0 %vm3673_vm0, %v4882_v0  ;;  %3324 = vmatprep.mubr.msk.bf16.mxu1 %vm3673_vm0, %v4882_v0  ;;  %v3629_v34 = vld [vmem:[%s4879_s0 + $0x264] sm:$0xff]  }
  0x8a   :  { %3221 = vmatmul.mubr.msk.bf16.gmra.mxu0 %vm204_vm1, %v3604_v35  ;;  %3325 = vmatmul.mubr.msk.bf16.gmra.mxu1 %vm204_vm1, %v3605_v36 }
  0x8b   :  { %3224 = vmatprep.mubr.msk.bf16.mxu0 %vm3673_vm0, %v4882_v0  ;;  %3328 = vmatprep.mubr.msk.bf16.mxu1 %vm3673_vm0, %v4882_v0 }
  0x92   :  { %3225 = vmatmul.mubr.msk.bf16.gmra.mxu0 %vm204_vm1, %v3606_v37  ;;  %3329 = vmatmul.mubr.msk.bf16.gmra.mxu1 %vm204_vm1, %v3607_v38 }
  0x93   :  { %3228 = vmatprep.mubr.msk.bf16.mxu0 %vm3673_vm0, %v4882_v0  ;;  %3332 = vmatprep.mubr.msk.bf16.mxu1 %vm3673_vm0, %v4882_v0 }
  0x9a   :  { %3229 = vmatmul.mubr.msk.bf16.gmra.mxu0 %vm204_vm1, %v3608_v39  ;;  %3333 = vmatmul.mubr.msk.bf16.gmra.mxu1 %vm204_vm1, %v3609_v40 }
  0x9b   :  { %3232 = vmatprep.mubr.msk.bf16.mxu0 %vm3673_vm0, %v4882_v0  ;;  %3336 = vmatprep.mubr.msk.bf16.mxu1 %vm3673_vm0, %v4882_v0 }
  0xa2   :  { %3233 = vmatmul.mubr.msk.bf16.gmra.mxu0 %vm204_vm1, %v3610_v41  ;;  %3337 = vmatmul.mubr.msk.bf16.gmra.mxu1 %vm204_vm1, %v3611_v42 }
  0xa3   :  { %3236 = vmatprep.mubr.msk.bf16.mxu0 %vm3673_vm0, %v4882_v0  ;;  %3340 = vmatprep.mubr.msk.bf16.mxu1 %vm3673_vm0, %v4882_v0 }
  0xaa   :  { %3237 = vmatmul.mubr.msk.bf16.gmra.mxu0 %vm204_vm1, %v3612_v43  ;;  %3341 = vmatmul.mubr.msk.bf16.gmra.mxu1 %vm204_vm1, %v3613_v44 }
  0xab   :  { %3240 = vmatprep.mubr.msk.bf16.mxu0 %vm3673_vm0, %v4882_v0  ;;  %3344 = vmatprep.mubr.msk.bf16.mxu1 %vm3673_vm0, %v4882_v0 }
  0xb2   :  { %3241 = vmatmul.mubr.msk.bf16.gmra.mxu0 %vm204_vm1, %v3614_v45  ;;  %3345 = vmatmul.mubr.msk.bf16.gmra.mxu1 %vm204_vm1, %v3615_v46  ;;  %v3630_v45 = vld [vmem:[%s4879_s0 + $0x1a8] sm:$0xff]  }
  0xb3   :  { %3244 = vmatprep.mubr.msk.bf16.mxu0 %vm3673_vm0, %v4882_v0  ;;  %3348 = vmatprep.mubr.msk.bf16.mxu1 %vm3673_vm0, %v4882_v0  ;;  %v3631_v46 = vld [vmem:[%s4879_s0 + $0x26c] sm:$0xff]  }
  0xba   :  { %3245 = vmatmul.mubr.msk.bf16.gmra.mxu0 %vm204_vm1, %v3616_v47  ;;  %3349 = vmatmul.mubr.msk.bf16.gmra.mxu1 %vm204_vm1, %v3617_v48 }
  0xbb   :  { %3248 = vmatprep.mubr.msk.bf16.mxu0 %vm3673_vm0, %v4882_v0  ;;  %3352 = vmatprep.mubr.msk.bf16.mxu1 %vm3673_vm0, %v4882_v0 }
  0xc2   :  { %3249 = vmatmul.mubr.msk.bf16.gmra.mxu0 %vm204_vm1, %v3618_v49  ;;  %3353 = vmatmul.mubr.msk.bf16.gmra.mxu1 %vm204_vm1, %v3619_v50 }
  0xc3   :  { %3252 = vmatprep.mubr.msk.bf16.mxu0 %vm3673_vm0, %v4882_v0  ;;  %3356 = vmatprep.mubr.msk.bf16.mxu1 %vm3673_vm0, %v4882_v0 }
  0xca   :  { %v4006_v53 = vpop.f32.mrf.mxu0  ;;  %3253 = vmatmul.mubr.msk.bf16.gmra.mxu0 %vm204_vm1, %v3620_v51  ;;  %v4009_v54 = vpop.f32.mrf.mxu1  ;;  %3357 = vmatmul.mubr.msk.bf16.gmra.mxu1 %vm204_vm1, %v3621_v52 }
  0xcb   :  { %3364 = vmatprep.mubr.msk.bf16.mxu0 %vm3673_vm0, %v4882_v0  ;;  %3468 = vmatprep.mubr.msk.bf16.mxu1 %vm3673_vm0, %v4882_v0 }
  0xcc   :  { %v3158_v56 = vpop.f32.mrf.mxu0  ;;  %v3262_v57 = vpop.f32.mrf.mxu1 }
  0xce   :  { %v4018_v58 = vpop.f32.mrf.mxu0  ;;  %v4020_v59 = vpop.f32.mrf.mxu1 }
  0xd0   :  { %v3159_v63 = vpop.f32.mrf.mxu0  ;;  %v3263_v1 = vpop.f32.mrf.mxu1 }
  0xd1   :  { %v3632_v63 = vld [vmem:[%s4879_s0 + $0x1b0] sm:$0xff]  }
  0xd2   :  { %v4030_v2 = vpop.f32.mrf.mxu0  ;;  %v4032_v3 = vpop.f32.mrf.mxu1  ;;  %3365 = vmatmul.mubr.msk.bf16.vlgmr.msra.gmra.mxu0 %vm204_vm1, %v3622_v60  ;;  %3469 = vmatmul.mubr.msk.bf16.vlgmr.msra.gmra.mxu1 %vm204_vm1, %v3623_v61  ;;  %v3633_v1 = vld [vmem:[%s4879_s0 + $0x274] sm:$0xff]  }
  0xd3   :  { %3368 = vmatprep.mubr.msk.bf16.mxu0 %vm3673_vm0, %v4882_v0  ;;  %3472 = vmatprep.mubr.msk.bf16.mxu1 %vm3673_vm0, %v4882_v0 }
  0xd4   :  { %v3162_v5 = vpop.f32.mrf.mxu0  ;;  %v3266_v6 = vpop.f32.mrf.mxu1 }
  0xd6   :  { %v4042_v7 = vpop.f32.mrf.mxu0  ;;  %v4044_v8 = vpop.f32.mrf.mxu1 }
  0xd8   :  { %v3163_v12 = vpop.f32.mrf.mxu0  ;;  %v3267_v13 = vpop.f32.mrf.mxu1 }
  0xda   :  { %v4054_v14 = vpop.f32.mrf.mxu0  ;;  %v4056_v15 = vpop.f32.mrf.mxu1  ;;  %3369 = vmatmul.mubr.msk.bf16.gmra.mxu0 %vm204_vm1, %v3624_v9  ;;  %3473 = vmatmul.mubr.msk.bf16.gmra.mxu1 %vm204_vm1, %v3625_v10 }
  0xdb   :  { %3372 = vmatprep.mubr.msk.bf16.mxu0 %vm3673_vm0, %v4882_v0  ;;  %3476 = vmatprep.mubr.msk.bf16.mxu1 %vm3673_vm0, %v4882_v0 }
  0xdc   :  { %v3166_v17 = vpop.f32.mrf.mxu0  ;;  %v3270_v18 = vpop.f32.mrf.mxu1 }
  0xde   :  { %v4066_v19 = vpop.f32.mrf.mxu0  ;;  %v4068_v20 = vpop.f32.mrf.mxu1 }
  0xe0   :  { %v3167_v24 = vpop.f32.mrf.mxu0  ;;  %v3271_v25 = vpop.f32.mrf.mxu1 }
  0xe1   :  { %v3634_v24 = vld [vmem:[%s4879_s0 + $0x1b8] sm:$0xff]  }
  0xe2   :  { %v4078_v26 = vpop.f32.mrf.mxu0  ;;  %v4080_v27 = vpop.f32.mrf.mxu1  ;;  %3373 = vmatmul.mubr.msk.bf16.gmra.mxu0 %vm204_vm1, %v3626_v21  ;;  %3477 = vmatmul.mubr.msk.bf16.gmra.mxu1 %vm204_vm1, %v3627_v22  ;;  %v3635_v25 = vld [vmem:[%s4879_s0 + $0x27c] sm:$0xff]  }
  0xe3   :  { %3376 = vmatprep.mubr.msk.bf16.mxu0 %vm3673_vm0, %v4882_v0  ;;  %3480 = vmatprep.mubr.msk.bf16.mxu1 %vm3673_vm0, %v4882_v0 }
  0xe4   :  { %v3170_v29 = vpop.f32.mrf.mxu0  ;;  %v3274_v30 = vpop.f32.mrf.mxu1 }
  0xe6   :  { %v4090_v31 = vpop.f32.mrf.mxu0  ;;  %v4092_v32 = vpop.f32.mrf.mxu1 }
  0xe8   :  { %v3171_v36 = vpop.f32.mrf.mxu0  ;;  %v3275_v37 = vpop.f32.mrf.mxu1 }
  0xea   :  { %v4102_v38 = vpop.f32.mrf.mxu0  ;;  %v4104_v39 = vpop.f32.mrf.mxu1  ;;  %3377 = vmatmul.mubr.msk.bf16.gmra.mxu0 %vm204_vm1, %v3628_v33  ;;  %3481 = vmatmul.mubr.msk.bf16.gmra.mxu1 %vm204_vm1, %v3629_v34 }
  0xeb   :  { %3380 = vmatprep.mubr.msk.bf16.mxu0 %vm3673_vm0, %v4882_v0  ;;  %3484 = vmatprep.mubr.msk.bf16.mxu1 %vm3673_vm0, %v4882_v0 }
  0xec   :  { %v3174_v41 = vpop.f32.mrf.mxu0  ;;  %v3278_v42 = vpop.f32.mrf.mxu1 }
  0xee   :  { %v4114_v43 = vpop.f32.mrf.mxu0  ;;  %v4116_v44 = vpop.f32.mrf.mxu1 }
  0xf0   :  { %v3175_v48 = vpop.f32.mrf.mxu0  ;;  %v3279_v49 = vpop.f32.mrf.mxu1 }
  0xf1   :  { %v3636_v48 = vld [vmem:[%s4879_s0 + $0x1c0] sm:$0xff]  }
  0xf2   :  { %v4126_v50 = vpop.f32.mrf.mxu0  ;;  %v4128_v51 = vpop.f32.mrf.mxu1  ;;  %3381 = vmatmul.mubr.msk.bf16.gmra.mxu0 %vm204_vm1, %v3630_v45  ;;  %3485 = vmatmul.mubr.msk.bf16.gmra.mxu1 %vm204_vm1, %v3631_v46  ;;  %v3637_v49 = vld [vmem:[%s4879_s0 + $0x284] sm:$0xff]  }
  0xf3   :  { %3384 = vmatprep.mubr.msk.bf16.mxu0 %vm3673_vm0, %v4882_v0  ;;  %3488 = vmatprep.mubr.msk.bf16.mxu1 %vm3673_vm0, %v4882_v0 }
  0xf4   :  { %v3178_v56 = vpop.f32.mrf.mxu0  ;;  %v3282_v57 = vpop.f32.mrf.mxu1 }
  0xf6   :  { %v4138_v60 = vpop.f32.mrf.mxu0  ;;  %v4140_v61 = vpop.f32.mrf.mxu1 }
  0xf8   :  { %v3179_v6 = vpop.f32.mrf.mxu0  ;;  %v3283_v9 = vpop.f32.mrf.mxu1 }
  0xfa   :  { %v4150_v10 = vpop.f32.mrf.mxu0  ;;  %v4152_v12 = vpop.f32.mrf.mxu1  ;;  %3385 = vmatmul.mubr.msk.bf16.gmra.mxu0 %vm204_vm1, %v3632_v63  ;;  %3489 = vmatmul.mubr.msk.bf16.gmra.mxu1 %vm204_vm1, %v3633_v1 }
  0xfb   :  { %3388 = vmatprep.mubr.msk.bf16.mxu0 %vm3673_vm0, %v4882_v0  ;;  %3492 = vmatprep.mubr.msk.bf16.mxu1 %vm3673_vm0, %v4882_v0 }
  0xfc   :  { %v3182_v17 = vpop.f32.mrf.mxu0  ;;  %v3286_v18 = vpop.f32.mrf.mxu1 }
  0xfe   :  { %v4162_v21 = vpop.f32.mrf.mxu0  ;;  %v4164_v22 = vpop.f32.mrf.mxu1 }
 0x100   :  { %v3183_v30 = vpop.f32.mrf.mxu0  ;;  %v3287_v33 = vpop.f32.mrf.mxu1 }
 0x101   :  { %v3638_v30 = vld [vmem:[%s4879_s0 + $0x1c8] sm:$0xff]  }
 0x102   :  { %v4174_v34 = vpop.f32.mrf.mxu0  ;;  %v4176_v36 = vpop.f32.mrf.mxu1  ;;  %3389 = vmatmul.mubr.msk.bf16.gmra.mxu0 %vm204_vm1, %v3634_v24  ;;  %3493 = vmatmul.mubr.msk.bf16.gmra.mxu1 %vm204_vm1, %v3635_v25  ;;  %v3639_v33 = vld [vmem:[%s4879_s0 + $0x28c] sm:$0xff]  }
 0x103   :  { %3392 = vmatprep.mubr.msk.bf16.mxu0 %vm3673_vm0, %v4882_v0  ;;  %3496 = vmatprep.mubr.msk.bf16.mxu1 %vm3673_vm0, %v4882_v0 }
 0x104   :  { %v3186_v41 = vpop.f32.mrf.mxu0  ;;  %v3290_v42 = vpop.f32.mrf.mxu1 }
 0x106   :  { %v4186_v45 = vpop.f32.mrf.mxu0  ;;  %v4188_v46 = vpop.f32.mrf.mxu1 }
 0x108   :  { %v3187_v57 = vpop.f32.mrf.mxu0  ;;  %v3291_v63 = vpop.f32.mrf.mxu1 }
 0x10a   :  { %v4198_v1 = vpop.f32.mrf.mxu0  ;;  %v4200_v6 = vpop.f32.mrf.mxu1  ;;  %3393 = vmatmul.mubr.msk.bf16.gmra.mxu0 %vm204_vm1, %v3636_v48  ;;  %3497 = vmatmul.mubr.msk.bf16.gmra.mxu1 %vm204_vm1, %v3637_v49 }
 0x10b   :  { %3396 = vmatprep.mubr.msk.bf16.mxu0 %vm3673_vm0, %v4882_v0  ;;  %3500 = vmatprep.mubr.msk.bf16.mxu1 %vm3673_vm0, %v4882_v0 }
 0x10c   :  { %v3190_v17 = vpop.f32.mrf.mxu0  ;;  %v3294_v18 = vpop.f32.mrf.mxu1 }
 0x10e   :  { %v4210_v24 = vpop.f32.mrf.mxu0  ;;  %v4212_v25 = vpop.f32.mrf.mxu1 }
 0x110   :  { %v3191_v42 = vpop.f32.mrf.mxu0  ;;  %v3295_v48 = vpop.f32.mrf.mxu1 }
 0x112   :  { %v4222_v49 = vpop.f32.mrf.mxu0  ;;  %v4224_v57 = vpop.f32.mrf.mxu1  ;;  %3397 = vmatmul.mubr.msk.bf16.gmra.mxu0 %vm204_vm1, %v3638_v30  ;;  %3501 = vmatmul.mubr.msk.bf16.gmra.mxu1 %vm204_vm1, %v3639_v33  ;;  %v3640_v30 = vld [vmem:[%s4879_s0 + $0x1d0] sm:$0xff]  }
 0x113   :  { %3400 = vmatprep.mubr.msk.bf16.mxu0 %vm3673_vm0, %v4882_v0  ;;  %3504 = vmatprep.mubr.msk.bf16.mxu1 %vm3673_vm0, %v4882_v0  ;;  %v3641_v33 = vld [vmem:[%s4879_s0 + $0x294] sm:$0xff]  }
 0x114   :  { %v3194_v17 = vpop.f32.mrf.mxu0  ;;  %v3298_v18 = vpop.f32.mrf.mxu1 }
 0x116   :  { %v4234_v42 = vpop.f32.mrf.mxu0  ;;  %v4236_v48 = vpop.f32.mrf.mxu1 }
 0x118   :  { %v3195_v41 = vpop.f32.mrf.mxu0  ;;  %v3299_v9 = vpop.f32.mrf.mxu1 }
 0x11a   :  { %v4246_v56 = vpop.f32.mrf.mxu0  ;;  %v4248_v17 = vpop.f32.mrf.mxu1  ;;  %3401 = vmatmul.mubr.msk.bf16.gmra.mxu0 %vm204_vm1, %v3640_v30  ;;  %3505 = vmatmul.mubr.msk.bf16.gmra.mxu1 %vm204_vm1, %v3641_v33  ;;  %v3642_v30 = vld [vmem:[%s4879_s0 + $0x1d8] sm:$0xff]  }
 0x11b   :  { %3404 = vmatprep.mubr.msk.bf16.mxu0 %vm3673_vm0, %v4882_v0  ;;  %3508 = vmatprep.mubr.msk.bf16.mxu1 %vm3673_vm0, %v4882_v0  ;;  %v3643_v33 = vld [vmem:[%s4879_s0 + $0x29c] sm:$0xff]  }
 0x11c   :  { %v3198_v63 = vpop.f32.mrf.mxu0  ;;  %v3302_v41 = vpop.f32.mrf.mxu1 }
 0x11e   :  { %v4258_v9 = vpop.f32.mrf.mxu0  ;;  %v4260_v37 = vpop.f32.mrf.mxu1 }
 0x120   :  { %v3199_v29 = vpop.f32.mrf.mxu0  ;;  %v3303_v13 = vpop.f32.mrf.mxu1 }
 0x122   :  { %v4270_v5 = vpop.f32.mrf.mxu0  ;;  %v4272_v63 = vpop.f32.mrf.mxu1  ;;  %3405 = vmatmul.mubr.msk.bf16.gmra.mxu0 %vm204_vm1, %v3642_v30  ;;  %3509 = vmatmul.mubr.msk.bf16.gmra.mxu1 %vm204_vm1, %v3643_v33  ;;  %v3644_v30 = vld [vmem:[%s4879_s0 + $0x1e0] sm:$0xff]  }
 0x123   :  { %3408 = vmatprep.mubr.msk.bf16.mxu0 %vm3673_vm0, %v4882_v0  ;;  %3512 = vmatprep.mubr.msk.bf16.mxu1 %vm3673_vm0, %v4882_v0  ;;  %v3645_v33 = vld [vmem:[%s4879_s0 + $0x2a4] sm:$0xff]  }
 0x124   :  { %v3202_v18 = vpop.f32.mrf.mxu0  ;;  %v3306_v29 = vpop.f32.mrf.mxu1 }
 0x126   :  { %v4282_v13 = vpop.f32.mrf.mxu0  ;;  %v4284_v52 = vpop.f32.mrf.mxu1 }
 0x127   :  { %4936 = vst [vmem:[#allocation2_spill] sm:$0xff] %v4282_v13  ;;  %4937 = vst [vmem:[#allocation3_spill] sm:$0xff] %v4284_v52 }
 0x128   :  { %v3203_v47 = vpop.f32.mrf.mxu0  ;;  %v3307_v40 = vpop.f32.mrf.mxu1 }
 0x12a   :  { %v4294_v35 = vpop.f32.mrf.mxu0  ;;  %v4296_v18 = vpop.f32.mrf.mxu1  ;;  %3409 = vmatmul.mubr.msk.bf16.gmra.mxu0 %vm204_vm1, %v3644_v30  ;;  %3513 = vmatmul.mubr.msk.bf16.gmra.mxu1 %vm204_vm1, %v3645_v33  ;;  %v3646_v30 = vld [vmem:[%s4879_s0 + $0x1e8] sm:$0xff]  }
 0x12b   :  { %4938 = vst [vmem:[#allocation4_spill] sm:$0xff] %v4294_v35  ;;  %4939 = vst [vmem:[#allocation5_spill] sm:$0xff] %v4296_v18  ;;  %3412 = vmatprep.mubr.msk.bf16.mxu0 %vm3673_vm0, %v4882_v0  ;;  %3516 = vmatprep.mubr.msk.bf16.mxu1 %vm3673_vm0, %v4882_v0  ;;  %v3647_v33 = vld [vmem:[%s4879_s0 + $0x2ac] sm:$0xff]  }
 0x12c   :  { %v3206_v41 = vpop.f32.mrf.mxu0  ;;  %v3310_v47 = vpop.f32.mrf.mxu1 }
 0x12e   :  { %v4306_v40 = vpop.f32.mrf.mxu0  ;;  %v4308_v28 = vpop.f32.mrf.mxu1 }
 0x12f   :  { %4940 = vst [vmem:[#allocation6_spill] sm:$0xff] %v4306_v40  ;;  %4941 = vst [vmem:[#allocation7_spill] sm:$0xff] %v4308_v28 }
 0x130   :  { %v3207_v23 = vpop.f32.mrf.mxu0  ;;  %v3311_v16 = vpop.f32.mrf.mxu1 }
 0x132   :  { %v4318_v11 = vpop.f32.mrf.mxu0  ;;  %v4320_v41 = vpop.f32.mrf.mxu1  ;;  %3413 = vmatmul.mubr.msk.bf16.gmra.mxu0 %vm204_vm1, %v3646_v30  ;;  %3517 = vmatmul.mubr.msk.bf16.gmra.mxu1 %vm204_vm1, %v3647_v33  ;;  %v3648_v30 = vld [vmem:[%s4879_s0 + $0x1f0] sm:$0xff]  }
 0x133   :  { %4942 = vst [vmem:[#allocation8_spill] sm:$0xff] %v4318_v11  ;;  %4943 = vst [vmem:[#allocation9_spill] sm:$0xff] %v4320_v41  ;;  %3416 = vmatprep.mubr.msk.bf16.mxu0 %vm3673_vm0, %v4882_v0  ;;  %3520 = vmatprep.mubr.msk.bf16.mxu1 %vm3673_vm0, %v4882_v0  ;;  %v3649_v33 = vld [vmem:[%s4879_s0 + $0x2b4] sm:$0xff]   ;;  %v4948_v41 = vmov 0.0   ;;  %v4608_v11 = vld [vmem:[%s4880_s2] ss:$0 sm:$0xff] }
 0x134   :  { %v3210_v29 = vpop.f32.mrf.mxu0  ;;  %v3314_v23 = vpop.f32.mrf.mxu1 }
 0x136   :  { %v4330_v16 = vpop.f32.mrf.mxu0  ;;  %v4332_v4 = vpop.f32.mrf.mxu1 }
 0x137   :  { %4944 = vst [vmem:[#allocation10_spill] sm:$0xff] %v4330_v16  ;;  %4945 = vst [vmem:[#allocation11_spill] sm:$0xff] %v4332_v4 }
 0x138   :  { %v3211_v62 = vpop.f32.mrf.mxu0  ;;  %v3315_v55 = vpop.f32.mrf.mxu1 }
 0x13a   :  { %v4342_v0 = vpop.f32.mrf.mxu0  ;;  %v4344_v29 = vpop.f32.mrf.mxu1  ;;  %3417 = vmatmul.mubr.msk.bf16.gmra.mxu0 %vm204_vm1, %v3648_v30  ;;  %3521 = vmatmul.mubr.msk.bf16.gmra.mxu1 %vm204_vm1, %v3649_v33  ;;  %v3650_v30 = vld [vmem:[%s4879_s0 + $0x1f8] sm:$0xff]  }
 0x13b   :  { %4946 = vst [vmem:[#allocation12_spill] sm:$0xff] %v4342_v0  ;;  %4947 = vst [vmem:[#allocation13_spill] sm:$0xff] %v4344_v29  ;;  %3420 = vmatprep.mubr.msk.bf16.mxu0 %vm3673_vm0, %v4948_v41  ;;  %3524 = vmatprep.mubr.msk.bf16.mxu1 %vm3673_vm0, %v4948_v41  ;;  %v3651_v33 = vld [vmem:[%s4879_s0 + $0x2bc] sm:$0xff]  }
 0x13c   :  { %v3214_v47 = vpop.f32.mrf.mxu0  ;;  %v3318_v62 = vpop.f32.mrf.mxu1 }
 0x13e   :  { %v4354_v55 = vpop.f32.mrf.mxu0  ;;  %v4356_v4 = vpop.f32.mrf.mxu1 }
 0x13f   :  { %4949 = vst [vmem:[#allocation14_spill] sm:$0xff] %v4354_v55  ;;  %4950 = vst [vmem:[#allocation15_spill] sm:$0xff] %v4356_v4 }
 0x140   :  { %v3215_v29 = vpop.f32.mrf.mxu0  ;;  %v3319_v0 = vpop.f32.mrf.mxu1 }
 0x142   :  { %v4366_v16 = vpop.f32.mrf.mxu0  ;;  %v4368_v47 = vpop.f32.mrf.mxu1  ;;  %3421 = vmatmul.mubr.msk.bf16.gmra.mxu0 %vm204_vm1, %v3650_v30  ;;  %3525 = vmatmul.mubr.msk.bf16.gmra.mxu1 %vm204_vm1, %v3651_v33  ;;  %v3652_v30 = vld [vmem:[%s4879_s0 + $0x200] sm:$0xff]  }
 0x143   :  { %4951 = vst [vmem:[#allocation16_spill] sm:$0xff] %v4366_v16  ;;  %4952 = vst [vmem:[#allocation17_spill] sm:$0xff] %v4368_v47  ;;  %3424 = vmatprep.mubr.msk.bf16.mxu0 %vm3673_vm0, %v4948_v41  ;;  %3528 = vmatprep.mubr.msk.bf16.mxu1 %vm3673_vm0, %v4948_v41  ;;  %v3653_v33 = vld [vmem:[%s4879_s0 + $0x2c4] sm:$0xff]  }
 0x144   :  { %v3218_v23 = vpop.f32.mrf.mxu0  ;;  %v3322_v29 = vpop.f32.mrf.mxu1 }
 0x146   :  { %v4378_v0 = vpop.f32.mrf.mxu0  ;;  %v4380_v4 = vpop.f32.mrf.mxu1 }
 0x147   :  { %4953 = vst [vmem:[#allocation18_spill] sm:$0xff] %v4378_v0  ;;  %4954 = vst [vmem:[#allocation19_spill] sm:$0xff] %v4380_v4 }
 0x148   :  { %v3219_v47 = vpop.f32.mrf.mxu0  ;;  %v3323_v16 = vpop.f32.mrf.mxu1 }
 0x14a   :  { %v4390_v55 = vpop.f32.mrf.mxu0  ;;  %v4392_v23 = vpop.f32.mrf.mxu1  ;;  %3425 = vmatmul.mubr.msk.bf16.gmra.mxu0 %vm204_vm1, %v3652_v30  ;;  %3529 = vmatmul.mubr.msk.bf16.gmra.mxu1 %vm204_vm1, %v3653_v33  ;;  %v3654_v30 = vld [vmem:[%s4879_s0 + $0x208] sm:$0xff]  }
 0x14b   :  { %4955 = vst [vmem:[#allocation20_spill] sm:$0xff] %v4390_v55  ;;  %4956 = vst [vmem:[#allocation21_spill] sm:$0xff] %v4392_v23  ;;  %3428 = vmatprep.mubr.msk.bf16.mxu0 %vm3673_vm0, %v4948_v41  ;;  %3532 = vmatprep.mubr.msk.bf16.mxu1 %vm3673_vm0, %v4948_v41  ;;  %v3655_v33 = vld [vmem:[%s4879_s0 + $0x2cc] sm:$0xff]  }
 0x14c   :  { %v3222_v62 = vpop.f32.mrf.mxu0  ;;  %v3326_v47 = vpop.f32.mrf.mxu1 }
 0x14e   :  { %v4402_v16 = vpop.f32.mrf.mxu0  ;;  %v4404_v4 = vpop.f32.mrf.mxu1 }
 0x14f   :  { %4957 = vst [vmem:[#allocation22_spill] sm:$0xff] %v4402_v16  ;;  %4958 = vst [vmem:[#allocation23_spill] sm:$0xff] %v4404_v4 }
 0x150   :  { %v3223_v23 = vpop.f32.mrf.mxu0  ;;  %v3327_v55 = vpop.f32.mrf.mxu1 }
 0x152   :  { %v4414_v0 = vpop.f32.mrf.mxu0  ;;  %v4416_v62 = vpop.f32.mrf.mxu1  ;;  %3429 = vmatmul.mubr.msk.bf16.gmra.mxu0 %vm204_vm1, %v3654_v30  ;;  %3533 = vmatmul.mubr.msk.bf16.gmra.mxu1 %vm204_vm1, %v3655_v33  ;;  %v3656_v30 = vld [vmem:[%s4879_s0 + $0x210] sm:$0xff]  }
 0x153   :  { %4959 = vst [vmem:[#allocation24_spill] sm:$0xff] %v4414_v0  ;;  %4960 = vst [vmem:[#allocation25_spill] sm:$0xff] %v4416_v62  ;;  %3432 = vmatprep.mubr.msk.bf16.mxu0 %vm3673_vm0, %v4948_v41  ;;  %3536 = vmatprep.mubr.msk.bf16.mxu1 %vm3673_vm0, %v4948_v41  ;;  %v3657_v33 = vld [vmem:[%s4879_s0 + $0x2d4] sm:$0xff]  }
 0x154   :  { %v3226_v29 = vpop.f32.mrf.mxu0  ;;  %v3330_v23 = vpop.f32.mrf.mxu1 }
 0x156   :  { %v4426_v55 = vpop.f32.mrf.mxu0  ;;  %v4428_v4 = vpop.f32.mrf.mxu1 }
 0x157   :  { %4961 = vst [vmem:[#allocation26_spill] sm:$0xff] %v4426_v55  ;;  %4962 = vst [vmem:[#allocation27_spill] sm:$0xff] %v4428_v4 }
 0x158   :  { %v3227_v62 = vpop.f32.mrf.mxu0  ;;  %v3331_v0 = vpop.f32.mrf.mxu1 }
 0x15a   :  { %v4438_v16 = vpop.f32.mrf.mxu0  ;;  %v4440_v29 = vpop.f32.mrf.mxu1  ;;  %3433 = vmatmul.mubr.msk.bf16.gmra.mxu0 %vm204_vm1, %v3656_v30  ;;  %3537 = vmatmul.mubr.msk.bf16.gmra.mxu1 %vm204_vm1, %v3657_v33  ;;  %v3658_v30 = vld [vmem:[%s4879_s0 + $0x218] sm:$0xff]  }
 0x15b   :  { %4963 = vst [vmem:[#allocation28_spill] sm:$0xff] %v4438_v16  ;;  %4964 = vst [vmem:[#allocation29_spill] sm:$0xff] %v4440_v29  ;;  %3436 = vmatprep.mubr.msk.bf16.mxu0 %vm3673_vm0, %v4948_v41  ;;  %3540 = vmatprep.mubr.msk.bf16.mxu1 %vm3673_vm0, %v4948_v41  ;;  %v3659_v33 = vld [vmem:[%s4879_s0 + $0x2dc] sm:$0xff]  }
 0x15c   :  { %v3230_v47 = vpop.f32.mrf.mxu0  ;;  %v3334_v62 = vpop.f32.mrf.mxu1 }
 0x15e   :  { %v4450_v0 = vpop.f32.mrf.mxu0  ;;  %v4452_v4 = vpop.f32.mrf.mxu1 }
 0x15f   :  { %4965 = vst [vmem:[#allocation30_spill] sm:$0xff] %v4450_v0  ;;  %4966 = vst [vmem:[#allocation31_spill] sm:$0xff] %v4452_v4 }
 0x160   :  { %v3231_v29 = vpop.f32.mrf.mxu0  ;;  %v3335_v16 = vpop.f32.mrf.mxu1 }
 0x162   :  { %v4462_v55 = vpop.f32.mrf.mxu0  ;;  %v4464_v47 = vpop.f32.mrf.mxu1  ;;  %3437 = vmatmul.mubr.msk.bf16.gmra.mxu0 %vm204_vm1, %v3658_v30  ;;  %3541 = vmatmul.mubr.msk.bf16.gmra.mxu1 %vm204_vm1, %v3659_v33  ;;  %v3660_v30 = vld [vmem:[%s4879_s0 + $0x220] sm:$0xff]  }
 0x163   :  { %4967 = vst [vmem:[#allocation32_spill] sm:$0xff] %v4462_v55  ;;  %4968 = vst [vmem:[#allocation33_spill] sm:$0xff] %v4464_v47  ;;  %3440 = vmatprep.mubr.msk.bf16.mxu0 %vm3673_vm0, %v4948_v41  ;;  %3544 = vmatprep.mubr.msk.bf16.mxu1 %vm3673_vm0, %v4948_v41  ;;  %v3661_v33 = vld [vmem:[%s4879_s0 + $0x2e4] sm:$0xff]  }
 0x164   :  { %v3234_v23 = vpop.f32.mrf.mxu0  ;;  %v3338_v29 = vpop.f32.mrf.mxu1 }
 0x166   :  { %v4474_v16 = vpop.f32.mrf.mxu0  ;;  %v4476_v4 = vpop.f32.mrf.mxu1 }
 0x167   :  { %4969 = vst [vmem:[#allocation34_spill] sm:$0xff] %v4474_v16  ;;  %4970 = vst [vmem:[#allocation35_spill] sm:$0xff] %v4476_v4 }
 0x168   :  { %v3235_v47 = vpop.f32.mrf.mxu0  ;;  %v3339_v55 = vpop.f32.mrf.mxu1 }
 0x16a   :  { %v4486_v0 = vpop.f32.mrf.mxu0  ;;  %v4488_v23 = vpop.f32.mrf.mxu1  ;;  %3441 = vmatmul.mubr.msk.bf16.gmra.mxu0 %vm204_vm1, %v3660_v30  ;;  %3545 = vmatmul.mubr.msk.bf16.gmra.mxu1 %vm204_vm1, %v3661_v33  ;;  %v3662_v30 = vld [vmem:[%s4879_s0 + $0x228] sm:$0xff]  }
 0x16b   :  { %4971 = vst [vmem:[#allocation36_spill] sm:$0xff] %v4486_v0  ;;  %4972 = vst [vmem:[#allocation37_spill] sm:$0xff] %v4488_v23  ;;  %3444 = vmatprep.mubr.msk.bf16.mxu0 %vm3673_vm0, %v4948_v41  ;;  %3548 = vmatprep.mubr.msk.bf16.mxu1 %vm3673_vm0, %v4948_v41  ;;  %v3663_v33 = vld [vmem:[%s4879_s0 + $0x2ec] sm:$0xff]  }
 0x16c   :  { %v3238_v62 = vpop.f32.mrf.mxu0  ;;  %v3342_v47 = vpop.f32.mrf.mxu1 }
 0x16e   :  { %v4498_v55 = vpop.f32.mrf.mxu0  ;;  %v4500_v4 = vpop.f32.mrf.mxu1 }
 0x16f   :  { %4973 = vst [vmem:[#allocation38_spill] sm:$0xff] %v4498_v55  ;;  %4974 = vst [vmem:[#allocation39_spill] sm:$0xff] %v4500_v4 }
 0x170   :  { %v3239_v23 = vpop.f32.mrf.mxu0  ;;  %v3343_v0 = vpop.f32.mrf.mxu1 }
 0x172   :  { %v4510_v16 = vpop.f32.mrf.mxu0  ;;  %v4512_v62 = vpop.f32.mrf.mxu1  ;;  %3445 = vmatmul.mubr.msk.bf16.gmra.mxu0 %vm204_vm1, %v3662_v30  ;;  %3549 = vmatmul.mubr.msk.bf16.gmra.mxu1 %vm204_vm1, %v3663_v33  ;;  %v3664_v30 = vld [vmem:[%s4879_s0 + $0x230] sm:$0xff]  }
 0x173   :  { %4975 = vst [vmem:[#allocation40_spill] sm:$0xff] %v4510_v16  ;;  %4976 = vst [vmem:[#allocation41_spill] sm:$0xff] %v4512_v62  ;;  %3448 = vmatprep.mubr.msk.bf16.mxu0 %vm3673_vm0, %v4948_v41  ;;  %3552 = vmatprep.mubr.msk.bf16.mxu1 %vm3673_vm0, %v4948_v41  ;;  %v3665_v33 = vld [vmem:[%s4879_s0 + $0x2f4] sm:$0xff]  }
 0x174   :  { %v3242_v29 = vpop.f32.mrf.mxu0  ;;  %v3346_v23 = vpop.f32.mrf.mxu1 }
 0x176   :  { %v4522_v0 = vpop.f32.mrf.mxu0  ;;  %v4524_v4 = vpop.f32.mrf.mxu1 }
 0x177   :  { %4977 = vst [vmem:[#allocation42_spill] sm:$0xff] %v4522_v0  ;;  %4978 = vst [vmem:[#allocation43_spill] sm:$0xff] %v4524_v4 }
 0x178   :  { %v3243_v62 = vpop.f32.mrf.mxu0  ;;  %v3347_v16 = vpop.f32.mrf.mxu1 }
 0x17a   :  { %v4534_v55 = vpop.f32.mrf.mxu0  ;;  %v4536_v29 = vpop.f32.mrf.mxu1  ;;  %3449 = vmatmul.mubr.msk.bf16.gmra.mxu0 %vm204_vm1, %v3664_v30  ;;  %3553 = vmatmul.mubr.msk.bf16.gmra.mxu1 %vm204_vm1, %v3665_v33  ;;  %v3666_v30 = vld [vmem:[%s4879_s0 + $0x238] sm:$0xff]  }
 0x17b   :  { %4979 = vst [vmem:[#allocation44_spill] sm:$0xff] %v4534_v55  ;;  %4980 = vst [vmem:[#allocation45_spill] sm:$0xff] %v4536_v29  ;;  %3452 = vmatprep.mubr.msk.bf16.mxu0 %vm3673_vm0, %v4948_v41  ;;  %3556 = vmatprep.mubr.msk.bf16.mxu1 %vm3673_vm0, %v4948_v41  ;;  %v3667_v33 = vld [vmem:[%s4879_s0 + $0x2fc] sm:$0xff]  }
 0x17c   :  { %v3246_v47 = vpop.f32.mrf.mxu0  ;;  %v3350_v62 = vpop.f32.mrf.mxu1 }
 0x17e   :  { %v4546_v16 = vpop.f32.mrf.mxu0  ;;  %v4548_v4 = vpop.f32.mrf.mxu1 }
 0x17f   :  { %4981 = vst [vmem:[#allocation46_spill] sm:$0xff] %v4546_v16  ;;  %4982 = vst [vmem:[#allocation47_spill] sm:$0xff] %v4548_v4 }
 0x180   :  { %v3247_v29 = vpop.f32.mrf.mxu0  ;;  %v3351_v55 = vpop.f32.mrf.mxu1 }
 0x182   :  { %v4558_v0 = vpop.f32.mrf.mxu0  ;;  %v4560_v47 = vpop.f32.mrf.mxu1  ;;  %3453 = vmatmul.mubr.msk.bf16.gmra.mxu0 %vm204_vm1, %v3666_v30  ;;  %3557 = vmatmul.mubr.msk.bf16.gmra.mxu1 %vm204_vm1, %v3667_v33  ;;  %v3668_v30 = vld [vmem:[%s4879_s0 + $0x240] sm:$0xff]  }
 0x183   :  { %4983 = vst [vmem:[#allocation48_spill] sm:$0xff] %v4558_v0  ;;  %4984 = vst [vmem:[#allocation49_spill] sm:$0xff] %v4560_v47  ;;  %3456 = vmatprep.mubr.msk.bf16.mxu0 %vm3673_vm0, %v4948_v41  ;;  %3560 = vmatprep.mubr.msk.bf16.mxu1 %vm3673_vm0, %v4948_v41  ;;  %v3669_v33 = vld [vmem:[%s4879_s0 + $0x304] sm:$0xff]  }
 0x184   :  { %v3250_v23 = vpop.f32.mrf.mxu0  ;;  %v3354_v29 = vpop.f32.mrf.mxu1 }
 0x186   :  { %v4570_v55 = vpop.f32.mrf.mxu0  ;;  %v4572_v4 = vpop.f32.mrf.mxu1 }
 0x187   :  { %4985 = vst [vmem:[#allocation50_spill] sm:$0xff] %v4570_v55  ;;  %4986 = vst [vmem:[#allocation51_spill] sm:$0xff] %v4572_v4  ;;  %v3670_v55 = vld [vmem:[%s4879_s0 + $0x248] ss:$0 sps:$4 sm:$0xff]  }
 0x188   :  { %v3251_v47 = vpop.f32.mrf.mxu0  ;;  %v3355_v0 = vpop.f32.mrf.mxu1 }
 0x18a   :  { %v4582_v16 = vpop.f32.mrf.mxu0  ;;  %v4584_v23 = vpop.f32.mrf.mxu1  ;;  %3457 = vmatmul.mubr.msk.bf16.gmra.mxu0 %vm204_vm1, %v3668_v30  ;;  %3561 = vmatmul.mubr.msk.bf16.gmra.mxu1 %vm204_vm1, %v3669_v33  ;;  %v3671_v30 = vld [vmem:[%s4879_s0 + $0x30c] ss:$0 sps:$4 sm:$0xff]  }
 0x18b   :  { %4987 = vst [vmem:[#allocation52_spill] sm:$0xff] %v4582_v16  ;;  %4988 = vst [vmem:[#allocation53_spill] sm:$0xff] %v4584_v23  ;;  %3460 = vmatprep.mubr.msk.bf16.mxu0 %vm3673_vm0, %v4948_v41  ;;  %3564 = vmatprep.mubr.msk.bf16.mxu1 %vm3673_vm0, %v4948_v41  ;;  %v4989_v41 = vmax.f32 %v4006_v53, %v4009_v54 }
 0x18c   :  { %v3254_v62 = vpop.f32.mrf.mxu0  ;;  %v3358_v47 = vpop.f32.mrf.mxu1 }
 0x18e   :  { %v509_v0 = vpop.f32.mrf.mxu0  ;;  %v989_v4 = vpop.f32.mrf.mxu1 }
 0x190   :  { %v3255_v33 = vpop.f32.mrf.mxu0  ;;  %v3359_v29 = vpop.f32.mrf.mxu1 }
 0x192   :  { %v1323_v23 = vpop.f32.mrf.mxu0  ;;  %3461 = vmatmul.mubr.msk.bf16.gmra.mxu0 %vm204_vm1, %v3670_v55  ;;  %v1852_v16 = vpop.f32.mrf.mxu1  ;;  %3565 = vmatmul.mubr.msk.bf16.gmra.mxu1 %vm204_vm1, %v3671_v30  ;;  %v4990_v55 = vmax.f32 %v4018_v58, %v4020_v59 }
 0x193   :  { %v1521_v4 = vmax.f32 %v4989_v41, %v1323_v23  ;;  %v4991_v41 = vmax.f32 %v4030_v2, %v4032_v3 }
 0x194   :  { %v3366_v62 = vpop.f32.mrf.mxu0  ;;  %v3470_v47 = vpop.f32.mrf.mxu1 }
 0x195   :  { %v2050_v0 = vmax.f32 %v1521_v4, %v1852_v16 }
 0x196   :  { %v1326_v33 = vpop.f32.mrf.mxu0  ;;  %v1855_v29 = vpop.f32.mrf.mxu1 }
 0x197   :  { %v1522_v28 = vmax.f32 %v4990_v55, %v1326_v33  ;;  %v2105_v18 = vadd.f32 %v4608_v11, %v2050_v0  ;;  %v4992_v0 = vmax.f32 %v4042_v7, %v4044_v8 }
 0x198   :  { %v3367_v40 = vpop.f32.mrf.mxu0  ;;  %v3471_v30 = vpop.f32.mrf.mxu1 }
 0x199   :  { %v2051_v53 = vmax.f32 %v1522_v28, %v1855_v29  ;;  %v2154_v35 = vmax.f32 %v2105_v18, 0.0 }
 0x19a   :  { %v1331_v54 = vpop.f32.mrf.mxu0  ;;  %v1860_v23 = vpop.f32.mrf.mxu1 }
 0x19b   :  { %v2106_v16 = vadd.f32 %v4608_v11, %v2051_v53  ;;  %v1523_v4 = vmax.f32 %v4991_v41, %v1331_v54 }
 0x19c   :  { %v3370_v62 = vpop.f32.mrf.mxu0  ;;  %v3474_v47 = vpop.f32.mrf.mxu1 }
 0x19d   :  { %v2155_v52 = vmax.f32 %v2106_v16, 0.0  ;;  %v2052_v13 = vmax.f32 %v1523_v4, %v1860_v23 }
 0x19e   :  { %v1334_v58 = vpop.f32.mrf.mxu0  ;;  %v1863_v59 = vpop.f32.mrf.mxu1 }
 0x19f   :  { %v2904_v40 = vpack.c.bf16 %v2155_v52, %v2154_v35  ;;  %v1524_v28 = vmax.f32 %v4992_v0, %v1334_v58  ;;  %v2107_v2 = vadd.f32 %v4608_v11, %v2052_v13  ;;  %v4993_v35 = vmax.f32 %v4054_v14, %v4056_v15 }
 0x1a0   :  { %v3371_v33 = vpop.f32.mrf.mxu0  ;;  %v3475_v29 = vpop.f32.mrf.mxu1  ;;  %v4994_v13 = vmax.f32 %v4066_v19, %v4068_v20 }
 0x1a1   :  { %2905 = vst [vmem:[%s4881_s3] sm:$0xff] %v2904_v40   ;;  %v2053_v3 = vmax.f32 %v1524_v28, %v1863_v59  ;;  %v2156_v8 = vmax.f32 %v2107_v2, 0.0  ;;  %v4995_v28 = vmax.f32 %v4078_v26, %v4080_v27 }
 0x1a2   :  { %v1339_v55 = vpop.f32.mrf.mxu0  ;;  %v1868_v18 = vpop.f32.mrf.mxu1 }
 0x1a3   :  { %v2108_v30 = vadd.f32 %v4608_v11, %v2053_v3  ;;  %v1525_v52 = vmax.f32 %v4993_v35, %v1339_v55  ;;  %v4996_v35 = vmax.f32 %v4090_v31, %v4092_v32 }
 0x1a4   :  { %v3374_v53 = vpop.f32.mrf.mxu0  ;;  %v3478_v7 = vpop.f32.mrf.mxu1 }
 0x1a5   :  { %v2157_v54 = vmax.f32 %v2108_v30, 0.0  ;;  %v2054_v23 = vmax.f32 %v1525_v52, %v1868_v18 }
 0x1a6   :  { %v1342_v16 = vpop.f32.mrf.mxu0  ;;  %v1871_v41 = vpop.f32.mrf.mxu1 }
 0x1a7   :  { %v2909_v4 = vpack.c.bf16 %v2157_v54, %v2156_v8  ;;  %v1526_v62 = vmax.f32 %v4994_v13, %v1342_v16  ;;  %v2109_v14 = vadd.f32 %v4608_v11, %v2054_v23  ;;  %v4997_v16 = vmax.f32 %v4102_v38, %v4104_v39 }
 0x1a8   :  { %v3375_v47 = vpop.f32.mrf.mxu0  ;;  %v3479_v58 = vpop.f32.mrf.mxu1 }
 0x1a9   :  { %3021 = vst [vmem:[%s4881_s3 + $0x8] sm:$0xff] %v2909_v4   ;;  %v2055_v15 = vmax.f32 %v1526_v62, %v1871_v41  ;;  %v2158_v20 = vmax.f32 %v2109_v14, 0.0 }
 0x1aa   :  { %v1347_v59 = vpop.f32.mrf.mxu0  ;;  %v1876_v40 = vpop.f32.mrf.mxu1 }
 0x1ab   :  { %v2110_v0 = vadd.f32 %v4608_v11, %v2055_v15  ;;  %v1527_v33 = vmax.f32 %v4995_v28, %v1347_v59  ;;  %v4998_v15 = vmax.f32 %v4114_v43, %v4116_v44 }
 0x1ac   :  { %v3378_v29 = vpop.f32.mrf.mxu0  ;;  %v3482_v19 = vpop.f32.mrf.mxu1 }
 0x1ad   :  { %v2159_v2 = vmax.f32 %v2110_v0, 0.0  ;;  %v2056_v3 = vmax.f32 %v1527_v33, %v1876_v40  ;;  %v4999_v19 = vmax.f32 %v4126_v50, %v4128_v51 }
 0x1ae   :  { %v1350_v55 = vpop.f32.mrf.mxu0  ;;  %v1879_v18 = vpop.f32.mrf.mxu1 }
 0x1af   :  { %v2914_v30 = vpack.c.bf16 %v2159_v2, %v2158_v20  ;;  %v1528_v52 = vmax.f32 %v4996_v35, %v1350_v55  ;;  %v2111_v26 = vadd.f32 %v4608_v11, %v2056_v3 }
 0x1b0   :  { %v3379_v53 = vpop.f32.mrf.mxu0  ;;  %v3483_v7 = vpop.f32.mrf.mxu1 }
 0x1b1   :  { %3022 = vst [vmem:[%s4881_s3 + $0x10] sm:$0xff] %v2914_v30   ;;  %v2057_v27 = vmax.f32 %v1528_v52, %v1879_v18  ;;  %v2160_v32 = vmax.f32 %v2111_v26, 0.0  ;;  %v5000_v52 = vmax.f32 %v4138_v60, %v4140_v61 }
 0x1b2   :  { %v1355_v8 = vpop.f32.mrf.mxu0  ;;  %v1884_v54 = vpop.f32.mrf.mxu1 }
 0x1b3   :  { %v2112_v23 = vadd.f32 %v4608_v11, %v2057_v27  ;;  %v1529_v41 = vmax.f32 %v4997_v16, %v1355_v8 }
 0x1b4   :  { %v3382_v4 = vpop.f32.mrf.mxu0  ;;  %v3486_v31 = vpop.f32.mrf.mxu1 }
 0x1b5   :  { %v2161_v13 = vmax.f32 %v2112_v23, 0.0  ;;  %v2058_v62 = vmax.f32 %v1529_v41, %v1884_v54  ;;  %v5001_v23 = vmax.f32 %v4150_v10, %v4152_v12 }
 0x1b6   :  { %v1358_v47 = vpop.f32.mrf.mxu0  ;;  %v1887_v58 = vpop.f32.mrf.mxu1 }
 0x1b7   :  { %v2919_v14 = vpack.c.bf16 %v2161_v13, %v2160_v32  ;;  %v1530_v59 = vmax.f32 %v4998_v15, %v1358_v47  ;;  %v2113_v38 = vadd.f32 %v4608_v11, %v2058_v62  ;;  %v5002_v47 = vmax.f32 %v4162_v21, %v4164_v22 }
 0x1b8   :  { %v3383_v40 = vpop.f32.mrf.mxu0  ;;  %v3487_v0 = vpop.f32.mrf.mxu1 }
 0x1b9   :  { %3023 = vst [vmem:[%s4881_s3 + $0x18] sm:$0xff] %v2919_v14   ;;  %v2059_v39 = vmax.f32 %v1530_v59, %v1887_v58  ;;  %v2162_v44 = vmax.f32 %v2113_v38, 0.0  ;;  %v5003_v38 = vmax.f32 %v4174_v34, %v4176_v36 }
 0x1ba   :  { %v1363_v28 = vpop.f32.mrf.mxu0  ;;  %v1892_v33 = vpop.f32.mrf.mxu1 }
 0x1bb   :  { %v2114_v29 = vadd.f32 %v4608_v11, %v2059_v39  ;;  %v1531_v20 = vmax.f32 %v4999_v19, %v1363_v28 }
 0x1bc   :  { %v3386_v2 = vpop.f32.mrf.mxu0  ;;  %v3490_v43 = vpop.f32.mrf.mxu1 }
 0x1bd   :  { %v2163_v3 = vmax.f32 %v2114_v29, 0.0  ;;  %v2060_v55 = vmax.f32 %v1531_v20, %v1892_v33  ;;  %v5004_v43 = vmax.f32 %v4186_v45, %v4188_v46 }
 0x1be   :  { %v1366_v18 = vpop.f32.mrf.mxu0  ;;  %v1895_v30 = vpop.f32.mrf.mxu1 }
 0x1bf   :  { %v2924_v35 = vpack.c.bf16 %v2163_v3, %v2162_v44  ;;  %v1532_v53 = vmax.f32 %v5000_v52, %v1366_v18  ;;  %v2115_v50 = vadd.f32 %v4608_v11, %v2060_v55  ;;  %v5005_v52 = vmax.f32 %v4198_v1, %v4200_v6 }
 0x1c0   :  { %v3387_v7 = vpop.f32.mrf.mxu0  ;;  %v3491_v26 = vpop.f32.mrf.mxu1 }
 0x1c1   :  { %3024 = vst [vmem:[%s4881_s3 + $0x20] sm:$0xff] %v2924_v35   ;;  %v2061_v51 = vmax.f32 %v1532_v53, %v1895_v30  ;;  %v2164_v61 = vmax.f32 %v2115_v50, 0.0 }
 0x1c2   :  { %v1371_v27 = vpop.f32.mrf.mxu0  ;;  %v1900_v8 = vpop.f32.mrf.mxu1 }
 0x1c3   :  { %v2116_v54 = vadd.f32 %v4608_v11, %v2061_v51  ;;  %v1533_v16 = vmax.f32 %v5001_v23, %v1371_v27 }
 0x1c4   :  { %v3390_v41 = vpop.f32.mrf.mxu0  ;;  %v3494_v60 = vpop.f32.mrf.mxu1 }
 0x1c5   :  { %v2165_v4 = vmax.f32 %v2116_v54, 0.0  ;;  %v2062_v31 = vmax.f32 %v1533_v16, %v1900_v8  ;;  %v5006_v54 = vmax.f32 %v4210_v24, %v4212_v25 }
 0x1c6   :  { %v1374_v32 = vpop.f32.mrf.mxu0  ;;  %v1903_v13 = vpop.f32.mrf.mxu1 }
 0x1c7   :  { %v2929_v62 = vpack.c.bf16 %v2165_v4, %v2164_v61  ;;  %v1534_v58 = vmax.f32 %v5002_v47, %v1374_v32  ;;  %v2117_v10 = vadd.f32 %v4608_v11, %v2062_v31  ;;  %v5007_v31 = vmax.f32 %v4222_v49, %v4224_v57 }
 0x1c8   :  { %v3391_v14 = vpop.f32.mrf.mxu0  ;;  %v3495_v15 = vpop.f32.mrf.mxu1 }
 0x1c9   :  { %3025 = vst [vmem:[%s4881_s3 + $0x28] sm:$0xff] %v2929_v62   ;;  %v2063_v12 = vmax.f32 %v1534_v58, %v1903_v13  ;;  %v2166_v22 = vmax.f32 %v2117_v10, 0.0  ;;  %v5008_v10 = vmax.f32 %v4234_v42, %v4236_v48 }
 0x1ca   :  { %v1379_v59 = vpop.f32.mrf.mxu0  ;;  %v1908_v40 = vpop.f32.mrf.mxu1 }
 0x1cb   :  { %v2118_v0 = vadd.f32 %v4608_v11, %v2063_v12  ;;  %v1535_v39 = vmax.f32 %v5003_v38, %v1379_v59 }
 0x1cc   :  { %v3394_v28 = vpop.f32.mrf.mxu0  ;;  %v3498_v21 = vpop.f32.mrf.mxu1 }
 0x1cd   :  { %v2167_v33 = vmax.f32 %v2118_v0, 0.0  ;;  %v2064_v29 = vmax.f32 %v1535_v39, %v1908_v40  ;;  %v5009_v28 = vmax.f32 %v4246_v56, %v4248_v17 }
 0x1ce   :  { %v1382_v19 = vpop.f32.mrf.mxu0  ;;  %v1911_v20 = vpop.f32.mrf.mxu1 }
 0x1cf   :  { %v2934_v2 = vpack.c.bf16 %v2167_v33, %v2166_v22  ;;  %v1536_v44 = vmax.f32 %v5004_v43, %v1382_v19  ;;  %v2119_v34 = vadd.f32 %v4608_v11, %v2064_v29  ;;  %v5010_v43 = vmax.f32 %v4258_v9, %v4260_v37 }
 0x1d0   :  { %v3395_v3 = vpop.f32.mrf.mxu0  ;;  %v3499_v55 = vpop.f32.mrf.mxu1 }
 0x1d1   :  { %3026 = vst [vmem:[%s4881_s3 + $0x30] sm:$0xff] %v2934_v2   ;;  %v2065_v36 = vmax.f32 %v1536_v44, %v1911_v20  ;;  %v2168_v46 = vmax.f32 %v2119_v34, 0.0 }
 0x1d2   :  { %v1387_v18 = vpop.f32.mrf.mxu0  ;;  %v1916_v30 = vpop.f32.mrf.mxu1 }
 0x1d3   :  { %v2120_v35 = vadd.f32 %v4608_v11, %v2065_v36  ;;  %v1537_v53 = vmax.f32 %v5005_v52, %v1387_v18 }
 0x1d4   :  { %v3398_v7 = vpop.f32.mrf.mxu0  ;;  %v3502_v45 = vpop.f32.mrf.mxu1 }
 0x1d5   :  { %v2169_v26 = vmax.f32 %v2120_v35, 0.0  ;;  %v2066_v50 = vmax.f32 %v1537_v53, %v1916_v30  ;;  %v5011_v30 = vmax.f32 %v4270_v5, %v4272_v63 }
 0x1d6   :  { %v1390_v51 = vpop.f32.mrf.mxu0  ;;  %v1919_v27 = vpop.f32.mrf.mxu1 }
 0x1d7   :  { %v2939_v8 = vpack.c.bf16 %v2169_v26, %v2168_v46  ;;  %v1538_v23 = vmax.f32 %v5006_v54, %v1390_v51  ;;  %v2121_v1 = vadd.f32 %v4608_v11, %v2066_v50  ;;  %v5012_v50 = vld [vmem:[#allocation2_spill] sm:$0xff]  ;;  %v5013_v51 = vld [vmem:[#allocation3_spill] sm:$0xff] }
 0x1d8   :  { %v3399_v16 = vpop.f32.mrf.mxu0  ;;  %v3503_v41 = vpop.f32.mrf.mxu1 }
 0x1d9   :  { %3027 = vst [vmem:[%s4881_s3 + $0x38] sm:$0xff] %v2939_v8   ;;  %v2067_v6 = vmax.f32 %v1538_v23, %v1919_v27  ;;  %v2170_v25 = vmax.f32 %v2121_v1, 0.0  ;;  %v5014_v27 = vmax.f32 %v5012_v50, %v5013_v51 }
 0x1da   :  { %v1395_v60 = vpop.f32.mrf.mxu0  ;;  %v1924_v61 = vpop.f32.mrf.mxu1 }
 0x1db   :  { %v2122_v4 = vadd.f32 %v4608_v11, %v2067_v6  ;;  %v1539_v32 = vmax.f32 %v5007_v31, %v1395_v60  ;;  %v5015_v6 = vld [vmem:[#allocation4_spill] sm:$0xff]  ;;  %v5016_v60 = vld [vmem:[#allocation5_spill] sm:$0xff] }
 0x1dc   :  { %v3402_v13 = vpop.f32.mrf.mxu0  ;;  %v3506_v24 = vpop.f32.mrf.mxu1 }
 0x1dd   :  { %v2171_v62 = vmax.f32 %v2122_v4, 0.0  ;;  %v2068_v47 = vmax.f32 %v1539_v32, %v1924_v61  ;;  %v5017_v61 = vmax.f32 %v5015_v6, %v5016_v60 }
 0x1de   :  { %v1398_v58 = vpop.f32.mrf.mxu0  ;;  %v1927_v14 = vpop.f32.mrf.mxu1 }
 0x1df   :  { %v2944_v15 = vpack.c.bf16 %v2171_v62, %v2170_v25  ;;  %v1540_v12 = vmax.f32 %v5008_v10, %v1398_v58  ;;  %v2123_v49 = vadd.f32 %v4608_v11, %v2068_v47 }
 0x1e0   :  { %v3403_v59 = vpop.f32.mrf.mxu0  ;;  %v3507_v40 = vpop.f32.mrf.mxu1 }
 0x1e1   :  { %3028 = vst [vmem:[%s4881_s3 + $0x40] sm:$0xff] %v2944_v15   ;;  %v2069_v57 = vmax.f32 %v1540_v12, %v1927_v14  ;;  %v2172_v48 = vmax.f32 %v2123_v49, 0.0  ;;  %v5018_v14 = vld [vmem:[#allocation6_spill] sm:$0xff]  ;;  %v5019_v15 = vld [vmem:[#allocation7_spill] sm:$0xff] }
 0x1e2   :  { %v1403_v0 = vpop.f32.mrf.mxu0  ;;  %v1932_v38 = vpop.f32.mrf.mxu1  ;;  %v5020_v10 = vmax.f32 %v5018_v14, %v5019_v15 }
 0x1e3   :  { %v2124_v39 = vadd.f32 %v4608_v11, %v2069_v57  ;;  %v1541_v21 = vmax.f32 %v5009_v28, %v1403_v0  ;;  %v5021_v28 = vld [vmem:[#allocation8_spill] sm:$0xff] }
 0x1e4   :  { %v3406_v22 = vpop.f32.mrf.mxu0  ;;  %v3510_v42 = vpop.f32.mrf.mxu1 }
 0x1e5   :  { %v2173_v33 = vmax.f32 %v2124_v39, 0.0  ;;  %v2070_v29 = vmax.f32 %v1541_v21, %v1932_v38  ;;  %v5022_v21 = vld [vmem:[#allocation9_spill] sm:$0xff] }
 0x1e6   :  { %v1406_v19 = vpop.f32.mrf.mxu0  ;;  %v1935_v20 = vpop.f32.mrf.mxu1  ;;  %v5023_v22 = vmax.f32 %v5021_v28, %v5022_v21 }
 0x1e7   :  { %v2949_v2 = vpack.c.bf16 %v2173_v33, %v2172_v48  ;;  %v1542_v44 = vmax.f32 %v5010_v43, %v1406_v19  ;;  %v2125_v56 = vadd.f32 %v4608_v11, %v2070_v29 }
 0x1e8   :  { %v3407_v3 = vpop.f32.mrf.mxu0  ;;  %v3511_v55 = vpop.f32.mrf.mxu1 }
 0x1e9   :  { %3029 = vst [vmem:[%s4881_s3 + $0x48] sm:$0xff] %v2949_v2   ;;  %v2071_v17 = vmax.f32 %v1542_v44, %v1935_v20  ;;  %v2174_v9 = vmax.f32 %v2125_v56, 0.0  ;;  %v5024_v3 = vld [vmem:[#allocation10_spill] sm:$0xff]  ;;  %v5025_v55 = vld [vmem:[#allocation11_spill] sm:$0xff] }
 0x1ea   :  { %v1411_v34 = vpop.f32.mrf.mxu0  ;;  %v1940_v36 = vpop.f32.mrf.mxu1  ;;  %v5026_v56 = vmax.f32 %v5024_v3, %v5025_v55 }
 0x1eb   :  { %v2126_v18 = vadd.f32 %v4608_v11, %v2071_v17  ;;  %v1543_v35 = vmax.f32 %v5011_v30, %v1411_v34 }
 0x1ec   :  { %v3410_v52 = vpop.f32.mrf.mxu0  ;;  %v3514_v37 = vpop.f32.mrf.mxu1 }
 0x1ed   :  { %v2175_v53 = vmax.f32 %v2126_v18, 0.0  ;;  %v2072_v7 = vmax.f32 %v1543_v35, %v1940_v36 }
 0x1ee   :  { %v1414_v45 = vpop.f32.mrf.mxu0  ;;  %v1943_v46 = vpop.f32.mrf.mxu1 }
 0x1ef   :  { %v2954_v26 = vpack.c.bf16 %v2175_v53, %v2174_v9  ;;  %v1544_v8 = vmax.f32 %v5014_v27, %v1414_v45  ;;  %v2127_v5 = vadd.f32 %v4608_v11, %v2072_v7  ;;  %v5027_v9 = vld [vmem:[#allocation12_spill] sm:$0xff]  ;;  %v5028_v53 = vld [vmem:[#allocation13_spill] sm:$0xff] }
 0x1f0   :  { %v3411_v54 = vpop.f32.mrf.mxu0  ;;  %v3515_v23 = vpop.f32.mrf.mxu1  ;;  %v5029_v7 = vmax.f32 %v5027_v9, %v5028_v53 }
 0x1f1   :  { %3030 = vst [vmem:[%s4881_s3 + $0x50] sm:$0xff] %v2954_v26   ;;  %v2073_v63 = vmax.f32 %v1544_v8, %v1943_v46  ;;  %v2176_v13 = vmax.f32 %v2127_v5, 0.0  ;;  %v5030_v5 = vld [vmem:[#allocation14_spill] sm:$0xff] }
 0x1f2   :  { %v1419_v16 = vpop.f32.mrf.mxu0  ;;  %v1948_v41 = vpop.f32.mrf.mxu1 }
 0x1f3   :  { %v2128_v1 = vadd.f32 %v4608_v11, %v2073_v63  ;;  %v1545_v4 = vmax.f32 %v5017_v61, %v1419_v16  ;;  %v5031_v63 = vld [vmem:[#allocation15_spill] sm:$0xff] }
 0x1f4   :  { %v3414_v31 = vpop.f32.mrf.mxu0  ;;  %v3518_v32 = vpop.f32.mrf.mxu1  ;;  %v5032_v16 = vmax.f32 %v5030_v5, %v5031_v63 }
 0x1f5   :  { %v2177_v24 = vmax.f32 %v2128_v1, 0.0  ;;  %v2074_v25 = vmax.f32 %v1545_v4, %v1948_v41 }
 0x1f6   :  { %v1422_v62 = vpop.f32.mrf.mxu0  ;;  %v1951_v47 = vpop.f32.mrf.mxu1 }
 0x1f7   :  { %v2959_v58 = vpack.c.bf16 %v2177_v24, %v2176_v13  ;;  %v1546_v12 = vmax.f32 %v5020_v10, %v1422_v62  ;;  %v2129_v49 = vadd.f32 %v4608_v11, %v2074_v25  ;;  %v5033_v13 = vld [vmem:[#allocation16_spill] sm:$0xff]  ;;  %v5034_v24 = vld [vmem:[#allocation17_spill] sm:$0xff] }
 0x1f8   :  { %v3415_v59 = vpop.f32.mrf.mxu0  ;;  %v3519_v40 = vpop.f32.mrf.mxu1  ;;  %v5035_v25 = vmax.f32 %v5033_v13, %v5034_v24 }
 0x1f9   :  { %3031 = vst [vmem:[%s4881_s3 + $0x58] sm:$0xff] %v2959_v58   ;;  %v2075_v57 = vmax.f32 %v1546_v12, %v1951_v47  ;;  %v2178_v29 = vmax.f32 %v2129_v49, 0.0  ;;  %v5036_v49 = vld [vmem:[#allocation18_spill] sm:$0xff] }
 0x1fa   :  { %v1427_v0 = vpop.f32.mrf.mxu0  ;;  %v1956_v38 = vpop.f32.mrf.mxu1 }
 0x1fb   :  { %v2130_v39 = vadd.f32 %v4608_v11, %v2075_v57  ;;  %v1547_v42 = vmax.f32 %v5023_v22, %v1427_v0  ;;  %v5037_v57 = vld [vmem:[#allocation19_spill] sm:$0xff] }
 0x1fc   :  { %v3418_v48 = vpop.f32.mrf.mxu0  ;;  %v3522_v33 = vpop.f32.mrf.mxu1  ;;  %v5038_v0 = vmax.f32 %v5036_v49, %v5037_v57 }
 0x1fd   :  { %v2179_v19 = vmax.f32 %v2130_v39, 0.0  ;;  %v2076_v20 = vmax.f32 %v1547_v42, %v1956_v38 }
 0x1fe   :  { %v1430_v2 = vpop.f32.mrf.mxu0  ;;  %v1959_v43 = vpop.f32.mrf.mxu1 }
 0x1ff   :  { %v2964_v44 = vpack.c.bf16 %v2179_v19, %v2178_v29  ;;  %v1548_v17 = vmax.f32 %v5026_v56, %v1430_v2  ;;  %v2131_v18 = vadd.f32 %v4608_v11, %v2076_v20  ;;  %v5039_v29 = vld [vmem:[#allocation20_spill] sm:$0xff]  ;;  %v5040_v19 = vld [vmem:[#allocation21_spill] sm:$0xff] }
 0x200   :  { %v3419_v34 = vpop.f32.mrf.mxu0  ;;  %v3523_v36 = vpop.f32.mrf.mxu1  ;;  %v5041_v20 = vmax.f32 %v5039_v29, %v5040_v19 }
 0x201   :  { %3032 = vst [vmem:[%s4881_s3 + $0x60] sm:$0xff] %v2964_v44   ;;  %v2077_v30 = vmax.f32 %v1548_v17, %v1959_v43  ;;  %v2180_v50 = vmax.f32 %v2131_v18, 0.0  ;;  %v5042_v18 = vld [vmem:[#allocation22_spill] sm:$0xff] }
 0x202   :  { %v1435_v35 = vpop.f32.mrf.mxu0  ;;  %v1964_v52 = vpop.f32.mrf.mxu1 }
 0x203   :  { %v2132_v37 = vadd.f32 %v4608_v11, %v2077_v30  ;;  %v1549_v45 = vmax.f32 %v5029_v7, %v1435_v35  ;;  %v5043_v30 = vld [vmem:[#allocation23_spill] sm:$0xff] }
 0x204   :  { %v3422_v46 = vpop.f32.mrf.mxu0  ;;  %v3526_v26 = vpop.f32.mrf.mxu1  ;;  %v5044_v35 = vmax.f32 %v5042_v18, %v5043_v30 }
 0x205   :  { %v2181_v51 = vmax.f32 %v2132_v37, 0.0  ;;  %v2078_v27 = vmax.f32 %v1549_v45, %v1964_v52 }
 0x206   :  { %v1438_v8 = vpop.f32.mrf.mxu0  ;;  %v1967_v54 = vpop.f32.mrf.mxu1 }
 0x207   :  { %v2969_v23 = vpack.c.bf16 %v2181_v51, %v2180_v50  ;;  %v1550_v41 = vmax.f32 %v5032_v16, %v1438_v8  ;;  %v2133_v60 = vadd.f32 %v4608_v11, %v2078_v27  ;;  %v5045_v50 = vld [vmem:[#allocation24_spill] sm:$0xff]  ;;  %v5046_v51 = vld [vmem:[#allocation25_spill] sm:$0xff] }
 0x208   :  { %v3423_v1 = vpop.f32.mrf.mxu0  ;;  %v3527_v6 = vpop.f32.mrf.mxu1  ;;  %v5047_v27 = vmax.f32 %v5045_v50, %v5046_v51 }
 0x209   :  { %3033 = vst [vmem:[%s4881_s3 + $0x68] sm:$0xff] %v2969_v23   ;;  %v2079_v61 = vmax.f32 %v1550_v41, %v1967_v54  ;;  %v2182_v14 = vmax.f32 %v2133_v60, 0.0  ;;  %v5048_v60 = vld [vmem:[#allocation26_spill] sm:$0xff] }
 0x20a   :  { %v1443_v4 = vpop.f32.mrf.mxu0  ;;  %v1972_v31 = vpop.f32.mrf.mxu1 }
 0x20b   :  { %v2134_v32 = vadd.f32 %v4608_v11, %v2079_v61  ;;  %v1551_v62 = vmax.f32 %v5035_v25, %v1443_v4  ;;  %v5049_v61 = vld [vmem:[#allocation27_spill] sm:$0xff] }
 0x20c   :  { %v3426_v47 = vpop.f32.mrf.mxu0  ;;  %v3530_v58 = vpop.f32.mrf.mxu1  ;;  %v5050_v4 = vmax.f32 %v5048_v60, %v5049_v61 }
 0x20d   :  { %v2183_v15 = vmax.f32 %v2134_v32, 0.0  ;;  %v2080_v10 = vmax.f32 %v1551_v62, %v1972_v31 }
 0x20e   :  { %v1446_v12 = vpop.f32.mrf.mxu0  ;;  %v1975_v59 = vpop.f32.mrf.mxu1 }
 0x20f   :  { %v2974_v40 = vpack.c.bf16 %v2183_v15, %v2182_v14  ;;  %v1552_v38 = vmax.f32 %v5038_v0, %v1446_v12  ;;  %v2135_v21 = vadd.f32 %v4608_v11, %v2080_v10  ;;  %v5051_v14 = vld [vmem:[#allocation28_spill] sm:$0xff]  ;;  %v5052_v15 = vld [vmem:[#allocation29_spill] sm:$0xff] }
 0x210   :  { %v3427_v39 = vpop.f32.mrf.mxu0  ;;  %v3531_v28 = vpop.f32.mrf.mxu1  ;;  %v5053_v10 = vmax.f32 %v5051_v14, %v5052_v15 }
 0x211   :  { %3034 = vst [vmem:[%s4881_s3 + $0x70] sm:$0xff] %v2974_v40   ;;  %v2081_v22 = vmax.f32 %v1552_v38, %v1975_v59  ;;  %v2184_v3 = vmax.f32 %v2135_v21, 0.0  ;;  %v5054_v21 = vld [vmem:[#allocation30_spill] sm:$0xff] }
 0x212   :  { %v1451_v42 = vpop.f32.mrf.mxu0  ;;  %v1980_v48 = vpop.f32.mrf.mxu1 }
 0x213   :  { %v2136_v33 = vadd.f32 %v4608_v11, %v2081_v22  ;;  %v1553_v2 = vmax.f32 %v5041_v20, %v1451_v42  ;;  %v5055_v22 = vld [vmem:[#allocation31_spill] sm:$0xff] }
 0x214   :  { %v3430_v43 = vpop.f32.mrf.mxu0  ;;  %v3534_v44 = vpop.f32.mrf.mxu1  ;;  %v5056_v42 = vmax.f32 %v5054_v21, %v5055_v22 }
 0x215   :  { %v2185_v55 = vmax.f32 %v2136_v33, 0.0  ;;  %v2082_v56 = vmax.f32 %v1553_v2, %v1980_v48 }
 0x216   :  { %v1454_v17 = vpop.f32.mrf.mxu0  ;;  %v1983_v34 = vpop.f32.mrf.mxu1 }
 0x217   :  { %v2979_v36 = vpack.c.bf16 %v2185_v55, %v2184_v3  ;;  %v1554_v52 = vmax.f32 %v5044_v35, %v1454_v17  ;;  %v2137_v53 = vadd.f32 %v4608_v11, %v2082_v56  ;;  %v5057_v3 = vld [vmem:[#allocation32_spill] sm:$0xff]  ;;  %v5058_v55 = vld [vmem:[#allocation33_spill] sm:$0xff] }
 0x218   :  { %v3431_v37 = vpop.f32.mrf.mxu0  ;;  %v3535_v9 = vpop.f32.mrf.mxu1  ;;  %v5059_v56 = vmax.f32 %v5057_v3, %v5058_v55 }
 0x219   :  { %3035 = vst [vmem:[%s4881_s3 + $0x78] sm:$0xff] %v2979_v36   ;;  %v2083_v7 = vmax.f32 %v1554_v52, %v1983_v34  ;;  %v2186_v5 = vmax.f32 %v2137_v53, 0.0  ;;  %v5060_v53 = vld [vmem:[#allocation34_spill] sm:$0xff] }
 0x21a   :  { %v1459_v45 = vpop.f32.mrf.mxu0  ;;  %v1988_v46 = vpop.f32.mrf.mxu1 }
 0x21b   :  { %v2138_v26 = vadd.f32 %v4608_v11, %v2083_v7  ;;  %v1555_v8 = vmax.f32 %v5047_v27, %v1459_v45  ;;  %v5061_v7 = vld [vmem:[#allocation35_spill] sm:$0xff] }
 0x21c   :  { %v3434_v54 = vpop.f32.mrf.mxu0  ;;  %v3538_v23 = vpop.f32.mrf.mxu1  ;;  %v5062_v45 = vmax.f32 %v5060_v53, %v5061_v7 }
 0x21d   :  { %v2187_v63 = vmax.f32 %v2138_v26, 0.0  ;;  %v2084_v16 = vmax.f32 %v1555_v8, %v1988_v46 }
 0x21e   :  { %v1462_v41 = vpop.f32.mrf.mxu0  ;;  %v1991_v1 = vpop.f32.mrf.mxu1 }
 0x21f   :  { %v2984_v6 = vpack.c.bf16 %v2187_v63, %v2186_v5  ;;  %v1556_v31 = vmax.f32 %v5050_v4, %v1462_v41  ;;  %v2139_v24 = vadd.f32 %v4608_v11, %v2084_v16  ;;  %v5063_v5 = vld [vmem:[#allocation36_spill] sm:$0xff]  ;;  %v5064_v63 = vld [vmem:[#allocation37_spill] sm:$0xff] }
 0x220   :  { %v3435_v32 = vpop.f32.mrf.mxu0  ;;  %v3539_v13 = vpop.f32.mrf.mxu1  ;;  %v5065_v16 = vmax.f32 %v5063_v5, %v5064_v63 }
 0x221   :  { %3036 = vst [vmem:[%s4881_s3 + $0x80] sm:$0xff] %v2984_v6   ;;  %v2085_v25 = vmax.f32 %v1556_v31, %v1991_v1  ;;  %v2188_v49 = vmax.f32 %v2139_v24, 0.0  ;;  %v5066_v24 = vld [vmem:[#allocation38_spill] sm:$0xff] }
 0x222   :  { %v1467_v62 = vpop.f32.mrf.mxu0  ;;  %v1996_v47 = vpop.f32.mrf.mxu1 }
 0x223   :  { %v2140_v58 = vadd.f32 %v4608_v11, %v2085_v25  ;;  %v1557_v12 = vmax.f32 %v5053_v10, %v1467_v62  ;;  %v5067_v25 = vld [vmem:[#allocation39_spill] sm:$0xff] }
 0x224   :  { %v3438_v59 = vpop.f32.mrf.mxu0  ;;  %v3542_v40 = vpop.f32.mrf.mxu1  ;;  %v5068_v62 = vmax.f32 %v5066_v24, %v5067_v25 }
 0x225   :  { %v2189_v57 = vmax.f32 %v2140_v58, 0.0  ;;  %v2086_v0 = vmax.f32 %v1557_v12, %v1996_v47 }
 0x226   :  { %v1470_v38 = vpop.f32.mrf.mxu0  ;;  %v1999_v39 = vpop.f32.mrf.mxu1 }
 0x227   :  { %v2989_v28 = vpack.c.bf16 %v2189_v57, %v2188_v49  ;;  %v1558_v48 = vmax.f32 %v5056_v42, %v1470_v38  ;;  %v2141_v19 = vadd.f32 %v4608_v11, %v2086_v0  ;;  %v5069_v49 = vld [vmem:[#allocation40_spill] sm:$0xff]  ;;  %v5070_v57 = vld [vmem:[#allocation41_spill] sm:$0xff] }
 0x228   :  { %v3439_v33 = vpop.f32.mrf.mxu0  ;;  %v3543_v29 = vpop.f32.mrf.mxu1  ;;  %v5071_v0 = vmax.f32 %v5069_v49, %v5070_v57 }
 0x229   :  { %3037 = vst [vmem:[%s4881_s3 + $0x88] sm:$0xff] %v2989_v28   ;;  %v2087_v20 = vmax.f32 %v1558_v48, %v1999_v39  ;;  %v2190_v18 = vmax.f32 %v2141_v19, 0.0  ;;  %v5072_v19 = vld [vmem:[#allocation42_spill] sm:$0xff] }
 0x22a   :  { %v1475_v2 = vpop.f32.mrf.mxu0  ;;  %v2004_v43 = vpop.f32.mrf.mxu1 }
 0x22b   :  { %v2142_v44 = vadd.f32 %v4608_v11, %v2087_v20  ;;  %v1559_v17 = vmax.f32 %v5059_v56, %v1475_v2  ;;  %v5073_v20 = vld [vmem:[#allocation43_spill] sm:$0xff] }
 0x22c   :  { %v3442_v34 = vpop.f32.mrf.mxu0  ;;  %v3546_v36 = vpop.f32.mrf.mxu1  ;;  %v5074_v2 = vmax.f32 %v5072_v19, %v5073_v20 }
 0x22d   :  { %v2191_v30 = vmax.f32 %v2142_v44, 0.0  ;;  %v2088_v35 = vmax.f32 %v1559_v17, %v2004_v43 }
 0x22e   :  { %v1478_v52 = vpop.f32.mrf.mxu0  ;;  %v2007_v37 = vpop.f32.mrf.mxu1 }
 0x22f   :  { %v2994_v9 = vpack.c.bf16 %v2191_v30, %v2190_v18  ;;  %v1560_v46 = vmax.f32 %v5062_v45, %v1478_v52  ;;  %v2143_v51 = vadd.f32 %v4608_v11, %v2088_v35  ;;  %v5075_v18 = vld [vmem:[#allocation44_spill] sm:$0xff]  ;;  %v5076_v30 = vld [vmem:[#allocation45_spill] sm:$0xff] }
 0x230   :  { %v3443_v26 = vpop.f32.mrf.mxu0  ;;  %v3547_v50 = vpop.f32.mrf.mxu1  ;;  %v5077_v35 = vmax.f32 %v5075_v18, %v5076_v30 }
 0x231   :  { %3038 = vst [vmem:[%s4881_s3 + $0x90] sm:$0xff] %v2994_v9   ;;  %v2089_v27 = vmax.f32 %v1560_v46, %v2007_v37  ;;  %v2192_v60 = vmax.f32 %v2143_v51, 0.0  ;;  %v5078_v51 = vld [vmem:[#allocation46_spill] sm:$0xff] }
 0x232   :  { %v1483_v8 = vpop.f32.mrf.mxu0  ;;  %v2012_v54 = vpop.f32.mrf.mxu1 }
 0x233   :  { %v2144_v23 = vadd.f32 %v4608_v11, %v2089_v27  ;;  %v1561_v41 = vmax.f32 %v5065_v16, %v1483_v8  ;;  %v5079_v27 = vld [vmem:[#allocation47_spill] sm:$0xff] }
 0x234   :  { %v3446_v1 = vpop.f32.mrf.mxu0  ;;  %v3550_v6 = vpop.f32.mrf.mxu1  ;;  %v5080_v8 = vmax.f32 %v5078_v51, %v5079_v27 }
 0x235   :  { %v2193_v61 = vmax.f32 %v2144_v23, 0.0  ;;  %v2090_v4 = vmax.f32 %v1561_v41, %v2012_v54 }
 0x236   :  { %v1486_v31 = vpop.f32.mrf.mxu0  ;;  %v2015_v32 = vpop.f32.mrf.mxu1 }
 0x237   :  { %v2999_v13 = vpack.c.bf16 %v2193_v61, %v2192_v60  ;;  %v1562_v47 = vmax.f32 %v5068_v62, %v1486_v31  ;;  %v2145_v15 = vadd.f32 %v4608_v11, %v2090_v4  ;;  %v5081_v60 = vld [vmem:[#allocation48_spill] sm:$0xff]  ;;  %v5082_v61 = vld [vmem:[#allocation49_spill] sm:$0xff] }
 0x238   :  { %v3447_v58 = vpop.f32.mrf.mxu0  ;;  %v3551_v14 = vpop.f32.mrf.mxu1  ;;  %v5083_v4 = vmax.f32 %v5081_v60, %v5082_v61 }
 0x239   :  { %3039 = vst [vmem:[%s4881_s3 + $0x98] sm:$0xff] %v2999_v13   ;;  %v2091_v10 = vmax.f32 %v1562_v47, %v2015_v32  ;;  %v2194_v21 = vmax.f32 %v2145_v15, 0.0  ;;  %v5084_v15 = vld [vmem:[#allocation50_spill] sm:$0xff] }
 0x23a   :  { %v1491_v12 = vpop.f32.mrf.mxu0  ;;  %v2020_v59 = vpop.f32.mrf.mxu1 }
 0x23b   :  { %v2146_v40 = vadd.f32 %v4608_v11, %v2091_v10  ;;  %v1563_v38 = vmax.f32 %v5071_v0, %v1491_v12  ;;  %v5085_v10 = vld [vmem:[#allocation51_spill] sm:$0xff] }
 0x23c   :  { %v3450_v39 = vpop.f32.mrf.mxu0  ;;  %v3554_v28 = vpop.f32.mrf.mxu1  ;;  %v5086_v12 = vmax.f32 %v5084_v15, %v5085_v10 }
 0x23d   :  { %v2195_v22 = vmax.f32 %v2146_v40, 0.0  ;;  %v2092_v42 = vmax.f32 %v1563_v38, %v2020_v59 }
 0x23e   :  { %v1494_v48 = vpop.f32.mrf.mxu0  ;;  %v2023_v33 = vpop.f32.mrf.mxu1 }
 0x23f   :  { %v3004_v29 = vpack.c.bf16 %v2195_v22, %v2194_v21  ;;  %v1564_v43 = vmax.f32 %v5074_v2, %v1494_v48  ;;  %v2147_v55 = vadd.f32 %v4608_v11, %v2092_v42  ;;  %v5087_v21 = vld [vmem:[#allocation52_spill] sm:$0xff]  ;;  %v5088_v22 = vld [vmem:[#allocation53_spill] sm:$0xff] }
 0x240   :  { %v3451_v44 = vpop.f32.mrf.mxu0  ;;  %v3555_v3 = vpop.f32.mrf.mxu1  ;;  %v5089_v42 = vmax.f32 %v5087_v21, %v5088_v22 }
 0x241   :  { %3040 = vst [vmem:[%s4881_s3 + $0xa0] sm:$0xff] %v3004_v29   ;;  %v2093_v56 = vmax.f32 %v1564_v43, %v2023_v33  ;;  %v2196_v53 = vmax.f32 %v2147_v55, 0.0 }
 0x242   :  { %v1499_v17 = vpop.f32.mrf.mxu0  ;;  %v2028_v34 = vpop.f32.mrf.mxu1 }
 0x243   :  { %v2148_v36 = vadd.f32 %v4608_v11, %v2093_v56  ;;  %v1565_v52 = vmax.f32 %v5077_v35, %v1499_v17 }
 0x244   :  { %v3454_v37 = vpop.f32.mrf.mxu0  ;;  %v3558_v9 = vpop.f32.mrf.mxu1 }
 0x245   :  { %v2197_v7 = vmax.f32 %v2148_v36, 0.0  ;;  %v2094_v45 = vmax.f32 %v1565_v52, %v2028_v34 }
 0x246   :  { %v1502_v46 = vpop.f32.mrf.mxu0  ;;  %v2031_v26 = vpop.f32.mrf.mxu1 }
 0x247   :  { %v3009_v50 = vpack.c.bf16 %v2197_v7, %v2196_v53  ;;  %v1566_v54 = vmax.f32 %v5080_v8, %v1502_v46  ;;  %v2149_v63 = vadd.f32 %v4608_v11, %v2094_v45 }
 0x248   :  { %v3455_v23 = vpop.f32.mrf.mxu0  ;;  %v3559_v5 = vpop.f32.mrf.mxu1 }
 0x249   :  { %3041 = vst [vmem:[%s4881_s3 + $0xa8] sm:$0xff] %v3009_v50   ;;  %v2095_v16 = vmax.f32 %v1566_v54, %v2031_v26  ;;  %v2198_v24 = vmax.f32 %v2149_v63, 0.0 }
 0x24a   :  { %v1507_v41 = vpop.f32.mrf.mxu0  ;;  %v2036_v1 = vpop.f32.mrf.mxu1 }
 0x24b   :  { %v2150_v6 = vadd.f32 %v4608_v11, %v2095_v16  ;;  %v1567_v31 = vmax.f32 %v5083_v4, %v1507_v41 }
 0x24c   :  { %v3458_v32 = vpop.f32.mrf.mxu0  ;;  %v3562_v13 = vpop.f32.mrf.mxu1 }
 0x24d   :  { %v2199_v25 = vmax.f32 %v2150_v6, 0.0  ;;  %v2096_v62 = vmax.f32 %v1567_v31, %v2036_v1 }
 0x24e   :  { %v1510_v47 = vpop.f32.mrf.mxu0  ;;  %v2039_v58 = vpop.f32.mrf.mxu1 }
 0x24f   :  { %v3014_v14 = vpack.c.bf16 %v2199_v25, %v2198_v24  ;;  %v1568_v59 = vmax.f32 %v5086_v12, %v1510_v47  ;;  %v2151_v57 = vadd.f32 %v4608_v11, %v2096_v62 }
 0x250   :  { %v3459_v40 = vpop.f32.mrf.mxu0  ;;  %v3563_v49 = vpop.f32.mrf.mxu1 }
 0x251   :  { %3042 = vst [vmem:[%s4881_s3 + $0xb0] sm:$0xff] %v3014_v14   ;;  %v2097_v0 = vmax.f32 %v1568_v59, %v2039_v58  ;;  %v2200_v19 = vmax.f32 %v2151_v57, 0.0 }
 0x252   :  { %v1515_v38 = vpop.f32.mrf.mxu0  ;;  %v2044_v39 = vpop.f32.mrf.mxu1 }
 0x253   :  { %v2152_v28 = vadd.f32 %v4608_v11, %v2097_v0  ;;  %v1569_v48 = vmax.f32 %v5089_v42, %v1515_v38 }
 0x254   :  { %v3462_v33 = vpop.f32.mrf.mxu0  ;;  %v3566_v29 = vpop.f32.mrf.mxu1 }
 0x255   :  { %v2201_v20 = vmax.f32 %v2152_v28, 0.0  ;;  %v2098_v2 = vmax.f32 %v1569_v48, %v2044_v39 }
 0x256   :  { %v1518_v43 = vpop.f32.mrf.mxu0  ;;  %v2047_v44 = vpop.f32.mrf.mxu1 }
 0x257   :  { %v3019_v3 = vpack.c.bf16 %v2201_v20, %v2200_v19  ;;  %v2153_v55 = vadd.f32 %v4608_v11, %v2098_v2 }
 0x258   :  { %v3463_v56 = vpop.f32.mrf.mxu0  ;;  %v3567_v17 = vpop.f32.mrf.mxu1 }
 0x259   :  { %3043 = vst [vmem:[%s4881_s3 + $0xb8] sm:$0xff] %v3019_v3   ;;  %v2202_v34 = vmax.f32 %v2153_v55, 0.0 }
 0x25b   :  { %v2900_v36 = vpack.c.bf16 %v2202_v34, %v2202_v34 }
 0x25d   :  { %2448 = vst [vmem:[%s4881_s3 + $0xc0] sm:$0xf] %v2900_v36 }

// kernel: model_based_extractor_forward.4
= control target key start
LH: loop header
LB: loop body
LE: loop exit
PB: predicated region body
PF: predicated region fallthrough
CT: control target
= control target key end

     0   :  { %8 = vsyncpa [#allocation3], 0  ;;  %s6190_s0 = inlined_call_operand.vmem [shape: bf16[4,98,576], index: 0, kind: input, shape index: {}]   ;;  %s6191_s1 = inlined_call_operand.hbm [shape: bf16[576,512], index: 1, kind: input, shape index: {}]   ;;  %s6192_s2 = inlined_call_operand.hbm [shape: f32[1,512], index: 2, kind: input, shape index: {}]   ;;  %s6193_s3 = inlined_call_operand.vmem [shape: bf16[98,512], index: 3, kind: output, shape index: {}]  }
   0x1   :  { %10 = vsyncpa [#allocation3 + $0x1], 0 }
   0x2   :  { %11 = vsyncpa [#allocation5], 0 }
   0x3   :  { %13 = vsyncpa [#allocation5 + $0x1], 0  ;;  %s4316_s12 = smov 0   ;;  %s4318_s13 = smov 0  }
   0x4   :  { %s4320_s14 = smov 0   ;;  %s4322_s15 = smov 0  }
   0x5   :  { %s4324_s16 = smov 0   ;;  %s4326_s17 = smov 0  }
   0x6 LB: > { %s3341_s18 = sadd.s32 4294967295, %s4288_s17   ;;  %s28_s19 = sadd.s32 1, %s4284_s16  ;;  %s4288_s17 = sphi %s4326_s17, %s19_s17   ;;  %s4284_s16 = sphi %s4324_s16, %s6321_s16   ;;  %s4280_s15 = sphi %s4322_s15, %s6320_s15   ;;  %s4276_s14 = sphi %s4320_s14, %s6319_s14   ;;  %s4272_s13 = sphi %s4318_s13, %s6318_s13   ;;  %s4268_s12 = sphi %s4316_s12, %s6317_s12  }
   0x7   : > { %p29_p0 = scmp.ge.s32.totalorder %s28_s19, 2  ;;  %s64_s20 = sadd.s32 1, %s4276_s14 }
   0x8   : > { %p71_p1 = scmp.ne.s32.totalorder %s4276_s14, %s4272_s13  ;;  %p72_p2 = scmp.eq.s32.totalorder %s4288_s17, 0 }
   0x9   : > { %s6323_s19 = smov (%p29_p0, %s28_s19), 0  ;;  %p77_p4 = scmp.ne.s32.totalorder %s4272_s13, %s4268_s12 }
   0xa   : > { %p4352_p3 = por %p72_p2, %p71_p1  ;;  %s61_s22 = ssub.s32 %s4284_s16, %s6323_s19 }
   0xb   : > { %p78_p5 = scmp.eq.s32.totalorder %s3341_s18, 0  ;;  %p62_p6 = scmp.eq.s32.totalorder %s61_s22, 0 }
   0xc   : > { %p129_p7 = scmp.eq.s32.totalorder %s3341_s18, 1  ;;  %p3757_p10 = scmp.lt.s32.totalorder %s4288_s17, 2 }
   0xd   : > { %p4359_p8 = por %p78_p5, %p77_p4  ;;  %s4372_s26 = sand.u32 1, %s4276_s14  }
   0xe   : > { %s4364_s24 = scalar_select %p62_p6, %s4276_s14, %s64_s20  }
   0xf   : > { %p4366_p9 = por %p129_p7, %p71_p1  ;;  %s3727_s27 = sshll.u32 %s4284_s16, 7 }
  0x10   : > { %s3743_s28 = smul.u32 576, %s4372_s26  ;;  %s175_s4 = scalar_lea.hbm %s6191_s1, %s3727_s27 }
  0x11   : > { %p4381_p11 = pnand %p3757_p10, %p4352_p3  ;;  %p3351_p12 = scmp.ge.s32.totalorder %s4288_s17, 1 }
  0x12   : > { %s169_s6 = scalar_lea.vmem [#allocation2], %s3743_s28  ;;  %s166_s8 = scalar_lea.sflag [#allocation3], %s4372_s26 }
  0x13   : > { %s176_s7 = sshll.u32 %s169_s6, 4  ;;  %p4180_p13 = pneg %p4381_p11  ;;  %s177_s7 = int_to_ptr.vmem [resolvable:$true] %s176_s7 }
  0x14   : > { %s4191_s9 = scalar_lea.vmem %s177_s7, 9216  ;;  %s4290_s10 = smov [#allocation2]  }
  0x15   : > { %p4192_p0 = scmp.ne.s32.totalorder %s177_s7, %s4191_s9  ;;  %s4196_s11 = sshll.u32 %s4290_s10, 4  ;;  %s4197_s11 = int_to_ptr.vmem [resolvable:$false] %s4196_s11 }
  0x16   : > { %s4198_s12 = scalar_lea.vmem %s4197_s11, 18432  ;;  %p4199_p3 = scmp.lt.s32.totalorder %s177_s7, %s4197_s11 }
  0x17   : > { %p4194_p1 = pnand %p4192_p0, %p4180_p13  ;;  %p4200_p4 = scmp.lt.s32.totalorder %s4198_s12, %s4191_s9 }
  0x19   : > { %p4195_p2 = pneg %p4194_p1  ;;  %p4201_p5 = por %p4200_p4, %p4199_p3 }
  0x1b   : > { %p4202_p6 = pnand %p4201_p5, %p4195_p2 }
  0x1d   : > { %4205 = shalt.err (!%p4202_p6)
}
  0x1e   : > { %s4291_s18 = smov 256   ;;  %s4292_s20 = smov 128  }
  0x1f   : > { %s4293_s21 = smov 8   ;;  %p203_p7 = scmp.lt.s32.totalorder %s4288_s17, 3 }
  0x20   : > { %3753 = dma.hbm_to_vmem [thread:$0]  (!%p4381_p11), %s175_s4, 9216, %s177_s7, %s166_s8, %s4291_s18, %s4292_s20, %s4293_s21  }
  0x21   : > { %s3348_s22 = sshll.u32 %s4372_s26, 1  ;;  %s3728_s27 = sshll.u32 %s4284_s16, 5 }
  0x22   : > { %p4399_p10 = pnand %p3351_p12, %p203_p7  ;;  %s196_s6 = scalar_lea.hbm %s6192_s2, %s3728_s27 }
  0x23   : > { %s190_s9 = scalar_lea.vmem [#allocation4], %s3348_s22  ;;  %s187_s11 = scalar_lea.sflag [#allocation5], %s4372_s26 }
  0x24   : > { %s198_s10 = sshll.u32 %s190_s9, 4  ;;  %s4294_s4 = smov [#allocation4]   ;;  %s199_s10 = int_to_ptr.vmem [resolvable:$true] %s198_s10 }
  0x25   : > { %s4219_s12 = scalar_lea.vmem %s199_s10, 32  ;;  %s4224_s7 = sshll.u32 %s4294_s4, 4  ;;  %s4225_s7 = int_to_ptr.vmem [resolvable:$false] %s4224_s7 }
  0x26   : > { %p4220_p0 = scmp.ne.s32.totalorder %s199_s10, %s4219_s12  ;;  %s4226_s8 = scalar_lea.vmem %s4225_s7, 64 }
  0x27   : > { %p4227_p12 = scmp.lt.s32.totalorder %s199_s10, %s4225_s7  ;;  %p4228_p3 = scmp.lt.s32.totalorder %s4226_s8, %s4219_s12 }
  0x28   : > { %p4222_p1 = pnand %p4220_p0, %p4180_p13 }
  0x29   : > { %p4229_p4 = por %p4228_p3, %p4227_p12 }
  0x2a   : > { %p4223_p2 = pneg %p4222_p1 }
  0x2c   : > { %p4230_p5 = pnand %p4229_p4, %p4223_p2 }
  0x2e   : > { %4233 = shalt.err (!%p4230_p5)
}
  0x2f   : > { %3756 = dma.hbm_to_vmem [thread:$0]  (!%p4381_p11), %s196_s6, 32, %s199_s10, %s187_s11  }
  0x30   : > { %207 = sbr.rel (%p4399_p10) target bundleno = 694 (0x2b6), region = 32 }
  0x35   : > { %s4415_s26 = sand.u32 1, %s4272_s13  }
  0x36   : > { %s3744_s18 = smul.u32 576, %s4415_s26  ;;  %s210_s20 = scalar_lea.sflag [#allocation3], %s4415_s26 }
  0x38   : > { %s4419_s21 = scalar_lea.vmem [#allocation2], %s3744_s18 }
  0x39   : > { %4259 = dma.done.wait (%p4359_p8), %s210_s20, 9216  }
  0x3a   : > { %4261 = vsyncadd (%p4359_p8), %s210_s20, 4294958080  ;;  %s3352_s5 = sshll.u32 %s4415_s26, 1  ;;  %s219_s22 = scalar_lea.sflag [#allocation5], %s4415_s26 }
  0x3b   : > { %s4427_s27 = scalar_lea.vmem [#allocation4], %s3352_s5 }
  0x3c   : > { %4263 = dma.done.wait (%p4359_p8), %s219_s22, 32  }
  0x3d   : > { %4265 = vsyncadd (%p4359_p8), %s219_s22, 4294967264  ;;  %v4434_v0 = vld [vmem:[%s4419_s21 + $0x74] ss:$8 sps:$4 sm:$0xff]   ;;  %v4441_v2 = vld [vmem:[%s4419_s21 + $0x70] ss:$8 sps:$4 sm:$0xff]   ;;  %vm917_vm0 = vcmask 523264  }
  0x3e   : > { %v4437_v1 = vld [vmem:[%s4419_s21 + $0x174] ss:$8 sps:$4 sm:$0xff]   ;;  %939 = vmatprep.subr.bf16.mxu0 %v4434_v0  ;;  %v4444_v3 = vld [vmem:[%s4419_s21 + $0x170] ss:$8 sps:$4 sm:$0xff]   ;;  %v4448_v4 = vld [vmem:[%s4419_s21 + $0x64] ss:$8 sps:$4 sm:$0xff]  }
  0x3f   : > { %1040 = vmatprep.subr.bf16.mxu1 %v4437_v1  ;;  %940 = vmatpush1.bf16.msra.mxu0 %v4441_v2  ;;  %v4453_v5 = vld [vmem:[%s4419_s21 + $0x164] ss:$8 sps:$4 sm:$0xff]   ;;  %v4456_v6 = vld [vmem:[%s4419_s21 + $0x60] ss:$8 sps:$4 sm:$0xff]   ;;  %v4464_v8 = vld [vmem:[%s4419_s21 + $0x54] ss:$8 sps:$4 sm:$0xff]  }
  0x40   : > { %1041 = vmatpush1.bf16.msra.mxu1 %v4444_v3  ;;  %941 = vmatprep.subr.bf16.mxu0 %v4448_v4  ;;  %v4460_v7 = vld [vmem:[%s4419_s21 + $0x160] ss:$8 sps:$4 sm:$0xff]   ;;  %v4467_v9 = vld [vmem:[%s4419_s21 + $0x154] ss:$8 sps:$4 sm:$0xff]   ;;  %v4470_v10 = vld [vmem:[%s4419_s21 + $0x50] ss:$8 sps:$4 sm:$0xff]  }
  0x41   : > { %1042 = vmatprep.subr.bf16.mxu1 %v4453_v5  ;;  %v4473_v11 = vld [vmem:[%s4419_s21 + $0x150] ss:$8 sps:$4 sm:$0xff]   ;;  %v4478_v12 = vld [vmem:[%s4419_s21 + $0x44] ss:$8 sps:$4 sm:$0xff]   ;;  %v4486_v14 = vld [vmem:[%s4419_s21 + $0x40] ss:$8 sps:$4 sm:$0xff]  }
  0x42   : > { %v4483_v13 = vld [vmem:[%s4419_s21 + $0x144] ss:$8 sps:$4 sm:$0xff]   ;;  %v4491_v15 = vld [vmem:[%s4419_s21 + $0x140] ss:$8 sps:$4 sm:$0xff]   ;;  %v4494_v16 = vld [vmem:[%s4419_s21 + $0x34] ss:$8 sps:$4 sm:$0xff]  }
  0x43   : > { %942 = vmatpush1.bf16.msra.mxu0 %v4456_v6  ;;  %v4499_v17 = vld [vmem:[%s4419_s21 + $0x134] ss:$8 sps:$4 sm:$0xff]   ;;  %v4502_v18 = vld [vmem:[%s4419_s21 + $0x30] ss:$8 sps:$4 sm:$0xff]   ;;  %v4510_v20 = vld [vmem:[%s4419_s21 + $0x24] ss:$8 sps:$4 sm:$0xff]  }
  0x44   : > { %1043 = vmatpush1.bf16.msra.mxu1 %v4460_v7  ;;  %943 = vmatprep.subr.bf16.mxu0 %v4464_v8  ;;  %v4505_v19 = vld [vmem:[%s4419_s21 + $0x130] ss:$8 sps:$4 sm:$0xff]   ;;  %v4515_v21 = vld [vmem:[%s4419_s21 + $0x124] ss:$8 sps:$4 sm:$0xff]   ;;  %v4518_v22 = vld [vmem:[%s4419_s21 + $0x20] ss:$8 sps:$4 sm:$0xff]  }
  0x45   : > { %1044 = vmatprep.subr.bf16.mxu1 %v4467_v9  ;;  %v4523_v23 = vld [vmem:[%s4419_s21 + $0x120] ss:$8 sps:$4 sm:$0xff]   ;;  %v4526_v24 = vld [vmem:[%s4419_s21 + $0x14] ss:$8 sps:$4 sm:$0xff]   ;;  %v4534_v26 = vld [vmem:[%s4419_s21 + $0x10] ss:$8 sps:$4 sm:$0xff]  }
  0x46   : > { %v4531_v25 = vld [vmem:[%s4419_s21 + $0x114] ss:$8 sps:$4 sm:$0xff]   ;;  %v4537_v27 = vld [vmem:[%s4419_s21 + $0x110] ss:$8 sps:$4 sm:$0xff]   ;;  %v4542_v28 = vld [vmem:[%s4419_s21 + $0x4] ss:$8 sps:$4 sm:$0xff]  }
  0x47   : > { %944 = vmatpush1.bf16.msra.mxu0 %v4470_v10  ;;  %v4547_v29 = vld [vmem:[%s4419_s21 + $0x104] ss:$8 sps:$4 sm:$0xff]   ;;  %v4550_v30 = vld [vmem:[%s4419_s21] ss:$8 sps:$4 sm:$0xff]   ;;  %v4558_v32 = vld [vmem:[%s4419_s21 + $0xf4] ss:$8 sps:$4 sm:$0xff]  }
  0x48   : > { %1045 = vmatpush1.bf16.msra.mxu1 %v4473_v11  ;;  %945 = vmatprep.subr.bf16.mxu0 %v4478_v12  ;;  %v4555_v31 = vld [vmem:[%s4419_s21 + $0x100] ss:$8 sps:$4 sm:$0xff]   ;;  %v4563_v33 = vld [vmem:[%s4419_s21 + $0x1f4] ss:$8 sps:$4 sm:$0xff]   ;;  %v4566_v34 = vld [vmem:[%s4419_s21 + $0xf0] ss:$8 sps:$4 sm:$0xff]  }
  0x49   : > { %1046 = vmatprep.subr.bf16.mxu1 %v4483_v13  ;;  %v4569_v35 = vld [vmem:[%s4419_s21 + $0x1f0] ss:$8 sps:$4 sm:$0xff]   ;;  %v4574_v36 = vld [vmem:[%s4419_s21 + $0xe4] ss:$8 sps:$4 sm:$0xff]   ;;  %v4582_v38 = vld [vmem:[%s4419_s21 + $0xe0] ss:$8 sps:$4 sm:$0xff]  }
  0x4a   : > { %v4579_v37 = vld [vmem:[%s4419_s21 + $0x1e4] ss:$8 sps:$4 sm:$0xff]   ;;  %v4587_v39 = vld [vmem:[%s4419_s21 + $0x1e0] ss:$8 sps:$4 sm:$0xff]   ;;  %v4590_v40 = vld [vmem:[%s4419_s21 + $0xd4] ss:$8 sps:$4 sm:$0xff]  }
  0x4b   : > { %946 = vmatpush1.bf16.msra.mxu0 %v4486_v14  ;;  %v4595_v41 = vld [vmem:[%s4419_s21 + $0x1d4] ss:$8 sps:$4 sm:$0xff]   ;;  %v4598_v42 = vld [vmem:[%s4419_s21 + $0xd0] ss:$8 sps:$4 sm:$0xff]   ;;  %v4606_v44 = vld [vmem:[%s4419_s21 + $0xc4] ss:$8 sps:$4 sm:$0xff]  }
  0x4c   : > { %1047 = vmatpush1.bf16.msra.mxu1 %v4491_v15  ;;  %947 = vmatprep.subr.bf16.mxu0 %v4494_v16  ;;  %v4601_v43 = vld [vmem:[%s4419_s21 + $0x1d0] ss:$8 sps:$4 sm:$0xff]   ;;  %v4611_v45 = vld [vmem:[%s4419_s21 + $0x1c4] ss:$8 sps:$4 sm:$0xff]   ;;  %v4614_v46 = vld [vmem:[%s4419_s21 + $0xc0] ss:$8 sps:$4 sm:$0xff]  }
  0x4d   : > { %1048 = vmatprep.subr.bf16.mxu1 %v4499_v17  ;;  %v4617_v47 = vld [vmem:[%s4419_s21 + $0x1c0] ss:$8 sps:$4 sm:$0xff]   ;;  %v4620_v48 = vld [vmem:[%s4419_s21 + $0xb4] ss:$8 sps:$4 sm:$0xff]   ;;  %v3908_v49 = vld [vmem:[%s6190_s0 + $0x4] ss:$20 sps:$4 sm:$0xff]  }
  0x4e   : > { %6230 = vst [vmem:[#allocation9_spill] sm:$0xff] %v4617_v47  ;;  %v4628_v50 = vld [vmem:[%s4419_s21 + $0x1b4] ss:$8 sps:$4 sm:$0xff]   ;;  %v3911_v51 = vld [vmem:[%s6190_s0 + $0xc] ss:$20 sps:$4 sm:$0xff]   ;;  %971 = vmatprep.mubr.bf16.mxu0 %v3908_v49  ;;  %s3745_s22 = smul.u32 104, %s4415_s26 }
  0x4f   : > { %948 = vmatpush1.bf16.msra.mxu0 %v4502_v18  ;;  %6231 = vst [vmem:[#allocation10_spill] sm:$0xff] %v4628_v50  ;;  %v4636_v52 = vld [vmem:[%s4419_s21 + $0xb0] ss:$8 sps:$4 sm:$0xff]   ;;  %1072 = vmatprep.mubr.bf16.mxu1 %v3911_v51  ;;  %v4644_v54 = vld [vmem:[%s4419_s21 + $0xa4] ss:$8 sps:$4 sm:$0xff]   ;;  %s3742_s23 = sshll.u32 (%p4366_p9), %s4280_s15, 3 }
  0x50   : > { %1049 = vmatpush1.bf16.msra.mxu1 %v4505_v19  ;;  %949 = vmatprep.subr.bf16.mxu0 %v4510_v20  ;;  %v4639_v53 = vld [vmem:[%s4419_s21 + $0x1b0] ss:$8 sps:$4 sm:$0xff]   ;;  %v4649_v55 = vld [vmem:[%s4419_s21 + $0x1a4] ss:$8 sps:$4 sm:$0xff]   ;;  %v4652_v56 = vld [vmem:[%s4419_s21 + $0xa0] ss:$8 sps:$4 sm:$0xff]  }
  0x51   : > { %1050 = vmatprep.subr.bf16.mxu1 %v4515_v21  ;;  %6232 = vst [vmem:[#allocation11_spill] sm:$0xff] %v4639_v53  ;;  %6233 = vst [vmem:[#allocation12_spill] sm:$0xff] %v4649_v55  ;;  %v4655_v57 = vld [vmem:[%s4419_s21 + $0x1a0] ss:$8 sps:$4 sm:$0xff]   ;;  %v4660_v58 = vld [vmem:[%s4419_s21 + $0x94] ss:$8 sps:$4 sm:$0xff]  }
  0x52   : > { %6234 = vst [vmem:[#allocation13_spill] sm:$0xff] %v4655_v57  ;;  %v4665_v59 = vld [vmem:[%s4419_s21 + $0x194] ss:$8 sps:$4 sm:$0xff]   ;;  %v4668_v60 = vld [vmem:[%s4419_s21 + $0x90] ss:$8 sps:$4 sm:$0xff]   ;;  %s6082_s26 = scalar_lea.vmem [#allocation6], %s3745_s22 }
  0x53   : > { %950 = vmatpush1.bf16.msra.mxu0 %v4518_v22  ;;  %6235 = vst [vmem:[#allocation14_spill] sm:$0xff] %v4665_v59  ;;  %v4671_v61 = vld [vmem:[%s4419_s21 + $0x190] ss:$8 sps:$4 sm:$0xff]   ;;  %v4676_v62 = vld [vmem:[%s4419_s21 + $0x84] ss:$8 sps:$4 sm:$0xff]  }
  0x54   : > { %1051 = vmatpush1.bf16.msra.mxu1 %v4523_v23  ;;  %951 = vmatprep.subr.bf16.mxu0 %v4526_v24  ;;  %6236 = vst [vmem:[#allocation15_spill] sm:$0xff] %v4671_v61  ;;  %v4681_v63 = vld [vmem:[%s4419_s21 + $0x184] ss:$8 sps:$4 sm:$0xff]   ;;  %v4684_v49 = vld [vmem:[%s4419_s21 + $0x80] ss:$8 sps:$4 sm:$0xff]  }
  0x55   : > { %1052 = vmatprep.subr.bf16.mxu1 %v4531_v25  ;;  %6237 = vst [vmem:[#allocation16_spill] sm:$0xff] %v4681_v63  ;;  %v4689_v51 = vld [vmem:[%s4419_s21 + $0x180] ss:$8 sps:$4 sm:$0xff]  }
  0x56   : > { %6238 = vst [vmem:[#allocation17_spill] sm:$0xff] %v4689_v51 }
  0x57   : > { %952 = vmatpush1.bf16.msra.mxu0 %v4534_v26 }
  0x58   : > { %1053 = vmatpush1.bf16.msra.mxu1 %v4537_v27  ;;  %953 = vmatprep.subr.bf16.mxu0 %v4542_v28 }
  0x59   : > { %1054 = vmatprep.subr.bf16.mxu1 %v4547_v29 }
  0x5b   : > { %954 = vmatpush1.bf16.msra.mxu0 %v4550_v30 }
  0x5c   : > { %1055 = vmatpush1.bf16.msra.mxu1 %v4555_v31  ;;  %955 = vmatprep.subr.bf16.mxu0 %v4558_v32 }
  0x5d   : > { %1056 = vmatprep.subr.bf16.mxu1 %v4563_v33 }
  0x5f   : > { %956 = vmatpush2.bf16.msra.mxu0 %v4566_v34 }
  0x60   : > { %1057 = vmatpush2.bf16.msra.mxu1 %v4569_v35  ;;  %957 = vmatprep.subr.bf16.mxu0 %v4574_v36 }
  0x61   : > { %1058 = vmatprep.subr.bf16.mxu1 %v4579_v37 }
  0x63   : > { %958 = vmatpush2.bf16.msra.mxu0 %v4582_v38 }
  0x64   : > { %1059 = vmatpush2.bf16.msra.mxu1 %v4587_v39  ;;  %959 = vmatprep.subr.bf16.mxu0 %v4590_v40 }
  0x65   : > { %1060 = vmatprep.subr.bf16.mxu1 %v4595_v41 }
  0x67   : > { %960 = vmatpush2.bf16.msra.mxu0 %v4598_v42 }
  0x68   : > { %1061 = vmatpush2.bf16.msra.mxu1 %v4601_v43  ;;  %961 = vmatprep.subr.bf16.mxu0 %v4606_v44 }
  0x69   : > { %1062 = vmatprep.subr.bf16.mxu1 %v4611_v45 }
  0x6b   : > { %962 = vmatpush2.bf16.msra.mxu0 %v4614_v46 }
  0x6c   : > { %1063 = vmatpush2.bf16.msra.mxu1 %v4617_v47  ;;  %963 = vmatprep.subr.bf16.mxu0 %v4620_v48  ;;  %v3917_v47 = vld [vmem:[%s6190_s0 + $0x28] ss:$20 sps:$4 sm:$0xff]  }
  0x6d   : > { %1064 = vmatprep.subr.bf16.mxu1 %v4628_v50  ;;  %v4716_v50 = vld [vmem:[%s4419_s21 + $0x224] ss:$8 sps:$4 sm:$0xff]  }
  0x6f   : > { %964 = vmatpush2.bf16.msra.mxu0 %v4636_v52 }
  0x70   : > { %1065 = vmatpush2.bf16.msra.mxu1 %v4639_v53  ;;  %965 = vmatprep.subr.bf16.mxu0 %v4644_v54  ;;  %v3918_v53 = vld [vmem:[%s6190_s0 + $0x34] ss:$20 sps:$4 sm:$0xff]  }
  0x71   : > { %1066 = vmatprep.subr.bf16.mxu1 %v4649_v55  ;;  %v3909_v55 = vld [vmem:[%s6190_s0 + $0x8] ss:$20 sps:$4 sm:$0xff]  }
  0x73   : > { %966 = vmatpush2.bf16.msra.mxu0 %v4652_v56 }
  0x74   : > { %1067 = vmatpush2.bf16.msra.mxu1 %v4655_v57  ;;  %967 = vmatprep.subr.bf16.mxu0 %v4660_v58  ;;  %v4694_v57 = vld [vmem:[%s4419_s21 + $0x234] ss:$8 sps:$4 sm:$0xff]  }
  0x75   : > { %1068 = vmatprep.subr.bf16.mxu1 %v4665_v59  ;;  %v3906_v59 = vld [vmem:[%s6190_s0] ss:$20 sps:$4 sm:$0xff]  }
  0x77   : > { %968 = vmatpush2.bf16.msra.mxu0 %v4668_v60 }
  0x78   : > { %1069 = vmatpush2.bf16.msra.mxu1 %v4671_v61  ;;  %969 = vmatprep.subr.bf16.mxu0 %v4676_v62  ;;  %v4705_v61 = vld [vmem:[%s4419_s21 + $0x230] ss:$8 sps:$4 sm:$0xff]  }
  0x79   : > { %1070 = vmatprep.subr.bf16.mxu1 %v4681_v63  ;;  %v3915_v63 = vld [vmem:[%s6190_s0 + $0x2c] ss:$20 sps:$4 sm:$0xff]  }
  0x7b   : > { %970 = vmatpush2.bf16.msra.mxu0 %v4684_v49 }
  0x7c   : > { %1071 = vmatpush2.bf16.msra.mxu1 %v4689_v51  ;;  %1149 = vmatprep.subr.bf16.mxu0 %v4694_v57  ;;  %v4721_v51 = vld [vmem:[%s4419_s21 + $0x220] ss:$8 sps:$4 sm:$0xff]  }
  0x7d   : > { %1496 = vmatprep.subr.bf16.mxu1 %v4434_v0  ;;  %v4725_v0 = vld [vmem:[%s4419_s21 + $0x214] ss:$8 sps:$4 sm:$0xff]  }
  0x7e   : > { %972 = vmatmul.mubr.bf16.vlgmr.msra.gmra.mxu0 %v3906_v59  ;;  %v4748_v59 = vld [vmem:[%s4419_s21 + $0x204] ss:$8 sps:$4 sm:$0xff]  }
  0x7f   : > { %1073 = vmatmul.mubr.bf16.vlgmr.msra.gmra.mxu1 %v3909_v55  ;;  %1150 = vmatpush1.bf16.msra.mxu0 %v4705_v61  ;;  %v3920_v55 = vld [vmem:[%s6190_s0 + $0x30] ss:$20 sps:$4 sm:$0xff]  }
  0x80   : > { %1497 = vmatpush1.bf16.msra.mxu1 %v4441_v2  ;;  %981 = vmatprep.mubr.bf16.mxu0 %v3915_v63  ;;  %v3923_v2 = vld [vmem:[%s6190_s0 + $0x54] ss:$20 sps:$4 sm:$0xff]   ;;  %v3945_v63 = vld [vmem:[%s6190_s0 + $0xcc] ss:$20 sps:$4 sm:$0xff]  }
  0x81   : > { %1498 = vmatprep.subr.bf16.mxu1 %v4448_v4  ;;  %1082 = vmatprep.mubr.bf16.mxu1 %v3918_v53  ;;  %v3927_v4 = vld [vmem:[%s6190_s0 + $0x5c] ss:$20 sps:$4 sm:$0xff]  }
  0x82   : > { %1151 = vmatprep.subr.bf16.mxu0 %v4716_v50  ;;  %v4745_v53 = vld [vmem:[%s4419_s21 + $0x210] ss:$8 sps:$4 sm:$0xff]  }
  0x83   : > { %1152 = vmatpush1.bf16.msra.mxu0 %v4721_v51 }
  0x84   : > { %1499 = vmatpush1.bf16.msra.mxu1 %v4456_v6  ;;  %1153 = vmatprep.subr.bf16.mxu0 %v4725_v0  ;;  %v4754_v6 = vld [vmem:[%s4419_s21 + $0x200] ss:$8 sps:$4 sm:$0xff]  }
  0x85   : > { %1500 = vmatprep.subr.bf16.mxu1 %v4464_v8  ;;  %v3926_v8 = vld [vmem:[%s6190_s0 + $0x50] ss:$20 sps:$4 sm:$0xff]  }
  0x86   : > { %982 = vmatmul.mubr.bf16.gmra.mxu0 %v3917_v47  ;;  %v3929_v47 = vld [vmem:[%s6190_s0 + $0x58] ss:$20 sps:$4 sm:$0xff]  }
  0x87   : > { %1083 = vmatmul.mubr.bf16.gmra.mxu1 %v3920_v55  ;;  %991 = vmatprep.mubr.bf16.mxu0 %v3923_v2  ;;  %v3947_v55 = vld [vmem:[%s6190_s0 + $0xc8] ss:$20 sps:$4 sm:$0xff]   ;;  %v3950_v2 = vld [vmem:[%s6190_s0 + $0xd0] ss:$20 sps:$4 sm:$0xff]  }
  0x88   : > { %1501 = vmatpush1.bf16.msra.mxu1 %v4470_v10  ;;  %1092 = vmatprep.mubr.bf16.mxu1 %v3927_v4  ;;  %v3930_v10 = vld [vmem:[%s6190_s0 + $0x7c] ss:$20 sps:$4 sm:$0xff]  }
  0x89   : > { %1502 = vmatprep.subr.bf16.mxu1 %v4478_v12  ;;  %1154 = vmatpush1.bf16.msra.mxu0 %v4745_v53  ;;  %v3933_v12 = vld [vmem:[%s6190_s0 + $0x84] ss:$20 sps:$4 sm:$0xff]  }
  0x8a   : > { %1155 = vmatprep.subr.bf16.mxu0 %v4748_v59 }
  0x8c   : > { %1503 = vmatpush1.bf16.msra.mxu1 %v4486_v14  ;;  %v3932_v14 = vld [vmem:[%s6190_s0 + $0x78] ss:$20 sps:$4 sm:$0xff]  }
  0x8d   : > { %1504 = vmatprep.subr.bf16.mxu1 %v4494_v16  ;;  %1156 = vmatpush1.bf16.msra.mxu0 %v4754_v6  ;;  %v3935_v16 = vld [vmem:[%s6190_s0 + $0x80] ss:$20 sps:$4 sm:$0xff]  }
  0x8e   : > { %992 = vmatmul.mubr.bf16.gmra.mxu0 %v3926_v8  ;;  %1597 = vmatprep.subr.bf16.mxu0 %v4437_v1 }
  0x8f   : > { %1093 = vmatmul.mubr.bf16.gmra.mxu1 %v3929_v47  ;;  %1001 = vmatprep.mubr.bf16.mxu0 %v3930_v10 }
  0x90   : > { %1505 = vmatpush1.bf16.msra.mxu1 %v4502_v18  ;;  %1102 = vmatprep.mubr.bf16.mxu1 %v3933_v12  ;;  %v3939_v18 = vld [vmem:[%s6190_s0 + $0xa4] ss:$20 sps:$4 sm:$0xff]   ;;  %v3961_v12 = vld [vmem:[%s6190_s0 + $0x108] ss:$20 sps:$4 sm:$0xff]  }
  0x91   : > { %1506 = vmatprep.subr.bf16.mxu1 %v4510_v20  ;;  %v3942_v20 = vld [vmem:[%s6190_s0 + $0xac] ss:$20 sps:$4 sm:$0xff]  }
  0x94   : > { %1507 = vmatpush1.bf16.msra.mxu1 %v4518_v22  ;;  %v3941_v22 = vld [vmem:[%s6190_s0 + $0xa0] ss:$20 sps:$4 sm:$0xff]  }
  0x95   : > { %1508 = vmatprep.subr.bf16.mxu1 %v4526_v24  ;;  %v3944_v24 = vld [vmem:[%s6190_s0 + $0xa8] ss:$20 sps:$4 sm:$0xff]  }
  0x96   : > { %1002 = vmatmul.mubr.bf16.gmra.mxu0 %v3932_v14  ;;  %v6212_v14 = vmov 0  }
  0x97   : > { %1103 = vmatmul.mubr.bf16.gmra.mxu1 %v3935_v16  ;;  %1011 = vmatprep.mubr.bf16.mxu0 %v3939_v18  ;;  %v3958_v16 = vld [vmem:[%s6190_s0 + $0x10] ss:$20 sps:$4 sm:$0xff]  }
  0x98   : > { %1509 = vmatpush1.bf16.msra.mxu1 %v4534_v26  ;;  %1112 = vmatprep.mubr.bf16.mxu1 %v3942_v20  ;;  %v3948_v26 = vld [vmem:[%s6190_s0 + $0xd4] ss:$20 sps:$4 sm:$0xff]   ;;  %v3959_v18 = vld [vmem:[%s6190_s0 + $0x104] ss:$20 sps:$4 sm:$0xff]  }
  0x99   : > { %1510 = vmatprep.subr.bf16.mxu1 %v4542_v28  ;;  %v376_v28 = vld [vmem:[%s6190_s0 + $0xf0] sm:$0x11]  ;;  %v3962_v20 = vld [vmem:[%s6190_s0 + $0x38] ss:$20 sps:$4 sm:$0xff]  }
  0x9a   : > { %v3384_v4 = vcombine.high %v376_v28, %v376_v28  ;;  %v3383_v47 = vcombine.low %v376_v28, %v376_v28  ;;  %v6240_v28 = vld [vmem:[#allocation10_spill] sm:$0xff] }
  0x9c   : > { %1511 = vmatpush1.bf16.msra.mxu1 %v4550_v30  ;;  %v377_v30 = vld [vmem:[%s6190_s0 + $0xf8] sm:$0x11] }
  0x9d   : > { %1512 = vmatprep.subr.bf16.mxu1 %v4558_v32  ;;  %v3386_v8 = vcombine.high %v377_v30, %v377_v30  ;;  %v3385_v10 = vcombine.low %v377_v30, %v377_v30  ;;  %v3987_v30 = vld [vmem:[%s6190_s0 + $0x110] ss:$20 sps:$4 sm:$0xff]  }
  0x9e   : > { %1012 = vmatmul.mubr.bf16.gmra.mxu0 %v3941_v22  ;;  %v3981_v22 = vld [vmem:[%s6190_s0 + $0x100] ss:$0 sps:$4 sm:$0x11]  }
  0x9f   : > { %1113 = vmatmul.mubr.bf16.gmra.mxu1 %v3944_v24  ;;  %1021 = vmatprep.mubr.bf16.mxu0 %v3945_v63  ;;  %v3982_v24 = vld [vmem:[%s6190_s0 + $0x1cc] ss:$20 sps:$4 sm:$0xff]   ;;  %v6239_v63 = vld [vmem:[#allocation9_spill] sm:$0xff] }
  0xa0   : > { %1513 = vmatpush2.bf16.msra.mxu1 %v4566_v34  ;;  %1122 = vmatprep.mubr.bf16.mxu1 %v3948_v26 }
  0xa1   : > { %1514 = vmatprep.subr.bf16.mxu1 %v4574_v36 }
  0xa4   : > { %1515 = vmatpush2.bf16.msra.mxu1 %v4582_v38 }
  0xa5   : > { %1516 = vmatprep.subr.bf16.mxu1 %v4590_v40 }
  0xa6   : > { %1022 = vmatmul.mubr.bf16.gmra.mxu0 %v3947_v55  ;;  %v6241_v55 = vld [vmem:[#allocation11_spill] sm:$0xff] }
  0xa7   : > { %1123 = vmatmul.mubr.bf16.gmra.mxu1 %v3950_v2  ;;  %1031 = vmatprep.mubr.bf16.mxu0 %v3384_v4  ;;  %v6242_v2 = vld [vmem:[#allocation12_spill] sm:$0xff] }
  0xa8   : > { %1517 = vmatpush2.bf16.msra.mxu1 %v4598_v42  ;;  %1132 = vmatprep.mubr.bf16.mxu1 %v3386_v8  ;;  %v6243_v8 = vld [vmem:[#allocation13_spill] sm:$0xff] }
  0xa9   : > { %1518 = vmatprep.subr.bf16.mxu1 %v4606_v44 }
  0xac   : > { %1519 = vmatpush2.bf16.msra.mxu1 %v4614_v46 }
  0xad   : > { %1520 = vmatprep.subr.bf16.mxu1 %v4620_v48 }
  0xae   : > { %1032 = vmatmul.mubr.bf16.gmra.mxu0 %v3383_v47  ;;  %v6244_v47 = vld [vmem:[#allocation14_spill] sm:$0xff] }
  0xaf   : > { %1133 = vmatmul.mubr.bf16.gmra.mxu1 %v3385_v10  ;;  %1173 = vmatprep.mubr.bf16.mxu0 %v6212_v14  ;;  %v6245_v10 = vld [vmem:[#allocation15_spill] sm:$0xff] }
  0xb0   : > { %1521 = vmatpush2.bf16.msra.mxu1 %v4636_v52  ;;  %1528 = vmatprep.mubr.bf16.mxu1 %v3961_v12  ;;  %v6246_v12 = vld [vmem:[#allocation16_spill] sm:$0xff] }
  0xb1   : > { %1522 = vmatprep.subr.bf16.mxu1 %v4644_v54 }
  0xb4   : > { %1523 = vmatpush2.bf16.msra.mxu1 %v4652_v56 }
  0xb5   : > { %1524 = vmatprep.subr.bf16.mxu1 %v4660_v58 }
  0xb6   : > { %3460 = vmatmul.mubr.msk.bf16.vlgmr.msra.gmra.mxu0 %vm917_vm0, %v3958_v16  ;;  %v3985_v16 = vld [vmem:[%s6190_s0 + $0x10c] ss:$20 sps:$4 sm:$0xff]  }
  0xb7   : > { %1598 = vmatpush1.bf16.msra.mxu0 %v4444_v3  ;;  %1183 = vmatprep.mubr.bf16.mxu0 %v6212_v14  ;;  %v3963_v3 = vld [vmem:[%s6190_s0 + $0x130] ss:$20 sps:$4 sm:$0xff]  }
  0xb8   : > { %1525 = vmatpush2.bf16.msra.mxu1 %v4668_v60  ;;  %1599 = vmatprep.subr.bf16.mxu0 %v4453_v5  ;;  %v3965_v5 = vld [vmem:[%s6190_s0 + $0x60] ss:$20 sps:$4 sm:$0xff]  }
  0xb9   : > { %1526 = vmatprep.subr.bf16.mxu1 %v4676_v62 }
  0xbb   : > { %1600 = vmatpush1.bf16.msra.mxu0 %v4460_v7  ;;  %v3966_v7 = vld [vmem:[%s6190_s0 + $0x12c] ss:$20 sps:$4 sm:$0xff]  }
  0xbc   : > { %1527 = vmatpush2.bf16.msra.mxu1 %v4684_v49  ;;  %1601 = vmatprep.subr.bf16.mxu0 %v4467_v9  ;;  %v3967_v9 = vld [vmem:[%s6190_s0 + $0x158] ss:$20 sps:$4 sm:$0xff]  }
  0xbd   : > { %1706 = vmatprep.subr.bf16.mxu1 %v4694_v57 }
  0xbe   : > { %3461 = vmatmul.mubr.msk.bf16.gmra.mxu0 %vm917_vm0, %v3962_v20  ;;  %v6247_v20 = vld [vmem:[#allocation17_spill] sm:$0xff] }
  0xbf   : > { %1529 = vmatmul.mubr.bf16.vlgmr.msra.gmra.mxu1 %v3959_v18  ;;  %1602 = vmatpush1.bf16.msra.mxu0 %v4473_v11  ;;  %v3969_v11 = vld [vmem:[%s6190_s0 + $0x88] ss:$20 sps:$4 sm:$0xff]  }
  0xc0   : > { %1707 = vmatpush1.bf16.msra.mxu1 %v4705_v61  ;;  %1603 = vmatprep.subr.bf16.mxu0 %v4483_v13  ;;  %v3970_v13 = vld [vmem:[%s6190_s0 + $0x154] ss:$20 sps:$4 sm:$0xff]  }
  0xc1   : > { %1193 = vmatprep.mubr.bf16.mxu0 %v6212_v14  ;;  %1538 = vmatprep.mubr.bf16.mxu1 %v3963_v3  ;;  %v3988_v18 = vld [vmem:[%s6190_s0 + $0x114] ss:$20 sps:$4 sm:$0xff]  }
  0xc2   : > { %1708 = vmatprep.subr.bf16.mxu1 %v4716_v50  ;;  %v4957_v3 = vld [vmem:[%s4419_s21 + $0x74] ss:$8 sps:$4 sm:$0xff]  }
  0xc3   : > { %1604 = vmatpush1.bf16.msra.mxu0 %v4491_v15  ;;  %v3971_v15 = vld [vmem:[%s6190_s0 + $0x180] ss:$20 sps:$4 sm:$0xff]  }
  0xc4   : > { %1709 = vmatpush1.bf16.msra.mxu1 %v4721_v51  ;;  %1605 = vmatprep.subr.bf16.mxu0 %v4499_v17  ;;  %v3973_v17 = vld [vmem:[%s6190_s0 + $0xb0] ss:$20 sps:$4 sm:$0xff]  }
  0xc5   : > { %1710 = vmatprep.subr.bf16.mxu1 %v4725_v0 }
  0xc6   : > { %3462 = vmatmul.mubr.msk.bf16.gmra.mxu0 %vm917_vm0, %v3965_v5  ;;  %v3989_v5 = vld [vmem:[%s6190_s0 + $0x138] ss:$20 sps:$4 sm:$0xff]  }
  0xc7   : > { %1539 = vmatmul.mubr.bf16.gmra.mxu1 %v3966_v7  ;;  %1606 = vmatpush1.bf16.msra.mxu0 %v4505_v19  ;;  %v3974_v19 = vld [vmem:[%s6190_s0 + $0x17c] ss:$20 sps:$4 sm:$0xff]  }
  0xc8   : > { %1203 = vmatprep.mubr.bf16.mxu0 %v6212_v14  ;;  %1607 = vmatprep.subr.bf16.mxu0 %v4515_v21  ;;  %v3975_v21 = vld [vmem:[%s6190_s0 + $0x1a8] ss:$20 sps:$4 sm:$0xff]   ;;  %v4965_v7 = vld [vmem:[%s4419_s21 + $0x70] ss:$8 sps:$4 sm:$0xff]  }
  0xc9   : > { %1548 = vmatprep.mubr.bf16.mxu1 %v3967_v9  ;;  %1711 = vmatpush1.bf16.msra.mxu1 %v4745_v53  ;;  %v4969_v9 = vld [vmem:[%s4419_s21 + $0x170] ss:$8 sps:$4 sm:$0xff]  }
  0xca   : > { %1712 = vmatprep.subr.bf16.mxu1 %v4748_v59 }
  0xcb   : > { %1608 = vmatpush1.bf16.msra.mxu0 %v4523_v23  ;;  %v3978_v23 = vld [vmem:[%s6190_s0 + $0x1a4] ss:$20 sps:$4 sm:$0xff]  }
  0xcc   : > { %1609 = vmatprep.subr.bf16.mxu0 %v4531_v25  ;;  %v3979_v25 = vld [vmem:[%s6190_s0 + $0x1d0] ss:$20 sps:$4 sm:$0xff]  }
  0xcd   : > { %1713 = vmatpush1.bf16.msra.mxu1 %v4754_v6 }
  0xce   : > { %3463 = vmatmul.mubr.msk.bf16.gmra.mxu0 %vm917_vm0, %v3969_v11  ;;  %2180 = vmatprep.subr.bf16.mxu1 %v4437_v1  ;;  %v3977_v1 = vld [vmem:[%s6190_s0 + $0xd8] ss:$20 sps:$4 sm:$0xff]  }
  0xcf   : > { %1549 = vmatmul.mubr.bf16.gmra.mxu1 %v3970_v13  ;;  %1610 = vmatpush1.bf16.msra.mxu0 %v4537_v27  ;;  %v3503_v27 = vld [vmem:[%s6190_s0 + $0x1f4] sm:$0x11]  ;;  %v4973_v11 = vld [vmem:[%s4419_s21 + $0x64] ss:$8 sps:$4 sm:$0xff]  }
  0xd0   : > { %1213 = vmatprep.mubr.bf16.mxu0 %v6212_v14  ;;  %1611 = vmatprep.subr.bf16.mxu0 %v4547_v29  ;;  %v3537_v26 = vcombine.high %v3503_v27, %v3503_v27  ;;  %v3536_v4 = vcombine.low %v3503_v27, %v3503_v27  ;;  %v4977_v13 = vld [vmem:[%s4419_s21 + $0x164] ss:$8 sps:$4 sm:$0xff]   ;;  %v5008_v27 = vld [vmem:[%s4419_s21 + $0x50] ss:$8 sps:$4 sm:$0xff]  }
  0xd1   : > { %1558 = vmatprep.mubr.bf16.mxu1 %v3971_v15  ;;  %6248 = vst [vmem:[#allocation9_spill] sm:$0xff] %v4977_v13  ;;  %v3991_v15 = vld [vmem:[%s6190_s0 + $0x134] ss:$20 sps:$4 sm:$0xff]  }
  0xd3   : > { %1612 = vmatpush1.bf16.msra.mxu0 %v4555_v31 }
  0xd4   : > { %1613 = vmatprep.subr.bf16.mxu0 %v4563_v33 }
  0xd6   : > { %3464 = vmatmul.mubr.msk.bf16.gmra.mxu0 %vm917_vm0, %v3973_v17  ;;  %v3992_v17 = vld [vmem:[%s6190_s0 + $0x13c] ss:$20 sps:$4 sm:$0xff]  }
  0xd7   : > { %1559 = vmatmul.mubr.bf16.gmra.mxu1 %v3974_v19  ;;  %1614 = vmatpush2.bf16.msra.mxu0 %v4569_v35  ;;  %v4988_v19 = vld [vmem:[%s4419_s21 + $0x60] ss:$8 sps:$4 sm:$0xff]  }
  0xd8   : > { %1223 = vmatprep.mubr.bf16.mxu0 %v6212_v14  ;;  %1615 = vmatprep.subr.bf16.mxu0 %v4579_v37 }
  0xd9   : > { %1568 = vmatprep.mubr.bf16.mxu1 %v3975_v21  ;;  %v4992_v21 = vld [vmem:[%s4419_s21 + $0x160] ss:$8 sps:$4 sm:$0xff]  }
  0xda   : > { %6249 = vst [vmem:[#allocation10_spill] sm:$0xff] %v4992_v21 }
  0xdb   : > { %1616 = vmatpush2.bf16.msra.mxu0 %v4587_v39 }
  0xdc   : > { %1617 = vmatprep.subr.bf16.mxu0 %v4595_v41 }
  0xde   : > { %3465 = vmatmul.mubr.msk.bf16.gmra.mxu0 %vm917_vm0, %v3977_v1  ;;  %v4996_v1 = vld [vmem:[%s4419_s21 + $0x54] ss:$8 sps:$4 sm:$0xff]  }
  0xdf   : > { %1569 = vmatmul.mubr.bf16.gmra.mxu1 %v3978_v23  ;;  %1618 = vmatpush2.bf16.msra.mxu0 %v4601_v43  ;;  %v5000_v23 = vld [vmem:[%s4419_s21 + $0x154] ss:$8 sps:$4 sm:$0xff]  }
  0xe0   : > { %1233 = vmatprep.mubr.bf16.mxu0 %v6212_v14  ;;  %1619 = vmatprep.subr.bf16.mxu0 %v4611_v45  ;;  %6250 = vst [vmem:[#allocation11_spill] sm:$0xff] %v5000_v23 }
  0xe1   : > { %1578 = vmatprep.mubr.bf16.mxu1 %v3979_v25  ;;  %v3993_v25 = vld [vmem:[%s6190_s0 + $0x160] ss:$20 sps:$4 sm:$0xff]  }
  0xe3   : > { %1620 = vmatpush2.bf16.msra.mxu0 %v6239_v63 }
  0xe4   : > { %1621 = vmatprep.subr.bf16.mxu0 %v6240_v28 }
  0xe6   : > { %3466 = vmatmul.mubr.msk.bf16.gmra.mxu0 %vm917_vm0, %v3981_v22  ;;  %v5012_v22 = vld [vmem:[%s4419_s21 + $0x150] ss:$8 sps:$4 sm:$0xff]  }
  0xe7   : > { %1579 = vmatmul.mubr.bf16.gmra.mxu1 %v3982_v24  ;;  %1622 = vmatpush2.bf16.msra.mxu0 %v6241_v55  ;;  %6251 = vst [vmem:[#allocation12_spill] sm:$0xff] %v5012_v22  ;;  %v5016_v24 = vld [vmem:[%s4419_s21 + $0x44] ss:$8 sps:$4 sm:$0xff]  }
  0xe8   : > { %1588 = vmatprep.mubr.bf16.mxu1 %v3537_v26  ;;  %1623 = vmatprep.subr.bf16.mxu0 %v6242_v2  ;;  %v5020_v26 = vld [vmem:[%s4419_s21 + $0x144] ss:$8 sps:$4 sm:$0xff]  }
  0xe9   : > { %1629 = vmatprep.mubr.bf16.mxu0 %v3987_v30  ;;  %6252 = vst [vmem:[#allocation13_spill] sm:$0xff] %v5020_v26  ;;  %v3995_v30 = vld [vmem:[%s6190_s0 + $0x15c] ss:$20 sps:$4 sm:$0xff]  }
  0xeb   : > { %1624 = vmatpush2.bf16.msra.mxu0 %v6243_v8 }
  0xec   : > { %1625 = vmatprep.subr.bf16.mxu0 %v6244_v47 }
  0xef   : > { %1589 = vmatmul.mubr.bf16.gmra.mxu1 %v3536_v4  ;;  %1626 = vmatpush2.bf16.msra.mxu0 %v6245_v10  ;;  %v3996_v4 = vld [vmem:[%s6190_s0 + $0x164] ss:$20 sps:$4 sm:$0xff]  }
  0xf0   : > { %1730 = vmatprep.mubr.bf16.mxu1 %v6212_v14  ;;  %1627 = vmatprep.subr.bf16.mxu0 %v6246_v12 }
  0xf3   : > { %1628 = vmatpush2.bf16.msra.mxu0 %v6247_v20 }
  0xf4   : > { %2079 = vmatprep.subr.bf16.mxu0 %v4957_v3 }
  0xf6   : > { %1630 = vmatmul.mubr.bf16.vlgmr.msra.gmra.mxu0 %v3985_v16  ;;  %v5031_v16 = vld [vmem:[%s4419_s21 + $0x40] ss:$8 sps:$4 sm:$0xff]  }
  0xf7   : > { %3541 = vmatmul.mubr.msk.bf16.vlgmr.msra.gmra.mxu1 %vm917_vm0, %v3988_v18  ;;  %2080 = vmatpush1.bf16.msra.mxu0 %v4965_v7  ;;  %v5035_v18 = vld [vmem:[%s4419_s21 + $0x140] ss:$8 sps:$4 sm:$0xff]  }
  0xf8   : > { %2181 = vmatpush1.bf16.msra.mxu1 %v4969_v9  ;;  %2081 = vmatprep.subr.bf16.mxu0 %v4973_v11  ;;  %6253 = vst [vmem:[#allocation14_spill] sm:$0xff] %v5035_v18 }
  0xf9   : > { %2182 = vmatprep.subr.bf16.mxu1 %v4977_v13  ;;  %1639 = vmatprep.mubr.bf16.mxu0 %v3989_v5  ;;  %v5039_v5 = vld [vmem:[%s4419_s21 + $0x34] ss:$8 sps:$4 sm:$0xff]   ;;  %v5102_v13 = vld [vmem:[%s4419_s21 + $0x4] ss:$8 sps:$4 sm:$0xff]  }
  0xfa   : > { %1740 = vmatprep.mubr.bf16.mxu1 %v6212_v14 }
  0xfb   : > { %2082 = vmatpush1.bf16.msra.mxu0 %v4988_v19 }
  0xfc   : > { %2183 = vmatpush1.bf16.msra.mxu1 %v4992_v21  ;;  %2083 = vmatprep.subr.bf16.mxu0 %v4996_v1  ;;  %v5094_v21 = vld [vmem:[%s4419_s21 + $0x10] ss:$8 sps:$4 sm:$0xff]  }
  0xfd   : > { %2184 = vmatprep.subr.bf16.mxu1 %v5000_v23  ;;  %v4001_v23 = vld [vmem:[%s6190_s0 + $0x1b0] ss:$20 sps:$4 sm:$0xff]  }
  0xfe   : > { %1640 = vmatmul.mubr.bf16.gmra.mxu0 %v3991_v15  ;;  %v5043_v15 = vld [vmem:[%s4419_s21 + $0x134] ss:$8 sps:$4 sm:$0xff]  }
  0xff   : > { %3542 = vmatmul.mubr.msk.bf16.gmra.mxu1 %vm917_vm0, %v3992_v17  ;;  %2084 = vmatpush1.bf16.msra.mxu0 %v5008_v27  ;;  %6254 = vst [vmem:[#allocation15_spill] sm:$0xff] %v5043_v15  ;;  %v3997_v17 = vld [vmem:[%s6190_s0 + $0x188] ss:$20 sps:$4 sm:$0xff]  }
 0x100   : > { %2185 = vmatpush1.bf16.msra.mxu1 %v5012_v22  ;;  %2085 = vmatprep.subr.bf16.mxu0 %v5016_v24  ;;  %v5078_v22 = vld [vmem:[%s4419_s21 + $0x120] ss:$8 sps:$4 sm:$0xff]  }
 0x101   : > { %2186 = vmatprep.subr.bf16.mxu1 %v5020_v26  ;;  %1649 = vmatprep.mubr.bf16.mxu0 %v3993_v25  ;;  %v5051_v25 = vld [vmem:[%s4419_s21 + $0x30] ss:$8 sps:$4 sm:$0xff]   ;;  %v5074_v26 = vld [vmem:[%s4419_s21 + $0x20] ss:$8 sps:$4 sm:$0xff]   ;;  %6258 = vst [vmem:[#allocation18_spill] sm:$0xff] %v5078_v22 }
 0x102   : > { %1750 = vmatprep.mubr.bf16.mxu1 %v6212_v14  ;;  %v5055_v14 = vld [vmem:[%s4419_s21 + $0x130] ss:$8 sps:$4 sm:$0xff]  }
 0x103   : > { %2086 = vmatpush1.bf16.msra.mxu0 %v5031_v16  ;;  %6255 = vst [vmem:[#allocation16_spill] sm:$0xff] %v5055_v14 }
 0x104   : > { %2187 = vmatpush1.bf16.msra.mxu1 %v5035_v18  ;;  %2087 = vmatprep.subr.bf16.mxu0 %v5039_v5  ;;  %v5063_v18 = vld [vmem:[%s4419_s21 + $0x124] ss:$8 sps:$4 sm:$0xff]  }
 0x105   : > { %2188 = vmatprep.subr.bf16.mxu1 %v5043_v15  ;;  %v5059_v15 = vld [vmem:[%s4419_s21 + $0x24] ss:$8 sps:$4 sm:$0xff]   ;;  %6256 = vst [vmem:[#allocation17_spill] sm:$0xff] %v5063_v18 }
 0x106   : > { %1650 = vmatmul.mubr.bf16.gmra.mxu0 %v3995_v30  ;;  %v6257_v30 = vmov 0  }
 0x107   : > { %3543 = vmatmul.mubr.msk.bf16.gmra.mxu1 %vm917_vm0, %v3996_v4  ;;  %2088 = vmatpush1.bf16.msra.mxu0 %v5051_v25  ;;  %v3999_v4 = vld [vmem:[%s6190_s0 + $0x184] ss:$20 sps:$4 sm:$0xff]  }
 0x108   : > { %2189 = vmatpush1.bf16.msra.mxu1 %v5055_v14  ;;  %2089 = vmatprep.subr.bf16.mxu0 %v5059_v15  ;;  %v4000_v14 = vld [vmem:[%s6190_s0 + $0x18c] ss:$20 sps:$4 sm:$0xff]  }
 0x109   : > { %2190 = vmatprep.subr.bf16.mxu1 %v5063_v18  ;;  %1659 = vmatprep.mubr.bf16.mxu0 %v3997_v17  ;;  %v5082_v17 = vld [vmem:[%s4419_s21 + $0x14] ss:$8 sps:$4 sm:$0xff]  }
 0x10a   : > { %1760 = vmatprep.mubr.bf16.mxu1 %v6257_v30  ;;  %v5086_v18 = vld [vmem:[%s4419_s21 + $0x114] ss:$8 sps:$4 sm:$0xff]  }
 0x10b   : > { %2090 = vmatpush1.bf16.msra.mxu0 %v5074_v26  ;;  %6259 = vst [vmem:[#allocation19_spill] sm:$0xff] %v5086_v18 }
 0x10c   : > { %2191 = vmatpush1.bf16.msra.mxu1 %v5078_v22  ;;  %2091 = vmatprep.subr.bf16.mxu0 %v5082_v17  ;;  %v5098_v22 = vld [vmem:[%s4419_s21 + $0x110] ss:$8 sps:$4 sm:$0xff]  }
 0x10d   : > { %2192 = vmatprep.subr.bf16.mxu1 %v5086_v18  ;;  %v5114_v18 = vld [vmem:[%s4419_s21] ss:$8 sps:$4 sm:$0xff]  }
 0x10e   : > { %1660 = vmatmul.mubr.bf16.gmra.mxu0 %v3999_v4  ;;  %v4004_v4 = vld [vmem:[%s6190_s0 + $0x1b4] ss:$20 sps:$4 sm:$0xff]  }
 0x10f   : > { %3544 = vmatmul.mubr.msk.bf16.gmra.mxu1 %vm917_vm0, %v4000_v14  ;;  %2092 = vmatpush1.bf16.msra.mxu0 %v5094_v21  ;;  %v4003_v14 = vld [vmem:[%s6190_s0 + $0x1ac] ss:$20 sps:$4 sm:$0xff]  }
 0x110   : > { %2193 = vmatpush1.bf16.msra.mxu1 %v5098_v22  ;;  %2093 = vmatprep.subr.bf16.mxu0 %v5102_v13 }
 0x111   : > { %2194 = vmatprep.subr.bf16.mxu1 %v4547_v29  ;;  %1669 = vmatprep.mubr.bf16.mxu0 %v4001_v23  ;;  %v4005_v29 = vld [vmem:[%s6190_s0 + $0x1d8] ss:$20 sps:$4 sm:$0xff]  }
 0x112   : > { %1770 = vmatprep.mubr.bf16.mxu1 %v6257_v30 }
 0x113   : > { %2094 = vmatpush1.bf16.msra.mxu0 %v5114_v18 }
 0x114   : > { %2195 = vmatpush1.bf16.msra.mxu1 %v4555_v31  ;;  %2095 = vmatprep.subr.bf16.mxu0 %v4558_v32  ;;  %v4007_v31 = vld [vmem:[%s6190_s0 + $0x1d4] ss:$20 sps:$4 sm:$0xff]   ;;  %v4008_v32 = vld [vmem:[%s6190_s0 + $0x1dc] ss:$20 sps:$4 sm:$0xff]  }
 0x115   : > { %2196 = vmatprep.subr.bf16.mxu1 %v4563_v33  ;;  %v3504_v33 = vld [vmem:[%s6190_s0 + $0x1fc] sm:$0x11] }
 0x116   : > { %1670 = vmatmul.mubr.bf16.gmra.mxu0 %v4003_v14 }
 0x117   : > { %3545 = vmatmul.mubr.msk.bf16.gmra.mxu1 %vm917_vm0, %v4004_v4  ;;  %2096 = vmatpush2.bf16.msra.mxu0 %v4566_v34  ;;  %v3539_v34 = vcombine.high %v3504_v33, %v3504_v33 }
 0x118   : > { %2197 = vmatpush2.bf16.msra.mxu1 %v4569_v35  ;;  %2097 = vmatprep.subr.bf16.mxu0 %v4574_v36  ;;  %v3538_v35 = vcombine.low %v3504_v33, %v3504_v33  ;;  %v4011_v36 = vld [vmem:[%s6190_s0 + $0x204] ss:$0 sps:$4 sm:$0x11]  }
 0x119   : > { %2198 = vmatprep.subr.bf16.mxu1 %v4579_v37  ;;  %1679 = vmatprep.mubr.bf16.mxu0 %v4005_v29  ;;  %v4014_v37 = vld [vmem:[%s6190_s0 + $0x20c] ss:$20 sps:$4 sm:$0xff]  }
 0x11a   : > { %1780 = vmatprep.mubr.bf16.mxu1 %v6257_v30  ;;  %v4032_v29 = vld [vmem:[%s6190_s0 + $0x280] ss:$20 sps:$4 sm:$0xff]  }
 0x11b   : > { %2098 = vmatpush2.bf16.msra.mxu0 %v4582_v38  ;;  %v4017_v38 = vld [vmem:[%s6190_s0 + $0x214] ss:$20 sps:$4 sm:$0xff]  }
 0x11c   : > { %2199 = vmatpush2.bf16.msra.mxu1 %v4587_v39  ;;  %2099 = vmatprep.subr.bf16.mxu0 %v4590_v40  ;;  %v380_v39 = vlaneseq  ;;  %v4012_v40 = vld [vmem:[%s6190_s0 + $0x208] ss:$20 sps:$4 sm:$0xff]  }
 0x11d   : > { %2200 = vmatprep.subr.bf16.mxu1 %v4595_v41  ;;  %v4015_v41 = vld [vmem:[%s6190_s0 + $0x210] ss:$20 sps:$4 sm:$0xff]  }
 0x11e   : > { %1680 = vmatmul.mubr.bf16.gmra.mxu0 %v4007_v31 }
 0x11f   : > { %3546 = vmatmul.mubr.msk.bf16.gmra.mxu1 %vm917_vm0, %v4008_v32  ;;  %2100 = vmatpush2.bf16.msra.mxu0 %v4598_v42  ;;  %v381_v42 = vshrl.u32 %v380_v39, 7  ;;  %v4036_v32 = vld [vmem:[%s6190_s0 + $0x2ac] ss:$20 sps:$4 sm:$0xff]  }
 0x120   : > { %2201 = vmatpush2.bf16.msra.mxu1 %v4601_v43  ;;  %2101 = vmatprep.subr.bf16.mxu0 %v4606_v44  ;;  %v4018_v43 = vld [vmem:[%s6190_s0 + $0x234] ss:$20 sps:$4 sm:$0xff]   ;;  %v4021_v44 = vld [vmem:[%s6190_s0 + $0x23c] ss:$20 sps:$4 sm:$0xff]  }
 0x121   : > { %2202 = vmatprep.subr.bf16.mxu1 %v4611_v45  ;;  %1689 = vmatprep.mubr.bf16.mxu0 %v3539_v34  ;;  %v382_v45 = vsub.s32 0, %v381_v42 }
 0x122   : > { %1790 = vmatprep.mubr.bf16.mxu1 %v6257_v30 }
 0x123   : > { %2102 = vmatpush2.bf16.msra.mxu0 %v4614_v46  ;;  %v339_v46 = vld [vmem:[%s4427_s27] sm:$0x3] }
 0x124   : > { %2203 = vmatpush2.bf16.msra.mxu1 %v6239_v63  ;;  %2103 = vmatprep.subr.bf16.mxu0 %v4620_v48  ;;  %v386_v48 = vsub.s32 1, %v381_v42 }
 0x125   : > { %2204 = vmatprep.subr.bf16.mxu1 %v6240_v28 }
 0x126   : > { %1690 = vmatmul.mubr.bf16.gmra.mxu0 %v3538_v35  ;;  %v4039_v35 = vld [vmem:[%s6190_s0 + $0x2b4] ss:$20 sps:$4 sm:$0xff]  }
 0x127   : > { %3547 = vmatmul.mubr.msk.bf16.gmra.mxu1 %vm917_vm0, %v4011_v36  ;;  %2104 = vmatpush2.bf16.msra.mxu0 %v4636_v52  ;;  %v4020_v52 = vld [vmem:[%s6190_s0 + $0x230] ss:$20 sps:$4 sm:$0xff]  }
 0x128   : > { %2205 = vmatpush2.bf16.msra.mxu1 %v6241_v55  ;;  %2105 = vmatprep.subr.bf16.mxu0 %v4644_v54  ;;  %v4023_v54 = vld [vmem:[%s6190_s0 + $0x238] ss:$20 sps:$4 sm:$0xff]  }
 0x129   : > { %2206 = vmatprep.subr.bf16.mxu1 %v6242_v2  ;;  %2111 = vmatprep.mubr.bf16.mxu0 %v4014_v37  ;;  %v4026_v2 = vld [vmem:[%s6190_s0 + $0x258] ss:$20 sps:$4 sm:$0xff]  }
 0x12a   : > { %2212 = vmatprep.mubr.bf16.mxu1 %v4017_v38 }
 0x12b   : > { %2106 = vmatpush2.bf16.msra.mxu0 %v4652_v56  ;;  %v5202_v56 = vrot.slane %v339_v46, %v382_v45 }
 0x12c   : > { %2207 = vmatpush2.bf16.msra.mxu1 %v6243_v8  ;;  %2107 = vmatprep.subr.bf16.mxu0 %v4660_v58  ;;  %v5213_v58 = vrot.slane %v339_v46, %v386_v48  ;;  %v4029_v8 = vld [vmem:[%s6190_s0 + $0x260] ss:$20 sps:$4 sm:$0xff]   ;;  %v4038_v46 = vld [vmem:[%s6190_s0 + $0x2a8] ss:$20 sps:$4 sm:$0xff]  }
 0x12d   : > { %2208 = vmatprep.subr.bf16.mxu1 %v6244_v47 }
 0x12f   : > { %2108 = vmatpush2.bf16.msra.mxu0 %v4668_v60 }
 0x130   : > { %2209 = vmatpush2.bf16.msra.mxu1 %v6245_v10  ;;  %2109 = vmatprep.subr.bf16.mxu0 %v4676_v62 }
 0x131   : > { %2210 = vmatprep.subr.bf16.mxu1 %v6246_v12 }
 0x133   : > { %2110 = vmatpush2.bf16.msra.mxu0 %v4684_v49 }
 0x134   : > { %2211 = vmatpush2.bf16.msra.mxu1 %v6247_v20  ;;  %2289 = vmatprep.subr.bf16.mxu0 %v4694_v57  ;;  %v4024_v57 = vld [vmem:[%s6190_s0 + $0x25c] ss:$20 sps:$4 sm:$0xff]  }
 0x135   : > { %2662 = vmatprep.subr.bf16.mxu1 %v4957_v3  ;;  %v4033_v3 = vld [vmem:[%s6190_s0 + $0x28c] ss:$20 sps:$4 sm:$0xff]  }
 0x136   : > { %2112 = vmatmul.mubr.bf16.vlgmr.msra.gmra.mxu0 %v4012_v40 }
 0x137   : > { %2213 = vmatmul.mubr.bf16.vlgmr.msra.gmra.mxu1 %v4015_v41  ;;  %2290 = vmatpush1.bf16.msra.mxu0 %v4705_v61 }
 0x138   : > { %2663 = vmatpush1.bf16.msra.mxu1 %v4965_v7  ;;  %2121 = vmatprep.mubr.bf16.mxu0 %v4018_v43 }
 0x139   : > { %2664 = vmatprep.subr.bf16.mxu1 %v4973_v11  ;;  %2222 = vmatprep.mubr.bf16.mxu1 %v4021_v44 }
 0x13a   : > { %2291 = vmatprep.subr.bf16.mxu0 %v4716_v50  ;;  %v4027_v50 = vld [vmem:[%s6190_s0 + $0x264] ss:$20 sps:$4 sm:$0xff]  }
 0x13b   : > { %2292 = vmatpush1.bf16.msra.mxu0 %v4721_v51 }
 0x13c   : > { %2665 = vmatpush1.bf16.msra.mxu1 %v4988_v19  ;;  %2293 = vmatprep.subr.bf16.mxu0 %v4725_v0 }
 0x13d   : > { %2666 = vmatprep.subr.bf16.mxu1 %v4996_v1 }
 0x13e   : > { %2122 = vmatmul.mubr.bf16.gmra.mxu0 %v4020_v52  ;;  %v973_v60 = vpop.f32.mrf.mxu0 }
 0x13f   : > { %v1074_v61 = vpop.f32.mrf.mxu1  ;;  %2223 = vmatmul.mubr.bf16.gmra.mxu1 %v4023_v54  ;;  %v974_v62 = vadd.f32 %v973_v60, %v5202_v56  ;;  %2131 = vmatprep.mubr.bf16.mxu0 %v4024_v57  ;;  %v4136_v57 = vld [vmem:[%s4419_s21 + $0xf4] ss:$8 sps:$4 sm:$0xff]  }
 0x140   : > { %2667 = vmatpush1.bf16.msra.mxu1 %v5008_v27  ;;  %v975_v49 = vpop.f32.mrf.mxu0  ;;  %2232 = vmatprep.mubr.bf16.mxu1 %v4027_v50  ;;  %v4045_v60 = vld [vmem:[%s6190_s0 + $0x2dc] ss:$20 sps:$4 sm:$0xff]  }
 0x141   : > { %v1076_v51 = vpop.f32.mrf.mxu1  ;;  %2668 = vmatprep.subr.bf16.mxu1 %v5016_v24  ;;  %v5218_v63 = vadd.f32 %v1074_v61, %v974_v62  ;;  %v976_v0 = vadd.f32 %v975_v49, %v5213_v58  ;;  %2294 = vmatpush1.bf16.msra.mxu0 %v4745_v53  ;;  %v4030_v53 = vld [vmem:[%s6190_s0 + $0x284] ss:$20 sps:$4 sm:$0xff]  }
 0x142   : > { %v977_v28 = vpop.f32.mrf.mxu0  ;;  %2295 = vmatprep.subr.bf16.mxu0 %v4748_v59 }
 0x143   : > { %v1078_v55 = vpop.f32.mrf.mxu1  ;;  %v5229_v47 = vadd.f32 %v1076_v51, %v976_v0  ;;  %v978_v10 = vadd.f32 %v977_v28, %v5202_v56  ;;  %v4137_v28 = vld [vmem:[%s4419_s21 + $0xf0] ss:$8 sps:$4 sm:$0xff]  }
 0x144   : > { %2669 = vmatpush1.bf16.msra.mxu1 %v5031_v16  ;;  %v979_v12 = vpop.f32.mrf.mxu0 }
 0x145   : > { %v1080_v20 = vpop.f32.mrf.mxu1  ;;  %2670 = vmatprep.subr.bf16.mxu1 %v5039_v5  ;;  %v5240_v7 = vadd.f32 %v1078_v55, %v978_v10  ;;  %v980_v59 = vadd.f32 %v979_v12, %v5213_v58  ;;  %2296 = vmatpush1.bf16.msra.mxu0 %v4754_v6  ;;  %v4135_v6 = vld [vmem:[%s4419_s21 + $0x174] ss:$8 sps:$4 sm:$0xff]  }
 0x146   : > { %2132 = vmatmul.mubr.bf16.gmra.mxu0 %v4026_v2  ;;  %v983_v11 = vpop.f32.mrf.mxu0  ;;  %2763 = vmatprep.subr.bf16.mxu0 %v4135_v6  ;;  %v4138_v2 = vld [vmem:[%s4419_s21 + $0xe4] ss:$8 sps:$4 sm:$0xff]   ;;  %v3584_v10 = vld [vmem:[%s6190_s0 + $0x2f8] sm:$0x11] }
 0x147   : > { %2233 = vmatmul.mubr.bf16.gmra.mxu1 %v4029_v8  ;;  %v1084_v19 = vpop.f32.mrf.mxu1  ;;  %v5244_v1 = vadd.f32 %v1080_v20, %v980_v59  ;;  %v984_v23 = vadd.f32 %v983_v11, %v5202_v56  ;;  %2141 = vmatprep.mubr.bf16.mxu0 %v4030_v53  ;;  %v3585_v20 = vld [vmem:[%s6190_s0 + $0x300] sm:$0x11] }
 0x148   : > { %2671 = vmatpush1.bf16.msra.mxu1 %v5051_v25  ;;  %v985_v27 = vpop.f32.mrf.mxu0  ;;  %2242 = vmatprep.mubr.bf16.mxu1 %v4033_v3  ;;  %v4035_v25 = vld [vmem:[%s6190_s0 + $0x288] ss:$20 sps:$4 sm:$0xff]   ;;  %v4044_v11 = vld [vmem:[%s6190_s0 + $0x2d0] ss:$20 sps:$4 sm:$0xff]  }
 0x149   : > { %2672 = vmatprep.subr.bf16.mxu1 %v5059_v15  ;;  %v1086_v24 = vpop.f32.mrf.mxu1  ;;  %v986_v16 = vadd.f32 %v985_v27, %v5213_v58  ;;  %v5250_v5 = vadd.f32 %v1084_v19, %v984_v23  ;;  %v4047_v19 = vld [vmem:[%s6190_s0 + $0x2d8] ss:$20 sps:$4 sm:$0xff]  }
 0x14a   : > { %v987_v14 = vpop.f32.mrf.mxu0 }
 0x14b   : > { %v1088_v4 = vpop.f32.mrf.mxu1  ;;  %v988_v15 = vadd.f32 %v987_v14, %v5202_v56  ;;  %v5260_v31 = vadd.f32 %v1086_v24, %v986_v16  ;;  %v4139_v24 = vld [vmem:[%s4419_s21 + $0xe0] ss:$8 sps:$4 sm:$0xff]   ;;  %v3618_v16 = vcombine.high %v3584_v10, %v3584_v10  ;;  %v4140_v14 = vld [vmem:[%s4419_s21 + $0xd4] ss:$8 sps:$4 sm:$0xff]  }
 0x14c   : > { %2673 = vmatpush1.bf16.msra.mxu1 %v5074_v26  ;;  %v989_v33 = vpop.f32.mrf.mxu0 }
 0x14d   : > { %2674 = vmatprep.subr.bf16.mxu1 %v5082_v17  ;;  %v1090_v34 = vpop.f32.mrf.mxu1  ;;  %v990_v36 = vadd.f32 %v989_v33, %v5213_v58  ;;  %v5271_v37 = vadd.f32 %v1088_v4, %v988_v15 }
 0x14e   : > { %2142 = vmatmul.mubr.bf16.gmra.mxu0 %v4032_v29  ;;  %v993_v38 = vpop.f32.mrf.mxu0  ;;  %v3620_v29 = vcombine.high %v3585_v20, %v3585_v20 }
 0x14f   : > { %2243 = vmatmul.mubr.bf16.gmra.mxu1 %v4035_v25  ;;  %v1094_v26 = vpop.f32.mrf.mxu1  ;;  %v994_v39 = vadd.f32 %v993_v38, %v5202_v56  ;;  %v5274_v40 = vadd.f32 %v1090_v34, %v990_v36  ;;  %2151 = vmatprep.mubr.bf16.mxu0 %v4036_v32  ;;  %v4141_v36 = vld [vmem:[%s4419_s21 + $0xd0] ss:$8 sps:$4 sm:$0xff]  }
 0x150   : > { %2675 = vmatpush1.bf16.msra.mxu1 %v5094_v21  ;;  %v995_v17 = vpop.f32.mrf.mxu0  ;;  %2252 = vmatprep.mubr.bf16.mxu1 %v4039_v35  ;;  %v4041_v21 = vld [vmem:[%s6190_s0 + $0x2b0] ss:$20 sps:$4 sm:$0xff]  }
 0x151   : > { %2676 = vmatprep.subr.bf16.mxu1 %v5102_v13  ;;  %v1096_v41 = vpop.f32.mrf.mxu1  ;;  %v996_v42 = vadd.f32 %v995_v17, %v5213_v58  ;;  %v5279_v43 = vadd.f32 %v1094_v26, %v994_v39  ;;  %v4042_v13 = vld [vmem:[%s6190_s0 + $0x2d4] ss:$20 sps:$4 sm:$0xff]   ;;  %v4142_v26 = vld [vmem:[%s4419_s21 + $0xc4] ss:$8 sps:$4 sm:$0xff]  }
 0x152   : > { %v997_v44 = vpop.f32.mrf.mxu0 }
 0x153   : > { %v1098_v45 = vpop.f32.mrf.mxu1  ;;  %v998_v48 = vadd.f32 %v997_v44, %v5202_v56  ;;  %v5288_v52 = vadd.f32 %v1096_v41, %v996_v42 }
 0x154   : > { %2677 = vmatpush1.bf16.msra.mxu1 %v5114_v18  ;;  %v999_v54 = vpop.f32.mrf.mxu0 }
 0x155   : > { %2678 = vmatprep.subr.bf16.mxu1 %v4136_v57  ;;  %v1100_v50 = vpop.f32.mrf.mxu1  ;;  %v1000_v61 = vadd.f32 %v999_v54, %v5213_v58  ;;  %v5299_v62 = vadd.f32 %v1098_v45, %v998_v48  ;;  %v3617_v45 = vcombine.low %v3584_v10, %v3584_v10  ;;  %v4144_v57 = vld [vmem:[%s4419_s21 + $0xb4] ss:$8 sps:$4 sm:$0xff]   ;;  %v4146_v10 = vld [vmem:[%s4419_s21 + $0xa4] ss:$8 sps:$4 sm:$0xff]  }
 0x156   : > { %2152 = vmatmul.mubr.bf16.gmra.mxu0 %v4038_v46  ;;  %v1003_v49 = vpop.f32.mrf.mxu0  ;;  %v3619_v46 = vcombine.low %v3585_v20, %v3585_v20 }
 0x157   : > { %2253 = vmatmul.mubr.bf16.gmra.mxu1 %v4041_v21  ;;  %v1104_v18 = vpop.f32.mrf.mxu1  ;;  %v1004_v51 = vadd.f32 %v1003_v49, %v5202_v56  ;;  %v5302_v0 = vadd.f32 %v1100_v50, %v1000_v61  ;;  %2161 = vmatprep.mubr.bf16.mxu0 %v4042_v13  ;;  %v4143_v13 = vld [vmem:[%s4419_s21 + $0xc0] ss:$8 sps:$4 sm:$0xff]  }
 0x158   : > { %2679 = vmatpush2.bf16.msra.mxu1 %v4137_v28  ;;  %v1005_v55 = vpop.f32.mrf.mxu0  ;;  %2262 = vmatprep.mubr.bf16.mxu1 %v4045_v60  ;;  %v4055_v60 = vld [vmem:[%s6190_s0 + $0x310] ss:$20 sps:$4 sm:$0xff]  }
 0x159   : > { %2680 = vmatprep.subr.bf16.mxu1 %v4138_v2  ;;  %v1106_v8 = vpop.f32.mrf.mxu1  ;;  %v1006_v53 = vadd.f32 %v1005_v55, %v5213_v58  ;;  %v5310_v12 = vadd.f32 %v1104_v18, %v1004_v51  ;;  %v4145_v2 = vld [vmem:[%s4419_s21 + $0xb0] ss:$8 sps:$4 sm:$0xff]  }
 0x15a   : > { %v1007_v3 = vpop.f32.mrf.mxu0 }
 0x15b   : > { %v1108_v59 = vpop.f32.mrf.mxu1  ;;  %v1008_v23 = vadd.f32 %v1007_v3, %v5202_v56  ;;  %v5322_v27 = vadd.f32 %v1106_v8, %v1006_v53 }
 0x15c   : > { %2681 = vmatpush2.bf16.msra.mxu1 %v4139_v24  ;;  %v1009_v6 = vpop.f32.mrf.mxu0 }
 0x15d   : > { %2682 = vmatprep.subr.bf16.mxu1 %v4140_v14  ;;  %v1110_v4 = vpop.f32.mrf.mxu1  ;;  %v1010_v25 = vadd.f32 %v1009_v6, %v5213_v58  ;;  %v5327_v15 = vadd.f32 %v1108_v59, %v1008_v23  ;;  %v4148_v14 = vld [vmem:[%s4419_s21 + $0x94] ss:$8 sps:$4 sm:$0xff]  }
 0x15e   : > { %2162 = vmatmul.mubr.bf16.gmra.mxu0 %v4044_v11  ;;  %v1013_v32 = vpop.f32.mrf.mxu0 }
 0x15f   : > { %2263 = vmatmul.mubr.bf16.gmra.mxu1 %v4047_v19  ;;  %v1114_v33 = vpop.f32.mrf.mxu1  ;;  %v1014_v34 = vadd.f32 %v1013_v32, %v5202_v56  ;;  %v5330_v35 = vadd.f32 %v1110_v4, %v1010_v25  ;;  %2171 = vmatprep.mubr.bf16.mxu0 %v3618_v16  ;;  %v4052_v19 = vld [vmem:[%s6190_s0 + $0x218] ss:$20 sps:$4 sm:$0xff]   ;;  %v4147_v16 = vld [vmem:[%s4419_s21 + $0xa0] ss:$8 sps:$4 sm:$0xff]  }
 0x160   : > { %2683 = vmatpush2.bf16.msra.mxu1 %v4141_v36  ;;  %v1015_v38 = vpop.f32.mrf.mxu0  ;;  %2272 = vmatprep.mubr.bf16.mxu1 %v3620_v29 }
 0x161   : > { %2684 = vmatprep.subr.bf16.mxu1 %v4142_v26  ;;  %v1116_v39 = vpop.f32.mrf.mxu1  ;;  %v1016_v17 = vadd.f32 %v1015_v38, %v5213_v58  ;;  %v5335_v41 = vadd.f32 %v1114_v33, %v1014_v34  ;;  %v4149_v38 = vld [vmem:[%s4419_s21 + $0x90] ss:$8 sps:$4 sm:$0xff]  }
 0x162   : > { %v1017_v42 = vpop.f32.mrf.mxu0 }
 0x163   : > { %v1118_v44 = vpop.f32.mrf.mxu1  ;;  %v1018_v21 = vadd.f32 %v1017_v42, %v5202_v56  ;;  %v5338_v48 = vadd.f32 %v1116_v39, %v1016_v17  ;;  %v6260_v39 = vld [vmem:[#allocation9_spill] sm:$0xff]  ;;  %v4150_v17 = vld [vmem:[%s4419_s21 + $0x84] ss:$8 sps:$4 sm:$0xff]  }
 0x164   : > { %2685 = vmatpush2.bf16.msra.mxu1 %v4143_v13  ;;  %v1019_v54 = vpop.f32.mrf.mxu0  ;;  %v4056_v13 = vld [vmem:[%s6190_s0 + $0x240] ss:$20 sps:$4 sm:$0xff]  }
 0x165   : > { %2686 = vmatprep.subr.bf16.mxu1 %v4144_v57  ;;  %v1120_v50 = vpop.f32.mrf.mxu1  ;;  %v1020_v61 = vadd.f32 %v1019_v54, %v5213_v58  ;;  %v5346_v49 = vadd.f32 %v1118_v44, %v1018_v21  ;;  %v6261_v54 = vld [vmem:[#allocation10_spill] sm:$0xff] }
 0x166   : > { %2172 = vmatmul.mubr.bf16.gmra.mxu0 %v3617_v45  ;;  %v1023_v18 = vpop.f32.mrf.mxu0 }
 0x167   : > { %2273 = vmatmul.mubr.bf16.gmra.mxu1 %v3619_v46  ;;  %v1124_v51 = vpop.f32.mrf.mxu1  ;;  %v1024_v28 = vadd.f32 %v1023_v18, %v5202_v56  ;;  %v5349_v55 = vadd.f32 %v1120_v50, %v1020_v61  ;;  %2313 = vmatprep.mubr.bf16.mxu0 %v6257_v30  ;;  %v4053_v46 = vld [vmem:[%s6190_s0 + $0x30c] ss:$20 sps:$4 sm:$0xff]   ;;  %v6262_v61 = vld [vmem:[#allocation11_spill] sm:$0xff]  ;;  %v4152_v18 = vld [vmem:[%s4419_s21 + $0x234] ss:$8 sps:$4 sm:$0xff]  }
 0x168   : > { %2687 = vmatpush2.bf16.msra.mxu1 %v4145_v2  ;;  %v1025_v8 = vpop.f32.mrf.mxu0  ;;  %2694 = vmatprep.mubr.bf16.mxu1 %v4055_v60  ;;  %v4151_v50 = vld [vmem:[%s4419_s21 + $0x80] ss:$8 sps:$4 sm:$0xff]  }
 0x169   : > { %2688 = vmatprep.subr.bf16.mxu1 %v4146_v10  ;;  %v1126_v53 = vpop.f32.mrf.mxu1  ;;  %v1026_v20 = vadd.f32 %v1025_v8, %v5213_v58  ;;  %v5355_v3 = vadd.f32 %v1124_v51, %v1024_v28  ;;  %v4059_v28 = vld [vmem:[%s6190_s0 + $0x338] ss:$20 sps:$4 sm:$0xff]  }
 0x16a   : > { %v1027_v59 = vpop.f32.mrf.mxu0  ;;  %v6263_v8 = vld [vmem:[#allocation12_spill] sm:$0xff] }
 0x16b   : > { %v1128_v11 = vpop.f32.mrf.mxu1  ;;  %v1028_v23 = vadd.f32 %v1027_v59, %v5202_v56  ;;  %v5361_v24 = vadd.f32 %v1126_v53, %v1026_v20  ;;  %v4153_v53 = vld [vmem:[%s4419_s21 + $0x230] ss:$8 sps:$4 sm:$0xff]  }
 0x16c   : > { %2689 = vmatpush2.bf16.msra.mxu1 %v4147_v16  ;;  %v1029_v6 = vpop.f32.mrf.mxu0  ;;  %v6264_v59 = vld [vmem:[#allocation13_spill] sm:$0xff]  ;;  %v4060_v16 = vld [vmem:[%s6190_s0 + $0x268] ss:$20 sps:$4 sm:$0xff]  }
 0x16d   : > { %2690 = vmatprep.subr.bf16.mxu1 %v4148_v14  ;;  %v1130_v4 = vpop.f32.mrf.mxu1  ;;  %v1030_v29 = vadd.f32 %v1029_v6, %v5213_v58  ;;  %v5366_v25 = vadd.f32 %v1128_v11, %v1028_v23  ;;  %v6265_v6 = vld [vmem:[#allocation14_spill] sm:$0xff] }
 0x16e   : > { %3622 = vmatmul.mubr.msk.bf16.vlgmr.msra.gmra.mxu0 %vm917_vm0, %v4052_v19  ;;  %v1033_v32 = vpop.f32.mrf.mxu0  ;;  %v4154_v19 = vld [vmem:[%s4419_s21 + $0x224] ss:$8 sps:$4 sm:$0xff]  }
 0x16f   : > { %v1134_v33 = vpop.f32.mrf.mxu1  ;;  %2764 = vmatpush1.bf16.msra.mxu0 %v4969_v9  ;;  %v1034_v34 = vadd.f32 %v1033_v32, %v5202_v56  ;;  %v5371_v36 = vadd.f32 %v1130_v4, %v1030_v29  ;;  %2323 = vmatprep.mubr.bf16.mxu0 %v6257_v30  ;;  %v4155_v4 = vld [vmem:[%s4419_s21 + $0x220] ss:$8 sps:$4 sm:$0xff]  }
 0x170   : > { %2691 = vmatpush2.bf16.msra.mxu1 %v4149_v38  ;;  %v1035_v26 = vpop.f32.mrf.mxu0  ;;  %2765 = vmatprep.subr.bf16.mxu0 %v6260_v39  ;;  %v6266_v29 = vld [vmem:[#allocation15_spill] sm:$0xff]  ;;  %v4063_v32 = vld [vmem:[%s6190_s0 + $0x360] ss:$20 sps:$4 sm:$0xff]  }
 0x171   : > { %2692 = vmatprep.subr.bf16.mxu1 %v4150_v17  ;;  %v1136_v42 = vpop.f32.mrf.mxu1  ;;  %v1036_v44 = vadd.f32 %v1035_v26, %v5213_v58  ;;  %v5377_v45 = vadd.f32 %v1134_v33, %v1034_v34  ;;  %v4156_v33 = vld [vmem:[%s4419_s21 + $0x214] ss:$8 sps:$4 sm:$0xff]   ;;  %v6267_v26 = vld [vmem:[#allocation16_spill] sm:$0xff] }
 0x172   : > { %v1037_v9 = vpop.f32.mrf.mxu0 }
 0x173   : > { %v1138_v21 = vpop.f32.mrf.mxu1  ;;  %2766 = vmatpush1.bf16.msra.mxu0 %v6261_v54  ;;  %v5387_v57 = vadd.f32 %v1136_v42, %v1036_v44  ;;  %v6268_v44 = vld [vmem:[#allocation17_spill] sm:$0xff]  ;;  %v4158_v54 = vld [vmem:[%s4419_s21 + $0x204] ss:$8 sps:$4 sm:$0xff]  }
 0x174   : > { %2693 = vmatpush2.bf16.msra.mxu1 %v4151_v50  ;;  %v1038_v60 = vpop.f32.mrf.mxu0  ;;  %2767 = vmatprep.subr.bf16.mxu0 %v6262_v61  ;;  %v4157_v9 = vld [vmem:[%s4419_s21 + $0x210] ss:$8 sps:$4 sm:$0xff]   ;;  %v6269_v50 = vld [vmem:[#allocation18_spill] sm:$0xff] }
 0x175   : > { %2872 = vmatprep.subr.bf16.mxu1 %v4152_v18  ;;  %v1139_v51 = vpop.f32.mrf.mxu1  ;;  %v6270_v18 = vld [vmem:[#allocation19_spill] sm:$0xff] }
 0x176   : > { %3623 = vmatmul.mubr.msk.bf16.gmra.mxu0 %vm917_vm0, %v4056_v13  ;;  %v1175_v2 = vpop.f32.mrf.mxu0  ;;  %v4064_v13 = vld [vmem:[%s6190_s0 + $0x290] ss:$20 sps:$4 sm:$0xff]   ;;  %v4067_v51 = vld [vmem:[%s6190_s0 + $0x388] ss:$20 sps:$4 sm:$0xff]  }
 0x177   : > { %2695 = vmatmul.mubr.bf16.vlgmr.msra.gmra.mxu1 %v4053_v46  ;;  %2768 = vmatpush1.bf16.msra.mxu0 %v6263_v8  ;;  %v5398_v10 = vadd.f32 %v1175_v2, %v5218_v63  ;;  %v4057_v63 = vld [vmem:[%s6190_s0 + $0x334] ss:$20 sps:$4 sm:$0xff]  }
 0x178   : > { %2873 = vmatpush1.bf16.msra.mxu1 %v4153_v53  ;;  %v1177_v20 = vpop.f32.mrf.mxu0  ;;  %2769 = vmatprep.subr.bf16.mxu0 %v6264_v59  ;;  %v4159_v2 = vld [vmem:[%s4419_s21 + $0x200] ss:$8 sps:$4 sm:$0xff]   ;;  %v4160_v59 = vld [vmem:[%s4419_s21 + $0x104] ss:$8 sps:$4 sm:$0xff]  }
 0x179   : > { %2333 = vmatprep.mubr.bf16.mxu0 %v6257_v30  ;;  %v5404_v11 = vadd.f32 %v1177_v20, %v5229_v47  ;;  %2704 = vmatprep.mubr.bf16.mxu1 %v4059_v28 }
 0x17a   : > { %2874 = vmatprep.subr.bf16.mxu1 %v4154_v19  ;;  %v1179_v23 = vpop.f32.mrf.mxu0 }
 0x17b   : > { %2770 = vmatpush1.bf16.msra.mxu0 %v6265_v6  ;;  %v5415_v14 = vadd.f32 %v1179_v23, %v5240_v7 }
 0x17c   : > { %2875 = vmatpush1.bf16.msra.mxu1 %v4155_v4  ;;  %v1181_v47 = vpop.f32.mrf.mxu0  ;;  %2771 = vmatprep.subr.bf16.mxu0 %v6266_v29  ;;  %v4071_v29 = vld [vmem:[%s6190_s0 + $0x3b0] ss:$20 sps:$4 sm:$0xff]  }
 0x17d   : > { %2876 = vmatprep.subr.bf16.mxu1 %v4156_v33  ;;  %v5424_v34 = vadd.f32 %v1181_v47, %v5244_v1  ;;  %v4162_v47 = vld [vmem:[%s4419_s21 + $0x1f4] ss:$8 sps:$4 sm:$0xff]  }
 0x17e   : > { %3624 = vmatmul.mubr.msk.bf16.gmra.mxu0 %vm917_vm0, %v4060_v16  ;;  %v1185_v7 = vpop.f32.mrf.mxu0  ;;  %v4161_v16 = vld [vmem:[%s4419_s21 + $0x100] ss:$8 sps:$4 sm:$0xff]  }
 0x17f   : > { %2705 = vmatmul.mubr.bf16.gmra.mxu1 %v4057_v63  ;;  %v5427_v38 = vpop.f32.mrf.mxu1  ;;  %2772 = vmatpush1.bf16.msra.mxu0 %v6267_v26  ;;  %v5431_v39 = vadd.f32 %v1185_v7, %v5250_v5  ;;  %v4061_v5 = vld [vmem:[%s6190_s0 + $0x35c] ss:$20 sps:$4 sm:$0xff]  }
 0x180   : > { %2343 = vmatprep.mubr.bf16.mxu0 %v6257_v30  ;;  %v1187_v17 = vpop.f32.mrf.mxu0  ;;  %2773 = vmatprep.subr.bf16.mxu0 %v6268_v44  ;;  %v4163_v7 = vld [vmem:[%s4419_s21 + $0x1f0] ss:$8 sps:$4 sm:$0xff]  }
 0x181   : > { %v5434_v42 = vpop.f32.mrf.mxu1  ;;  %2714 = vmatprep.mubr.bf16.mxu1 %v4063_v32  ;;  %v5438_v1 = vadd.f32 %v1187_v17, %v5260_v31  ;;  %2877 = vmatpush1.bf16.msra.mxu1 %v4157_v9 }
 0x182   : > { %v1189_v46 = vpop.f32.mrf.mxu0  ;;  %2878 = vmatprep.subr.bf16.mxu1 %v4158_v54  ;;  %v4165_v54 = vld [vmem:[%s4419_s21 + $0x1e0] ss:$8 sps:$4 sm:$0xff]  }
 0x183   : > { %v5441_v21 = vpop.f32.mrf.mxu1  ;;  %2774 = vmatpush1.bf16.msra.mxu0 %v6269_v50  ;;  %v5452_v31 = vadd.f32 %v1189_v46, %v5271_v37 }
 0x184   : > { %v1191_v60 = vpop.f32.mrf.mxu0  ;;  %2775 = vmatprep.subr.bf16.mxu0 %v6270_v18  ;;  %v4166_v18 = vld [vmem:[%s4419_s21 + $0x1d4] ss:$8 sps:$4 sm:$0xff]  }
 0x185   : > { %v5454_v61 = vpop.f32.mrf.mxu1  ;;  %v5461_v28 = vadd.f32 %v1191_v60, %v5274_v40  ;;  %2879 = vmatpush1.bf16.msra.mxu1 %v4159_v2 }
 0x186   : > { %3625 = vmatmul.mubr.msk.bf16.gmra.mxu0 %vm917_vm0, %v4064_v13  ;;  %v1195_v37 = vpop.f32.mrf.mxu0  ;;  %v4072_v13 = vld [vmem:[%s6190_s0 + $0x2e0] ss:$20 sps:$4 sm:$0xff]  }
 0x187   : > { %2715 = vmatmul.mubr.bf16.gmra.mxu1 %v4061_v5  ;;  %v5465_v8 = vpop.f32.mrf.mxu1  ;;  %2776 = vmatpush1.bf16.msra.mxu0 %v5098_v22  ;;  %v5469_v53 = vadd.f32 %v1195_v37, %v5279_v43  ;;  %v4065_v22 = vld [vmem:[%s6190_s0 + $0x384] ss:$20 sps:$4 sm:$0xff]  }
 0x188   : > { %2353 = vmatprep.mubr.bf16.mxu0 %v6257_v30  ;;  %v1197_v20 = vpop.f32.mrf.mxu0  ;;  %2777 = vmatprep.subr.bf16.mxu0 %v4160_v59  ;;  %v4068_v43 = vld [vmem:[%s6190_s0 + $0x2b8] ss:$20 sps:$4 sm:$0xff]  }
 0x189   : > { %v5472_v40 = vpop.f32.mrf.mxu1  ;;  %2724 = vmatprep.mubr.bf16.mxu1 %v4067_v51  ;;  %v5476_v19 = vadd.f32 %v1197_v20, %v5288_v52  ;;  %v4075_v51 = vld [vmem:[%s6190_s0 + $0x3d8] ss:$20 sps:$4 sm:$0xff]  }
 0x18a   : > { %v1199_v23 = vpop.f32.mrf.mxu0 }
 0x18b   : > { %v5478_v63 = vpop.f32.mrf.mxu1  ;;  %2778 = vmatpush1.bf16.msra.mxu0 %v4161_v16  ;;  %v5488_v6 = vadd.f32 %v1199_v23, %v5299_v62 }
 0x18c   : > { %v1201_v4 = vpop.f32.mrf.mxu0  ;;  %2779 = vmatprep.subr.bf16.mxu0 %v4162_v47 }
 0x18d   : > { %v5490_v52 = vpop.f32.mrf.mxu1  ;;  %v5497_v32 = vadd.f32 %v1201_v4, %v5302_v0  ;;  %v4164_v0 = vld [vmem:[%s4419_s21 + $0x1e4] ss:$8 sps:$4 sm:$0xff]  }
 0x18e   : > { %3626 = vmatmul.mubr.msk.bf16.gmra.mxu0 %vm917_vm0, %v4068_v43  ;;  %v1205_v33 = vpop.f32.mrf.mxu0  ;;  %v3665_v43 = vld [vmem:[%s6190_s0 + $0x3fc] sm:$0x11] }
 0x18f   : > { %2725 = vmatmul.mubr.bf16.gmra.mxu1 %v4065_v22  ;;  %v5500_v62 = vpop.f32.mrf.mxu1  ;;  %2780 = vmatpush2.bf16.msra.mxu0 %v4163_v7  ;;  %v5504_v26 = vadd.f32 %v1205_v33, %v5310_v12  ;;  %v4069_v12 = vld [vmem:[%s6190_s0 + $0x3ac] ss:$20 sps:$4 sm:$0xff]  }
 0x190   : > { %2363 = vmatprep.mubr.bf16.mxu0 %v6257_v30  ;;  %v1207_v17 = vpop.f32.mrf.mxu0  ;;  %2781 = vmatprep.subr.bf16.mxu0 %v4164_v0  ;;  %v4169_v33 = vld [vmem:[%s4419_s21 + $0x1c0] ss:$8 sps:$4 sm:$0xff]  }
 0x191   : > { %v5507_v44 = vpop.f32.mrf.mxu1  ;;  %2734 = vmatprep.mubr.bf16.mxu1 %v4071_v29  ;;  %v5511_v9 = vadd.f32 %v1207_v17, %v5322_v27  ;;  %v4076_v29 = vld [vmem:[%s6190_s0 + $0x308] ss:$0 sps:$4 sm:$0x11]   ;;  %v3699_v17 = vcombine.high %v3665_v43, %v3665_v43 }
 0x192   : > { %v1209_v46 = vpop.f32.mrf.mxu0 }
 0x193   : > { %v5513_v5 = vpop.f32.mrf.mxu1  ;;  %2782 = vmatpush2.bf16.msra.mxu0 %v4165_v54  ;;  %v5523_v50 = vadd.f32 %v1209_v46, %v5327_v15  ;;  %v4167_v15 = vld [vmem:[%s4419_s21 + $0x1d0] ss:$8 sps:$4 sm:$0xff]   ;;  %v4170_v46 = vld [vmem:[%s4419_s21 + $0x1b4] ss:$8 sps:$4 sm:$0xff]  }
 0x194   : > { %v1211_v60 = vpop.f32.mrf.mxu0  ;;  %2783 = vmatprep.subr.bf16.mxu0 %v4166_v18 }
 0x195   : > { %v5525_v27 = vpop.f32.mrf.mxu1  ;;  %v5532_v2 = vadd.f32 %v1211_v60, %v5330_v35  ;;  %v4168_v35 = vld [vmem:[%s4419_s21 + $0x1c4] ss:$8 sps:$4 sm:$0xff]   ;;  %v4171_v60 = vld [vmem:[%s4419_s21 + $0x1b0] ss:$8 sps:$4 sm:$0xff]  }
 0x196   : > { %3627 = vmatmul.mubr.msk.bf16.gmra.mxu0 %vm917_vm0, %v4072_v13  ;;  %v1215_v37 = vpop.f32.mrf.mxu0 }
 0x197   : > { %2735 = vmatmul.mubr.bf16.gmra.mxu1 %v4069_v12  ;;  %v5535_v20 = vpop.f32.mrf.mxu1  ;;  %2784 = vmatpush2.bf16.msra.mxu0 %v4167_v15  ;;  %v5539_v59 = vadd.f32 %v1215_v37, %v5335_v41  ;;  %v4073_v41 = vld [vmem:[%s6190_s0 + $0x3d4] ss:$20 sps:$4 sm:$0xff]   ;;  %v4081_v12 = vld [vmem:[%s6190_s0 + $0x318] ss:$20 sps:$4 sm:$0xff]  }
 0x198   : > { %2373 = vmatprep.mubr.bf16.mxu0 %v6257_v30  ;;  %v1217_v23 = vpop.f32.mrf.mxu0  ;;  %2785 = vmatprep.subr.bf16.mxu0 %v4168_v35  ;;  %v4172_v15 = vld [vmem:[%s4419_s21 + $0x1a4] ss:$8 sps:$4 sm:$0xff]  }
 0x199   : > { %v5542_v22 = vpop.f32.mrf.mxu1  ;;  %2744 = vmatprep.mubr.bf16.mxu1 %v4075_v51  ;;  %v5549_v16 = vadd.f32 %v1217_v23, %v5338_v48 }
 0x19a   : > { %v1219_v4 = vpop.f32.mrf.mxu0 }
 0x19b   : > { %v5551_v47 = vpop.f32.mrf.mxu1  ;;  %2786 = vmatpush2.bf16.msra.mxu0 %v4169_v33  ;;  %v5561_v7 = vadd.f32 %v1219_v4, %v5346_v49  ;;  %v3698_v4 = vcombine.low %v3665_v43, %v3665_v43  ;;  %v4175_v43 = vld [vmem:[%s4419_s21 + $0x190] ss:$8 sps:$4 sm:$0xff]  }
 0x19c   : > { %v1221_v48 = vpop.f32.mrf.mxu0  ;;  %2787 = vmatprep.subr.bf16.mxu0 %v4170_v46 }
 0x19d   : > { %v5563_v0 = vpop.f32.mrf.mxu1  ;;  %v5570_v13 = vadd.f32 %v1221_v48, %v5349_v55 }
 0x19e   : > { %3628 = vmatmul.mubr.msk.bf16.gmra.mxu0 %vm917_vm0, %v4076_v29  ;;  %v1225_v49 = vpop.f32.mrf.mxu0 }
 0x19f   : > { %2745 = vmatmul.mubr.bf16.gmra.mxu1 %v4073_v41  ;;  %v5573_v54 = vpop.f32.mrf.mxu1  ;;  %2788 = vmatpush2.bf16.msra.mxu0 %v4171_v60  ;;  %v5577_v18 = vadd.f32 %v1225_v49, %v5355_v3  ;;  %v4173_v41 = vld [vmem:[%s4419_s21 + $0x1a0] ss:$8 sps:$4 sm:$0xff]   ;;  %v4176_v60 = vld [vmem:[%s4419_s21 + $0x184] ss:$8 sps:$4 sm:$0xff]  }
 0x1a0   : > { %2754 = vmatprep.mubr.bf16.mxu1 %v3699_v17  ;;  %v1227_v51 = vpop.f32.mrf.mxu0  ;;  %2789 = vmatprep.subr.bf16.mxu0 %v4172_v15  ;;  %v4174_v17 = vld [vmem:[%s4419_s21 + $0x194] ss:$8 sps:$4 sm:$0xff]  }
 0x1a1   : > { %6271 = vst [vmem:[#allocation9_spill] sm:$0xff] %v5577_v18  ;;  %v5579_v37 = vpop.f32.mrf.mxu1  ;;  %2795 = vmatprep.mubr.bf16.mxu0 %v4081_v12  ;;  %v5583_v55 = vadd.f32 %v1227_v51, %v5361_v24  ;;  %v4079_v15 = vld [vmem:[%s6190_s0 + $0x314] ss:$20 sps:$4 sm:$0xff]  }
 0x1a2   : > { %v1229_v23 = vpop.f32.mrf.mxu0 }
 0x1a3   : > { %6272 = vst [vmem:[#allocation10_spill] sm:$0xff] %v5583_v55  ;;  %v5585_v35 = vpop.f32.mrf.mxu1  ;;  %2790 = vmatpush2.bf16.msra.mxu0 %v4173_v41  ;;  %v5589_v3 = vadd.f32 %v1229_v23, %v5366_v25  ;;  %v4085_v41 = vld [vmem:[%s6190_s0 + $0x340] ss:$20 sps:$4 sm:$0xff]  }
 0x1a4   : > { %v1231_v29 = vpop.f32.mrf.mxu0  ;;  %2791 = vmatprep.subr.bf16.mxu0 %v4174_v17 }
 0x1a5   : > { %6273 = vst [vmem:[#allocation11_spill] sm:$0xff] %v5589_v3  ;;  %v5591_v33 = vpop.f32.mrf.mxu1  ;;  %v5595_v48 = vadd.f32 %v1231_v29, %v5371_v36 }
 0x1a6   : > { %v1235_v24 = vpop.f32.mrf.mxu0 }
 0x1a7   : > { %6274 = vst [vmem:[#allocation12_spill] sm:$0xff] %v5595_v48  ;;  %2755 = vmatmul.mubr.bf16.gmra.mxu1 %v3698_v4  ;;  %v5597_v46 = vpop.f32.mrf.mxu1  ;;  %2792 = vmatpush2.bf16.msra.mxu0 %v4175_v43  ;;  %v5601_v12 = vadd.f32 %v1235_v24, %v5377_v45  ;;  %v4082_v45 = vld [vmem:[%s6190_s0 + $0x31c] ss:$20 sps:$4 sm:$0xff]   ;;  %v4177_v4 = vld [vmem:[%s4419_s21 + $0x180] ss:$8 sps:$4 sm:$0xff]   ;;  %s3148_s21 = scalar_lea.vmem (%p4366_p9), %s6193_s3, %s3742_s23 }
 0x1a8   : > { %2896 = vmatprep.mubr.bf16.mxu1 %v6257_v30  ;;  %v1237_v25 = vpop.f32.mrf.mxu0  ;;  %2793 = vmatprep.subr.bf16.mxu0 %v4176_v60  ;;  %v4086_v60 = vld [vmem:[%s6190_s0 + $0x344] ss:$20 sps:$4 sm:$0xff]  }
 0x1a9   : > { %6275 = vst [vmem:[#allocation13_spill] sm:$0xff] %v5601_v12  ;;  %v5604_v49 = vpop.f32.mrf.mxu1  ;;  %v5608_v36 = vadd.f32 %v1237_v25, %v5387_v57  ;;  %v4083_v25 = vld [vmem:[%s6190_s0 + $0x33c] ss:$20 sps:$4 sm:$0xff]  }
 0x1aa   : > { %v1239_v23 = vpop.f32.mrf.mxu0 }
 0x1ab   : > { %6276 = vst [vmem:[#allocation14_spill] sm:$0xff] %v5608_v36  ;;  %v5610_v51 = vpop.f32.mrf.mxu1  ;;  %2794 = vmatpush2.bf16.msra.mxu0 %v4177_v4 }
 0x1ac   : > { %v1240_v57 = vpop.f32.mrf.mxu0 }
 0x1ad   : > { %v5622_v29 = vpop.f32.mrf.mxu1  ;;  %v1533_v57 = vadd.f32 %v5434_v42, %v5213_v58  ;;  %v4090_v42 = vld [vmem:[%s6190_s0 + $0x36c] ss:$20 sps:$4 sm:$0xff]  }
 0x1ae   : > { %6277 = vst [vmem:[#allocation15_spill] sm:$0xff] %v5622_v29  ;;  %2796 = vmatmul.mubr.bf16.vlgmr.msra.gmra.mxu0 %v4079_v15  ;;  %v4089_v15 = vld [vmem:[%s6190_s0 + $0x368] ss:$20 sps:$4 sm:$0xff]  }
 0x1af   : > { %3703 = vmatmul.mubr.msk.bf16.vlgmr.msra.gmra.mxu1 %vm917_vm0, %v4082_v45  ;;  %v5625_v17 = vpop.f32.mrf.mxu1  ;;  %2805 = vmatprep.mubr.bf16.mxu0 %v4085_v41  ;;  %v1531_v45 = vadd.f32 %v5427_v38, %v5202_v56  ;;  %v1242_v38 = vmax.f32 %v5398_v10, 0.0  ;;  %v4093_v10 = vld [vmem:[%s6190_s0 + $0x390] ss:$20 sps:$4 sm:$0xff]  }
 0x1b0   : > { %6278 = vst [vmem:[#allocation16_spill] sm:$0xff] %v5625_v17  ;;  %2906 = vmatprep.mubr.bf16.mxu1 %v6257_v30 }
 0x1b1   : > { %v5628_v24 = vpop.f32.mrf.mxu1 }
 0x1b2   : > { %6279 = vst [vmem:[#allocation17_spill] sm:$0xff] %v5628_v24 }
 0x1b3   : > { %v1594_v43 = vpop.f32.mrf.mxu1 }
 0x1b5   : > { %v1595_v23 = vpop.f32.mrf.mxu1 }
 0x1b6   : > { %2806 = vmatmul.mubr.bf16.gmra.mxu0 %v4083_v25  ;;  %v1631_v4 = vpop.f32.mrf.mxu0  ;;  %v1535_v23 = vadd.f32 %v5441_v21, %v5202_v56 }
 0x1b7   : > { %3704 = vmatmul.mubr.msk.bf16.gmra.mxu1 %vm917_vm0, %v4086_v60  ;;  %v1732_v41 = vpop.f32.mrf.mxu1  ;;  %v1632_v43 = vadd.f32 %v1631_v4, %v1531_v45  ;;  %2815 = vmatprep.mubr.bf16.mxu0 %v4089_v15  ;;  %v4087_v60 = vld [vmem:[%s6190_s0 + $0x364] ss:$20 sps:$4 sm:$0xff]   ;;  %v1537_v15 = vadd.f32 %v5454_v61, %v5213_v58  ;;  %v1244_v61 = vmax.f32 %v5415_v14, 0.0  ;;  %v1545_v14 = vadd.f32 %v5478_v63, %v5202_v56  ;;  %v4094_v63 = vld [vmem:[%s6190_s0 + $0x394] ss:$20 sps:$4 sm:$0xff]  }
 0x1b8   : > { %2916 = vmatprep.mubr.bf16.mxu1 %v6257_v30  ;;  %v1633_v36 = vpop.f32.mrf.mxu0 }
 0x1b9   : > { %v1734_v12 = vpop.f32.mrf.mxu1  ;;  %v1733_v48 = vadd.f32 %v1732_v41, %v1632_v43  ;;  %v1634_v24 = vadd.f32 %v1633_v36, %v1533_v57  ;;  %v1243_v36 = vmax.f32 %v5404_v11, 0.0  ;;  %v1541_v41 = vadd.f32 %v5465_v8, %v5202_v56 }
 0x1ba   : > { %v1635_v25 = vpop.f32.mrf.mxu0 }
 0x1bb   : > { %v1736_v3 = vpop.f32.mrf.mxu1  ;;  %v1799_v45 = vmax.f32 %v1733_v48, 0.0  ;;  %v1735_v4 = vadd.f32 %v1734_v12, %v1634_v24  ;;  %v1636_v21 = vadd.f32 %v1635_v25, %v1535_v23  ;;  %v1543_v48 = vadd.f32 %v5472_v40, %v5213_v58 }
 0x1bc   : > { %v1637_v57 = vpop.f32.mrf.mxu0 }
 0x1bd   : > { %v1738_v43 = vpop.f32.mrf.mxu1  ;;  %v5662_v17 = vadd.f32 %v1799_v45, %v1242_v38  ;;  %v1800_v55 = vmax.f32 %v1735_v4, 0.0  ;;  %v1737_v29 = vadd.f32 %v1736_v3, %v1636_v21  ;;  %v1638_v18 = vadd.f32 %v1637_v57, %v1537_v15 }
 0x1be   : > { %2816 = vmatmul.mubr.bf16.gmra.mxu0 %v4087_v60  ;;  %v1641_v12 = vpop.f32.mrf.mxu0  ;;  %v1245_v3 = vmax.f32 %v5424_v34, 0.0  ;;  %v4091_v34 = vld [vmem:[%s6190_s0 + $0x38c] ss:$20 sps:$4 sm:$0xff]   ;;  %v1551_v57 = vadd.f32 %v5500_v62, %v5202_v56 }
 0x1bf   : > { %3705 = vmatmul.mubr.msk.bf16.gmra.mxu1 %vm917_vm0, %v4090_v42  ;;  %v1742_v11 = vpop.f32.mrf.mxu1  ;;  %v5668_v24 = vadd.f32 %v1800_v55, %v1243_v36  ;;  %v1801_v8 = vmax.f32 %v1737_v29, 0.0  ;;  %v1739_v23 = vadd.f32 %v1738_v43, %v1638_v18  ;;  %v1642_v25 = vadd.f32 %v1641_v12, %v1541_v41  ;;  %2825 = vmatprep.mubr.bf16.mxu0 %v4093_v10 }
 0x1c0   : > { %2926 = vmatprep.mubr.bf16.mxu1 %v6257_v30  ;;  %v1643_v38 = vpop.f32.mrf.mxu0  ;;  %v1246_v55 = vmax.f32 %v5431_v39, 0.0  ;;  %v1547_v18 = vadd.f32 %v5490_v52, %v5213_v58  ;;  %v4097_v39 = vld [vmem:[%s6190_s0 + $0x3b8] ss:$20 sps:$4 sm:$0xff]   ;;  %v1247_v52 = vmax.f32 %v5438_v1, 0.0 }
 0x1c1   : > { %v1744_v40 = vpop.f32.mrf.mxu1  ;;  %v5674_v60 = vadd.f32 %v1801_v8, %v1244_v61  ;;  %v1802_v15 = vmax.f32 %v1739_v23, 0.0  ;;  %v1644_v42 = vadd.f32 %v1643_v38, %v1543_v48  ;;  %v1743_v45 = vadd.f32 %v1742_v11, %v1642_v25 }
 0x1c2   : > { %v1645_v29 = vpop.f32.mrf.mxu0  ;;  %v1248_v23 = vmax.f32 %v5452_v31, 0.0  ;;  %v1553_v25 = vadd.f32 %v5507_v44, %v5213_v58  ;;  %v1555_v31 = vadd.f32 %v5513_v5, %v5202_v56  ;;  %v4098_v5 = vld [vmem:[%s6190_s0 + $0x3bc] ss:$20 sps:$4 sm:$0xff]  }
 0x1c3   : > { %v1746_v4 = vpop.f32.mrf.mxu1  ;;  %v5685_v21 = vadd.f32 %v1802_v15, %v1245_v3  ;;  %v1803_v10 = vmax.f32 %v1743_v45, 0.0  ;;  %v1646_v36 = vadd.f32 %v1645_v29, %v1545_v14  ;;  %v1745_v41 = vadd.f32 %v1744_v40, %v1644_v42 }
 0x1c4   : > { %v1647_v43 = vpop.f32.mrf.mxu0  ;;  %v1249_v15 = vmax.f32 %v5461_v28, 0.0  ;;  %v4095_v28 = vld [vmem:[%s6190_s0 + $0x3b4] ss:$20 sps:$4 sm:$0xff]  }
 0x1c5   : > { %v1748_v61 = vpop.f32.mrf.mxu1  ;;  %v5693_v48 = vadd.f32 %v1803_v10, %v1246_v55  ;;  %v1804_v12 = vmax.f32 %v1745_v41, 0.0  ;;  %v1648_v11 = vadd.f32 %v1647_v43, %v1547_v18  ;;  %v1747_v8 = vadd.f32 %v1746_v4, %v1646_v36 }
 0x1c6   : > { %2826 = vmatmul.mubr.bf16.gmra.mxu0 %v4091_v34  ;;  %v1651_v3 = vpop.f32.mrf.mxu0  ;;  %v1250_v4 = vmax.f32 %v5469_v53, 0.0  ;;  %v1557_v34 = vadd.f32 %v5525_v27, %v5213_v58  ;;  %v4101_v53 = vld [vmem:[%s6190_s0 + $0x3e0] ss:$20 sps:$4 sm:$0xff]   ;;  %v1251_v27 = vmax.f32 %v5476_v19, 0.0 }
 0x1c7   : > { %3706 = vmatmul.mubr.msk.bf16.gmra.mxu1 %vm917_vm0, %v4094_v63  ;;  %v1752_v1 = vpop.f32.mrf.mxu1  ;;  %v5699_v14 = vadd.f32 %v1804_v12, %v1247_v52  ;;  %v1805_v62 = vmax.f32 %v1747_v8, 0.0  ;;  %v1652_v38 = vadd.f32 %v1651_v3, %v1551_v57  ;;  %v1749_v40 = vadd.f32 %v1748_v61, %v1648_v11  ;;  %2835 = vmatprep.mubr.bf16.mxu0 %v4097_v39 }
 0x1c8   : > { %2936 = vmatprep.mubr.bf16.mxu1 %v6257_v30  ;;  %v1653_v42 = vpop.f32.mrf.mxu0  ;;  %v1561_v57 = vadd.f32 %v5535_v20, %v5202_v56  ;;  %v1563_v3 = vadd.f32 %v5542_v22, %v5213_v58  ;;  %v1253_v22 = vmax.f32 %v5497_v32, 0.0  ;;  %v4099_v32 = vld [vmem:[%s6190_s0 + $0x3dc] ss:$20 sps:$4 sm:$0xff]  }
 0x1c9   : > { %v1754_v44 = vpop.f32.mrf.mxu1  ;;  %v5705_v45 = vadd.f32 %v1805_v62, %v1248_v23  ;;  %v1806_v55 = vmax.f32 %v1749_v40, 0.0  ;;  %v1654_v18 = vadd.f32 %v1653_v42, %v1553_v25  ;;  %v1753_v29 = vadd.f32 %v1752_v1, %v1652_v38 }
 0x1ca   : > { %v1655_v63 = vpop.f32.mrf.mxu0  ;;  %v1252_v25 = vmax.f32 %v5488_v6, 0.0  ;;  %v5736_v6 = vld [vmem:[%s6190_s0 + $0x404] sm:$0x11] }
 0x1cb   : > { %v1756_v10 = vpop.f32.mrf.mxu1  ;;  %v5716_v36 = vadd.f32 %v1806_v55, %v1249_v15  ;;  %v1807_v41 = vmax.f32 %v1753_v29, 0.0  ;;  %v1656_v39 = vadd.f32 %v1655_v63, %v1555_v31  ;;  %v1755_v52 = vadd.f32 %v1754_v44, %v1654_v18 }
 0x1cc   : > { %v1657_v43 = vpop.f32.mrf.mxu0  ;;  %v1565_v15 = vadd.f32 %v5551_v47, %v5202_v56  ;;  %v4102_v47 = vld [vmem:[%s6190_s0 + $0x3e4] ss:$20 sps:$4 sm:$0xff]  }
 0x1cd   : > { %v1758_v61 = vpop.f32.mrf.mxu1  ;;  %v5724_v12 = vadd.f32 %v1807_v41, %v1250_v4  ;;  %v1808_v11 = vmax.f32 %v1755_v52, 0.0  ;;  %v1658_v8 = vadd.f32 %v1657_v43, %v1557_v34  ;;  %v1757_v23 = vadd.f32 %v1756_v10, %v1656_v39 }
 0x1ce   : > { %2836 = vmatmul.mubr.bf16.gmra.mxu0 %v4095_v28  ;;  %v1661_v1 = vpop.f32.mrf.mxu0  ;;  %v1254_v4 = vmax.f32 %v5504_v26, 0.0  ;;  %v1567_v34 = vadd.f32 %v5563_v0, %v5213_v58  ;;  %v3701_v28 = vcombine.high %v5736_v6, %v5736_v6  ;;  %v1255_v0 = vmax.f32 %v5511_v9, 0.0 }
 0x1cf   : > { %3707 = vmatmul.mubr.msk.bf16.gmra.mxu1 %vm917_vm0, %v4098_v5  ;;  %v1762_v19 = vpop.f32.mrf.mxu1  ;;  %v5730_v62 = vadd.f32 %v1808_v11, %v1251_v27  ;;  %v1809_v20 = vmax.f32 %v1757_v23, 0.0  ;;  %v1662_v38 = vadd.f32 %v1661_v1, %v1561_v57  ;;  %v1759_v40 = vadd.f32 %v1758_v61, %v1658_v8  ;;  %2845 = vmatprep.mubr.bf16.mxu0 %v4101_v53 }
 0x1d0   : > { %2946 = vmatprep.mubr.bf16.mxu1 %v6257_v30  ;;  %v1663_v31 = vpop.f32.mrf.mxu0  ;;  %v1571_v52 = vadd.f32 %v5573_v54, %v5202_v56  ;;  %v1256_v8 = vmax.f32 %v5523_v50, 0.0  ;;  %v1573_v23 = vadd.f32 %v5579_v37, %v5213_v58  ;;  %v1575_v50 = vadd.f32 %v5585_v35, %v5202_v56 }
 0x1d1   : > { %v1764_v42 = vpop.f32.mrf.mxu1  ;;  %v5741_v44 = vadd.f32 %v1809_v20, %v1252_v25  ;;  %v1810_v55 = vmax.f32 %v1759_v40, 0.0  ;;  %v1664_v18 = vadd.f32 %v1663_v31, %v1563_v3  ;;  %v1763_v29 = vadd.f32 %v1762_v19, %v1662_v38 }
 0x1d2   : > { %v1665_v63 = vpop.f32.mrf.mxu0  ;;  %v1257_v20 = vmax.f32 %v5532_v2, 0.0  ;;  %v4105_v2 = vld [vmem:[%s6190_s0 + $0x40c] ss:$0 sps:$4 sm:$0x11]  }
 0x1d3   : > { %v1766_v10 = vpop.f32.mrf.mxu1  ;;  %v5754_v5 = vadd.f32 %v1810_v55, %v1253_v22  ;;  %v1811_v41 = vmax.f32 %v1763_v29, 0.0  ;;  %v1666_v26 = vadd.f32 %v1665_v63, %v1565_v15  ;;  %v1765_v39 = vadd.f32 %v1764_v42, %v1664_v18 }
 0x1d4   : > { %v1667_v53 = vpop.f32.mrf.mxu0  ;;  %v1258_v42 = vmax.f32 %v5539_v59, 0.0  ;;  %v1577_v55 = vadd.f32 %v5591_v33, %v5213_v58  ;;  %v1581_v59 = vadd.f32 %v5597_v46, %v5202_v56 }
 0x1d5   : > { %v1768_v27 = vpop.f32.mrf.mxu1  ;;  %v5759_v57 = vadd.f32 %v1811_v41, %v1254_v4  ;;  %v1812_v43 = vmax.f32 %v1765_v39, 0.0  ;;  %v1668_v61 = vadd.f32 %v1667_v53, %v1567_v34  ;;  %v1767_v11 = vadd.f32 %v1766_v10, %v1666_v26 }
 0x1d6   : > { %2846 = vmatmul.mubr.bf16.gmra.mxu0 %v4099_v32  ;;  %v1671_v25 = vpop.f32.mrf.mxu0  ;;  %v1259_v10 = vmax.f32 %v5549_v16, 0.0  ;;  %v1260_v26 = vmax.f32 %v5561_v7, 0.0  ;;  %v1583_v39 = vadd.f32 %v5604_v49, %v5213_v58 }
 0x1d7   : > { %3708 = vmatmul.mubr.msk.bf16.gmra.mxu1 %vm917_vm0, %v4102_v47  ;;  %v1772_v9 = vpop.f32.mrf.mxu1  ;;  %v5765_v3 = vadd.f32 %v1812_v43, %v1255_v0  ;;  %v1813_v54 = vmax.f32 %v1767_v11, 0.0  ;;  %v1672_v1 = vadd.f32 %v1671_v25, %v1571_v52  ;;  %v1769_v19 = vadd.f32 %v1768_v27, %v1668_v61  ;;  %2855 = vmatprep.mubr.bf16.mxu0 %v3701_v28 }
 0x1d8   : > { %2956 = vmatprep.mubr.bf16.mxu1 %v6257_v30  ;;  %v1673_v38 = vpop.f32.mrf.mxu0  ;;  %v3700_v30 = vcombine.low %v5736_v6, %v5736_v6  ;;  %v1261_v43 = vmax.f32 %v5570_v13, 0.0  ;;  %v1585_v61 = vadd.f32 %v5610_v51, %v5202_v56  ;;  %v6282_v51 = vld [vmem:[#allocation10_spill] sm:$0xff] }
 0x1d9   : > { %v1774_v37 = vpop.f32.mrf.mxu1  ;;  %v5771_v40 = vadd.f32 %v1813_v54, %v1256_v8  ;;  %v1814_v22 = vmax.f32 %v1769_v19, 0.0  ;;  %v1674_v15 = vadd.f32 %v1673_v38, %v1573_v23  ;;  %v1773_v31 = vadd.f32 %v1772_v9, %v1672_v1  ;;  %v6280_v9 = vld [vmem:[#allocation9_spill] sm:$0xff]  ;;  %v6281_v1 = vld [vmem:[#allocation15_spill] sm:$0xff] }
 0x1da   : > { %v1675_v18 = vpop.f32.mrf.mxu0  ;;  %v1262_v54 = vmax.f32 %v6280_v9, 0.0  ;;  %v1587_v19 = vadd.f32 %v6281_v1, %v5213_v58 }
 0x1db   : > { %v1776_v29 = vpop.f32.mrf.mxu1  ;;  %v5781_v35 = vadd.f32 %v1814_v22, %v1257_v20  ;;  %v1815_v4 = vmax.f32 %v1773_v31, 0.0  ;;  %v1676_v34 = vadd.f32 %v1675_v18, %v1575_v50  ;;  %v1775_v63 = vadd.f32 %v1774_v37, %v1674_v15  ;;  %v6283_v31 = vld [vmem:[#allocation16_spill] sm:$0xff] }
 0x1dc   : > { %v1677_v33 = vpop.f32.mrf.mxu0  ;;  %v1263_v15 = vmax.f32 %v6282_v51, 0.0 }
 0x1dd   : > { %v1778_v32 = vpop.f32.mrf.mxu1  ;;  %v5786_v47 = vadd.f32 %v1815_v4, %v1258_v42  ;;  %v1816_v28 = vmax.f32 %v1775_v63, 0.0  ;;  %v1678_v6 = vadd.f32 %v1677_v33, %v1577_v55  ;;  %v1777_v41 = vadd.f32 %v1776_v29, %v1676_v34  ;;  %v6284_v34 = vld [vmem:[#allocation11_spill] sm:$0xff] }
 0x1de   : > { %2856 = vmatmul.mubr.bf16.gmra.mxu0 %v3700_v30  ;;  %v1681_v0 = vpop.f32.mrf.mxu0  ;;  %v1591_v42 = vadd.f32 %v6283_v31, %v5202_v56  ;;  %v1264_v63 = vmax.f32 %v6284_v34, 0.0 }
 0x1df   : > { %3709 = vmatmul.mubr.msk.bf16.gmra.mxu1 %vm917_vm0, %v4105_v2  ;;  %v1782_v16 = vpop.f32.mrf.mxu1  ;;  %v5792_v52 = vadd.f32 %v1816_v28, %v1259_v10  ;;  %v1817_v46 = vmax.f32 %v1777_v41, 0.0  ;;  %v1682_v53 = vadd.f32 %v1681_v0, %v1581_v59  ;;  %v1779_v27 = vadd.f32 %v1778_v32, %v1678_v6  ;;  %v6285_v10 = vld [vmem:[#allocation17_spill] sm:$0xff] }
 0x1e0   : > { %v1683_v11 = vpop.f32.mrf.mxu0  ;;  %v1593_v59 = vadd.f32 %v6285_v10, %v5213_v58 }
 0x1e1   : > { %v1784_v7 = vpop.f32.mrf.mxu1  ;;  %v5797_v8 = vadd.f32 %v1817_v46, %v1260_v26  ;;  %v1818_v49 = vmax.f32 %v1779_v27, 0.0  ;;  %v1684_v23 = vadd.f32 %v1683_v11, %v1583_v39  ;;  %v1783_v25 = vadd.f32 %v1782_v16, %v1682_v53  ;;  %v6287_v39 = vld [vmem:[#allocation12_spill] sm:$0xff] }
 0x1e2   : > { %v1685_v20 = vpop.f32.mrf.mxu0  ;;  %v1265_v0 = vmax.f32 %v6287_v39, 0.0 }
 0x1e3   : > { %v1786_v50 = vpop.f32.mrf.mxu1  ;;  %v5802_v38 = vadd.f32 %v1818_v49, %v1261_v43  ;;  %v1819_v13 = vmax.f32 %v1783_v25, 0.0  ;;  %v1686_v37 = vadd.f32 %v1685_v20, %v1585_v61  ;;  %v1785_v22 = vadd.f32 %v1784_v7, %v1684_v23  ;;  %v6289_v49 = vld [vmem:[#allocation13_spill] sm:$0xff]  ;;  %v6291_v20 = vld [vmem:[#allocation14_spill] sm:$0xff] }
 0x1e4   : > { %v1687_v55 = vpop.f32.mrf.mxu0  ;;  %v1266_v23 = vmax.f32 %v6289_v49, 0.0 }
 0x1e5   : > { %v1788_v18 = vpop.f32.mrf.mxu1  ;;  %v5807_v29 = vadd.f32 %v1819_v13, %v1262_v54  ;;  %v1820_v30 = vmax.f32 %v1785_v22, 0.0  ;;  %v1688_v2 = vadd.f32 %v1687_v55, %v1587_v19  ;;  %v1787_v4 = vadd.f32 %v1786_v50, %v1686_v37 }
 0x1e6   : > { %v1691_v33 = vpop.f32.mrf.mxu0  ;;  %v1267_v50 = vmax.f32 %v6291_v20, 0.0 }
 0x1e7   : > { %v1792_v32 = vpop.f32.mrf.mxu1  ;;  %v5812_v28 = vadd.f32 %v1820_v30, %v1263_v15  ;;  %v1821_v6 = vmax.f32 %v1787_v4, 0.0  ;;  %v1692_v41 = vadd.f32 %v1691_v33, %v1591_v42  ;;  %v1789_v26 = vadd.f32 %v1788_v18, %v1688_v2 }
 0x1e8   : > { %v1693_v16 = vpop.f32.mrf.mxu0 }
 0x1e9   : > { %6286 = vst [vmem:[#allocation18_spill] sm:$0xff] %v5812_v28  ;;  %v1794_v46 = vpop.f32.mrf.mxu1  ;;  %v5815_v53 = vadd.f32 %v1821_v6, %v1264_v63  ;;  %v1822_v27 = vmax.f32 %v1789_v26, 0.0  ;;  %v1694_v43 = vadd.f32 %v1693_v16, %v1593_v59  ;;  %v1793_v61 = vadd.f32 %v1792_v32, %v1692_v41 }
 0x1ea   : > { %v1695_v11 = vpop.f32.mrf.mxu0 }
 0x1eb   : > { %6288 = vst [vmem:[#allocation19_spill] sm:$0xff] %v5815_v53  ;;  %v1796_v7 = vpop.f32.mrf.mxu1  ;;  %v5818_v25 = vadd.f32 %v1822_v27, %v1265_v0  ;;  %v1823_v9 = vmax.f32 %v1793_v61, 0.0  ;;  %v1795_v54 = vadd.f32 %v1794_v46, %v1694_v43 }
 0x1ec   : > { %v1696_v1 = vpop.f32.mrf.mxu0 }
 0x1ed   : > { %6290 = vst [vmem:[#allocation9_spill] sm:$0xff] %v5818_v25  ;;  %v1797_v19 = vpop.f32.mrf.mxu1  ;;  %v5821_v13 = vadd.f32 %v1823_v9, %v1266_v23  ;;  %v1824_v37 = vmax.f32 %v1795_v54, 0.0 }
 0x1ef   : > { %6292 = vst [vmem:[#allocation15_spill] sm:$0xff] %v5821_v13  ;;  %v5823_v22 = vadd.f32 %v1824_v37, %v1267_v50 }
 0x1f1   : > { %6293 = vst [vmem:[#allocation10_spill] sm:$0xff] %v5823_v22 }
 0x1f6   : > { %v2113_v51 = vpop.f32.mrf.mxu0 }
 0x1f7   : > { %v2214_v15 = vpop.f32.mrf.mxu1  ;;  %v2114_v31 = vadd.f32 %v2113_v51, %v5202_v56 }
 0x1f8   : > { %v2115_v42 = vpop.f32.mrf.mxu0 }
 0x1f9   : > { %v2216_v55 = vpop.f32.mrf.mxu1  ;;  %v5826_v18 = vadd.f32 %v2214_v15, %v2114_v31  ;;  %v2116_v30 = vadd.f32 %v2115_v42, %v5213_v58 }
 0x1fa   : > { %v2117_v2 = vpop.f32.mrf.mxu0 }
 0x1fb   : > { %v2218_v4 = vpop.f32.mrf.mxu1  ;;  %v5829_v34 = vadd.f32 %v2216_v55, %v2116_v30  ;;  %v2118_v63 = vadd.f32 %v2117_v2, %v5202_v56 }
 0x1fc   : > { %v2119_v10 = vpop.f32.mrf.mxu0 }
 0x1fd   : > { %v2220_v59 = vpop.f32.mrf.mxu1  ;;  %v5832_v33 = vadd.f32 %v2218_v4, %v2118_v63  ;;  %v2120_v32 = vadd.f32 %v2119_v10, %v5213_v58 }
 0x1fe   : > { %v2123_v6 = vpop.f32.mrf.mxu0 }
 0x1ff   : > { %v2224_v41 = vpop.f32.mrf.mxu1  ;;  %v5835_v26 = vadd.f32 %v2220_v59, %v2120_v32  ;;  %v2124_v39 = vadd.f32 %v2123_v6, %v5202_v56 }
 0x200   : > { %v2125_v0 = vpop.f32.mrf.mxu0 }
 0x201   : > { %v2226_v16 = vpop.f32.mrf.mxu1  ;;  %v2126_v46 = vadd.f32 %v2125_v0, %v5213_v58  ;;  %v5839_v27 = vadd.f32 %v2224_v41, %v2124_v39 }
 0x202   : > { %v2127_v43 = vpop.f32.mrf.mxu0 }
 0x203   : > { %v2228_v61 = vpop.f32.mrf.mxu1  ;;  %v2128_v11 = vadd.f32 %v2127_v43, %v5202_v56  ;;  %v5842_v7 = vadd.f32 %v2226_v16, %v2126_v46 }
 0x204   : > { %v2129_v49 = vpop.f32.mrf.mxu0 }
 0x205   : > { %v2230_v23 = vpop.f32.mrf.mxu1  ;;  %v2130_v9 = vadd.f32 %v2129_v49, %v5213_v58  ;;  %v5845_v54 = vadd.f32 %v2228_v61, %v2128_v11 }
 0x206   : > { %v2133_v1 = vpop.f32.mrf.mxu0 }
 0x207   : > { %v2234_v19 = vpop.f32.mrf.mxu1  ;;  %v2134_v20 = vadd.f32 %v2133_v1, %v5202_v56  ;;  %v5848_v50 = vadd.f32 %v2230_v23, %v2130_v9 }
 0x208   : > { %v2135_v37 = vpop.f32.mrf.mxu0 }
 0x209   : > { %v2236_v51 = vpop.f32.mrf.mxu1  ;;  %v2136_v15 = vadd.f32 %v2135_v37, %v5213_v58  ;;  %v5851_v31 = vadd.f32 %v2234_v19, %v2134_v20 }
 0x20a   : > { %v2137_v42 = vpop.f32.mrf.mxu0 }
 0x20b   : > { %v2238_v55 = vpop.f32.mrf.mxu1  ;;  %v2138_v30 = vadd.f32 %v2137_v42, %v5202_v56  ;;  %v5854_v2 = vadd.f32 %v2236_v51, %v2136_v15 }
 0x20c   : > { %v2139_v4 = vpop.f32.mrf.mxu0 }
 0x20d   : > { %v2240_v63 = vpop.f32.mrf.mxu1  ;;  %v2140_v10 = vadd.f32 %v2139_v4, %v5213_v58  ;;  %v5857_v59 = vadd.f32 %v2238_v55, %v2138_v30 }
 0x20e   : > { %v2143_v32 = vpop.f32.mrf.mxu0 }
 0x20f   : > { %v2244_v6 = vpop.f32.mrf.mxu1  ;;  %v2144_v41 = vadd.f32 %v2143_v32, %v5202_v56  ;;  %v5860_v39 = vadd.f32 %v2240_v63, %v2140_v10 }
 0x210   : > { %v2145_v0 = vpop.f32.mrf.mxu0 }
 0x211   : > { %v2246_v16 = vpop.f32.mrf.mxu1  ;;  %v2146_v46 = vadd.f32 %v2145_v0, %v5213_v58  ;;  %v5863_v43 = vadd.f32 %v2244_v6, %v2144_v41 }
 0x212   : > { %v2147_v61 = vpop.f32.mrf.mxu0 }
 0x213   : > { %v2248_v11 = vpop.f32.mrf.mxu1  ;;  %v2148_v49 = vadd.f32 %v2147_v61, %v5202_v56  ;;  %v5866_v23 = vadd.f32 %v2246_v16, %v2146_v46 }
 0x214   : > { %v2149_v9 = vpop.f32.mrf.mxu0 }
 0x215   : > { %v2250_v1 = vpop.f32.mrf.mxu1  ;;  %v2150_v19 = vadd.f32 %v2149_v9, %v5213_v58  ;;  %v5869_v20 = vadd.f32 %v2248_v11, %v2148_v49 }
 0x216   : > { %v2153_v37 = vpop.f32.mrf.mxu0 }
 0x217   : > { %v2254_v51 = vpop.f32.mrf.mxu1  ;;  %v2154_v15 = vadd.f32 %v2153_v37, %v5202_v56  ;;  %v5872_v42 = vadd.f32 %v2250_v1, %v2150_v19 }
 0x218   : > { %v2155_v55 = vpop.f32.mrf.mxu0 }
 0x219   : > { %v2256_v30 = vpop.f32.mrf.mxu1  ;;  %v2156_v4 = vadd.f32 %v2155_v55, %v5213_v58  ;;  %v5875_v63 = vadd.f32 %v2254_v51, %v2154_v15 }
 0x21a   : > { %v2157_v10 = vpop.f32.mrf.mxu0 }
 0x21b   : > { %v2258_v32 = vpop.f32.mrf.mxu1  ;;  %v2158_v6 = vadd.f32 %v2157_v10, %v5202_v56  ;;  %v5878_v41 = vadd.f32 %v2256_v30, %v2156_v4 }
 0x21c   : > { %v2159_v0 = vpop.f32.mrf.mxu0 }
 0x21d   : > { %v2260_v16 = vpop.f32.mrf.mxu1  ;;  %v2160_v46 = vadd.f32 %v2159_v0, %v5213_v58  ;;  %v5881_v61 = vadd.f32 %v2258_v32, %v2158_v6 }
 0x21e   : > { %v2163_v11 = vpop.f32.mrf.mxu0 }
 0x21f   : > { %v2264_v49 = vpop.f32.mrf.mxu1  ;;  %v2164_v9 = vadd.f32 %v2163_v11, %v5202_v56  ;;  %v5884_v1 = vadd.f32 %v2260_v16, %v2160_v46 }
 0x220   : > { %v2165_v19 = vpop.f32.mrf.mxu0 }
 0x221   : > { %v2266_v37 = vpop.f32.mrf.mxu1  ;;  %v2166_v51 = vadd.f32 %v2165_v19, %v5213_v58  ;;  %v5887_v15 = vadd.f32 %v2264_v49, %v2164_v9 }
 0x222   : > { %v2167_v55 = vpop.f32.mrf.mxu0 }
 0x223   : > { %v2268_v30 = vpop.f32.mrf.mxu1  ;;  %v2168_v4 = vadd.f32 %v2167_v55, %v5202_v56  ;;  %v5890_v10 = vadd.f32 %v2266_v37, %v2166_v51 }
 0x224   : > { %v2169_v32 = vpop.f32.mrf.mxu0 }
 0x225   : > { %v2270_v6 = vpop.f32.mrf.mxu1  ;;  %v2170_v0 = vadd.f32 %v2169_v32, %v5213_v58  ;;  %v5893_v22 = vadd.f32 %v2268_v30, %v2168_v4 }
 0x226   : > { %v2173_v16 = vpop.f32.mrf.mxu0 }
 0x227   : > { %6294 = vst [vmem:[#allocation16_spill] sm:$0xff] %v5893_v22  ;;  %v2274_v46 = vpop.f32.mrf.mxu1  ;;  %v2174_v11 = vadd.f32 %v2173_v16, %v5202_v56  ;;  %v5896_v13 = vadd.f32 %v2270_v6, %v2170_v0 }
 0x228   : > { %v2175_v49 = vpop.f32.mrf.mxu0 }
 0x229   : > { %v2276_v9 = vpop.f32.mrf.mxu1  ;;  %v2176_v19 = vadd.f32 %v2175_v49, %v5213_v58  ;;  %v5899_v25 = vadd.f32 %v2274_v46, %v2174_v11 }
 0x22a   : > { %v2177_v37 = vpop.f32.mrf.mxu0 }
 0x22b   : > { %v2278_v51 = vpop.f32.mrf.mxu1  ;;  %v5901_v55 = vadd.f32 %v2276_v9, %v2176_v19 }
 0x22c   : > { %v2178_v53 = vpop.f32.mrf.mxu0 }
 0x22d   : > { %v2279_v32 = vpop.f32.mrf.mxu1 }
 0x22e   : > { %v2315_v30 = vpop.f32.mrf.mxu0 }
 0x22f   : > { %v2316_v4 = vadd.f32 %v2315_v30, %v5826_v18 }
 0x230   : > { %v2317_v28 = vpop.f32.mrf.mxu0 }
 0x231   : > { %v2382_v22 = vmax.f32 %v2316_v4, 0.0  ;;  %v2318_v6 = vadd.f32 %v2317_v28, %v5829_v34 }
 0x232   : > { %v2319_v0 = vpop.f32.mrf.mxu0 }
 0x233   : > { %v5906_v16 = vadd.f32 %v2382_v22, %v5662_v17  ;;  %v2383_v49 = vmax.f32 %v2318_v6, 0.0  ;;  %v2320_v46 = vadd.f32 %v2319_v0, %v5832_v33 }
 0x234   : > { %v2321_v11 = vpop.f32.mrf.mxu0 }
 0x235   : > { %v5910_v9 = vadd.f32 %v2383_v49, %v5668_v24  ;;  %v2384_v53 = vmax.f32 %v2320_v46, 0.0  ;;  %v2322_v19 = vadd.f32 %v2321_v11, %v5835_v26 }
 0x236   : > { %v2325_v37 = vpop.f32.mrf.mxu0 }
 0x237   : > { %v5913_v18 = vpop.f32.mrf.mxu1  ;;  %v5916_v51 = vadd.f32 %v2384_v53, %v5674_v60  ;;  %v2385_v28 = vmax.f32 %v2322_v19, 0.0  ;;  %v2326_v17 = vadd.f32 %v2325_v37, %v5839_v27 }
 0x238   : > { %v2327_v22 = vpop.f32.mrf.mxu0 }
 0x239   : > { %v5919_v34 = vpop.f32.mrf.mxu1  ;;  %v5922_v33 = vadd.f32 %v2385_v28, %v5685_v21  ;;  %v2386_v24 = vmax.f32 %v2326_v17, 0.0  ;;  %v2328_v32 = vadd.f32 %v2327_v22, %v5842_v7 }
 0x23a   : > { %v2329_v30 = vpop.f32.mrf.mxu0 }
 0x23b   : > { %v5925_v26 = vpop.f32.mrf.mxu1  ;;  %v5928_v4 = vadd.f32 %v2386_v24, %v5693_v48  ;;  %v2387_v60 = vmax.f32 %v2328_v32, 0.0  ;;  %v2330_v6 = vadd.f32 %v2329_v30, %v5845_v54 }
 0x23c   : > { %v2331_v0 = vpop.f32.mrf.mxu0 }
 0x23d   : > { %v5931_v27 = vpop.f32.mrf.mxu1  ;;  %v5934_v49 = vadd.f32 %v2387_v60, %v5699_v14  ;;  %v2388_v21 = vmax.f32 %v2330_v6, 0.0  ;;  %v2332_v46 = vadd.f32 %v2331_v0, %v5848_v50 }
 0x23e   : > { %v2335_v11 = vpop.f32.mrf.mxu0 }
 0x23f   : > { %v5937_v7 = vpop.f32.mrf.mxu1  ;;  %v5940_v53 = vadd.f32 %v2388_v21, %v5705_v45  ;;  %v2389_v48 = vmax.f32 %v2332_v46, 0.0  ;;  %v2336_v19 = vadd.f32 %v2335_v11, %v5851_v31 }
 0x240   : > { %v2337_v37 = vpop.f32.mrf.mxu0 }
 0x241   : > { %v5943_v54 = vpop.f32.mrf.mxu1  ;;  %v5946_v28 = vadd.f32 %v2389_v48, %v5716_v36  ;;  %v2390_v14 = vmax.f32 %v2336_v19, 0.0  ;;  %v2338_v17 = vadd.f32 %v2337_v37, %v5854_v2 }
 0x242   : > { %v2339_v22 = vpop.f32.mrf.mxu0 }
 0x243   : > { %v5949_v50 = vpop.f32.mrf.mxu1  ;;  %v5952_v24 = vadd.f32 %v2390_v14, %v5724_v12  ;;  %v2391_v45 = vmax.f32 %v2338_v17, 0.0  ;;  %v2340_v32 = vadd.f32 %v2339_v22, %v5857_v59 }
 0x244   : > { %v2341_v30 = vpop.f32.mrf.mxu0 }
 0x245   : > { %v5955_v31 = vpop.f32.mrf.mxu1  ;;  %v5958_v60 = vadd.f32 %v2391_v45, %v5730_v62  ;;  %v2392_v36 = vmax.f32 %v2340_v32, 0.0  ;;  %v2342_v6 = vadd.f32 %v2341_v30, %v5860_v39 }
 0x246   : > { %v2345_v0 = vpop.f32.mrf.mxu0 }
 0x247   : > { %v5961_v2 = vpop.f32.mrf.mxu1  ;;  %v5964_v21 = vadd.f32 %v2392_v36, %v5741_v44  ;;  %v2393_v12 = vmax.f32 %v2342_v6, 0.0  ;;  %v2346_v46 = vadd.f32 %v2345_v0, %v5863_v43 }
 0x248   : > { %v2347_v11 = vpop.f32.mrf.mxu0 }
 0x249   : > { %v5967_v59 = vpop.f32.mrf.mxu1  ;;  %v5970_v48 = vadd.f32 %v2393_v12, %v5754_v5  ;;  %v2394_v62 = vmax.f32 %v2346_v46, 0.0  ;;  %v2348_v19 = vadd.f32 %v2347_v11, %v5866_v23 }
 0x24a   : > { %v2349_v37 = vpop.f32.mrf.mxu0 }
 0x24b   : > { %v5973_v39 = vpop.f32.mrf.mxu1  ;;  %v5976_v14 = vadd.f32 %v2394_v62, %v5759_v57  ;;  %v2395_v44 = vmax.f32 %v2348_v19, 0.0  ;;  %v2350_v17 = vadd.f32 %v2349_v37, %v5869_v20 }
 0x24c   : > { %v2351_v22 = vpop.f32.mrf.mxu0 }
 0x24d   : > { %v5979_v43 = vpop.f32.mrf.mxu1  ;;  %v5982_v45 = vadd.f32 %v2395_v44, %v5765_v3  ;;  %v2396_v5 = vmax.f32 %v2350_v17, 0.0  ;;  %v2352_v32 = vadd.f32 %v2351_v22, %v5872_v42 }
 0x24e   : > { %v2355_v30 = vpop.f32.mrf.mxu0 }
 0x24f   : > { %v5985_v23 = vpop.f32.mrf.mxu1  ;;  %v5988_v36 = vadd.f32 %v2396_v5, %v5771_v40  ;;  %v2397_v57 = vmax.f32 %v2352_v32, 0.0  ;;  %v2356_v6 = vadd.f32 %v2355_v30, %v5875_v63 }
 0x250   : > { %v2357_v0 = vpop.f32.mrf.mxu0 }
 0x251   : > { %v5991_v20 = vpop.f32.mrf.mxu1  ;;  %v5994_v12 = vadd.f32 %v2397_v57, %v5781_v35  ;;  %v2398_v3 = vmax.f32 %v2356_v6, 0.0  ;;  %v2358_v46 = vadd.f32 %v2357_v0, %v5878_v41 }
 0x252   : > { %v2359_v11 = vpop.f32.mrf.mxu0 }
 0x253   : > { %v5997_v42 = vpop.f32.mrf.mxu1  ;;  %v6000_v62 = vadd.f32 %v2398_v3, %v5786_v47  ;;  %v2399_v40 = vmax.f32 %v2358_v46, 0.0  ;;  %v2360_v19 = vadd.f32 %v2359_v11, %v5881_v61  ;;  %v6296_v46 = vld [vmem:[#allocation16_spill] sm:$0xff] }
 0x254   : > { %v2361_v37 = vpop.f32.mrf.mxu0 }
 0x255   : > { %v6003_v63 = vpop.f32.mrf.mxu1  ;;  %v6006_v44 = vadd.f32 %v2399_v40, %v5792_v52  ;;  %v2400_v35 = vmax.f32 %v2360_v19, 0.0  ;;  %v2362_v17 = vadd.f32 %v2361_v37, %v5884_v1  ;;  %v6297_v19 = vld [vmem:[#allocation18_spill] sm:$0xff] }
 0x256   : > { %v2365_v22 = vpop.f32.mrf.mxu0 }
 0x257   : > { %v6009_v41 = vpop.f32.mrf.mxu1  ;;  %v6012_v5 = vadd.f32 %v2400_v35, %v5797_v8  ;;  %v2401_v47 = vmax.f32 %v2362_v17, 0.0  ;;  %v2366_v32 = vadd.f32 %v2365_v22, %v5887_v15  ;;  %v6299_v22 = vld [vmem:[#allocation19_spill] sm:$0xff] }
 0x258   : > { %v2367_v30 = vpop.f32.mrf.mxu0 }
 0x259   : > { %v6015_v61 = vpop.f32.mrf.mxu1  ;;  %v6018_v57 = vadd.f32 %v2401_v47, %v5802_v38  ;;  %v2402_v52 = vmax.f32 %v2366_v32, 0.0  ;;  %v2368_v6 = vadd.f32 %v2367_v30, %v5890_v10 }
 0x25a   : > { %v2369_v0 = vpop.f32.mrf.mxu0 }
 0x25b   : > { %v6021_v1 = vpop.f32.mrf.mxu1  ;;  %v6024_v3 = vadd.f32 %v2402_v52, %v5807_v29  ;;  %v2403_v8 = vmax.f32 %v2368_v6, 0.0  ;;  %v2370_v11 = vadd.f32 %v2369_v0, %v6296_v46  ;;  %v6301_v6 = vld [vmem:[#allocation9_spill] sm:$0xff] }
 0x25c   : > { %v2371_v40 = vpop.f32.mrf.mxu0 }
 0x25d   : > { %6295 = vst [vmem:[#allocation11_spill] sm:$0xff] %v6024_v3  ;;  %v6027_v15 = vpop.f32.mrf.mxu1  ;;  %v6030_v37 = vadd.f32 %v2403_v8, %v6297_v19  ;;  %v2404_v38 = vmax.f32 %v2370_v11, 0.0  ;;  %v2372_v35 = vadd.f32 %v2371_v40, %v5896_v13  ;;  %v6303_v40 = vld [vmem:[#allocation15_spill] sm:$0xff] }
 0x25e   : > { %v2375_v17 = vpop.f32.mrf.mxu0 }
 0x25f   : > { %6298 = vst [vmem:[#allocation17_spill] sm:$0xff] %v6030_v37  ;;  %v6033_v10 = vpop.f32.mrf.mxu1  ;;  %v6036_v47 = vadd.f32 %v2404_v38, %v6299_v22  ;;  %v2405_v29 = vmax.f32 %v2372_v35, 0.0  ;;  %v2376_v32 = vadd.f32 %v2375_v17, %v5899_v25  ;;  %v6305_v25 = vld [vmem:[#allocation10_spill] sm:$0xff] }
 0x260   : > { %v2377_v30 = vpop.f32.mrf.mxu0 }
 0x261   : > { %6300 = vst [vmem:[#allocation12_spill] sm:$0xff] %v6036_v47  ;;  %v6039_v52 = vpop.f32.mrf.mxu1  ;;  %v6042_v0 = vadd.f32 %v2405_v29, %v6301_v6  ;;  %v2406_v8 = vmax.f32 %v2376_v32, 0.0  ;;  %v2378_v46 = vadd.f32 %v2377_v30, %v5901_v55  ;;  %v2697_v55 = vadd.f32 %v5913_v18, %v5202_v56 }
 0x262   : > { %v2379_v13 = vpop.f32.mrf.mxu0 }
 0x263   : > { %6302 = vst [vmem:[#allocation13_spill] sm:$0xff] %v6042_v0  ;;  %v6045_v11 = vpop.f32.mrf.mxu1  ;;  %v6048_v19 = vadd.f32 %v2406_v8, %v6303_v40  ;;  %v2407_v38 = vmax.f32 %v2378_v46, 0.0  ;;  %v2699_v8 = vadd.f32 %v5919_v34, %v5213_v58 }
 0x264   : > { %v2380_v35 = vpop.f32.mrf.mxu0 }
 0x265   : > { %6304 = vst [vmem:[#allocation14_spill] sm:$0xff] %v6048_v19  ;;  %v6050_v22 = vpop.f32.mrf.mxu1  ;;  %v6053_v17 = vadd.f32 %v2407_v38, %v6305_v25  ;;  %v2701_v38 = vadd.f32 %v5925_v26, %v5202_v56  ;;  %v2707_v26 = vadd.f32 %v5937_v7, %v5202_v56  ;;  %v2711_v7 = vadd.f32 %v5949_v50, %v5202_v56 }
 0x267   : > { %6306 = vst [vmem:[#allocation16_spill] sm:$0xff] %v6053_v17  ;;  %v6055_v47 = vpop.f32.mrf.mxu1 }
 0x268   : > { %6307 = vst [vmem:[#allocation18_spill] sm:$0xff] %v6055_v47 }
 0x269   : > { %v6057_v29 = vpop.f32.mrf.mxu1 }
 0x26a   : > { %6308 = vst [vmem:[#allocation19_spill] sm:$0xff] %v6057_v29 }
 0x26b   : > { %v2760_v32 = vpop.f32.mrf.mxu1 }
 0x26d   : > { %v2761_v6 = vpop.f32.mrf.mxu1 }
 0x26e   : > { %v2797_v30 = vpop.f32.mrf.mxu0  ;;  %v2703_v6 = vadd.f32 %v5931_v27, %v5213_v58 }
 0x26f   : > { %v2898_v13 = vpop.f32.mrf.mxu1  ;;  %v2798_v46 = vadd.f32 %v2797_v30, %v2697_v55 }
 0x270   : > { %v2799_v40 = vpop.f32.mrf.mxu0 }
 0x271   : > { %v2900_v35 = vpop.f32.mrf.mxu1  ;;  %v2899_v25 = vadd.f32 %v2898_v13, %v2798_v46  ;;  %v2800_v17 = vadd.f32 %v2799_v40, %v2699_v8  ;;  %v2709_v46 = vadd.f32 %v5943_v54, %v5213_v58 }
 0x272   : > { %v2801_v19 = vpop.f32.mrf.mxu0 }
 0x273   : > { %v2902_v32 = vpop.f32.mrf.mxu1  ;;  %v2965_v18 = vmax.f32 %v2899_v25, 0.0  ;;  %v2901_v0 = vadd.f32 %v2900_v35, %v2800_v17  ;;  %v2802_v37 = vadd.f32 %v2801_v19, %v2701_v38 }
 0x274   : > { %v2803_v29 = vpop.f32.mrf.mxu0 }
 0x275   : > { %v2904_v47 = vpop.f32.mrf.mxu1  ;;  %v2991_v34 = vadd.f32 %v2965_v18, %v5906_v16  ;;  %v2966_v55 = vmax.f32 %v2901_v0, 0.0  ;;  %v2903_v30 = vadd.f32 %v2902_v32, %v2802_v37  ;;  %v2804_v3 = vadd.f32 %v2803_v29, %v2703_v6 }
 0x276   : > { %v2807_v13 = vpop.f32.mrf.mxu0 }
 0x277   : > { %v2908_v8 = vpop.f32.mrf.mxu1  ;;  %v2992_v27 = vadd.f32 %v2966_v55, %v5910_v9  ;;  %v2967_v17 = vmax.f32 %v2903_v30, 0.0  ;;  %v2905_v19 = vadd.f32 %v2904_v47, %v2804_v3  ;;  %v3017_v40 = vmul.f32 0.25, %v2991_v34 }
 0x278   : > { %v2808_v35 = vadd.f32 %v2807_v13, %v2707_v26  ;;  %v2809_v38 = vpop.f32.mrf.mxu0  ;;  %v2713_v9 = vadd.f32 %v5955_v31, %v5213_v58  ;;  %v2717_v34 = vadd.f32 %v5961_v2, %v5202_v56 }
 0x279   : > { %v2910_v16 = vpop.f32.mrf.mxu1  ;;  %v3018_v0 = vmul.f32 0.25, %v2992_v27  ;;  %v2993_v37 = vadd.f32 %v2967_v17, %v5916_v51  ;;  %v2968_v29 = vmax.f32 %v2905_v19, 0.0  ;;  %v2810_v25 = vadd.f32 %v2809_v38, %v2709_v46 }
 0x27a   : > { %v2909_v32 = vadd.f32 %v2908_v8, %v2808_v35  ;;  %v2811_v6 = vpop.f32.mrf.mxu0 }
 0x27b   : > { %v2912_v18 = vpop.f32.mrf.mxu1  ;;  %v3729_v54 = vpack.c.bf16 %v3018_v0, %v3017_v40  ;;  %v2994_v3 = vadd.f32 %v2968_v29, %v5922_v33  ;;  %v2911_v47 = vadd.f32 %v2910_v16, %v2810_v25  ;;  %v2812_v51 = vadd.f32 %v2811_v6, %v2711_v7 }
 0x27c   : > { %v2969_v55 = vmax.f32 %v2909_v32, 0.0  ;;  %v2813_v30 = vpop.f32.mrf.mxu0  ;;  %v3019_v50 = vmul.f32 0.25, %v2993_v37  ;;  %v2719_v33 = vadd.f32 %v5967_v59, %v5213_v58  ;;  %v2723_v6 = vadd.f32 %v5979_v43, %v5213_v58 }
 0x27d   : > { %v2914_v26 = vpop.f32.mrf.mxu1  ;;  %3123 = vst [vmem:[%s6082_s26] sm:$0xff] %v3729_v54  ;;  %v3020_v13 = vmul.f32 0.25, %v2994_v3  ;;  %v2970_v8 = vmax.f32 %v2911_v47, 0.0  ;;  %v2814_v31 = vadd.f32 %v2813_v30, %v2713_v9  ;;  %v2913_v27 = vadd.f32 %v2912_v18, %v2812_v51 }
 0x27e   : > { %v2995_v46 = vadd.f32 %v2969_v55, %v5928_v4  ;;  %v2817_v2 = vpop.f32.mrf.mxu0  ;;  %v2721_v4 = vadd.f32 %v5973_v39, %v5202_v56 }
 0x27f   : > { %v2918_v17 = vpop.f32.mrf.mxu1  ;;  %v3730_v19 = vpack.c.bf16 %v3020_v13, %v3019_v50  ;;  %v2996_v40 = vadd.f32 %v2970_v8, %v5934_v49  ;;  %v2915_v35 = vadd.f32 %v2914_v26, %v2814_v31  ;;  %v2818_v38 = vadd.f32 %v2817_v2, %v2717_v34 }
 0x280   : > { %v3021_v16 = vmul.f32 0.25, %v2995_v46  ;;  %v2971_v0 = vmax.f32 %v2913_v27, 0.0  ;;  %v2819_v37 = vpop.f32.mrf.mxu0 }
 0x281   : > { %v2920_v29 = vpop.f32.mrf.mxu1  ;;  %3124 = vst [vmem:[%s6082_s26 + $0x8] sm:$0xff] %v3730_v19  ;;  %v3022_v25 = vmul.f32 0.25, %v2996_v40  ;;  %v2972_v7 = vmax.f32 %v2915_v35, 0.0  ;;  %v2919_v32 = vadd.f32 %v2918_v17, %v2818_v38  ;;  %v2820_v59 = vadd.f32 %v2819_v37, %v2719_v33 }
 0x282   : > { %v2997_v49 = vadd.f32 %v2971_v0, %v5940_v53  ;;  %v2821_v18 = vpop.f32.mrf.mxu0  ;;  %v2727_v53 = vadd.f32 %v5985_v23, %v5202_v56  ;;  %v2731_v17 = vadd.f32 %v5997_v42, %v5202_v56 }
 0x283   : > { %v2922_v9 = vpop.f32.mrf.mxu1  ;;  %v3731_v54 = vpack.c.bf16 %v3022_v25, %v3021_v16  ;;  %v2998_v3 = vadd.f32 %v2972_v7, %v5946_v28  ;;  %v2973_v47 = vmax.f32 %v2919_v32, 0.0  ;;  %v2921_v34 = vadd.f32 %v2920_v29, %v2820_v59 }
 0x284   : > { %v3023_v55 = vmul.f32 0.25, %v2997_v49  ;;  %v2822_v51 = vadd.f32 %v2821_v18, %v2721_v4  ;;  %v2823_v30 = vpop.f32.mrf.mxu0  ;;  %v2729_v28 = vadd.f32 %v5991_v20, %v5213_v58  ;;  %v2733_v20 = vadd.f32 %v6003_v63, %v5213_v58 }
 0x285   : > { %v2924_v26 = vpop.f32.mrf.mxu1  ;;  %3125 = vst [vmem:[%s6082_s26 + $0x10] sm:$0xff] %v3731_v54  ;;  %v3024_v50 = vmul.f32 0.25, %v2998_v3  ;;  %v2999_v39 = vadd.f32 %v2973_v47, %v5952_v24  ;;  %v2974_v13 = vmax.f32 %v2921_v34, 0.0  ;;  %v2824_v43 = vadd.f32 %v2823_v30, %v2723_v6 }
 0x286   : > { %v2923_v8 = vadd.f32 %v2922_v9, %v2822_v51  ;;  %v2827_v31 = vpop.f32.mrf.mxu0  ;;  %v2739_v47 = vadd.f32 %v6015_v61, %v5213_v58 }
 0x287   : > { %v2928_v33 = vpop.f32.mrf.mxu1  ;;  %v3732_v46 = vpack.c.bf16 %v3024_v50, %v3023_v55  ;;  %v3000_v27 = vadd.f32 %v2974_v13, %v5958_v60  ;;  %v2925_v2 = vadd.f32 %v2924_v26, %v2824_v43  ;;  %v2828_v19 = vadd.f32 %v2827_v31, %v2727_v53 }
 0x288   : > { %v2975_v24 = vmax.f32 %v2923_v8, 0.0  ;;  %v2829_v40 = vpop.f32.mrf.mxu0  ;;  %v3025_v38 = vmul.f32 0.25, %v2999_v39 }
 0x289   : > { %v2930_v35 = vpop.f32.mrf.mxu1  ;;  %3126 = vst [vmem:[%s6082_s26 + $0x18] sm:$0xff] %v3732_v46  ;;  %v3026_v23 = vmul.f32 0.25, %v3000_v27  ;;  %v2976_v16 = vmax.f32 %v2925_v2, 0.0  ;;  %v2830_v0 = vadd.f32 %v2829_v40, %v2729_v28  ;;  %v2929_v60 = vadd.f32 %v2928_v33, %v2828_v19 }
 0x28a   : > { %v3001_v37 = vadd.f32 %v2975_v24, %v5964_v21  ;;  %v2831_v29 = vpop.f32.mrf.mxu0  ;;  %v2737_v21 = vadd.f32 %v6009_v41, %v5202_v56  ;;  %v2747_v24 = vadd.f32 %v6033_v10, %v5202_v56 }
 0x28b   : > { %v2932_v25 = vpop.f32.mrf.mxu1  ;;  %v3733_v7 = vpack.c.bf16 %v3026_v23, %v3025_v38  ;;  %v3002_v42 = vadd.f32 %v2976_v16, %v5970_v48  ;;  %v2931_v32 = vadd.f32 %v2930_v35, %v2830_v0  ;;  %v2832_v59 = vadd.f32 %v2831_v29, %v2731_v17 }
 0x28c   : > { %v3027_v4 = vmul.f32 0.25, %v3001_v37  ;;  %v2977_v6 = vmax.f32 %v2929_v60, 0.0  ;;  %v2833_v49 = vpop.f32.mrf.mxu0 }
 0x28d   : > { %v2934_v18 = vpop.f32.mrf.mxu1  ;;  %3127 = vst [vmem:[%s6082_s26 + $0x20] sm:$0xff] %v3733_v7  ;;  %v3028_v9 = vmul.f32 0.25, %v3002_v42  ;;  %v2978_v54 = vmax.f32 %v2931_v32, 0.0  ;;  %v2933_v3 = vadd.f32 %v2932_v25, %v2832_v59  ;;  %v2834_v63 = vadd.f32 %v2833_v49, %v2733_v20 }
 0x28e   : > { %v3003_v48 = vadd.f32 %v2977_v6, %v5976_v14  ;;  %v2837_v34 = vpop.f32.mrf.mxu0  ;;  %v2741_v14 = vadd.f32 %v6021_v1, %v5202_v56 }
 0x28f   : > { %v2938_v55 = vpop.f32.mrf.mxu1  ;;  %v3734_v51 = vpack.c.bf16 %v3028_v9, %v3027_v4  ;;  %v3004_v30 = vadd.f32 %v2978_v54, %v5982_v45  ;;  %v2979_v26 = vmax.f32 %v2933_v3, 0.0  ;;  %v2935_v50 = vadd.f32 %v2934_v18, %v2834_v63 }
 0x290   : > { %v3029_v39 = vmul.f32 0.25, %v3003_v48  ;;  %v2838_v13 = vadd.f32 %v2837_v34, %v2737_v21  ;;  %v2839_v43 = vpop.f32.mrf.mxu0  ;;  %v2743_v45 = vadd.f32 %v6027_v15, %v5213_v58  ;;  %v2749_v15 = vadd.f32 %v6039_v52, %v5213_v58 }
 0x291   : > { %v2940_v53 = vpop.f32.mrf.mxu1  ;;  %3128 = vst [vmem:[%s6082_s26 + $0x28] sm:$0xff] %v3734_v51  ;;  %v3030_v8 = vmul.f32 0.25, %v3004_v30  ;;  %v3005_v41 = vadd.f32 %v2979_v26, %v5988_v36  ;;  %v2980_v31 = vmax.f32 %v2935_v50, 0.0  ;;  %v2840_v61 = vadd.f32 %v2839_v43, %v2739_v47  ;;  %v6309_v26 = vld [vmem:[#allocation11_spill] sm:$0xff] }
 0x292   : > { %v2939_v33 = vadd.f32 %v2938_v55, %v2838_v13  ;;  %v2841_v28 = vpop.f32.mrf.mxu0  ;;  %v2753_v18 = vadd.f32 %v6050_v22, %v5213_v58 }
 0x293   : > { %v2942_v46 = vpop.f32.mrf.mxu1  ;;  %v3735_v27 = vpack.c.bf16 %v3030_v8, %v3029_v39  ;;  %v3006_v2 = vadd.f32 %v2980_v31, %v5994_v12  ;;  %v2941_v17 = vadd.f32 %v2940_v53, %v2840_v61  ;;  %v2842_v19 = vadd.f32 %v2841_v28, %v2741_v14  ;;  %v6312_v31 = vld [vmem:[#allocation17_spill] sm:$0xff] }
 0x294   : > { %v2981_v36 = vmax.f32 %v2939_v33, 0.0  ;;  %v2843_v40 = vpop.f32.mrf.mxu0  ;;  %v3031_v38 = vmul.f32 0.25, %v3005_v41 }
 0x295   : > { %v2944_v35 = vpop.f32.mrf.mxu1  ;;  %3129 = vst [vmem:[%s6082_s26 + $0x30] sm:$0xff] %v3735_v27  ;;  %v3032_v1 = vmul.f32 0.25, %v3006_v2  ;;  %v2982_v23 = vmax.f32 %v2941_v17, 0.0  ;;  %v2844_v16 = vadd.f32 %v2843_v40, %v2743_v45  ;;  %v2943_v12 = vadd.f32 %v2942_v46, %v2842_v19 }
 0x296   : > { %v3007_v0 = vadd.f32 %v2981_v36, %v6000_v62  ;;  %v2847_v20 = vpop.f32.mrf.mxu0  ;;  %v2751_v62 = vadd.f32 %v6045_v11, %v5202_v56 }
 0x297   : > { %v2948_v37 = vpop.f32.mrf.mxu1  ;;  %v3736_v60 = vpack.c.bf16 %v3032_v1, %v3031_v38  ;;  %v3008_v10 = vadd.f32 %v2982_v23, %v6006_v44  ;;  %v2945_v29 = vadd.f32 %v2944_v35, %v2844_v16  ;;  %v2848_v25 = vadd.f32 %v2847_v20, %v2747_v24  ;;  %v6313_v24 = vld [vmem:[#allocation12_spill] sm:$0xff]  ;;  %v6314_v38 = vld [vmem:[#allocation13_spill] sm:$0xff] }
 0x298   : > { %v3033_v7 = vmul.f32 0.25, %v3007_v0  ;;  %v2983_v42 = vmax.f32 %v2943_v12, 0.0  ;;  %v2849_v32 = vpop.f32.mrf.mxu0 }
 0x299   : > { %v2950_v59 = vpop.f32.mrf.mxu1  ;;  %3130 = vst [vmem:[%s6082_s26 + $0x38] sm:$0xff] %v3736_v60  ;;  %v3034_v4 = vmul.f32 0.25, %v3008_v10  ;;  %v2984_v6 = vmax.f32 %v2945_v29, 0.0  ;;  %v2949_v49 = vadd.f32 %v2948_v37, %v2848_v25  ;;  %v2850_v52 = vadd.f32 %v2849_v32, %v2749_v15  ;;  %v6315_v60 = vld [vmem:[#allocation14_spill] sm:$0xff]  ;;  %v6316_v25 = vld [vmem:[#allocation16_spill] sm:$0xff] }
 0x29a   : > { %v3009_v44 = vadd.f32 %v2983_v42, %v6012_v5  ;;  %v2851_v9 = vpop.f32.mrf.mxu0  ;;  %v6310_v5 = vld [vmem:[#allocation18_spill] sm:$0xff] }
 0x29b   : > { %v2952_v54 = vpop.f32.mrf.mxu1  ;;  %v3737_v3 = vpack.c.bf16 %v3034_v4, %v3033_v7  ;;  %v3010_v63 = vadd.f32 %v2984_v6, %v6018_v57  ;;  %v2985_v21 = vmax.f32 %v2949_v49, 0.0  ;;  %v2951_v47 = vadd.f32 %v2950_v59, %v2850_v52  ;;  %v6311_v57 = vld [vmem:[#allocation19_spill] sm:$0xff]  ;;  %v3203_v6 = vld [vmem:[%s6082_s26 + $0x8] sm:$0xff] (%p4366_p9)  ;;  %v3205_v49 = vld [vmem:[%s6082_s26 + $0x10] sm:$0xff] (%p4366_p9) }
 0x29c   : > { %v3035_v48 = vmul.f32 0.25, %v3009_v44  ;;  %v2852_v34 = vadd.f32 %v2851_v9, %v2751_v62  ;;  %v2853_v55 = vpop.f32.mrf.mxu0  ;;  %v2757_v39 = vadd.f32 %v6310_v5, %v5202_v56  ;;  %v2759_v8 = vadd.f32 %v6311_v57, %v5213_v58  ;;  %v3201_v4 = vld [vmem:[%s6082_s26] sm:$0xff] (%p4366_p9)  ;;  %v3207_v52 = vld [vmem:[%s6082_s26 + $0x18] sm:$0xff] (%p4366_p9)  ;;  %3204 = vst [vmem:[%s3148_s21 + $0x10] sm:$0xff] (%p4366_p9), %v3203_v6  ;;  %3206 = vst [vmem:[%s3148_s21 + $0x20] sm:$0xff] (%p4366_p9), %v3205_v49 }
 0x29d   : > { %v2954_v51 = vpop.f32.mrf.mxu1  ;;  %3131 = vst [vmem:[%s6082_s26 + $0x40] sm:$0xff] %v3737_v3  ;;  %v3036_v30 = vmul.f32 0.25, %v3010_v63  ;;  %v3011_v11 = vadd.f32 %v2985_v21, %v6309_v26  ;;  %v2986_v50 = vmax.f32 %v2951_v47, 0.0  ;;  %v2854_v22 = vadd.f32 %v2853_v55, %v2753_v18  ;;  %v3209_v62 = vld [vmem:[%s6082_s26 + $0x20] sm:$0xff] (%p4366_p9)  ;;  %v3211_v18 = vld [vmem:[%s6082_s26 + $0x28] sm:$0xff] (%p4366_p9)  ;;  %3202 = vst [vmem:[%s3148_s21] sm:$0xff] (%p4366_p9), %v3201_v4 }
 0x29e   : > { %v2953_v13 = vadd.f32 %v2952_v54, %v2852_v34  ;;  %v2857_v43 = vpop.f32.mrf.mxu0  ;;  %3208 = vst [vmem:[%s3148_s21 + $0x30] sm:$0xff] (%p4366_p9), %v3207_v52  ;;  %3210 = vst [vmem:[%s3148_s21 + $0x40] sm:$0xff] (%p4366_p9), %v3209_v62  ;;  %v3213_v44 = vld [vmem:[%s6082_s26 + $0x30] sm:$0xff] (%p4366_p9) }
 0x29f   : > { %v2958_v53 = vpop.f32.mrf.mxu1  ;;  %v3738_v41 = vpack.c.bf16 %v3036_v30, %v3035_v48  ;;  %v3012_v61 = vadd.f32 %v2986_v50, %v6312_v31  ;;  %v2955_v14 = vadd.f32 %v2954_v51, %v2854_v22  ;;  %v2858_v28 = vadd.f32 %v2857_v43, %v2757_v39  ;;  %3212 = vst [vmem:[%s3148_s21 + $0x50] sm:$0xff] (%p4366_p9), %v3211_v18 }
 0x2a0   : > { %v2987_v33 = vmax.f32 %v2953_v13, 0.0  ;;  %v2859_v46 = vpop.f32.mrf.mxu0  ;;  %v3037_v27 = vmul.f32 0.25, %v3011_v11  ;;  %v3215_v9 = vld [vmem:[%s6082_s26 + $0x38] sm:$0xff] (%p4366_p9)  ;;  %3214 = vst [vmem:[%s3148_s21 + $0x60] sm:$0xff] (%p4366_p9), %v3213_v44 }
 0x2a1   : > { %v2960_v45 = vpop.f32.mrf.mxu1  ;;  %3132 = vst [vmem:[%s6082_s26 + $0x48] sm:$0xff] %v3738_v41  ;;  %v3038_v2 = vmul.f32 0.25, %v3012_v61  ;;  %v2988_v17 = vmax.f32 %v2955_v14, 0.0  ;;  %v2860_v56 = vadd.f32 %v2859_v46, %v2759_v8  ;;  %v2959_v19 = vadd.f32 %v2958_v53, %v2858_v28  ;;  %3216 = vst [vmem:[%s3148_s21 + $0x70] sm:$0xff] (%p4366_p9), %v3215_v9 }
 0x2a2   : > { %v3013_v36 = vadd.f32 %v2987_v33, %v6313_v24  ;;  %v2861_v40 = vpop.f32.mrf.mxu0 }
 0x2a3   : > { %v2962_v58 = vpop.f32.mrf.mxu1  ;;  %v3739_v35 = vpack.c.bf16 %v3038_v2, %v3037_v27  ;;  %v3014_v1 = vadd.f32 %v2988_v17, %v6314_v38  ;;  %v2961_v23 = vadd.f32 %v2960_v45, %v2860_v56  ;;  %v2989_v16 = vmax.f32 %v2959_v19, 0.0 }
 0x2a4   : > { %v2862_v15 = vpop.f32.mrf.mxu0  ;;  %v3039_v12 = vmul.f32 0.25, %v3013_v36  ;;  %v3217_v54 = vld [vmem:[%s6082_s26 + $0x40] sm:$0xff] (%p4366_p9) }
 0x2a5   : > { %v2963_v0 = vpop.f32.mrf.mxu1  ;;  %3133 = vst [vmem:[%s6082_s26 + $0x50] sm:$0xff] %v3739_v35  ;;  %v3040_v20 = vmul.f32 0.25, %v3014_v1  ;;  %v2990_v37 = vmax.f32 %v2961_v23, 0.0  ;;  %v3015_v10 = vadd.f32 %v2989_v16, %v6315_v60  ;;  %3218 = vst [vmem:[%s3148_s21 + $0x80] sm:$0xff] (%p4366_p9), %v3217_v54 }
 0x2a7   : > { %v3740_v29 = vpack.c.bf16 %v3040_v20, %v3039_v12  ;;  %v3016_v7 = vadd.f32 %v2990_v37, %v6316_v25  ;;  %v3041_v42 = vmul.f32 0.25, %v3015_v10 }
 0x2a8   : > { %v3219_v3 = vld [vmem:[%s6082_s26 + $0x48] sm:$0xff] (%p4366_p9) }
 0x2a9   : > { %3134 = vst [vmem:[%s6082_s26 + $0x58] sm:$0xff] %v3740_v29  ;;  %v3042_v32 = vmul.f32 0.25, %v3016_v7  ;;  %3142 = sbr.rel (!%p4366_p9) target bundleno = 694 (0x2b6), region = 44  ;;  %3220 = vst [vmem:[%s3148_s21 + $0x90] sm:$0xff] (%p4366_p9), %v3219_v3 }
 0x2ab   : > { %v3741_v59 = vpack.c.bf16 %v3042_v32, %v3041_v42 }
 0x2ac   : > { %v3221_v63 = vld [vmem:[%s6082_s26 + $0x50] sm:$0xff] (%p4366_p9) }
 0x2ad   : > { %3135 = vst [vmem:[%s6082_s26 + $0x60] sm:$0x11] %v3741_v59  ;;  %3222 = vst [vmem:[%s3148_s21 + $0xa0] sm:$0xff] (%p4366_p9), %v3221_v63 }
 0x2b0   : > { %v3223_v21 = vld [vmem:[%s6082_s26 + $0x58] sm:$0xff] }
 0x2b1   : > { %3224 = vst [vmem:[%s3148_s21 + $0xb0] sm:$0xff] %v3223_v21 }
 0x2b4   : > { %v3225_v47 = vld [vmem:[%s6082_s26 + $0x60] sm:$0xff] }
 0x2b5   : > { %3226 = vst [vmem:[%s3148_s21 + $0xc0] sm:$0xff] %v3225_v47 }
 0x2b6 PF: > { %s19_s17 = sadd.s32 1, %s4288_s17   ;;  %s6317_s12 = smov %s4272_s13 }
 0x2b7   : > { %p16_p8 = scmp.ge.s32.totalorder %s19_s17, 4   ;;  %s6318_s13 = smov %s4276_s14 }
 0x2b8   : > { %s6319_s14 = smov %s4364_s24  ;;  %s6320_s15 = smov %s4284_s16 }
 0x2b9   : > { %s6321_s16 = smov %s6323_s19  ;;  %18 = sbr.rel (!%p16_p8) target bundleno = 6 (0x6), region = 129 }
 0x2be   :  { %3242 = vsyncpa [#allocation3], 1 }
 0x2bf   :  { %3244 = vsyncpa [#allocation3 + $0x1], 1 }
 0x2c0   :  { %3245 = vsyncpa [#allocation5], 1 }
 0x2c1   :  { %3247 = vsyncpa [#allocation5 + $0x1], 1 }

// kernel: model_based_extractor_forward.5
= control target key start
LH: loop header
LB: loop body
LE: loop exit
PB: predicated region body
PF: predicated region fallthrough
CT: control target
= control target key end

     0   :  { %10 = vsyncpa [#allocation4], 0  ;;  %s8751_s18 = smov 0   ;;  %s9808_s0 = inlined_call_operand.vmem [shape: bf16[2,25088], index: 0, kind: input, shape index: {}]   ;;  %s9809_s1 = inlined_call_operand.vmem [shape: bf16[25088,256], index: 1, kind: input, shape index: {}]   ;;  %s9810_s2 = inlined_call_operand.vmem [shape: f32[1,256], index: 2, kind: input, shape index: {}]   ;;  %s9811_s3 = inlined_call_operand.vmem [shape: bf16[256,128], index: 3, kind: input, shape index: {}]   ;;  %s9812_s4 = inlined_call_operand.vmem [shape: f32[1,128], index: 4, kind: input, shape index: {}]   ;;  %s9813_s5 = inlined_call_operand.hbm [shape: f32[2,128], index: 5, kind: output, shape index: {}]  }
   0x1 LB: > { %s8757_s19 = sadd.s32 4294967295, %s8714_s18   ;;  %p6629_p0 = scmp.ge.s32.totalorder %s8714_s18, 1  ;;  %s8714_s18 = sphi %s8751_s18, %s16_s18  }
   0x2   : > { %p195_p1 = scmp.lt.s32.totalorder %s8714_s18, 5 }
   0x4   : > { %p196_p2 = pnand %p6629_p0, %p195_p1 }
   0x5   : > { %s223_s20 = smul.u32 (!%p196_p2), 49, %s8757_s19  ;;  %p6632_p5 = scmp.ne.s32.totalorder (!%p196_p2), %s8757_s19, 0 }
   0x6   : > { %199 = sbr.rel (%p196_p2) target bundleno = 1275 (0x4fb), region = 40 }
   0x7   : > { %s228_s21 = smul.u32 (!%p196_p2), 784, %s8757_s19  ;;  %p224_p3 = scmp.lt.s32.totalorder (!%p196_p2), %s223_s20, 195 }
   0x9   : > { %p229_p4 = scmp.lt.s32.totalorder (!%p196_p2), %s228_s21, 3135 }
   0xb   : > { %s9815_s20 = smov (!%p224_p3, %s223_s20), 195  ;;  %s9817_s21 = smov (!%p229_p4, %s228_s21), 3135 }
   0xc   : > { %s8766_s24 = scalar_lea.vmem %s9808_s0, %s9815_s20  ;;  %s7440_s25 = sshll.u32 %s9817_s21, 3 }
   0xd   : > { %s8771_s28 = scalar_lea.vmem %s9809_s1, %s7440_s25  ;;  %239 = sbr.rel (%p6632_p5) target bundleno = 20 (0x14), region = 44 }
  0x12   : > { %v8716_v0 = vmov 0.0  }
  0x13   : > { %240 = vst [vmem:[#allocation2] sm:$0xf] %v8716_v0 }
  0x14 PF: > { %v7482_v1 = vld [vmem:[%s8771_s28 + $0x74] ss:$8 sps:$4 sm:$0xff]   ;;  %v7486_v3 = vld [vmem:[%s8771_s28 + $0x70] ss:$8 sps:$4 sm:$0xff]   ;;  %v7488_v5 = vld [vmem:[%s8771_s28 + $0x64] ss:$8 sps:$4 sm:$0xff]   ;;  %v1044_v39 = vlaneseq }
  0x15   : > { %v7484_v2 = vld [vmem:[%s8771_s28 + $0x174] ss:$8 sps:$4 sm:$0xff]   ;;  %5317 = vmatprep.subr.bf16.mxu0 %v7482_v1  ;;  %v7487_v4 = vld [vmem:[%s8771_s28 + $0x170] ss:$8 sps:$4 sm:$0xff]   ;;  %v7490_v6 = vld [vmem:[%s8771_s28 + $0x164] ss:$8 sps:$4 sm:$0xff]  }
  0x16   : > { %5358 = vmatprep.subr.bf16.mxu1 %v7484_v2  ;;  %5318 = vmatpush1.bf16.msra.mxu0 %v7486_v3  ;;  %v7492_v7 = vld [vmem:[%s8771_s28 + $0x60] ss:$8 sps:$4 sm:$0xff]   ;;  %v7494_v9 = vld [vmem:[%s8771_s28 + $0x54] ss:$8 sps:$4 sm:$0xff]   ;;  %v7498_v11 = vld [vmem:[%s8771_s28 + $0x50] ss:$8 sps:$4 sm:$0xff]  }
  0x17   : > { %5359 = vmatpush1.bf16.msra.mxu1 %v7487_v4  ;;  %5319 = vmatprep.subr.bf16.mxu0 %v7488_v5  ;;  %v7493_v8 = vld [vmem:[%s8771_s28 + $0x160] ss:$8 sps:$4 sm:$0xff]   ;;  %v7496_v10 = vld [vmem:[%s8771_s28 + $0x154] ss:$8 sps:$4 sm:$0xff]   ;;  %v7499_v12 = vld [vmem:[%s8771_s28 + $0x150] ss:$8 sps:$4 sm:$0xff]  }
  0x18   : > { %5360 = vmatprep.subr.bf16.mxu1 %v7490_v6  ;;  %v7500_v13 = vld [vmem:[%s8771_s28 + $0x44] ss:$8 sps:$4 sm:$0xff]   ;;  %v7504_v15 = vld [vmem:[%s8771_s28 + $0x40] ss:$8 sps:$4 sm:$0xff]   ;;  %v7506_v17 = vld [vmem:[%s8771_s28 + $0x34] ss:$8 sps:$4 sm:$0xff]  }
  0x19   : > { %v7502_v14 = vld [vmem:[%s8771_s28 + $0x144] ss:$8 sps:$4 sm:$0xff]   ;;  %v7505_v16 = vld [vmem:[%s8771_s28 + $0x140] ss:$8 sps:$4 sm:$0xff]   ;;  %v7508_v18 = vld [vmem:[%s8771_s28 + $0x134] ss:$8 sps:$4 sm:$0xff]  }
  0x1a   : > { %5320 = vmatpush1.bf16.msra.mxu0 %v7492_v7  ;;  %v7510_v19 = vld [vmem:[%s8771_s28 + $0x30] ss:$8 sps:$4 sm:$0xff]   ;;  %v7512_v21 = vld [vmem:[%s8771_s28 + $0x24] ss:$8 sps:$4 sm:$0xff]   ;;  %v7516_v23 = vld [vmem:[%s8771_s28 + $0x20] ss:$8 sps:$4 sm:$0xff]  }
  0x1b   : > { %5361 = vmatpush1.bf16.msra.mxu1 %v7493_v8  ;;  %5321 = vmatprep.subr.bf16.mxu0 %v7494_v9  ;;  %v7511_v20 = vld [vmem:[%s8771_s28 + $0x130] ss:$8 sps:$4 sm:$0xff]   ;;  %v7514_v22 = vld [vmem:[%s8771_s28 + $0x124] ss:$8 sps:$4 sm:$0xff]   ;;  %v7517_v24 = vld [vmem:[%s8771_s28 + $0x120] ss:$8 sps:$4 sm:$0xff]  }
  0x1c   : > { %5362 = vmatprep.subr.bf16.mxu1 %v7496_v10  ;;  %v7518_v25 = vld [vmem:[%s8771_s28 + $0x14] ss:$8 sps:$4 sm:$0xff]   ;;  %v7522_v27 = vld [vmem:[%s8771_s28 + $0x10] ss:$8 sps:$4 sm:$0xff]   ;;  %v7524_v29 = vld [vmem:[%s8771_s28 + $0x4] ss:$8 sps:$4 sm:$0xff]  }
  0x1d   : > { %v7520_v26 = vld [vmem:[%s8771_s28 + $0x114] ss:$8 sps:$4 sm:$0xff]   ;;  %v7523_v28 = vld [vmem:[%s8771_s28 + $0x110] ss:$8 sps:$4 sm:$0xff]   ;;  %v7526_v30 = vld [vmem:[%s8771_s28 + $0x104] ss:$8 sps:$4 sm:$0xff]  }
  0x1e   : > { %5322 = vmatpush1.bf16.msra.mxu0 %v7498_v11  ;;  %v7528_v31 = vld [vmem:[%s8771_s28] ss:$8 sps:$4 sm:$0xff]   ;;  %v7530_v33 = vld [vmem:[%s8771_s28 + $0xf4] ss:$8 sps:$4 sm:$0xff]   ;;  %v7534_v35 = vld [vmem:[%s8771_s28 + $0xf0] ss:$8 sps:$4 sm:$0xff]  }
  0x1f   : > { %5363 = vmatpush1.bf16.msra.mxu1 %v7499_v12  ;;  %5323 = vmatprep.subr.bf16.mxu0 %v7500_v13  ;;  %v7529_v32 = vld [vmem:[%s8771_s28 + $0x100] ss:$8 sps:$4 sm:$0xff]   ;;  %v7532_v34 = vld [vmem:[%s8771_s28 + $0x1f4] ss:$8 sps:$4 sm:$0xff]   ;;  %v7535_v36 = vld [vmem:[%s8771_s28 + $0x1f0] ss:$8 sps:$4 sm:$0xff]  }
  0x20   : > { %5364 = vmatprep.subr.bf16.mxu1 %v7502_v14  ;;  %v8717_v37 = vmov 1966171168   ;;  %v7536_v40 = vld [vmem:[%s8771_s28 + $0xe4] ss:$8 sps:$4 sm:$0xff]   ;;  %v7540_v42 = vld [vmem:[%s8771_s28 + $0xe0] ss:$8 sps:$4 sm:$0xff]  }
  0x21   : > { %v1042_v38 = vunpack.c.l.s4 %v8717_v37  ;;  %v7538_v41 = vld [vmem:[%s8771_s28 + $0x1e4] ss:$8 sps:$4 sm:$0xff]   ;;  %v8813_v44 = vshrl.u32 %v1044_v39, 7  ;;  %v7541_v45 = vld [vmem:[%s8771_s28 + $0x1e0] ss:$8 sps:$4 sm:$0xff]   ;;  %p7418_p6 = scmp.ne.s32.totalorder %s8757_s19, 3 }
  0x22   : > { %5324 = vmatpush1.bf16.msra.mxu0 %v7504_v15  ;;  %v7542_v46 = vld [vmem:[%s8771_s28 + $0xd4] ss:$8 sps:$4 sm:$0xff]   ;;  %v7546_v48 = vld [vmem:[%s8771_s28 + $0xd0] ss:$8 sps:$4 sm:$0xff]   ;;  %v7548_v51 = vld [vmem:[%s8771_s28 + $0xc4] ss:$8 sps:$4 sm:$0xff]  }
  0x23   : > { %5365 = vmatpush1.bf16.msra.mxu1 %v7505_v16  ;;  %5325 = vmatprep.subr.bf16.mxu0 %v7506_v17  ;;  %v1043_v43 = vunpack.c.0.s8 %v1042_v38  ;;  %v7544_v47 = vld [vmem:[%s8771_s28 + $0x1d4] ss:$8 sps:$4 sm:$0xff]   ;;  %v7547_v49 = vld [vmem:[%s8771_s28 + $0x1d0] ss:$8 sps:$4 sm:$0xff]   ;;  %v7550_v52 = vld [vmem:[%s8771_s28 + $0x1c4] ss:$8 sps:$4 sm:$0xff]  }
  0x24   : > { %5366 = vmatprep.subr.bf16.mxu1 %v7508_v18  ;;  %v242_v53 = vld [vmem:[%s8766_s24] sm:$0xff]  ;;  %v7554_v57 = vld [vmem:[%s8771_s28 + $0xb4] ss:$8 sps:$4 sm:$0xff]   ;;  %v7558_v60 = vld [vmem:[%s8771_s28 + $0xb0] ss:$8 sps:$4 sm:$0xff]  }
  0x25   : > { %v8821_v50 = vsub.s32 %v1043_v43, %v8813_v44  ;;  %v7552_v54 = vld [vmem:[%s8771_s28 + $0xc0] ss:$8 sps:$4 sm:$0xff]   ;;  %v7556_v58 = vld [vmem:[%s8771_s28 + $0x1b4] ss:$8 sps:$4 sm:$0xff]   ;;  %v7559_v62 = vld [vmem:[%s8771_s28 + $0x1b0] ss:$8 sps:$4 sm:$0xff]   ;;  %v1040_v2 = vcombine.high %v242_v53, %v242_v53 }
  0x26   : > { %5326 = vmatpush1.bf16.msra.mxu0 %v7510_v19  ;;  %v7553_v56 = vld [vmem:[%s8771_s28 + $0x1c0] ss:$8 sps:$4 sm:$0xff]   ;;  %v7560_v63 = vld [vmem:[%s8771_s28 + $0xa4] ss:$8 sps:$4 sm:$0xff]   ;;  %v7566_v5 = vld [vmem:[%s8771_s28 + $0x94] ss:$8 sps:$4 sm:$0xff]  }
  0x27   : > { %5367 = vmatpush1.bf16.msra.mxu1 %v7511_v20  ;;  %5327 = vmatprep.subr.bf16.mxu0 %v7512_v21  ;;  %v1047_v55 = vrot.slane %v242_v53, %v8821_v50  ;;  %v7562_v0 = vld [vmem:[%s8771_s28 + $0x1a4] ss:$8 sps:$4 sm:$0xff]   ;;  %v7564_v3 = vld [vmem:[%s8771_s28 + $0xa0] ss:$8 sps:$4 sm:$0xff]   ;;  %v7568_v6 = vld [vmem:[%s8771_s28 + $0x194] ss:$8 sps:$4 sm:$0xff]   ;;  %v8841_v7 = vrot.slane %v1040_v2, %v8821_v50 }
  0x28   : > { %5368 = vmatprep.subr.bf16.mxu1 %v7514_v22  ;;  %v7565_v4 = vld [vmem:[%s8771_s28 + $0x1a0] ss:$8 sps:$4 sm:$0xff]   ;;  %v7570_v8 = vld [vmem:[%s8771_s28 + $0x90] ss:$8 sps:$4 sm:$0xff]   ;;  %v7572_v10 = vld [vmem:[%s8771_s28 + $0x84] ss:$8 sps:$4 sm:$0xff]  }
  0x29   : > { %v1055_v59 = vcombine.high %v1047_v55, %v1047_v55  ;;  %v7571_v9 = vld [vmem:[%s8771_s28 + $0x190] ss:$8 sps:$4 sm:$0xff]   ;;  %v7574_v11 = vld [vmem:[%s8771_s28 + $0x184] ss:$8 sps:$4 sm:$0xff]   ;;  %v1056_v12 = vcombine.high %v8841_v7, %v8841_v7  ;;  %v7576_v13 = vld [vmem:[%s8771_s28 + $0x80] ss:$8 sps:$4 sm:$0xff]   ;;  %v1063_v14 = vrot.slane %v1047_v55, %v8821_v50 }
  0x2a   : > { %5328 = vmatpush1.bf16.msra.mxu0 %v7516_v23  ;;  %v7577_v15 = vld [vmem:[%s8771_s28 + $0x180] ss:$8 sps:$4 sm:$0xff]   ;;  %v7581_v16 = vld [vmem:[%s8771_s28 + $0x274] ss:$8 sps:$4 sm:$0xff]   ;;  %v7579_v20 = vld [vmem:[%s8771_s28 + $0x270] ss:$8 sps:$4 sm:$0xff]  }
  0x2b   : > { %5369 = vmatpush1.bf16.msra.mxu1 %v7517_v24  ;;  %5329 = vmatprep.subr.bf16.mxu0 %v7518_v25  ;;  %v1077_v61 = vrot.slane %v1055_v59, %v8821_v50  ;;  %v7584_v17 = vld [vmem:[%s8771_s28 + $0x374] ss:$8 sps:$4 sm:$0xff]   ;;  %v1084_v18 = vrot.slane %v1056_v12, %v8821_v50  ;;  %v1085_v19 = vcombine.high %v1063_v14, %v1063_v14  ;;  %v7582_v21 = vld [vmem:[%s8771_s28 + $0x370] ss:$8 sps:$4 sm:$0xff]   ;;  %v7587_v22 = vld [vmem:[%s8771_s28 + $0x264] ss:$8 sps:$4 sm:$0xff]  }
  0x2c   : > { %5370 = vmatprep.subr.bf16.mxu1 %v7520_v26  ;;  %v7590_v23 = vld [vmem:[%s8771_s28 + $0x364] ss:$8 sps:$4 sm:$0xff]   ;;  %v7585_v25 = vld [vmem:[%s8771_s28 + $0x260] ss:$8 sps:$4 sm:$0xff]   ;;  %v7603_v37 = vld [vmem:[%s8771_s28 + $0x230] ss:$8 sps:$4 sm:$0xff]  }
  0x2d   : > { %v1087_v1 = vcombine.high %v1077_v61, %v1077_v61  ;;  %5349 = vmatprep.mubr.bf16.mxu0 %v1077_v61  ;;  %v1088_v24 = vcombine.high %v1084_v18, %v1084_v18  ;;  %v7588_v26 = vld [vmem:[%s8771_s28 + $0x360] ss:$8 sps:$4 sm:$0xff]   ;;  %v7606_v38 = vld [vmem:[%s8771_s28 + $0x330] ss:$8 sps:$4 sm:$0xff]   ;;  %v7611_v39 = vld [vmem:[%s8771_s28 + $0x224] ss:$8 sps:$4 sm:$0xff]  }
  0x2e   : > { %5330 = vmatpush1.bf16.msra.mxu0 %v7522_v27  ;;  %v7593_v27 = vld [vmem:[%s8771_s28 + $0x254] ss:$8 sps:$4 sm:$0xff]   ;;  %v7627_v55 = vld [vmem:[%s8771_s28 + $0x2f0] ss:$8 sps:$4 sm:$0xff]   ;;  %v7633_v59 = vld [vmem:[%s8771_s28 + $0x2e0] ss:$8 sps:$4 sm:$0xff]  }
  0x2f   : > { %5371 = vmatpush1.bf16.msra.mxu1 %v7523_v28  ;;  %5331 = vmatprep.subr.bf16.mxu0 %v7524_v29  ;;  %v7596_v28 = vld [vmem:[%s8771_s28 + $0x354] ss:$8 sps:$4 sm:$0xff]   ;;  %v7591_v29 = vld [vmem:[%s8771_s28 + $0x250] ss:$8 sps:$4 sm:$0xff]   ;;  %v7650_v2 = vld [vmem:[%s8771_s28 + $0x3c4] ss:$8 sps:$4 sm:$0xff]  }
  0x30   : > { %5372 = vmatprep.subr.bf16.mxu1 %v7526_v30  ;;  %5390 = vmatprep.mubr.bf16.mxu1 %v1087_v1  ;;  %v7594_v30 = vld [vmem:[%s8771_s28 + $0x350] ss:$8 sps:$4 sm:$0xff]   ;;  %v7617_v43 = vld [vmem:[%s8771_s28 + $0x214] ss:$8 sps:$4 sm:$0xff]   ;;  %v7647_v1 = vld [vmem:[%s8771_s28 + $0x2c4] ss:$8 sps:$4 sm:$0xff]  }
  0x31   : > { %v7629_v53 = vld [vmem:[%s8771_s28 + $0x2f4] ss:$8 sps:$4 sm:$0xff]   ;;  %v7657_v12 = vld [vmem:[%s8771_s28 + $0x2a0] ss:$8 sps:$4 sm:$0xff]  }
  0x32   : > { %5332 = vmatpush1.bf16.msra.mxu0 %v7528_v31  ;;  %v7599_v31 = vld [vmem:[%s8771_s28 + $0x244] ss:$8 sps:$4 sm:$0xff]   ;;  %v7641_v61 = vld [vmem:[%s8771_s28 + $0x2d4] ss:$8 sps:$4 sm:$0xff]  }
  0x33   : > { %5373 = vmatpush1.bf16.msra.mxu1 %v7529_v32  ;;  %5333 = vmatprep.subr.bf16.mxu0 %v7530_v33  ;;  %v7602_v32 = vld [vmem:[%s8771_s28 + $0x344] ss:$8 sps:$4 sm:$0xff]   ;;  %v7597_v33 = vld [vmem:[%s8771_s28 + $0x240] ss:$8 sps:$4 sm:$0xff]  }
  0x34   : > { %5374 = vmatprep.subr.bf16.mxu1 %v7532_v34  ;;  %v7600_v34 = vld [vmem:[%s8771_s28 + $0x340] ss:$8 sps:$4 sm:$0xff]  }
  0x36   : > { %5334 = vmatpush2.bf16.msra.mxu0 %v7534_v35  ;;  %v7605_v35 = vld [vmem:[%s8771_s28 + $0x234] ss:$8 sps:$4 sm:$0xff]  }
  0x37   : > { %5375 = vmatpush2.bf16.msra.mxu1 %v7535_v36  ;;  %5335 = vmatprep.subr.bf16.mxu0 %v7536_v40  ;;  %v7608_v36 = vld [vmem:[%s8771_s28 + $0x334] ss:$8 sps:$4 sm:$0xff]   ;;  %v7614_v40 = vld [vmem:[%s8771_s28 + $0x324] ss:$8 sps:$4 sm:$0xff]  }
  0x38   : > { %5376 = vmatprep.subr.bf16.mxu1 %v7538_v41  ;;  %v7609_v41 = vld [vmem:[%s8771_s28 + $0x220] ss:$8 sps:$4 sm:$0xff]  }
  0x3a   : > { %5336 = vmatpush2.bf16.msra.mxu0 %v7540_v42  ;;  %v7612_v42 = vld [vmem:[%s8771_s28 + $0x320] ss:$8 sps:$4 sm:$0xff]  }
  0x3b   : > { %5377 = vmatpush2.bf16.msra.mxu1 %v7541_v45  ;;  %5337 = vmatprep.subr.bf16.mxu0 %v7542_v46  ;;  %v7620_v45 = vld [vmem:[%s8771_s28 + $0x314] ss:$8 sps:$4 sm:$0xff]   ;;  %v7615_v46 = vld [vmem:[%s8771_s28 + $0x210] ss:$8 sps:$4 sm:$0xff]  }
  0x3c   : > { %5378 = vmatprep.subr.bf16.mxu1 %v7544_v47  ;;  %v7618_v47 = vld [vmem:[%s8771_s28 + $0x310] ss:$8 sps:$4 sm:$0xff]  }
  0x3e   : > { %5338 = vmatpush2.bf16.msra.mxu0 %v7546_v48  ;;  %v7623_v48 = vld [vmem:[%s8771_s28 + $0x204] ss:$8 sps:$4 sm:$0xff]  }
  0x3f   : > { %5379 = vmatpush2.bf16.msra.mxu1 %v7547_v49  ;;  %5339 = vmatprep.subr.bf16.mxu0 %v7548_v51  ;;  %v7626_v49 = vld [vmem:[%s8771_s28 + $0x304] ss:$8 sps:$4 sm:$0xff]   ;;  %v7621_v51 = vld [vmem:[%s8771_s28 + $0x200] ss:$8 sps:$4 sm:$0xff]  }
  0x40   : > { %5380 = vmatprep.subr.bf16.mxu1 %v7550_v52  ;;  %v7624_v52 = vld [vmem:[%s8771_s28 + $0x300] ss:$8 sps:$4 sm:$0xff]  }
  0x42   : > { %5340 = vmatpush2.bf16.msra.mxu0 %v7552_v54  ;;  %v7632_v54 = vld [vmem:[%s8771_s28 + $0x3f4] ss:$8 sps:$4 sm:$0xff]  }
  0x43   : > { %5381 = vmatpush2.bf16.msra.mxu1 %v7553_v56  ;;  %5341 = vmatprep.subr.bf16.mxu0 %v7554_v57  ;;  %v7630_v56 = vld [vmem:[%s8771_s28 + $0x3f0] ss:$8 sps:$4 sm:$0xff]   ;;  %v7635_v57 = vld [vmem:[%s8771_s28 + $0x2e4] ss:$8 sps:$4 sm:$0xff]  }
  0x44   : > { %5382 = vmatprep.subr.bf16.mxu1 %v7556_v58  ;;  %v7638_v58 = vld [vmem:[%s8771_s28 + $0x3e4] ss:$8 sps:$4 sm:$0xff]  }
  0x46   : > { %5342 = vmatpush2.bf16.msra.mxu0 %v7558_v60  ;;  %v7636_v60 = vld [vmem:[%s8771_s28 + $0x3e0] ss:$8 sps:$4 sm:$0xff]  }
  0x47   : > { %5383 = vmatpush2.bf16.msra.mxu1 %v7559_v62  ;;  %5343 = vmatprep.subr.bf16.mxu0 %v7560_v63  ;;  %v7644_v62 = vld [vmem:[%s8771_s28 + $0x3d4] ss:$8 sps:$4 sm:$0xff]   ;;  %v7639_v63 = vld [vmem:[%s8771_s28 + $0x2d0] ss:$8 sps:$4 sm:$0xff]  }
  0x48   : > { %5384 = vmatprep.subr.bf16.mxu1 %v7562_v0  ;;  %v7642_v0 = vld [vmem:[%s8771_s28 + $0x3d0] ss:$8 sps:$4 sm:$0xff]  }
  0x4a   : > { %5344 = vmatpush2.bf16.msra.mxu0 %v7564_v3  ;;  %v7645_v3 = vld [vmem:[%s8771_s28 + $0x2c0] ss:$8 sps:$4 sm:$0xff]  }
  0x4b   : > { %5385 = vmatpush2.bf16.msra.mxu1 %v7565_v4  ;;  %5345 = vmatprep.subr.bf16.mxu0 %v7566_v5  ;;  %v7648_v4 = vld [vmem:[%s8771_s28 + $0x3c0] ss:$8 sps:$4 sm:$0xff]   ;;  %v7653_v5 = vld [vmem:[%s8771_s28 + $0x2b4] ss:$8 sps:$4 sm:$0xff]  }
  0x4c   : > { %5386 = vmatprep.subr.bf16.mxu1 %v7568_v6  ;;  %v7656_v6 = vld [vmem:[%s8771_s28 + $0x3b4] ss:$8 sps:$4 sm:$0xff]  }
  0x4e   : > { %5346 = vmatpush2.bf16.msra.mxu0 %v7570_v8  ;;  %v7651_v8 = vld [vmem:[%s8771_s28 + $0x2b0] ss:$8 sps:$4 sm:$0xff]  }
  0x4f   : > { %5387 = vmatpush2.bf16.msra.mxu1 %v7571_v9  ;;  %5347 = vmatprep.subr.bf16.mxu0 %v7572_v10  ;;  %v7654_v9 = vld [vmem:[%s8771_s28 + $0x3b0] ss:$8 sps:$4 sm:$0xff]   ;;  %v7659_v10 = vld [vmem:[%s8771_s28 + $0x2a4] ss:$8 sps:$4 sm:$0xff]  }
  0x50   : > { %5388 = vmatprep.subr.bf16.mxu1 %v7574_v11  ;;  %v7662_v11 = vld [vmem:[%s8771_s28 + $0x3a4] ss:$8 sps:$4 sm:$0xff]  }
  0x52   : > { %5348 = vmatpush2.bf16.msra.mxu0 %v7576_v13  ;;  %v7660_v13 = vld [vmem:[%s8771_s28 + $0x3a0] ss:$8 sps:$4 sm:$0xff]  }
  0x53   : > { %5389 = vmatpush2.bf16.msra.mxu1 %v7577_v15  ;;  %5399 = vmatprep.subr.bf16.mxu0 %v7581_v16  ;;  %v7668_v15 = vld [vmem:[%s8771_s28 + $0x394] ss:$8 sps:$4 sm:$0xff]   ;;  %v7663_v16 = vld [vmem:[%s8771_s28 + $0x290] ss:$8 sps:$4 sm:$0xff]  }
  0x54   : > { %5440 = vmatprep.subr.bf16.mxu1 %v7584_v17  ;;  %v7666_v17 = vld [vmem:[%s8771_s28 + $0x390] ss:$8 sps:$4 sm:$0xff]  }
  0x55   : > { %5350 = vmatmul.mubr.bf16.vlgmr.msra.gmra.mxu0 %v1063_v14  ;;  %v7665_v14 = vld [vmem:[%s8771_s28 + $0x294] ss:$8 sps:$4 sm:$0xff]  }
  0x56   : > { %5391 = vmatmul.mubr.bf16.vlgmr.msra.gmra.mxu1 %v1085_v19  ;;  %5400 = vmatpush1.bf16.msra.mxu0 %v7579_v20  ;;  %v7674_v19 = vld [vmem:[%s8771_s28 + $0x384] ss:$8 sps:$4 sm:$0xff]   ;;  %v7669_v20 = vld [vmem:[%s8771_s28 + $0x280] ss:$8 sps:$4 sm:$0xff]  }
  0x57   : > { %5441 = vmatpush1.bf16.msra.mxu1 %v7582_v21  ;;  %5401 = vmatprep.subr.bf16.mxu0 %v7587_v22  ;;  %v1070_v21 = vrot.slane %v8841_v7, %v8821_v50  ;;  %v7672_v22 = vld [vmem:[%s8771_s28 + $0x380] ss:$8 sps:$4 sm:$0xff]   ;;  %v7683_v7 = vld [vmem:[%s8771_s28 + $0x464] ss:$8 sps:$4 sm:$0xff]  }
  0x58   : > { %5442 = vmatprep.subr.bf16.mxu1 %v7590_v23  ;;  %5431 = vmatprep.mubr.bf16.mxu0 %v1084_v18  ;;  %v7671_v18 = vld [vmem:[%s8771_s28 + $0x284] ss:$8 sps:$4 sm:$0xff]   ;;  %v7677_v23 = vld [vmem:[%s8771_s28 + $0x474] ss:$8 sps:$4 sm:$0xff]  }
  0x59   : > { %5472 = vmatprep.mubr.bf16.mxu1 %v1088_v24  ;;  %v7680_v24 = vld [vmem:[%s8771_s28 + $0x574] ss:$8 sps:$4 sm:$0xff]  }
  0x5a   : > { %5402 = vmatpush1.bf16.msra.mxu0 %v7585_v25  ;;  %v7675_v25 = vld [vmem:[%s8771_s28 + $0x470] ss:$8 sps:$4 sm:$0xff]  }
  0x5b   : > { %5443 = vmatpush1.bf16.msra.mxu1 %v7588_v26  ;;  %5403 = vmatprep.subr.bf16.mxu0 %v7593_v27  ;;  %v1086_v26 = vcombine.high %v1070_v21, %v1070_v21  ;;  %v7678_v27 = vld [vmem:[%s8771_s28 + $0x570] ss:$8 sps:$4 sm:$0xff]  }
  0x5c   : > { %5444 = vmatprep.subr.bf16.mxu1 %v7596_v28  ;;  %v8924_v28 = vld [vmem:[%s8766_s24 + $0x8] sm:$0xff] }
  0x5e   : > { %5404 = vmatpush1.bf16.msra.mxu0 %v7591_v29  ;;  %v7686_v29 = vld [vmem:[%s8771_s28 + $0x564] ss:$8 sps:$4 sm:$0xff]  }
  0x5f   : > { %5445 = vmatpush1.bf16.msra.mxu1 %v7594_v30  ;;  %5405 = vmatprep.subr.bf16.mxu0 %v7599_v31  ;;  %v8930_v30 = vrot.slane %v8924_v28, %v8821_v50 }
  0x60   : > { %5446 = vmatprep.subr.bf16.mxu1 %v7602_v32  ;;  %v7681_v32 = vld [vmem:[%s8771_s28 + $0x460] ss:$8 sps:$4 sm:$0xff]  }
  0x61   : > { %v1104_v31 = vcombine.high %v8930_v30, %v8930_v30 }
  0x62   : > { %5406 = vmatpush1.bf16.msra.mxu0 %v7597_v33  ;;  %v7684_v33 = vld [vmem:[%s8771_s28 + $0x560] ss:$8 sps:$4 sm:$0xff]  }
  0x63   : > { %5447 = vmatpush1.bf16.msra.mxu1 %v7600_v34  ;;  %5407 = vmatprep.subr.bf16.mxu0 %v7605_v35  ;;  %v7689_v34 = vld [vmem:[%s8771_s28 + $0x454] ss:$8 sps:$4 sm:$0xff]  }
  0x64   : > { %5448 = vmatprep.subr.bf16.mxu1 %v7608_v36  ;;  %v7692_v35 = vld [vmem:[%s8771_s28 + $0x554] ss:$8 sps:$4 sm:$0xff]   ;;  %v1126_v36 = vrot.slane %v1104_v31, %v8821_v50 }
  0x66   : > { %5408 = vmatpush1.bf16.msra.mxu0 %v7603_v37  ;;  %v1136_v37 = vcombine.high %v1126_v36, %v1126_v36 }
  0x67   : > { %5449 = vmatpush1.bf16.msra.mxu1 %v7606_v38  ;;  %5409 = vmatprep.subr.bf16.mxu0 %v7611_v39  ;;  %v7687_v38 = vld [vmem:[%s8771_s28 + $0x450] ss:$8 sps:$4 sm:$0xff]  }
  0x68   : > { %5450 = vmatprep.subr.bf16.mxu1 %v7614_v40  ;;  %v7690_v39 = vld [vmem:[%s8771_s28 + $0x550] ss:$8 sps:$4 sm:$0xff]   ;;  %v7695_v40 = vld [vmem:[%s8771_s28 + $0x444] ss:$8 sps:$4 sm:$0xff]  }
  0x6a   : > { %5410 = vmatpush1.bf16.msra.mxu0 %v7609_v41  ;;  %v7698_v41 = vld [vmem:[%s8771_s28 + $0x544] ss:$8 sps:$4 sm:$0xff]  }
  0x6b   : > { %5451 = vmatpush1.bf16.msra.mxu1 %v7612_v42  ;;  %5411 = vmatprep.subr.bf16.mxu0 %v7617_v43  ;;  %v7693_v42 = vld [vmem:[%s8771_s28 + $0x440] ss:$8 sps:$4 sm:$0xff]  }
  0x6c   : > { %5452 = vmatprep.subr.bf16.mxu1 %v7620_v45  ;;  %v7696_v43 = vld [vmem:[%s8771_s28 + $0x540] ss:$8 sps:$4 sm:$0xff]   ;;  %v7701_v45 = vld [vmem:[%s8771_s28 + $0x434] ss:$8 sps:$4 sm:$0xff]  }
  0x6e   : > { %5412 = vmatpush1.bf16.msra.mxu0 %v7615_v46  ;;  %v7704_v46 = vld [vmem:[%s8771_s28 + $0x534] ss:$8 sps:$4 sm:$0xff]  }
  0x6f   : > { %5453 = vmatpush1.bf16.msra.mxu1 %v7618_v47  ;;  %5413 = vmatprep.subr.bf16.mxu0 %v7623_v48  ;;  %v7699_v47 = vld [vmem:[%s8771_s28 + $0x430] ss:$8 sps:$4 sm:$0xff]  }
  0x70   : > { %5454 = vmatprep.subr.bf16.mxu1 %v7626_v49  ;;  %v7702_v48 = vld [vmem:[%s8771_s28 + $0x530] ss:$8 sps:$4 sm:$0xff]   ;;  %v7707_v49 = vld [vmem:[%s8771_s28 + $0x424] ss:$8 sps:$4 sm:$0xff]  }
  0x72   : > { %5414 = vmatpush1.bf16.msra.mxu0 %v7621_v51  ;;  %v7710_v51 = vld [vmem:[%s8771_s28 + $0x524] ss:$8 sps:$4 sm:$0xff]  }
  0x73   : > { %5455 = vmatpush1.bf16.msra.mxu1 %v7624_v52  ;;  %5415 = vmatprep.subr.bf16.mxu0 %v7629_v53  ;;  %v7705_v52 = vld [vmem:[%s8771_s28 + $0x420] ss:$8 sps:$4 sm:$0xff]  }
  0x74   : > { %5456 = vmatprep.subr.bf16.mxu1 %v7632_v54  ;;  %v7708_v53 = vld [vmem:[%s8771_s28 + $0x520] ss:$8 sps:$4 sm:$0xff]   ;;  %v7713_v54 = vld [vmem:[%s8771_s28 + $0x414] ss:$8 sps:$4 sm:$0xff]  }
  0x76   : > { %5416 = vmatpush2.bf16.msra.mxu0 %v7627_v55  ;;  %v7716_v55 = vld [vmem:[%s8771_s28 + $0x514] ss:$8 sps:$4 sm:$0xff]  }
  0x77   : > { %5457 = vmatpush2.bf16.msra.mxu1 %v7630_v56  ;;  %5417 = vmatprep.subr.bf16.mxu0 %v7635_v57  ;;  %v7711_v56 = vld [vmem:[%s8771_s28 + $0x410] ss:$8 sps:$4 sm:$0xff]  }
  0x78   : > { %5458 = vmatprep.subr.bf16.mxu1 %v7638_v58  ;;  %v7714_v57 = vld [vmem:[%s8771_s28 + $0x510] ss:$8 sps:$4 sm:$0xff]   ;;  %v7719_v58 = vld [vmem:[%s8771_s28 + $0x404] ss:$8 sps:$4 sm:$0xff]  }
  0x7a   : > { %5418 = vmatpush2.bf16.msra.mxu0 %v7633_v59  ;;  %v7722_v59 = vld [vmem:[%s8771_s28 + $0x504] ss:$8 sps:$4 sm:$0xff]  }
  0x7b   : > { %5459 = vmatpush2.bf16.msra.mxu1 %v7636_v60  ;;  %5419 = vmatprep.subr.bf16.mxu0 %v7641_v61  ;;  %v7717_v60 = vld [vmem:[%s8771_s28 + $0x400] ss:$8 sps:$4 sm:$0xff]  }
  0x7c   : > { %5460 = vmatprep.subr.bf16.mxu1 %v7644_v62  ;;  %v7720_v61 = vld [vmem:[%s8771_s28 + $0x500] ss:$8 sps:$4 sm:$0xff]   ;;  %v7725_v62 = vld [vmem:[%s8771_s28 + $0x4f4] ss:$8 sps:$4 sm:$0xff]  }
  0x7e   : > { %5420 = vmatpush2.bf16.msra.mxu0 %v7639_v63  ;;  %v7728_v63 = vld [vmem:[%s8771_s28 + $0x5f4] ss:$8 sps:$4 sm:$0xff]  }
  0x7f   : > { %5461 = vmatpush2.bf16.msra.mxu1 %v7642_v0  ;;  %5421 = vmatprep.subr.bf16.mxu0 %v7647_v1  ;;  %v7723_v0 = vld [vmem:[%s8771_s28 + $0x4f0] ss:$8 sps:$4 sm:$0xff]  }
  0x80   : > { %5462 = vmatprep.subr.bf16.mxu1 %v7650_v2  ;;  %v7726_v1 = vld [vmem:[%s8771_s28 + $0x5f0] ss:$8 sps:$4 sm:$0xff]   ;;  %v7731_v2 = vld [vmem:[%s8771_s28 + $0x4e4] ss:$8 sps:$4 sm:$0xff]  }
  0x82   : > { %5422 = vmatpush2.bf16.msra.mxu0 %v7645_v3  ;;  %v7734_v3 = vld [vmem:[%s8771_s28 + $0x5e4] ss:$8 sps:$4 sm:$0xff]  }
  0x83   : > { %5463 = vmatpush2.bf16.msra.mxu1 %v7648_v4  ;;  %5423 = vmatprep.subr.bf16.mxu0 %v7653_v5  ;;  %v7729_v4 = vld [vmem:[%s8771_s28 + $0x4e0] ss:$8 sps:$4 sm:$0xff]  }
  0x84   : > { %5464 = vmatprep.subr.bf16.mxu1 %v7656_v6  ;;  %v7732_v5 = vld [vmem:[%s8771_s28 + $0x5e0] ss:$8 sps:$4 sm:$0xff]   ;;  %v7737_v6 = vld [vmem:[%s8771_s28 + $0x4d4] ss:$8 sps:$4 sm:$0xff]  }
  0x86   : > { %5424 = vmatpush2.bf16.msra.mxu0 %v7651_v8  ;;  %v7740_v8 = vld [vmem:[%s8771_s28 + $0x5d4] ss:$8 sps:$4 sm:$0xff]  }
  0x87   : > { %5465 = vmatpush2.bf16.msra.mxu1 %v7654_v9  ;;  %5425 = vmatprep.subr.bf16.mxu0 %v7659_v10  ;;  %v7735_v9 = vld [vmem:[%s8771_s28 + $0x4d0] ss:$8 sps:$4 sm:$0xff]  }
  0x88   : > { %5466 = vmatprep.subr.bf16.mxu1 %v7662_v11  ;;  %v7738_v10 = vld [vmem:[%s8771_s28 + $0x5d0] ss:$8 sps:$4 sm:$0xff]   ;;  %v7743_v11 = vld [vmem:[%s8771_s28 + $0x4c4] ss:$8 sps:$4 sm:$0xff]  }
  0x8a   : > { %5426 = vmatpush2.bf16.msra.mxu0 %v7657_v12  ;;  %v7746_v12 = vld [vmem:[%s8771_s28 + $0x5c4] ss:$8 sps:$4 sm:$0xff]  }
  0x8b   : > { %5467 = vmatpush2.bf16.msra.mxu1 %v7660_v13  ;;  %5427 = vmatprep.subr.bf16.mxu0 %v7665_v14  ;;  %v7741_v13 = vld [vmem:[%s8771_s28 + $0x4c0] ss:$8 sps:$4 sm:$0xff]  }
  0x8c   : > { %5468 = vmatprep.subr.bf16.mxu1 %v7668_v15  ;;  %v7744_v14 = vld [vmem:[%s8771_s28 + $0x5c0] ss:$8 sps:$4 sm:$0xff]   ;;  %v7749_v15 = vld [vmem:[%s8771_s28 + $0x4b4] ss:$8 sps:$4 sm:$0xff]  }
  0x8e   : > { %5428 = vmatpush2.bf16.msra.mxu0 %v7663_v16  ;;  %v7752_v16 = vld [vmem:[%s8771_s28 + $0x5b4] ss:$8 sps:$4 sm:$0xff]  }
  0x8f   : > { %5469 = vmatpush2.bf16.msra.mxu1 %v7666_v17  ;;  %5429 = vmatprep.subr.bf16.mxu0 %v7671_v18  ;;  %v7747_v17 = vld [vmem:[%s8771_s28 + $0x4b0] ss:$8 sps:$4 sm:$0xff]  }
  0x90   : > { %5470 = vmatprep.subr.bf16.mxu1 %v7674_v19  ;;  %v7750_v18 = vld [vmem:[%s8771_s28 + $0x5b0] ss:$8 sps:$4 sm:$0xff]   ;;  %v7755_v19 = vld [vmem:[%s8771_s28 + $0x4a4] ss:$8 sps:$4 sm:$0xff]  }
  0x92   : > { %5430 = vmatpush2.bf16.msra.mxu0 %v7669_v20  ;;  %v7758_v20 = vld [vmem:[%s8771_s28 + $0x5a4] ss:$8 sps:$4 sm:$0xff]  }
  0x93   : > { %5471 = vmatpush2.bf16.msra.mxu1 %v7672_v22  ;;  %5481 = vmatprep.subr.bf16.mxu0 %v7677_v23  ;;  %v7753_v22 = vld [vmem:[%s8771_s28 + $0x4a0] ss:$8 sps:$4 sm:$0xff]  }
  0x94   : > { %5522 = vmatprep.subr.bf16.mxu1 %v7680_v24  ;;  %v7756_v23 = vld [vmem:[%s8771_s28 + $0x5a0] ss:$8 sps:$4 sm:$0xff]   ;;  %v7761_v24 = vld [vmem:[%s8771_s28 + $0x494] ss:$8 sps:$4 sm:$0xff]  }
  0x95   : > { %5432 = vmatmul.mubr.bf16.vlgmr.msra.gmra.mxu0 %v1070_v21  ;;  %v1089_v21 = vcombine.high %v8924_v28, %v8924_v28  ;;  %v7762_v28 = vld [vmem:[%s8771_s28 + $0x590] ss:$8 sps:$4 sm:$0xff]  }
  0x96   : > { %5473 = vmatmul.mubr.bf16.vlgmr.msra.gmra.mxu1 %v1086_v26  ;;  %5482 = vmatpush1.bf16.msra.mxu0 %v7675_v25  ;;  %v7764_v25 = vld [vmem:[%s8771_s28 + $0x594] ss:$8 sps:$4 sm:$0xff]  }
  0x97   : > { %5523 = vmatpush1.bf16.msra.mxu1 %v7678_v27  ;;  %5483 = vmatprep.subr.bf16.mxu0 %v7683_v7  ;;  %v8990_v26 = vrot.slane %v1089_v21, %v8821_v50  ;;  %v7759_v27 = vld [vmem:[%s8771_s28 + $0x490] ss:$8 sps:$4 sm:$0xff]   ;;  %v7767_v7 = vld [vmem:[%s8771_s28 + $0x484] ss:$8 sps:$4 sm:$0xff]  }
  0x98   : > { %5524 = vmatprep.subr.bf16.mxu1 %v7686_v29  ;;  %5513 = vmatprep.mubr.bf16.mxu0 %v1126_v36  ;;  %v7770_v29 = vld [vmem:[%s8771_s28 + $0x584] ss:$8 sps:$4 sm:$0xff]   ;;  %v7776_v36 = vld [vmem:[%s8771_s28 + $0x774] ss:$8 sps:$4 sm:$0xff]  }
  0x99   : > { %5554 = vmatprep.mubr.bf16.mxu1 %v1136_v37  ;;  %v1105_v31 = vcombine.high %v8990_v26, %v8990_v26  ;;  %v7842_v21 = vld [vmem:[%s8771_s28 + $0x7c4] ss:$8 sps:$4 sm:$0xff]  }
  0x9a   : > { %5484 = vmatpush1.bf16.msra.mxu0 %v7681_v32  ;;  %v1112_v32 = vrot.slane %v8930_v30, %v8821_v50  ;;  %v7774_v30 = vld [vmem:[%s8771_s28 + $0x770] ss:$8 sps:$4 sm:$0xff]  }
  0x9b   : > { %5525 = vmatpush1.bf16.msra.mxu1 %v7684_v33  ;;  %5485 = vmatprep.subr.bf16.mxu0 %v7689_v34  ;;  %v7765_v33 = vld [vmem:[%s8771_s28 + $0x480] ss:$8 sps:$4 sm:$0xff]   ;;  %v1133_v37 = vrot.slane %v1105_v31, %v8821_v50 }
  0x9c   : > { %5526 = vmatprep.subr.bf16.mxu1 %v7692_v35  ;;  %v7768_v34 = vld [vmem:[%s8771_s28 + $0x580] ss:$8 sps:$4 sm:$0xff]   ;;  %v7773_v35 = vld [vmem:[%s8771_s28 + $0x674] ss:$8 sps:$4 sm:$0xff]  }
  0x9d   : > { %v7849_v31 = vld [vmem:[%s8771_s28 + $0x6a0] ss:$8 sps:$4 sm:$0xff]  }
  0x9e   : > { %5486 = vmatpush1.bf16.msra.mxu0 %v7687_v38  ;;  %v1134_v38 = vcombine.high %v1112_v32, %v1112_v32 }
  0x9f   : > { %5527 = vmatpush1.bf16.msra.mxu1 %v7690_v39  ;;  %5487 = vmatprep.subr.bf16.mxu0 %v7695_v40  ;;  %v7771_v39 = vld [vmem:[%s8771_s28 + $0x670] ss:$8 sps:$4 sm:$0xff]   ;;  %v7779_v40 = vld [vmem:[%s8771_s28 + $0x664] ss:$8 sps:$4 sm:$0xff]  }
  0xa0   : > { %5528 = vmatprep.subr.bf16.mxu1 %v7698_v41  ;;  %v7782_v41 = vld [vmem:[%s8771_s28 + $0x764] ss:$8 sps:$4 sm:$0xff]  }
  0xa2   : > { %5488 = vmatpush1.bf16.msra.mxu0 %v7693_v42  ;;  %v1137_v42 = vcombine.high %v1133_v37, %v1133_v37 }
  0xa3   : > { %5529 = vmatpush1.bf16.msra.mxu1 %v7696_v43  ;;  %5489 = vmatprep.subr.bf16.mxu0 %v7701_v45  ;;  %v7777_v43 = vld [vmem:[%s8771_s28 + $0x660] ss:$8 sps:$4 sm:$0xff]  }
  0xa4   : > { %5530 = vmatprep.subr.bf16.mxu1 %v7704_v46  ;;  %v7780_v45 = vld [vmem:[%s8771_s28 + $0x760] ss:$8 sps:$4 sm:$0xff]   ;;  %v7785_v46 = vld [vmem:[%s8771_s28 + $0x654] ss:$8 sps:$4 sm:$0xff]  }
  0xa6   : > { %5490 = vmatpush1.bf16.msra.mxu0 %v7699_v47  ;;  %v7788_v47 = vld [vmem:[%s8771_s28 + $0x754] ss:$8 sps:$4 sm:$0xff]  }
  0xa7   : > { %5531 = vmatpush1.bf16.msra.mxu1 %v7702_v48  ;;  %5491 = vmatprep.subr.bf16.mxu0 %v7707_v49  ;;  %v7783_v48 = vld [vmem:[%s8771_s28 + $0x650] ss:$8 sps:$4 sm:$0xff]  }
  0xa8   : > { %5532 = vmatprep.subr.bf16.mxu1 %v7710_v51  ;;  %v7786_v49 = vld [vmem:[%s8771_s28 + $0x750] ss:$8 sps:$4 sm:$0xff]   ;;  %v7791_v51 = vld [vmem:[%s8771_s28 + $0x644] ss:$8 sps:$4 sm:$0xff]  }
  0xaa   : > { %5492 = vmatpush1.bf16.msra.mxu0 %v7705_v52  ;;  %v7794_v52 = vld [vmem:[%s8771_s28 + $0x744] ss:$8 sps:$4 sm:$0xff]  }
  0xab   : > { %5533 = vmatpush1.bf16.msra.mxu1 %v7708_v53  ;;  %5493 = vmatprep.subr.bf16.mxu0 %v7713_v54  ;;  %v7789_v53 = vld [vmem:[%s8771_s28 + $0x640] ss:$8 sps:$4 sm:$0xff]  }
  0xac   : > { %5534 = vmatprep.subr.bf16.mxu1 %v7716_v55  ;;  %v7792_v54 = vld [vmem:[%s8771_s28 + $0x740] ss:$8 sps:$4 sm:$0xff]   ;;  %v7797_v55 = vld [vmem:[%s8771_s28 + $0x634] ss:$8 sps:$4 sm:$0xff]  }
  0xae   : > { %5494 = vmatpush1.bf16.msra.mxu0 %v7711_v56  ;;  %v7800_v56 = vld [vmem:[%s8771_s28 + $0x734] ss:$8 sps:$4 sm:$0xff]  }
  0xaf   : > { %5535 = vmatpush1.bf16.msra.mxu1 %v7714_v57  ;;  %5495 = vmatprep.subr.bf16.mxu0 %v7719_v58  ;;  %v7795_v57 = vld [vmem:[%s8771_s28 + $0x630] ss:$8 sps:$4 sm:$0xff]  }
  0xb0   : > { %5536 = vmatprep.subr.bf16.mxu1 %v7722_v59  ;;  %v7798_v58 = vld [vmem:[%s8771_s28 + $0x730] ss:$8 sps:$4 sm:$0xff]   ;;  %v7803_v59 = vld [vmem:[%s8771_s28 + $0x624] ss:$8 sps:$4 sm:$0xff]  }
  0xb2   : > { %5496 = vmatpush1.bf16.msra.mxu0 %v7717_v60  ;;  %v7806_v60 = vld [vmem:[%s8771_s28 + $0x724] ss:$8 sps:$4 sm:$0xff]  }
  0xb3   : > { %5537 = vmatpush1.bf16.msra.mxu1 %v7720_v61  ;;  %5497 = vmatprep.subr.bf16.mxu0 %v7725_v62  ;;  %v7801_v61 = vld [vmem:[%s8771_s28 + $0x620] ss:$8 sps:$4 sm:$0xff]  }
  0xb4   : > { %5538 = vmatprep.subr.bf16.mxu1 %v7728_v63  ;;  %v7804_v62 = vld [vmem:[%s8771_s28 + $0x720] ss:$8 sps:$4 sm:$0xff]   ;;  %v7809_v63 = vld [vmem:[%s8771_s28 + $0x614] ss:$8 sps:$4 sm:$0xff]  }
  0xb6   : > { %5498 = vmatpush2.bf16.msra.mxu0 %v7723_v0  ;;  %v7812_v0 = vld [vmem:[%s8771_s28 + $0x714] ss:$8 sps:$4 sm:$0xff]  }
  0xb7   : > { %5539 = vmatpush2.bf16.msra.mxu1 %v7726_v1  ;;  %5499 = vmatprep.subr.bf16.mxu0 %v7731_v2  ;;  %v7807_v1 = vld [vmem:[%s8771_s28 + $0x610] ss:$8 sps:$4 sm:$0xff]  }
  0xb8   : > { %5540 = vmatprep.subr.bf16.mxu1 %v7734_v3  ;;  %v7810_v2 = vld [vmem:[%s8771_s28 + $0x710] ss:$8 sps:$4 sm:$0xff]   ;;  %v7815_v3 = vld [vmem:[%s8771_s28 + $0x604] ss:$8 sps:$4 sm:$0xff]  }
  0xba   : > { %5500 = vmatpush2.bf16.msra.mxu0 %v7729_v4  ;;  %v7818_v4 = vld [vmem:[%s8771_s28 + $0x704] ss:$8 sps:$4 sm:$0xff]  }
  0xbb   : > { %5541 = vmatpush2.bf16.msra.mxu1 %v7732_v5  ;;  %5501 = vmatprep.subr.bf16.mxu0 %v7737_v6  ;;  %v7813_v5 = vld [vmem:[%s8771_s28 + $0x600] ss:$8 sps:$4 sm:$0xff]  }
  0xbc   : > { %5542 = vmatprep.subr.bf16.mxu1 %v7740_v8  ;;  %v7816_v6 = vld [vmem:[%s8771_s28 + $0x700] ss:$8 sps:$4 sm:$0xff]   ;;  %v7821_v8 = vld [vmem:[%s8771_s28 + $0x6f4] ss:$8 sps:$4 sm:$0xff]  }
  0xbe   : > { %5502 = vmatpush2.bf16.msra.mxu0 %v7735_v9  ;;  %v7824_v9 = vld [vmem:[%s8771_s28 + $0x7f4] ss:$8 sps:$4 sm:$0xff]  }
  0xbf   : > { %5543 = vmatpush2.bf16.msra.mxu1 %v7738_v10  ;;  %5503 = vmatprep.subr.bf16.mxu0 %v7743_v11  ;;  %v7819_v10 = vld [vmem:[%s8771_s28 + $0x6f0] ss:$8 sps:$4 sm:$0xff]  }
  0xc0   : > { %5544 = vmatprep.subr.bf16.mxu1 %v7746_v12  ;;  %v7822_v11 = vld [vmem:[%s8771_s28 + $0x7f0] ss:$8 sps:$4 sm:$0xff]   ;;  %v7827_v12 = vld [vmem:[%s8771_s28 + $0x6e4] ss:$8 sps:$4 sm:$0xff]  }
  0xc2   : > { %5504 = vmatpush2.bf16.msra.mxu0 %v7741_v13  ;;  %v7830_v13 = vld [vmem:[%s8771_s28 + $0x7e4] ss:$8 sps:$4 sm:$0xff]  }
  0xc3   : > { %5545 = vmatpush2.bf16.msra.mxu1 %v7744_v14  ;;  %5505 = vmatprep.subr.bf16.mxu0 %v7749_v15  ;;  %v7825_v14 = vld [vmem:[%s8771_s28 + $0x6e0] ss:$8 sps:$4 sm:$0xff]  }
  0xc4   : > { %5546 = vmatprep.subr.bf16.mxu1 %v7752_v16  ;;  %v7828_v15 = vld [vmem:[%s8771_s28 + $0x7e0] ss:$8 sps:$4 sm:$0xff]   ;;  %v7833_v16 = vld [vmem:[%s8771_s28 + $0x6d4] ss:$8 sps:$4 sm:$0xff]  }
  0xc6   : > { %5506 = vmatpush2.bf16.msra.mxu0 %v7747_v17  ;;  %v7836_v17 = vld [vmem:[%s8771_s28 + $0x7d4] ss:$8 sps:$4 sm:$0xff]  }
  0xc7   : > { %5547 = vmatpush2.bf16.msra.mxu1 %v7750_v18  ;;  %5507 = vmatprep.subr.bf16.mxu0 %v7755_v19  ;;  %v7831_v18 = vld [vmem:[%s8771_s28 + $0x6d0] ss:$8 sps:$4 sm:$0xff]  }
  0xc8   : > { %5548 = vmatprep.subr.bf16.mxu1 %v7758_v20  ;;  %v7834_v19 = vld [vmem:[%s8771_s28 + $0x7d0] ss:$8 sps:$4 sm:$0xff]   ;;  %v7839_v20 = vld [vmem:[%s8771_s28 + $0x6c4] ss:$8 sps:$4 sm:$0xff]  }
  0xca   : > { %5508 = vmatpush2.bf16.msra.mxu0 %v7753_v22  ;;  %v7837_v22 = vld [vmem:[%s8771_s28 + $0x6c0] ss:$8 sps:$4 sm:$0xff]  }
  0xcb   : > { %5549 = vmatpush2.bf16.msra.mxu1 %v7756_v23  ;;  %5509 = vmatprep.subr.bf16.mxu0 %v7761_v24  ;;  %v7840_v23 = vld [vmem:[%s8771_s28 + $0x7c0] ss:$8 sps:$4 sm:$0xff]   ;;  %v7845_v24 = vld [vmem:[%s8771_s28 + $0x6b4] ss:$8 sps:$4 sm:$0xff]  }
  0xcc   : > { %5550 = vmatprep.subr.bf16.mxu1 %v7764_v25  ;;  %v7848_v25 = vld [vmem:[%s8771_s28 + $0x7b4] ss:$8 sps:$4 sm:$0xff]  }
  0xce   : > { %5510 = vmatpush2.bf16.msra.mxu0 %v7759_v27  ;;  %v7843_v27 = vld [vmem:[%s8771_s28 + $0x6b0] ss:$8 sps:$4 sm:$0xff]  }
  0xcf   : > { %5551 = vmatpush2.bf16.msra.mxu1 %v7762_v28  ;;  %5511 = vmatprep.subr.bf16.mxu0 %v7767_v7  ;;  %v7846_v28 = vld [vmem:[%s8771_s28 + $0x7b0] ss:$8 sps:$4 sm:$0xff]   ;;  %v7851_v7 = vld [vmem:[%s8771_s28 + $0x6a4] ss:$8 sps:$4 sm:$0xff]  }
  0xd0   : > { %5552 = vmatprep.subr.bf16.mxu1 %v7770_v29  ;;  %v7854_v29 = vld [vmem:[%s8771_s28 + $0x7a4] ss:$8 sps:$4 sm:$0xff]  }
  0xd2   : > { %5512 = vmatpush2.bf16.msra.mxu0 %v7765_v33  ;;  %v7852_v33 = vld [vmem:[%s8771_s28 + $0x7a0] ss:$8 sps:$4 sm:$0xff]  }
  0xd3   : > { %5553 = vmatpush2.bf16.msra.mxu1 %v7768_v34  ;;  %5563 = vmatprep.subr.bf16.mxu0 %v7773_v35  ;;  %v7857_v34 = vld [vmem:[%s8771_s28 + $0x694] ss:$8 sps:$4 sm:$0xff]  }
  0xd4   : > { %5604 = vmatprep.subr.bf16.mxu1 %v7776_v36  ;;  %v7860_v35 = vld [vmem:[%s8771_s28 + $0x794] ss:$8 sps:$4 sm:$0xff]  }
  0xd5   : > { %5514 = vmatmul.mubr.bf16.vlgmr.msra.gmra.mxu0 %v1112_v32  ;;  %v9059_v32 = vld [vmem:[%s8766_s24 + $0x10] sm:$0xff] }
  0xd6   : > { %5555 = vmatmul.mubr.bf16.vlgmr.msra.gmra.mxu1 %v1134_v38  ;;  %5564 = vmatpush1.bf16.msra.mxu0 %v7771_v39  ;;  %v9066_v36 = vrot.slane %v9059_v32, %v8821_v50  ;;  %v7858_v38 = vld [vmem:[%s8771_s28 + $0x790] ss:$8 sps:$4 sm:$0xff]   ;;  %v7863_v39 = vld [vmem:[%s8771_s28 + $0x684] ss:$8 sps:$4 sm:$0xff]  }
  0xd7   : > { %5605 = vmatpush1.bf16.msra.mxu1 %v7774_v30  ;;  %5565 = vmatprep.subr.bf16.mxu0 %v7779_v40  ;;  %v7866_v30 = vld [vmem:[%s8771_s28 + $0x784] ss:$8 sps:$4 sm:$0xff]  }
  0xd8   : > { %5606 = vmatprep.subr.bf16.mxu1 %v7782_v41  ;;  %5595 = vmatprep.mubr.bf16.mxu0 %v1133_v37  ;;  %v7855_v37 = vld [vmem:[%s8771_s28 + $0x690] ss:$8 sps:$4 sm:$0xff]   ;;  %v1153_v40 = vcombine.high %v9066_v36, %v9066_v36  ;;  %v7861_v41 = vld [vmem:[%s8771_s28 + $0x680] ss:$8 sps:$4 sm:$0xff]  }
  0xd9   : > { %5636 = vmatprep.mubr.bf16.mxu1 %v1137_v42  ;;  %v1119_v42 = vrot.slane %v8990_v26, %v8821_v50  ;;  %v7879_v26 = vld [vmem:[%s8771_s28 + $0x964] ss:$8 sps:$4 sm:$0xff]  }
  0xda   : > { %5566 = vmatpush1.bf16.msra.mxu0 %v7777_v43  ;;  %v7864_v43 = vld [vmem:[%s8771_s28 + $0x780] ss:$8 sps:$4 sm:$0xff]  }
  0xdb   : > { %5607 = vmatpush1.bf16.msra.mxu1 %v7780_v45  ;;  %5567 = vmatprep.subr.bf16.mxu0 %v7785_v46  ;;  %v7870_v45 = vld [vmem:[%s8771_s28 + $0x874] ss:$8 sps:$4 sm:$0xff]  }
  0xdc   : > { %5608 = vmatprep.subr.bf16.mxu1 %v7788_v47  ;;  %v7873_v46 = vld [vmem:[%s8771_s28 + $0x974] ss:$8 sps:$4 sm:$0xff]   ;;  %v1175_v47 = vrot.slane %v1153_v40, %v8821_v50  ;;  %v7931_v40 = vld [vmem:[%s8771_s28 + $0x9d0] ss:$8 sps:$4 sm:$0xff]  }
  0xde   : > { %5568 = vmatpush1.bf16.msra.mxu0 %v7783_v48  ;;  %v7868_v48 = vld [vmem:[%s8771_s28 + $0x870] ss:$8 sps:$4 sm:$0xff]  }
  0xdf   : > { %5609 = vmatpush1.bf16.msra.mxu1 %v7786_v49  ;;  %5569 = vmatprep.subr.bf16.mxu0 %v7791_v51  ;;  %v1135_v49 = vcombine.high %v1119_v42, %v1119_v42  ;;  %v7871_v51 = vld [vmem:[%s8771_s28 + $0x970] ss:$8 sps:$4 sm:$0xff]  }
  0xe0   : > { %5610 = vmatprep.subr.bf16.mxu1 %v7794_v52  ;;  %v7876_v52 = vld [vmem:[%s8771_s28 + $0x864] ss:$8 sps:$4 sm:$0xff]  }
  0xe2   : > { %5570 = vmatpush1.bf16.msra.mxu0 %v7789_v53  ;;  %v7874_v53 = vld [vmem:[%s8771_s28 + $0x860] ss:$8 sps:$4 sm:$0xff]  }
  0xe3   : > { %5611 = vmatpush1.bf16.msra.mxu1 %v7792_v54  ;;  %5571 = vmatprep.subr.bf16.mxu0 %v7797_v55  ;;  %v1185_v54 = vcombine.high %v1175_v47, %v1175_v47 }
  0xe4   : > { %5612 = vmatprep.subr.bf16.mxu1 %v7800_v56 }
  0xe6   : > { %5572 = vmatpush1.bf16.msra.mxu0 %v7795_v57  ;;  %v7877_v57 = vld [vmem:[%s8771_s28 + $0x960] ss:$8 sps:$4 sm:$0xff]  }
  0xe7   : > { %5613 = vmatpush1.bf16.msra.mxu1 %v7798_v58  ;;  %5573 = vmatprep.subr.bf16.mxu0 %v7803_v59  ;;  %v7882_v59 = vld [vmem:[%s8771_s28 + $0x854] ss:$8 sps:$4 sm:$0xff]  }
  0xe8   : > { %5614 = vmatprep.subr.bf16.mxu1 %v7806_v60 }
  0xea   : > { %5574 = vmatpush1.bf16.msra.mxu0 %v7801_v61 }
  0xeb   : > { %5615 = vmatpush1.bf16.msra.mxu1 %v7804_v62  ;;  %5575 = vmatprep.subr.bf16.mxu0 %v7809_v63  ;;  %v7885_v62 = vld [vmem:[%s8771_s28 + $0x954] ss:$8 sps:$4 sm:$0xff]  }
  0xec   : > { %5616 = vmatprep.subr.bf16.mxu1 %v7812_v0 }
  0xee   : > { %5576 = vmatpush1.bf16.msra.mxu0 %v7807_v1  ;;  %v7880_v1 = vld [vmem:[%s8771_s28 + $0x850] ss:$8 sps:$4 sm:$0xff]  }
  0xef   : > { %5617 = vmatpush1.bf16.msra.mxu1 %v7810_v2  ;;  %5577 = vmatprep.subr.bf16.mxu0 %v7815_v3  ;;  %v7883_v3 = vld [vmem:[%s8771_s28 + $0x950] ss:$8 sps:$4 sm:$0xff]  }
  0xf0   : > { %5618 = vmatprep.subr.bf16.mxu1 %v7818_v4 }
  0xf2   : > { %5578 = vmatpush1.bf16.msra.mxu0 %v7813_v5  ;;  %v7888_v5 = vld [vmem:[%s8771_s28 + $0x844] ss:$8 sps:$4 sm:$0xff]  }
  0xf3   : > { %5619 = vmatpush1.bf16.msra.mxu1 %v7816_v6  ;;  %5579 = vmatprep.subr.bf16.mxu0 %v7821_v8  ;;  %v7891_v6 = vld [vmem:[%s8771_s28 + $0x944] ss:$8 sps:$4 sm:$0xff]  }
  0xf4   : > { %5620 = vmatprep.subr.bf16.mxu1 %v7824_v9  ;;  %v7886_v9 = vld [vmem:[%s8771_s28 + $0x840] ss:$8 sps:$4 sm:$0xff]  }
  0xf6   : > { %5580 = vmatpush2.bf16.msra.mxu0 %v7819_v10  ;;  %v7889_v10 = vld [vmem:[%s8771_s28 + $0x940] ss:$8 sps:$4 sm:$0xff]  }
  0xf7   : > { %5621 = vmatpush2.bf16.msra.mxu1 %v7822_v11  ;;  %5581 = vmatprep.subr.bf16.mxu0 %v7827_v12  ;;  %v7894_v11 = vld [vmem:[%s8771_s28 + $0x834] ss:$8 sps:$4 sm:$0xff]  }
  0xf8   : > { %5622 = vmatprep.subr.bf16.mxu1 %v7830_v13  ;;  %v7897_v12 = vld [vmem:[%s8771_s28 + $0x934] ss:$8 sps:$4 sm:$0xff]   ;;  %v7892_v13 = vld [vmem:[%s8771_s28 + $0x830] ss:$8 sps:$4 sm:$0xff]  }
  0xfa   : > { %5582 = vmatpush2.bf16.msra.mxu0 %v7825_v14  ;;  %v7895_v14 = vld [vmem:[%s8771_s28 + $0x930] ss:$8 sps:$4 sm:$0xff]  }
  0xfb   : > { %5623 = vmatpush2.bf16.msra.mxu1 %v7828_v15  ;;  %5583 = vmatprep.subr.bf16.mxu0 %v7833_v16  ;;  %v7900_v15 = vld [vmem:[%s8771_s28 + $0x824] ss:$8 sps:$4 sm:$0xff]  }
  0xfc   : > { %5624 = vmatprep.subr.bf16.mxu1 %v7836_v17  ;;  %v7903_v16 = vld [vmem:[%s8771_s28 + $0x924] ss:$8 sps:$4 sm:$0xff]   ;;  %v7898_v17 = vld [vmem:[%s8771_s28 + $0x820] ss:$8 sps:$4 sm:$0xff]  }
  0xfe   : > { %5584 = vmatpush2.bf16.msra.mxu0 %v7831_v18  ;;  %v7901_v18 = vld [vmem:[%s8771_s28 + $0x920] ss:$8 sps:$4 sm:$0xff]  }
  0xff   : > { %5625 = vmatpush2.bf16.msra.mxu1 %v7834_v19  ;;  %5585 = vmatprep.subr.bf16.mxu0 %v7839_v20  ;;  %v7906_v19 = vld [vmem:[%s8771_s28 + $0x814] ss:$8 sps:$4 sm:$0xff]  }
 0x100   : > { %5626 = vmatprep.subr.bf16.mxu1 %v7842_v21  ;;  %v7909_v20 = vld [vmem:[%s8771_s28 + $0x914] ss:$8 sps:$4 sm:$0xff]   ;;  %v7904_v21 = vld [vmem:[%s8771_s28 + $0x810] ss:$8 sps:$4 sm:$0xff]  }
 0x102   : > { %5586 = vmatpush2.bf16.msra.mxu0 %v7837_v22  ;;  %v7907_v22 = vld [vmem:[%s8771_s28 + $0x910] ss:$8 sps:$4 sm:$0xff]  }
 0x103   : > { %5627 = vmatpush2.bf16.msra.mxu1 %v7840_v23  ;;  %5587 = vmatprep.subr.bf16.mxu0 %v7845_v24  ;;  %v7912_v23 = vld [vmem:[%s8771_s28 + $0x804] ss:$8 sps:$4 sm:$0xff]  }
 0x104   : > { %5628 = vmatprep.subr.bf16.mxu1 %v7848_v25  ;;  %v7915_v24 = vld [vmem:[%s8771_s28 + $0x904] ss:$8 sps:$4 sm:$0xff]   ;;  %v7910_v25 = vld [vmem:[%s8771_s28 + $0x800] ss:$8 sps:$4 sm:$0xff]  }
 0x106   : > { %5588 = vmatpush2.bf16.msra.mxu0 %v7843_v27  ;;  %v7913_v27 = vld [vmem:[%s8771_s28 + $0x900] ss:$8 sps:$4 sm:$0xff]  }
 0x107   : > { %5629 = vmatpush2.bf16.msra.mxu1 %v7846_v28  ;;  %5589 = vmatprep.subr.bf16.mxu0 %v7851_v7  ;;  %v7918_v28 = vld [vmem:[%s8771_s28 + $0x8f4] ss:$8 sps:$4 sm:$0xff]  }
 0x108   : > { %5630 = vmatprep.subr.bf16.mxu1 %v7854_v29  ;;  %v7921_v7 = vld [vmem:[%s8771_s28 + $0x9f4] ss:$8 sps:$4 sm:$0xff]   ;;  %v7916_v29 = vld [vmem:[%s8771_s28 + $0x8f0] ss:$8 sps:$4 sm:$0xff]  }
 0x10a   : > { %5590 = vmatpush2.bf16.msra.mxu0 %v7849_v31  ;;  %v7919_v31 = vld [vmem:[%s8771_s28 + $0x9f0] ss:$8 sps:$4 sm:$0xff]  }
 0x10b   : > { %5631 = vmatpush2.bf16.msra.mxu1 %v7852_v33  ;;  %5591 = vmatprep.subr.bf16.mxu0 %v7857_v34  ;;  %v7924_v33 = vld [vmem:[%s8771_s28 + $0x8e4] ss:$8 sps:$4 sm:$0xff]  }
 0x10c   : > { %5632 = vmatprep.subr.bf16.mxu1 %v7860_v35  ;;  %v7927_v34 = vld [vmem:[%s8771_s28 + $0x9e4] ss:$8 sps:$4 sm:$0xff]   ;;  %v7922_v35 = vld [vmem:[%s8771_s28 + $0x8e0] ss:$8 sps:$4 sm:$0xff]  }
 0x10e   : > { %5592 = vmatpush2.bf16.msra.mxu0 %v7855_v37  ;;  %v7925_v37 = vld [vmem:[%s8771_s28 + $0x9e0] ss:$8 sps:$4 sm:$0xff]  }
 0x10f   : > { %5633 = vmatpush2.bf16.msra.mxu1 %v7858_v38  ;;  %5593 = vmatprep.subr.bf16.mxu0 %v7863_v39  ;;  %v7930_v38 = vld [vmem:[%s8771_s28 + $0x8d4] ss:$8 sps:$4 sm:$0xff]  }
 0x110   : > { %5634 = vmatprep.subr.bf16.mxu1 %v7866_v30  ;;  %v7933_v39 = vld [vmem:[%s8771_s28 + $0x9d4] ss:$8 sps:$4 sm:$0xff]   ;;  %v7928_v30 = vld [vmem:[%s8771_s28 + $0x8d0] ss:$8 sps:$4 sm:$0xff]  }
 0x112   : > { %5594 = vmatpush2.bf16.msra.mxu0 %v7861_v41  ;;  %v7936_v41 = vld [vmem:[%s8771_s28 + $0x8c4] ss:$8 sps:$4 sm:$0xff]  }
 0x113   : > { %5635 = vmatpush2.bf16.msra.mxu1 %v7864_v43  ;;  %5645 = vmatprep.subr.bf16.mxu0 %v7870_v45  ;;  %v7934_v43 = vld [vmem:[%s8771_s28 + $0x8c0] ss:$8 sps:$4 sm:$0xff]  }
 0x114   : > { %5686 = vmatprep.subr.bf16.mxu1 %v7873_v46  ;;  %v7937_v45 = vld [vmem:[%s8771_s28 + $0x9c0] ss:$8 sps:$4 sm:$0xff]   ;;  %v7942_v46 = vld [vmem:[%s8771_s28 + $0x8b4] ss:$8 sps:$4 sm:$0xff]  }
 0x115   : > { %v5351_v55 = vpop.f32.mrf.mxu0  ;;  %5596 = vmatmul.mubr.bf16.vlgmr.msra.gmra.mxu0 %v1119_v42  ;;  %v7939_v42 = vld [vmem:[%s8771_s28 + $0x9c4] ss:$8 sps:$4 sm:$0xff]  }
 0x116   : > { %v5392_v56 = vpop.f32.mrf.mxu1  ;;  %5637 = vmatmul.mubr.bf16.vlgmr.msra.gmra.mxu1 %v1135_v49  ;;  %5646 = vmatpush1.bf16.msra.mxu0 %v7868_v48  ;;  %v7940_v48 = vld [vmem:[%s8771_s28 + $0x8b0] ss:$8 sps:$4 sm:$0xff]  }
 0x117   : > { %v9087_v58 = vadd.f32 %v5392_v56, %v5351_v55  ;;  %5687 = vmatpush1.bf16.msra.mxu1 %v7871_v51  ;;  %v5353_v60 = vpop.f32.mrf.mxu0  ;;  %5647 = vmatprep.subr.bf16.mxu0 %v7876_v52  ;;  %v7943_v49 = vld [vmem:[%s8771_s28 + $0x9b0] ss:$8 sps:$4 sm:$0xff]   ;;  %v7948_v51 = vld [vmem:[%s8771_s28 + $0x8a4] ss:$8 sps:$4 sm:$0xff]   ;;  %v7954_v55 = vld [vmem:[%s8771_s28 + $0x894] ss:$8 sps:$4 sm:$0xff]  }
 0x118   : > { %v5394_v61 = vpop.f32.mrf.mxu1  ;;  %5688 = vmatprep.subr.bf16.mxu1 %v7879_v26  ;;  %5677 = vmatprep.mubr.bf16.mxu0 %v1175_v47  ;;  %v7945_v47 = vld [vmem:[%s8771_s28 + $0x9b4] ss:$8 sps:$4 sm:$0xff]   ;;  %v7951_v52 = vld [vmem:[%s8771_s28 + $0x9a4] ss:$8 sps:$4 sm:$0xff]   ;;  %v1138_v26 = vcombine.high %v9059_v32, %v9059_v32  ;;  %v7955_v32 = vld [vmem:[%s8771_s28 + $0x990] ss:$8 sps:$4 sm:$0xff]  }
 0x119   : > { %v9091_v63 = vadd.f32 %v5394_v61, %v5353_v60  ;;  %5718 = vmatprep.mubr.bf16.mxu1 %v1185_v54  ;;  %v5355_v0 = vpop.f32.mrf.mxu0  ;;  %v7949_v54 = vld [vmem:[%s8771_s28 + $0x9a0] ss:$8 sps:$4 sm:$0xff]   ;;  %v7957_v56 = vld [vmem:[%s8771_s28 + $0x994] ss:$8 sps:$4 sm:$0xff]   ;;  %v7960_v60 = vld [vmem:[%s8771_s28 + $0x884] ss:$8 sps:$4 sm:$0xff]  }
 0x11a   : > { %v5396_v2 = vpop.f32.mrf.mxu1  ;;  %5648 = vmatpush1.bf16.msra.mxu0 %v7874_v53  ;;  %v7946_v53 = vld [vmem:[%s8771_s28 + $0x8a0] ss:$8 sps:$4 sm:$0xff]   ;;  %v7963_v61 = vld [vmem:[%s8771_s28 + $0x984] ss:$8 sps:$4 sm:$0xff]  }
 0x11b   : > { %5689 = vmatpush1.bf16.msra.mxu1 %v7877_v57  ;;  %v5356_v4 = vpop.f32.mrf.mxu0  ;;  %5649 = vmatprep.subr.bf16.mxu0 %v7882_v59  ;;  %v9144_v57 = vrot.slane %v1138_v26, %v8821_v50  ;;  %v7952_v59 = vld [vmem:[%s8771_s28 + $0x890] ss:$8 sps:$4 sm:$0xff]   ;;  %v7958_v0 = vld [vmem:[%s8771_s28 + $0x880] ss:$8 sps:$4 sm:$0xff]   ;;  %v8017_v26 = vld [vmem:[%s8771_s28 + $0xbf4] ss:$8 sps:$4 sm:$0xff]  }
 0x11c   : > { %5690 = vmatprep.subr.bf16.mxu1 %v7885_v62  ;;  %v5397_v8 = vpop.f32.mrf.mxu1  ;;  %v7961_v2 = vld [vmem:[%s8771_s28 + $0x980] ss:$8 sps:$4 sm:$0xff]   ;;  %v7969_v4 = vld [vmem:[%s8771_s28 + $0xb74] ss:$8 sps:$4 sm:$0xff]  }
 0x11d   : > { %v1154_v62 = vcombine.high %v9144_v57, %v9144_v57 }
 0x11e   : > { %5650 = vmatpush1.bf16.msra.mxu0 %v7880_v1  ;;  %v1161_v1 = vrot.slane %v9066_v36, %v8821_v50  ;;  %v7975_v36 = vld [vmem:[%s8771_s28 + $0xb64] ss:$8 sps:$4 sm:$0xff]  }
 0x11f   : > { %5691 = vmatpush1.bf16.msra.mxu1 %v7883_v3  ;;  %5651 = vmatprep.subr.bf16.mxu0 %v7888_v5  ;;  %v7966_v3 = vld [vmem:[%s8771_s28 + $0xa74] ss:$8 sps:$4 sm:$0xff]   ;;  %v7964_v5 = vld [vmem:[%s8771_s28 + $0xa70] ss:$8 sps:$4 sm:$0xff]  }
 0x120   : > { %5692 = vmatprep.subr.bf16.mxu1 %v7891_v6  ;;  %v1182_v6 = vrot.slane %v1154_v62, %v8821_v50  ;;  %v1183_v8 = vcombine.high %v1161_v1, %v1161_v1  ;;  %v8024_v62 = vld [vmem:[%s8771_s28 + $0xad0] ss:$8 sps:$4 sm:$0xff]  }
 0x122   : > { %5652 = vmatpush1.bf16.msra.mxu0 %v7886_v9  ;;  %v7967_v9 = vld [vmem:[%s8771_s28 + $0xb70] ss:$8 sps:$4 sm:$0xff]  }
 0x123   : > { %5693 = vmatpush1.bf16.msra.mxu1 %v7889_v10  ;;  %5653 = vmatprep.subr.bf16.mxu0 %v7894_v11  ;;  %v7972_v10 = vld [vmem:[%s8771_s28 + $0xa64] ss:$8 sps:$4 sm:$0xff]   ;;  %v7970_v11 = vld [vmem:[%s8771_s28 + $0xa60] ss:$8 sps:$4 sm:$0xff]  }
 0x124   : > { %5694 = vmatprep.subr.bf16.mxu1 %v7897_v12  ;;  %v1186_v12 = vcombine.high %v1182_v6, %v1182_v6 }
 0x126   : > { %5654 = vmatpush1.bf16.msra.mxu0 %v7892_v13 }
 0x127   : > { %5695 = vmatpush1.bf16.msra.mxu1 %v7895_v14  ;;  %5655 = vmatprep.subr.bf16.mxu0 %v7900_v15  ;;  %v7973_v15 = vld [vmem:[%s8771_s28 + $0xb60] ss:$8 sps:$4 sm:$0xff]  }
 0x128   : > { %5696 = vmatprep.subr.bf16.mxu1 %v7903_v16 }
 0x12a   : > { %5656 = vmatpush1.bf16.msra.mxu0 %v7898_v17  ;;  %v7978_v17 = vld [vmem:[%s8771_s28 + $0xa54] ss:$8 sps:$4 sm:$0xff]  }
 0x12b   : > { %5697 = vmatpush1.bf16.msra.mxu1 %v7901_v18  ;;  %5657 = vmatprep.subr.bf16.mxu0 %v7906_v19 }
 0x12c   : > { %5698 = vmatprep.subr.bf16.mxu1 %v7909_v20  ;;  %v7981_v20 = vld [vmem:[%s8771_s28 + $0xb54] ss:$8 sps:$4 sm:$0xff]  }
 0x12e   : > { %5658 = vmatpush1.bf16.msra.mxu0 %v7904_v21 }
 0x12f   : > { %5699 = vmatpush1.bf16.msra.mxu1 %v7907_v22  ;;  %5659 = vmatprep.subr.bf16.mxu0 %v7912_v23 }
 0x130   : > { %5700 = vmatprep.subr.bf16.mxu1 %v7915_v24 }
 0x132   : > { %5660 = vmatpush1.bf16.msra.mxu0 %v7910_v25 }
 0x133   : > { %5701 = vmatpush1.bf16.msra.mxu1 %v7913_v27  ;;  %5661 = vmatprep.subr.bf16.mxu0 %v7918_v28  ;;  %v7979_v27 = vld [vmem:[%s8771_s28 + $0xb50] ss:$8 sps:$4 sm:$0xff]  }
 0x134   : > { %5702 = vmatprep.subr.bf16.mxu1 %v7921_v7  ;;  %v7987_v7 = vld [vmem:[%s8771_s28 + $0xb44] ss:$8 sps:$4 sm:$0xff]  }
 0x136   : > { %5662 = vmatpush2.bf16.msra.mxu0 %v7916_v29 }
 0x137   : > { %5703 = vmatpush2.bf16.msra.mxu1 %v7919_v31  ;;  %5663 = vmatprep.subr.bf16.mxu0 %v7924_v33  ;;  %v7982_v31 = vld [vmem:[%s8771_s28 + $0xa40] ss:$8 sps:$4 sm:$0xff]  }
 0x138   : > { %5704 = vmatprep.subr.bf16.mxu1 %v7927_v34  ;;  %v7985_v33 = vld [vmem:[%s8771_s28 + $0xb40] ss:$8 sps:$4 sm:$0xff]   ;;  %v7990_v34 = vld [vmem:[%s8771_s28 + $0xa34] ss:$8 sps:$4 sm:$0xff]  }
 0x13a   : > { %5664 = vmatpush2.bf16.msra.mxu0 %v7922_v35  ;;  %v7993_v35 = vld [vmem:[%s8771_s28 + $0xb34] ss:$8 sps:$4 sm:$0xff]  }
 0x13b   : > { %5705 = vmatpush2.bf16.msra.mxu1 %v7925_v37  ;;  %5665 = vmatprep.subr.bf16.mxu0 %v7930_v38  ;;  %v7988_v37 = vld [vmem:[%s8771_s28 + $0xa30] ss:$8 sps:$4 sm:$0xff]  }
 0x13c   : > { %5706 = vmatprep.subr.bf16.mxu1 %v7933_v39  ;;  %v7991_v38 = vld [vmem:[%s8771_s28 + $0xb30] ss:$8 sps:$4 sm:$0xff]   ;;  %v7996_v39 = vld [vmem:[%s8771_s28 + $0xa24] ss:$8 sps:$4 sm:$0xff]  }
 0x13e   : > { %5666 = vmatpush2.bf16.msra.mxu0 %v7928_v30  ;;  %v7999_v30 = vld [vmem:[%s8771_s28 + $0xb24] ss:$8 sps:$4 sm:$0xff]  }
 0x13f   : > { %5707 = vmatpush2.bf16.msra.mxu1 %v7931_v40  ;;  %5667 = vmatprep.subr.bf16.mxu0 %v7936_v41  ;;  %v7994_v40 = vld [vmem:[%s8771_s28 + $0xa20] ss:$8 sps:$4 sm:$0xff]  }
 0x140   : > { %5708 = vmatprep.subr.bf16.mxu1 %v7939_v42  ;;  %v7997_v41 = vld [vmem:[%s8771_s28 + $0xb20] ss:$8 sps:$4 sm:$0xff]   ;;  %v8002_v42 = vld [vmem:[%s8771_s28 + $0xa14] ss:$8 sps:$4 sm:$0xff]  }
 0x142   : > { %5668 = vmatpush2.bf16.msra.mxu0 %v7934_v43  ;;  %v8005_v43 = vld [vmem:[%s8771_s28 + $0xb14] ss:$8 sps:$4 sm:$0xff]  }
 0x143   : > { %5709 = vmatpush2.bf16.msra.mxu1 %v7937_v45  ;;  %5669 = vmatprep.subr.bf16.mxu0 %v7942_v46  ;;  %v8000_v45 = vld [vmem:[%s8771_s28 + $0xa10] ss:$8 sps:$4 sm:$0xff]  }
 0x144   : > { %5710 = vmatprep.subr.bf16.mxu1 %v7945_v47  ;;  %v8003_v46 = vld [vmem:[%s8771_s28 + $0xb10] ss:$8 sps:$4 sm:$0xff]   ;;  %v8008_v47 = vld [vmem:[%s8771_s28 + $0xa04] ss:$8 sps:$4 sm:$0xff]  }
 0x146   : > { %5670 = vmatpush2.bf16.msra.mxu0 %v7940_v48  ;;  %v8011_v48 = vld [vmem:[%s8771_s28 + $0xb04] ss:$8 sps:$4 sm:$0xff]  }
 0x147   : > { %5711 = vmatpush2.bf16.msra.mxu1 %v7943_v49  ;;  %5671 = vmatprep.subr.bf16.mxu0 %v7948_v51  ;;  %v8006_v49 = vld [vmem:[%s8771_s28 + $0xa00] ss:$8 sps:$4 sm:$0xff]  }
 0x148   : > { %5712 = vmatprep.subr.bf16.mxu1 %v7951_v52  ;;  %v8009_v51 = vld [vmem:[%s8771_s28 + $0xb00] ss:$8 sps:$4 sm:$0xff]   ;;  %v8014_v52 = vld [vmem:[%s8771_s28 + $0xaf4] ss:$8 sps:$4 sm:$0xff]  }
 0x14a   : > { %5672 = vmatpush2.bf16.msra.mxu0 %v7946_v53  ;;  %v8012_v53 = vld [vmem:[%s8771_s28 + $0xaf0] ss:$8 sps:$4 sm:$0xff]  }
 0x14b   : > { %5713 = vmatpush2.bf16.msra.mxu1 %v7949_v54  ;;  %5673 = vmatprep.subr.bf16.mxu0 %v7954_v55  ;;  %v8015_v54 = vld [vmem:[%s8771_s28 + $0xbf0] ss:$8 sps:$4 sm:$0xff]   ;;  %v8020_v55 = vld [vmem:[%s8771_s28 + $0xae4] ss:$8 sps:$4 sm:$0xff]  }
 0x14c   : > { %5714 = vmatprep.subr.bf16.mxu1 %v7957_v56  ;;  %v8023_v56 = vld [vmem:[%s8771_s28 + $0xbe4] ss:$8 sps:$4 sm:$0xff]  }
 0x14e   : > { %5674 = vmatpush2.bf16.msra.mxu0 %v7952_v59  ;;  %v8018_v59 = vld [vmem:[%s8771_s28 + $0xae0] ss:$8 sps:$4 sm:$0xff]  }
 0x14f   : > { %5715 = vmatpush2.bf16.msra.mxu1 %v7955_v32  ;;  %5675 = vmatprep.subr.bf16.mxu0 %v7960_v60  ;;  %v8021_v32 = vld [vmem:[%s8771_s28 + $0xbe0] ss:$8 sps:$4 sm:$0xff]   ;;  %v8026_v60 = vld [vmem:[%s8771_s28 + $0xad4] ss:$8 sps:$4 sm:$0xff]  }
 0x150   : > { %5716 = vmatprep.subr.bf16.mxu1 %v7963_v61  ;;  %v8029_v61 = vld [vmem:[%s8771_s28 + $0xbd4] ss:$8 sps:$4 sm:$0xff]  }
 0x152   : > { %5676 = vmatpush2.bf16.msra.mxu0 %v7958_v0  ;;  %v8027_v0 = vld [vmem:[%s8771_s28 + $0xbd0] ss:$8 sps:$4 sm:$0xff]  }
 0x153   : > { %5717 = vmatpush2.bf16.msra.mxu1 %v7961_v2  ;;  %5727 = vmatprep.subr.bf16.mxu0 %v7966_v3  ;;  %v8035_v2 = vld [vmem:[%s8771_s28 + $0xbc4] ss:$8 sps:$4 sm:$0xff]   ;;  %v8030_v3 = vld [vmem:[%s8771_s28 + $0xac0] ss:$8 sps:$4 sm:$0xff]  }
 0x154   : > { %5768 = vmatprep.subr.bf16.mxu1 %v7969_v4  ;;  %v8033_v4 = vld [vmem:[%s8771_s28 + $0xbc0] ss:$8 sps:$4 sm:$0xff]  }
 0x155   : > { %v5433_v13 = vpop.f32.mrf.mxu0  ;;  %5678 = vmatmul.mubr.bf16.vlgmr.msra.gmra.mxu0 %v1161_v1  ;;  %v8032_v1 = vld [vmem:[%s8771_s28 + $0xac4] ss:$8 sps:$4 sm:$0xff]  }
 0x156   : > { %v5474_v14 = vpop.f32.mrf.mxu1  ;;  %5719 = vmatmul.mubr.bf16.vlgmr.msra.gmra.mxu1 %v1183_v8  ;;  %v5434_v16 = vadd.f32 %v5433_v13, %v9087_v58  ;;  %5728 = vmatpush1.bf16.msra.mxu0 %v7964_v5  ;;  %v7976_v58 = vld [vmem:[%s8771_s28 + $0xa50] ss:$8 sps:$4 sm:$0xff]   ;;  %v8038_v5 = vld [vmem:[%s8771_s28 + $0xab4] ss:$8 sps:$4 sm:$0xff]   ;;  %v8045_v13 = vld [vmem:[%s8771_s28 + $0xba0] ss:$8 sps:$4 sm:$0xff]  }
 0x157   : > { %5769 = vmatpush1.bf16.msra.mxu1 %v7967_v9  ;;  %v5435_v18 = vpop.f32.mrf.mxu0  ;;  %5729 = vmatprep.subr.bf16.mxu0 %v7972_v10  ;;  %v8036_v8 = vld [vmem:[%s8771_s28 + $0xab0] ss:$8 sps:$4 sm:$0xff]   ;;  %v8044_v10 = vld [vmem:[%s8771_s28 + $0xaa4] ss:$8 sps:$4 sm:$0xff]  }
 0x158   : > { %v5476_v19 = vpop.f32.mrf.mxu1  ;;  %5770 = vmatprep.subr.bf16.mxu1 %v7975_v36  ;;  %v5436_v21 = vadd.f32 %v5435_v18, %v9091_v63  ;;  %v9169_v22 = vadd.f32 %v5474_v14, %v5434_v16  ;;  %5759 = vmatprep.mubr.bf16.mxu0 %v1182_v6  ;;  %v7984_v63 = vld [vmem:[%s8771_s28 + $0xa44] ss:$8 sps:$4 sm:$0xff]   ;;  %v8041_v6 = vld [vmem:[%s8771_s28 + $0xbb4] ss:$8 sps:$4 sm:$0xff]   ;;  %v8039_v9 = vld [vmem:[%s8771_s28 + $0xbb0] ss:$8 sps:$4 sm:$0xff]  }
 0x159   : > { %5800 = vmatprep.mubr.bf16.mxu1 %v1186_v12  ;;  %v5437_v23 = vpop.f32.mrf.mxu0  ;;  %v8047_v36 = vld [vmem:[%s8771_s28 + $0xba4] ss:$8 sps:$4 sm:$0xff]   ;;  %v9219_v12 = vld [vmem:[%s8766_s24 + $0x18] sm:$0xff] }
 0x15a   : > { %v5478_v24 = vpop.f32.mrf.mxu1  ;;  %v9172_v25 = vadd.f32 %v5476_v19, %v5436_v21  ;;  %5730 = vmatpush1.bf16.msra.mxu0 %v7970_v11  ;;  %v8042_v11 = vld [vmem:[%s8771_s28 + $0xaa0] ss:$8 sps:$4 sm:$0xff]   ;;  %v8050_v14 = vld [vmem:[%s8771_s28 + $0xa94] ss:$8 sps:$4 sm:$0xff]   ;;  %v9226_v16 = vrot.slane %v9219_v12, %v8821_v50  ;;  %v8051_v18 = vld [vmem:[%s8771_s28 + $0xb90] ss:$8 sps:$4 sm:$0xff]  }
 0x15b   : > { %5771 = vmatpush1.bf16.msra.mxu1 %v7973_v15  ;;  %v5438_v28 = vpop.f32.mrf.mxu0  ;;  %5731 = vmatprep.subr.bf16.mxu0 %v7978_v17  ;;  %v8053_v15 = vld [vmem:[%s8771_s28 + $0xb94] ss:$8 sps:$4 sm:$0xff]   ;;  %v8048_v17 = vld [vmem:[%s8771_s28 + $0xa90] ss:$8 sps:$4 sm:$0xff]   ;;  %v8056_v19 = vld [vmem:[%s8771_s28 + $0xa84] ss:$8 sps:$4 sm:$0xff]  }
 0x15c   : > { %5772 = vmatprep.subr.bf16.mxu1 %v7981_v20  ;;  %v5479_v29 = vpop.f32.mrf.mxu1  ;;  %v8059_v20 = vld [vmem:[%s8771_s28 + $0xb84] ss:$8 sps:$4 sm:$0xff]   ;;  %v1202_v21 = vcombine.high %v9226_v16, %v9226_v16  ;;  %v8054_v23 = vld [vmem:[%s8771_s28 + $0xa80] ss:$8 sps:$4 sm:$0xff]   ;;  %v8066_v28 = vld [vmem:[%s8771_s28 + $0xd74] ss:$8 sps:$4 sm:$0xff]  }
 0x15d   : > { %v8057_v24 = vld [vmem:[%s8771_s28 + $0xb80] ss:$8 sps:$4 sm:$0xff]  }
 0x15e   : > { %5732 = vmatpush1.bf16.msra.mxu0 %v7976_v58  ;;  %v1168_v58 = vrot.slane %v9144_v57, %v8821_v50  ;;  %v8072_v57 = vld [vmem:[%s8771_s28 + $0xd64] ss:$8 sps:$4 sm:$0xff]  }
 0x15f   : > { %5773 = vmatpush1.bf16.msra.mxu1 %v7979_v27  ;;  %5733 = vmatprep.subr.bf16.mxu0 %v7984_v63  ;;  %v8063_v27 = vld [vmem:[%s8771_s28 + $0xc74] ss:$8 sps:$4 sm:$0xff]   ;;  %v8061_v63 = vld [vmem:[%s8771_s28 + $0xc70] ss:$8 sps:$4 sm:$0xff]  }
 0x160   : > { %5774 = vmatprep.subr.bf16.mxu1 %v7987_v7  ;;  %v1224_v7 = vrot.slane %v1202_v21, %v8821_v50  ;;  %v1184_v29 = vcombine.high %v1168_v58, %v1168_v58  ;;  %v8126_v21 = vld [vmem:[%s8771_s28 + $0xdd4] ss:$8 sps:$4 sm:$0xff]  }
 0x162   : > { %5734 = vmatpush1.bf16.msra.mxu0 %v7982_v31  ;;  %v8064_v31 = vld [vmem:[%s8771_s28 + $0xd70] ss:$8 sps:$4 sm:$0xff]  }
 0x163   : > { %5775 = vmatpush1.bf16.msra.mxu1 %v7985_v33  ;;  %5735 = vmatprep.subr.bf16.mxu0 %v7990_v34  ;;  %v8069_v33 = vld [vmem:[%s8771_s28 + $0xc64] ss:$8 sps:$4 sm:$0xff]   ;;  %v8067_v34 = vld [vmem:[%s8771_s28 + $0xc60] ss:$8 sps:$4 sm:$0xff]  }
 0x164   : > { %5776 = vmatprep.subr.bf16.mxu1 %v7993_v35  ;;  %v1234_v35 = vcombine.high %v1224_v7, %v1224_v7 }
 0x166   : > { %5736 = vmatpush1.bf16.msra.mxu0 %v7988_v37 }
 0x167   : > { %5777 = vmatpush1.bf16.msra.mxu1 %v7991_v38  ;;  %5737 = vmatprep.subr.bf16.mxu0 %v7996_v39  ;;  %v8070_v39 = vld [vmem:[%s8771_s28 + $0xd60] ss:$8 sps:$4 sm:$0xff]  }
 0x168   : > { %5778 = vmatprep.subr.bf16.mxu1 %v7999_v30 }
 0x16a   : > { %5738 = vmatpush1.bf16.msra.mxu0 %v7994_v40  ;;  %v8075_v40 = vld [vmem:[%s8771_s28 + $0xc54] ss:$8 sps:$4 sm:$0xff]  }
 0x16b   : > { %5779 = vmatpush1.bf16.msra.mxu1 %v7997_v41  ;;  %5739 = vmatprep.subr.bf16.mxu0 %v8002_v42 }
 0x16c   : > { %5780 = vmatprep.subr.bf16.mxu1 %v8005_v43  ;;  %v8078_v43 = vld [vmem:[%s8771_s28 + $0xd54] ss:$8 sps:$4 sm:$0xff]  }
 0x16e   : > { %5740 = vmatpush1.bf16.msra.mxu0 %v8000_v45 }
 0x16f   : > { %5781 = vmatpush1.bf16.msra.mxu1 %v8003_v46  ;;  %5741 = vmatprep.subr.bf16.mxu0 %v8008_v47 }
 0x170   : > { %5782 = vmatprep.subr.bf16.mxu1 %v8011_v48 }
 0x172   : > { %5742 = vmatpush1.bf16.msra.mxu0 %v8006_v49 }
 0x173   : > { %5783 = vmatpush1.bf16.msra.mxu1 %v8009_v51  ;;  %5743 = vmatprep.subr.bf16.mxu0 %v8014_v52  ;;  %v8076_v51 = vld [vmem:[%s8771_s28 + $0xd50] ss:$8 sps:$4 sm:$0xff]  }
 0x174   : > { %5784 = vmatprep.subr.bf16.mxu1 %v8017_v26  ;;  %v8084_v26 = vld [vmem:[%s8771_s28 + $0xd44] ss:$8 sps:$4 sm:$0xff]  }
 0x176   : > { %5744 = vmatpush2.bf16.msra.mxu0 %v8012_v53 }
 0x177   : > { %5785 = vmatpush2.bf16.msra.mxu1 %v8015_v54  ;;  %5745 = vmatprep.subr.bf16.mxu0 %v8020_v55  ;;  %v8079_v54 = vld [vmem:[%s8771_s28 + $0xc40] ss:$8 sps:$4 sm:$0xff]  }
 0x178   : > { %5786 = vmatprep.subr.bf16.mxu1 %v8023_v56  ;;  %v8082_v55 = vld [vmem:[%s8771_s28 + $0xd40] ss:$8 sps:$4 sm:$0xff]   ;;  %v8087_v56 = vld [vmem:[%s8771_s28 + $0xc34] ss:$8 sps:$4 sm:$0xff]  }
 0x17a   : > { %5746 = vmatpush2.bf16.msra.mxu0 %v8018_v59  ;;  %v8090_v59 = vld [vmem:[%s8771_s28 + $0xd34] ss:$8 sps:$4 sm:$0xff]  }
 0x17b   : > { %5787 = vmatpush2.bf16.msra.mxu1 %v8021_v32  ;;  %5747 = vmatprep.subr.bf16.mxu0 %v8026_v60  ;;  %v8085_v32 = vld [vmem:[%s8771_s28 + $0xc30] ss:$8 sps:$4 sm:$0xff]  }
 0x17c   : > { %5788 = vmatprep.subr.bf16.mxu1 %v8029_v61  ;;  %v8088_v60 = vld [vmem:[%s8771_s28 + $0xd30] ss:$8 sps:$4 sm:$0xff]   ;;  %v8093_v61 = vld [vmem:[%s8771_s28 + $0xc24] ss:$8 sps:$4 sm:$0xff]  }
 0x17e   : > { %5748 = vmatpush2.bf16.msra.mxu0 %v8024_v62  ;;  %v8096_v62 = vld [vmem:[%s8771_s28 + $0xd24] ss:$8 sps:$4 sm:$0xff]  }
 0x17f   : > { %5789 = vmatpush2.bf16.msra.mxu1 %v8027_v0  ;;  %5749 = vmatprep.subr.bf16.mxu0 %v8032_v1  ;;  %v8091_v0 = vld [vmem:[%s8771_s28 + $0xc20] ss:$8 sps:$4 sm:$0xff]  }
 0x180   : > { %5790 = vmatprep.subr.bf16.mxu1 %v8035_v2  ;;  %v8094_v1 = vld [vmem:[%s8771_s28 + $0xd20] ss:$8 sps:$4 sm:$0xff]   ;;  %v8099_v2 = vld [vmem:[%s8771_s28 + $0xc14] ss:$8 sps:$4 sm:$0xff]  }
 0x182   : > { %5750 = vmatpush2.bf16.msra.mxu0 %v8030_v3  ;;  %v8102_v3 = vld [vmem:[%s8771_s28 + $0xd14] ss:$8 sps:$4 sm:$0xff]  }
 0x183   : > { %5791 = vmatpush2.bf16.msra.mxu1 %v8033_v4  ;;  %5751 = vmatprep.subr.bf16.mxu0 %v8038_v5  ;;  %v8097_v4 = vld [vmem:[%s8771_s28 + $0xc10] ss:$8 sps:$4 sm:$0xff]  }
 0x184   : > { %5792 = vmatprep.subr.bf16.mxu1 %v8041_v6  ;;  %v8100_v5 = vld [vmem:[%s8771_s28 + $0xd10] ss:$8 sps:$4 sm:$0xff]   ;;  %v8105_v6 = vld [vmem:[%s8771_s28 + $0xc04] ss:$8 sps:$4 sm:$0xff]  }
 0x186   : > { %5752 = vmatpush2.bf16.msra.mxu0 %v8036_v8  ;;  %v8108_v8 = vld [vmem:[%s8771_s28 + $0xd04] ss:$8 sps:$4 sm:$0xff]  }
 0x187   : > { %5793 = vmatpush2.bf16.msra.mxu1 %v8039_v9  ;;  %5753 = vmatprep.subr.bf16.mxu0 %v8044_v10  ;;  %v8103_v9 = vld [vmem:[%s8771_s28 + $0xc00] ss:$8 sps:$4 sm:$0xff]  }
 0x188   : > { %5794 = vmatprep.subr.bf16.mxu1 %v8047_v36  ;;  %v8106_v10 = vld [vmem:[%s8771_s28 + $0xd00] ss:$8 sps:$4 sm:$0xff]   ;;  %v8111_v36 = vld [vmem:[%s8771_s28 + $0xcf4] ss:$8 sps:$4 sm:$0xff]  }
 0x18a   : > { %5754 = vmatpush2.bf16.msra.mxu0 %v8042_v11  ;;  %v8114_v11 = vld [vmem:[%s8771_s28 + $0xdf4] ss:$8 sps:$4 sm:$0xff]  }
 0x18b   : > { %5795 = vmatpush2.bf16.msra.mxu1 %v8045_v13  ;;  %5755 = vmatprep.subr.bf16.mxu0 %v8050_v14  ;;  %v8109_v13 = vld [vmem:[%s8771_s28 + $0xcf0] ss:$8 sps:$4 sm:$0xff]  }
 0x18c   : > { %5796 = vmatprep.subr.bf16.mxu1 %v8053_v15  ;;  %v8112_v14 = vld [vmem:[%s8771_s28 + $0xdf0] ss:$8 sps:$4 sm:$0xff]   ;;  %v8117_v15 = vld [vmem:[%s8771_s28 + $0xce4] ss:$8 sps:$4 sm:$0xff]  }
 0x18e   : > { %5756 = vmatpush2.bf16.msra.mxu0 %v8048_v17  ;;  %v8120_v17 = vld [vmem:[%s8771_s28 + $0xde4] ss:$8 sps:$4 sm:$0xff]  }
 0x18f   : > { %5797 = vmatpush2.bf16.msra.mxu1 %v8051_v18  ;;  %5757 = vmatprep.subr.bf16.mxu0 %v8056_v19  ;;  %v8115_v18 = vld [vmem:[%s8771_s28 + $0xce0] ss:$8 sps:$4 sm:$0xff]  }
 0x190   : > { %5798 = vmatprep.subr.bf16.mxu1 %v8059_v20  ;;  %v8118_v19 = vld [vmem:[%s8771_s28 + $0xde0] ss:$8 sps:$4 sm:$0xff]   ;;  %v8123_v20 = vld [vmem:[%s8771_s28 + $0xcd4] ss:$8 sps:$4 sm:$0xff]  }
 0x192   : > { %5758 = vmatpush2.bf16.msra.mxu0 %v8054_v23  ;;  %v8121_v23 = vld [vmem:[%s8771_s28 + $0xcd0] ss:$8 sps:$4 sm:$0xff]  }
 0x193   : > { %5799 = vmatpush2.bf16.msra.mxu1 %v8057_v24  ;;  %5809 = vmatprep.subr.bf16.mxu0 %v8063_v27  ;;  %v8129_v24 = vld [vmem:[%s8771_s28 + $0xcc4] ss:$8 sps:$4 sm:$0xff]  }
 0x194   : > { %5850 = vmatprep.subr.bf16.mxu1 %v8066_v28  ;;  %v8132_v27 = vld [vmem:[%s8771_s28 + $0xdc4] ss:$8 sps:$4 sm:$0xff]   ;;  %v8127_v28 = vld [vmem:[%s8771_s28 + $0xcc0] ss:$8 sps:$4 sm:$0xff]  }
 0x195   : > { %v5515_v37 = vpop.f32.mrf.mxu0  ;;  %5760 = vmatmul.mubr.bf16.vlgmr.msra.gmra.mxu0 %v1168_v58  ;;  %v8124_v58 = vld [vmem:[%s8771_s28 + $0xdd0] ss:$8 sps:$4 sm:$0xff]  }
 0x196   : > { %v5556_v38 = vpop.f32.mrf.mxu1  ;;  %5801 = vmatmul.mubr.bf16.vlgmr.msra.gmra.mxu1 %v1184_v29  ;;  %v5516_v30 = vadd.f32 %v5515_v37, %v9169_v22  ;;  %5810 = vmatpush1.bf16.msra.mxu0 %v8061_v63  ;;  %v8073_v22 = vld [vmem:[%s8771_s28 + $0xc50] ss:$8 sps:$4 sm:$0xff]   ;;  %v8130_v63 = vld [vmem:[%s8771_s28 + $0xdc0] ss:$8 sps:$4 sm:$0xff]   ;;  %v8138_v29 = vld [vmem:[%s8771_s28 + $0xdb4] ss:$8 sps:$4 sm:$0xff]  }
 0x197   : > { %5851 = vmatpush1.bf16.msra.mxu1 %v8064_v31  ;;  %v5517_v41 = vpop.f32.mrf.mxu0  ;;  %5811 = vmatprep.subr.bf16.mxu0 %v8069_v33  ;;  %v8133_v31 = vld [vmem:[%s8771_s28 + $0xcb0] ss:$8 sps:$4 sm:$0xff]   ;;  %v8139_v37 = vld [vmem:[%s8771_s28 + $0xca0] ss:$8 sps:$4 sm:$0xff]  }
 0x198   : > { %v5558_v42 = vpop.f32.mrf.mxu1  ;;  %5852 = vmatprep.subr.bf16.mxu1 %v8072_v57  ;;  %v5518_v45 = vadd.f32 %v5517_v41, %v9172_v25  ;;  %v9251_v46 = vadd.f32 %v5556_v38, %v5516_v30  ;;  %5841 = vmatprep.mubr.bf16.mxu0 %v1224_v7  ;;  %v8081_v25 = vld [vmem:[%s8771_s28 + $0xc44] ss:$8 sps:$4 sm:$0xff]   ;;  %v8135_v7 = vld [vmem:[%s8771_s28 + $0xcb4] ss:$8 sps:$4 sm:$0xff]   ;;  %v8136_v33 = vld [vmem:[%s8771_s28 + $0xdb0] ss:$8 sps:$4 sm:$0xff]  }
 0x199   : > { %5882 = vmatprep.mubr.bf16.mxu1 %v1234_v35  ;;  %v5519_v47 = vpop.f32.mrf.mxu0  ;;  %v8141_v57 = vld [vmem:[%s8771_s28 + $0xca4] ss:$8 sps:$4 sm:$0xff]   ;;  %v1187_v35 = vcombine.high %v9219_v12, %v9219_v12  ;;  %v8142_v38 = vld [vmem:[%s8771_s28 + $0xda0] ss:$8 sps:$4 sm:$0xff]   ;;  %v8150_v30 = vld [vmem:[%s8771_s28 + $0xd94] ss:$8 sps:$4 sm:$0xff]  }
 0x19a   : > { %v5560_v48 = vpop.f32.mrf.mxu1  ;;  %v9254_v49 = vadd.f32 %v5558_v42, %v5518_v45  ;;  %5812 = vmatpush1.bf16.msra.mxu0 %v8067_v34  ;;  %v8144_v34 = vld [vmem:[%s8771_s28 + $0xda4] ss:$8 sps:$4 sm:$0xff]   ;;  %v8145_v41 = vld [vmem:[%s8771_s28 + $0xc90] ss:$8 sps:$4 sm:$0xff]   ;;  %v8151_v47 = vld [vmem:[%s8771_s28 + $0xc80] ss:$8 sps:$4 sm:$0xff]  }
 0x19b   : > { %5853 = vmatpush1.bf16.msra.mxu1 %v8070_v39  ;;  %v5520_v52 = vpop.f32.mrf.mxu0  ;;  %5813 = vmatprep.subr.bf16.mxu0 %v8075_v40  ;;  %v8147_v39 = vld [vmem:[%s8771_s28 + $0xc94] ss:$8 sps:$4 sm:$0xff]   ;;  %v9306_v40 = vrot.slane %v1187_v35, %v8821_v50  ;;  %v8148_v12 = vld [vmem:[%s8771_s28 + $0xd90] ss:$8 sps:$4 sm:$0xff]   ;;  %v8153_v42 = vld [vmem:[%s8771_s28 + $0xc84] ss:$8 sps:$4 sm:$0xff]  }
 0x19c   : > { %5854 = vmatprep.subr.bf16.mxu1 %v8078_v43  ;;  %v5561_v53 = vpop.f32.mrf.mxu1  ;;  %v8156_v43 = vld [vmem:[%s8771_s28 + $0xd84] ss:$8 sps:$4 sm:$0xff]   ;;  %v8154_v48 = vld [vmem:[%s8771_s28 + $0xd80] ss:$8 sps:$4 sm:$0xff]   ;;  %v8162_v52 = vld [vmem:[%s8771_s28 + $0xf74] ss:$8 sps:$4 sm:$0xff]  }
 0x19d   : > { %v1203_v45 = vcombine.high %v9306_v40, %v9306_v40  ;;  %v8210_v35 = vld [vmem:[%s8771_s28 + $0xff4] ss:$8 sps:$4 sm:$0xff]  }
 0x19e   : > { %5814 = vmatpush1.bf16.msra.mxu0 %v8073_v22  ;;  %v1210_v22 = vrot.slane %v9226_v16, %v8821_v50  ;;  %v8168_v16 = vld [vmem:[%s8771_s28 + $0xf64] ss:$8 sps:$4 sm:$0xff]  }
 0x19f   : > { %5855 = vmatpush1.bf16.msra.mxu1 %v8076_v51  ;;  %5815 = vmatprep.subr.bf16.mxu0 %v8081_v25  ;;  %v8159_v51 = vld [vmem:[%s8771_s28 + $0xe74] ss:$8 sps:$4 sm:$0xff]   ;;  %v8157_v25 = vld [vmem:[%s8771_s28 + $0xe70] ss:$8 sps:$4 sm:$0xff]  }
 0x1a0   : > { %5856 = vmatprep.subr.bf16.mxu1 %v8084_v26  ;;  %v1231_v26 = vrot.slane %v1203_v45, %v8821_v50  ;;  %v1232_v53 = vcombine.high %v1210_v22, %v1210_v22  ;;  %v8217_v45 = vld [vmem:[%s8771_s28 + $0xed0] ss:$8 sps:$4 sm:$0xff]  }
 0x1a2   : > { %5816 = vmatpush1.bf16.msra.mxu0 %v8079_v54  ;;  %v8160_v54 = vld [vmem:[%s8771_s28 + $0xf70] ss:$8 sps:$4 sm:$0xff]  }
 0x1a3   : > { %5857 = vmatpush1.bf16.msra.mxu1 %v8082_v55  ;;  %5817 = vmatprep.subr.bf16.mxu0 %v8087_v56  ;;  %v8165_v55 = vld [vmem:[%s8771_s28 + $0xe64] ss:$8 sps:$4 sm:$0xff]   ;;  %v8163_v56 = vld [vmem:[%s8771_s28 + $0xe60] ss:$8 sps:$4 sm:$0xff]  }
 0x1a4   : > { %5858 = vmatprep.subr.bf16.mxu1 %v8090_v59  ;;  %v1235_v59 = vcombine.high %v1231_v26, %v1231_v26 }
 0x1a6   : > { %5818 = vmatpush1.bf16.msra.mxu0 %v8085_v32 }
 0x1a7   : > { %5859 = vmatpush1.bf16.msra.mxu1 %v8088_v60  ;;  %5819 = vmatprep.subr.bf16.mxu0 %v8093_v61  ;;  %v8166_v61 = vld [vmem:[%s8771_s28 + $0xf60] ss:$8 sps:$4 sm:$0xff]  }
 0x1a8   : > { %5860 = vmatprep.subr.bf16.mxu1 %v8096_v62 }
 0x1aa   : > { %5820 = vmatpush1.bf16.msra.mxu0 %v8091_v0  ;;  %v8171_v0 = vld [vmem:[%s8771_s28 + $0xe54] ss:$8 sps:$4 sm:$0xff]  }
 0x1ab   : > { %5861 = vmatpush1.bf16.msra.mxu1 %v8094_v1  ;;  %5821 = vmatprep.subr.bf16.mxu0 %v8099_v2 }
 0x1ac   : > { %5862 = vmatprep.subr.bf16.mxu1 %v8102_v3  ;;  %v8174_v3 = vld [vmem:[%s8771_s28 + $0xf54] ss:$8 sps:$4 sm:$0xff]  }
 0x1ae   : > { %5822 = vmatpush1.bf16.msra.mxu0 %v8097_v4 }
 0x1af   : > { %5863 = vmatpush1.bf16.msra.mxu1 %v8100_v5  ;;  %5823 = vmatprep.subr.bf16.mxu0 %v8105_v6 }
 0x1b0   : > { %5864 = vmatprep.subr.bf16.mxu1 %v8108_v8 }
 0x1b2   : > { %5824 = vmatpush1.bf16.msra.mxu0 %v8103_v9 }
 0x1b3   : > { %5865 = vmatpush1.bf16.msra.mxu1 %v8106_v10  ;;  %5825 = vmatprep.subr.bf16.mxu0 %v8111_v36  ;;  %v8172_v10 = vld [vmem:[%s8771_s28 + $0xf50] ss:$8 sps:$4 sm:$0xff]  }
 0x1b4   : > { %5866 = vmatprep.subr.bf16.mxu1 %v8114_v11  ;;  %v8180_v11 = vld [vmem:[%s8771_s28 + $0xf44] ss:$8 sps:$4 sm:$0xff]  }
 0x1b6   : > { %5826 = vmatpush2.bf16.msra.mxu0 %v8109_v13 }
 0x1b7   : > { %5867 = vmatpush2.bf16.msra.mxu1 %v8112_v14  ;;  %5827 = vmatprep.subr.bf16.mxu0 %v8117_v15  ;;  %v8175_v14 = vld [vmem:[%s8771_s28 + $0xe40] ss:$8 sps:$4 sm:$0xff]  }
 0x1b8   : > { %5868 = vmatprep.subr.bf16.mxu1 %v8120_v17  ;;  %v8178_v15 = vld [vmem:[%s8771_s28 + $0xf40] ss:$8 sps:$4 sm:$0xff]   ;;  %v8183_v17 = vld [vmem:[%s8771_s28 + $0xe34] ss:$8 sps:$4 sm:$0xff]  }
 0x1ba   : > { %5828 = vmatpush2.bf16.msra.mxu0 %v8115_v18  ;;  %v8186_v18 = vld [vmem:[%s8771_s28 + $0xf34] ss:$8 sps:$4 sm:$0xff]  }
 0x1bb   : > { %5869 = vmatpush2.bf16.msra.mxu1 %v8118_v19  ;;  %5829 = vmatprep.subr.bf16.mxu0 %v8123_v20  ;;  %v8181_v19 = vld [vmem:[%s8771_s28 + $0xe30] ss:$8 sps:$4 sm:$0xff]  }
 0x1bc   : > { %5870 = vmatprep.subr.bf16.mxu1 %v8126_v21  ;;  %v8184_v20 = vld [vmem:[%s8771_s28 + $0xf30] ss:$8 sps:$4 sm:$0xff]   ;;  %v8189_v21 = vld [vmem:[%s8771_s28 + $0xe24] ss:$8 sps:$4 sm:$0xff]  }
 0x1be   : > { %5830 = vmatpush2.bf16.msra.mxu0 %v8121_v23  ;;  %v8192_v23 = vld [vmem:[%s8771_s28 + $0xf24] ss:$8 sps:$4 sm:$0xff]  }
 0x1bf   : > { %5871 = vmatpush2.bf16.msra.mxu1 %v8124_v58  ;;  %5831 = vmatprep.subr.bf16.mxu0 %v8129_v24  ;;  %v8187_v58 = vld [vmem:[%s8771_s28 + $0xe20] ss:$8 sps:$4 sm:$0xff]  }
 0x1c0   : > { %5872 = vmatprep.subr.bf16.mxu1 %v8132_v27  ;;  %v8190_v24 = vld [vmem:[%s8771_s28 + $0xf20] ss:$8 sps:$4 sm:$0xff]   ;;  %v8195_v27 = vld [vmem:[%s8771_s28 + $0xe14] ss:$8 sps:$4 sm:$0xff]  }
 0x1c2   : > { %5832 = vmatpush2.bf16.msra.mxu0 %v8127_v28  ;;  %v8198_v28 = vld [vmem:[%s8771_s28 + $0xf14] ss:$8 sps:$4 sm:$0xff]  }
 0x1c3   : > { %5873 = vmatpush2.bf16.msra.mxu1 %v8130_v63  ;;  %5833 = vmatprep.subr.bf16.mxu0 %v8135_v7  ;;  %v8193_v63 = vld [vmem:[%s8771_s28 + $0xe10] ss:$8 sps:$4 sm:$0xff]  }
 0x1c4   : > { %5874 = vmatprep.subr.bf16.mxu1 %v8138_v29  ;;  %v8196_v7 = vld [vmem:[%s8771_s28 + $0xf10] ss:$8 sps:$4 sm:$0xff]   ;;  %v8201_v29 = vld [vmem:[%s8771_s28 + $0xe04] ss:$8 sps:$4 sm:$0xff]  }
 0x1c6   : > { %5834 = vmatpush2.bf16.msra.mxu0 %v8133_v31  ;;  %v8204_v31 = vld [vmem:[%s8771_s28 + $0xf04] ss:$8 sps:$4 sm:$0xff]  }
 0x1c7   : > { %5875 = vmatpush2.bf16.msra.mxu1 %v8136_v33  ;;  %5835 = vmatprep.subr.bf16.mxu0 %v8141_v57  ;;  %v8199_v33 = vld [vmem:[%s8771_s28 + $0xe00] ss:$8 sps:$4 sm:$0xff]  }
 0x1c8   : > { %5876 = vmatprep.subr.bf16.mxu1 %v8144_v34  ;;  %v8202_v57 = vld [vmem:[%s8771_s28 + $0xf00] ss:$8 sps:$4 sm:$0xff]   ;;  %v8207_v34 = vld [vmem:[%s8771_s28 + $0xef4] ss:$8 sps:$4 sm:$0xff]  }
 0x1ca   : > { %5836 = vmatpush2.bf16.msra.mxu0 %v8139_v37  ;;  %v8205_v37 = vld [vmem:[%s8771_s28 + $0xef0] ss:$8 sps:$4 sm:$0xff]  }
 0x1cb   : > { %5877 = vmatpush2.bf16.msra.mxu1 %v8142_v38  ;;  %5837 = vmatprep.subr.bf16.mxu0 %v8147_v39  ;;  %v8208_v38 = vld [vmem:[%s8771_s28 + $0xff0] ss:$8 sps:$4 sm:$0xff]   ;;  %v8213_v39 = vld [vmem:[%s8771_s28 + $0xee4] ss:$8 sps:$4 sm:$0xff]  }
 0x1cc   : > { %5878 = vmatprep.subr.bf16.mxu1 %v8150_v30  ;;  %v8216_v30 = vld [vmem:[%s8771_s28 + $0xfe4] ss:$8 sps:$4 sm:$0xff]  }
 0x1ce   : > { %5838 = vmatpush2.bf16.msra.mxu0 %v8145_v41  ;;  %v8211_v41 = vld [vmem:[%s8771_s28 + $0xee0] ss:$8 sps:$4 sm:$0xff]  }
 0x1cf   : > { %5879 = vmatpush2.bf16.msra.mxu1 %v8148_v12  ;;  %5839 = vmatprep.subr.bf16.mxu0 %v8153_v42  ;;  %v8214_v12 = vld [vmem:[%s8771_s28 + $0xfe0] ss:$8 sps:$4 sm:$0xff]   ;;  %v8219_v42 = vld [vmem:[%s8771_s28 + $0xed4] ss:$8 sps:$4 sm:$0xff]  }
 0x1d0   : > { %5880 = vmatprep.subr.bf16.mxu1 %v8156_v43  ;;  %v8222_v43 = vld [vmem:[%s8771_s28 + $0xfd4] ss:$8 sps:$4 sm:$0xff]  }
 0x1d2   : > { %5840 = vmatpush2.bf16.msra.mxu0 %v8151_v47  ;;  %v8220_v47 = vld [vmem:[%s8771_s28 + $0xfd0] ss:$8 sps:$4 sm:$0xff]  }
 0x1d3   : > { %5881 = vmatpush2.bf16.msra.mxu1 %v8154_v48  ;;  %5891 = vmatprep.subr.bf16.mxu0 %v8159_v51  ;;  %v8228_v48 = vld [vmem:[%s8771_s28 + $0xfc4] ss:$8 sps:$4 sm:$0xff]   ;;  %v8223_v51 = vld [vmem:[%s8771_s28 + $0xec0] ss:$8 sps:$4 sm:$0xff]  }
 0x1d4   : > { %5932 = vmatprep.subr.bf16.mxu1 %v8162_v52  ;;  %v8226_v52 = vld [vmem:[%s8771_s28 + $0xfc0] ss:$8 sps:$4 sm:$0xff]  }
 0x1d5   : > { %v5597_v32 = vpop.f32.mrf.mxu0  ;;  %5842 = vmatmul.mubr.bf16.vlgmr.msra.gmra.mxu0 %v1210_v22  ;;  %v8225_v22 = vld [vmem:[%s8771_s28 + $0xec4] ss:$8 sps:$4 sm:$0xff]  }
 0x1d6   : > { %v5638_v60 = vpop.f32.mrf.mxu1  ;;  %5883 = vmatmul.mubr.bf16.vlgmr.msra.gmra.mxu1 %v1232_v53  ;;  %v5598_v62 = vadd.f32 %v5597_v32, %v9251_v46  ;;  %5892 = vmatpush1.bf16.msra.mxu0 %v8157_v25  ;;  %v8169_v46 = vld [vmem:[%s8771_s28 + $0xe50] ss:$8 sps:$4 sm:$0xff]   ;;  %v8231_v25 = vld [vmem:[%s8771_s28 + $0xeb4] ss:$8 sps:$4 sm:$0xff]   ;;  %v8238_v32 = vld [vmem:[%s8771_s28 + $0xfa0] ss:$8 sps:$4 sm:$0xff]  }
 0x1d7   : > { %5933 = vmatpush1.bf16.msra.mxu1 %v8160_v54  ;;  %v5599_v1 = vpop.f32.mrf.mxu0  ;;  %5893 = vmatprep.subr.bf16.mxu0 %v8165_v55  ;;  %v8229_v53 = vld [vmem:[%s8771_s28 + $0xeb0] ss:$8 sps:$4 sm:$0xff]   ;;  %v8237_v55 = vld [vmem:[%s8771_s28 + $0xea4] ss:$8 sps:$4 sm:$0xff]  }
 0x1d8   : > { %v5640_v2 = vpop.f32.mrf.mxu1  ;;  %5934 = vmatprep.subr.bf16.mxu1 %v8168_v16  ;;  %v5600_v4 = vadd.f32 %v5599_v1, %v9254_v49  ;;  %v9331_v5 = vadd.f32 %v5638_v60, %v5598_v62  ;;  %5923 = vmatprep.mubr.bf16.mxu0 %v1231_v26  ;;  %v8177_v49 = vld [vmem:[%s8771_s28 + $0xe44] ss:$8 sps:$4 sm:$0xff]   ;;  %v8234_v26 = vld [vmem:[%s8771_s28 + $0xfb4] ss:$8 sps:$4 sm:$0xff]   ;;  %v8232_v54 = vld [vmem:[%s8771_s28 + $0xfb0] ss:$8 sps:$4 sm:$0xff]  }
 0x1d9   : > { %5964 = vmatprep.mubr.bf16.mxu1 %v1235_v59  ;;  %v5601_v6 = vpop.f32.mrf.mxu0  ;;  %v8240_v16 = vld [vmem:[%s8771_s28 + $0xfa4] ss:$8 sps:$4 sm:$0xff]   ;;  %v8235_v59 = vld [vmem:[%s8771_s28 + $0xea0] ss:$8 sps:$4 sm:$0xff]   ;;  %v8243_v60 = vld [vmem:[%s8771_s28 + $0xe94] ss:$8 sps:$4 sm:$0xff]  }
 0x1da   : > { %v5642_v8 = vpop.f32.mrf.mxu1  ;;  %v9334_v9 = vadd.f32 %v5640_v2, %v5600_v4  ;;  %5894 = vmatpush1.bf16.msra.mxu0 %v8163_v56  ;;  %v9380_v56 = vld [vmem:[%s8766_s24 + $0x20] sm:$0xff]  ;;  %v8244_v1 = vld [vmem:[%s8771_s28 + $0xf90] ss:$8 sps:$4 sm:$0xff]   ;;  %v1217_v6 = vrot.slane %v9306_v40, %v8821_v50 }
 0x1db   : > { %5935 = vmatpush1.bf16.msra.mxu1 %v8166_v61  ;;  %v5602_v36 = vpop.f32.mrf.mxu0  ;;  %5895 = vmatprep.subr.bf16.mxu0 %v8171_v0  ;;  %v8246_v61 = vld [vmem:[%s8771_s28 + $0xf94] ss:$8 sps:$4 sm:$0xff]   ;;  %v9388_v62 = vrot.slane %v9380_v56, %v8821_v50  ;;  %v8241_v0 = vld [vmem:[%s8771_s28 + $0xe90] ss:$8 sps:$4 sm:$0xff]   ;;  %v8249_v2 = vld [vmem:[%s8771_s28 + $0xe84] ss:$8 sps:$4 sm:$0xff]  }
 0x1dc   : > { %5936 = vmatprep.subr.bf16.mxu1 %v8174_v3  ;;  %v5643_v13 = vpop.f32.mrf.mxu1  ;;  %v8252_v3 = vld [vmem:[%s8771_s28 + $0xf84] ss:$8 sps:$4 sm:$0xff]   ;;  %v8250_v8 = vld [vmem:[%s8771_s28 + $0xf80] ss:$8 sps:$4 sm:$0xff]   ;;  %v8259_v36 = vld [vmem:[%s8771_s28 + $0x1174] ss:$8 sps:$4 sm:$0xff]  }
 0x1dd   : > { %v1251_v4 = vcombine.high %v9388_v62, %v9388_v62  ;;  %v8254_v13 = vld [vmem:[%s8771_s28 + $0x1070] ss:$8 sps:$4 sm:$0xff]   ;;  %v8262_v40 = vld [vmem:[%s8771_s28 + $0x1064] ss:$8 sps:$4 sm:$0xff]  }
 0x1de   : > { %5896 = vmatpush1.bf16.msra.mxu0 %v8169_v46  ;;  %v8247_v46 = vld [vmem:[%s8771_s28 + $0xe80] ss:$8 sps:$4 sm:$0xff]  }
 0x1df   : > { %5937 = vmatpush1.bf16.msra.mxu1 %v8172_v10  ;;  %5897 = vmatprep.subr.bf16.mxu0 %v8177_v49  ;;  %v8256_v10 = vld [vmem:[%s8771_s28 + $0x1074] ss:$8 sps:$4 sm:$0xff]   ;;  %v1273_v49 = vrot.slane %v1251_v4, %v8821_v50 }
 0x1e0   : > { %5938 = vmatprep.subr.bf16.mxu1 %v8180_v11  ;;  %v1233_v11 = vcombine.high %v1217_v6, %v1217_v6  ;;  %v8319_v4 = vld [vmem:[%s8771_s28 + $0x11d4] ss:$8 sps:$4 sm:$0xff]  }
 0x1e2   : > { %5898 = vmatpush1.bf16.msra.mxu0 %v8175_v14  ;;  %v8257_v14 = vld [vmem:[%s8771_s28 + $0x1170] ss:$8 sps:$4 sm:$0xff]  }
 0x1e3   : > { %5939 = vmatpush1.bf16.msra.mxu1 %v8178_v15  ;;  %5899 = vmatprep.subr.bf16.mxu0 %v8183_v17  ;;  %v8265_v15 = vld [vmem:[%s8771_s28 + $0x1164] ss:$8 sps:$4 sm:$0xff]   ;;  %v1283_v17 = vcombine.high %v1273_v49, %v1273_v49 }
 0x1e4   : > { %5940 = vmatprep.subr.bf16.mxu1 %v8186_v18 }
 0x1e6   : > { %5900 = vmatpush1.bf16.msra.mxu0 %v8181_v19 }
 0x1e7   : > { %5941 = vmatpush1.bf16.msra.mxu1 %v8184_v20  ;;  %5901 = vmatprep.subr.bf16.mxu0 %v8189_v21  ;;  %v8260_v21 = vld [vmem:[%s8771_s28 + $0x1060] ss:$8 sps:$4 sm:$0xff]  }
 0x1e8   : > { %5942 = vmatprep.subr.bf16.mxu1 %v8192_v23  ;;  %v8263_v23 = vld [vmem:[%s8771_s28 + $0x1160] ss:$8 sps:$4 sm:$0xff]  }
 0x1ea   : > { %5902 = vmatpush1.bf16.msra.mxu0 %v8187_v58 }
 0x1eb   : > { %5943 = vmatpush1.bf16.msra.mxu1 %v8190_v24  ;;  %5903 = vmatprep.subr.bf16.mxu0 %v8195_v27  ;;  %v8268_v27 = vld [vmem:[%s8771_s28 + $0x1054] ss:$8 sps:$4 sm:$0xff]  }
 0x1ec   : > { %5944 = vmatprep.subr.bf16.mxu1 %v8198_v28  ;;  %v8271_v28 = vld [vmem:[%s8771_s28 + $0x1154] ss:$8 sps:$4 sm:$0xff]  }
 0x1ee   : > { %5904 = vmatpush1.bf16.msra.mxu0 %v8193_v63 }
 0x1ef   : > { %5945 = vmatpush1.bf16.msra.mxu1 %v8196_v7  ;;  %5905 = vmatprep.subr.bf16.mxu0 %v8201_v29 }
 0x1f0   : > { %5946 = vmatprep.subr.bf16.mxu1 %v8204_v31 }
 0x1f2   : > { %5906 = vmatpush1.bf16.msra.mxu0 %v8199_v33  ;;  %v8266_v33 = vld [vmem:[%s8771_s28 + $0x1050] ss:$8 sps:$4 sm:$0xff]  }
 0x1f3   : > { %5947 = vmatpush1.bf16.msra.mxu1 %v8202_v57  ;;  %5907 = vmatprep.subr.bf16.mxu0 %v8207_v34  ;;  %v8269_v57 = vld [vmem:[%s8771_s28 + $0x1150] ss:$8 sps:$4 sm:$0xff]  }
 0x1f4   : > { %5948 = vmatprep.subr.bf16.mxu1 %v8210_v35  ;;  %v8277_v35 = vld [vmem:[%s8771_s28 + $0x1144] ss:$8 sps:$4 sm:$0xff]  }
 0x1f6   : > { %5908 = vmatpush2.bf16.msra.mxu0 %v8205_v37 }
 0x1f7   : > { %5949 = vmatpush2.bf16.msra.mxu1 %v8208_v38  ;;  %5909 = vmatprep.subr.bf16.mxu0 %v8213_v39  ;;  %v8272_v38 = vld [vmem:[%s8771_s28 + $0x1040] ss:$8 sps:$4 sm:$0xff]  }
 0x1f8   : > { %5950 = vmatprep.subr.bf16.mxu1 %v8216_v30  ;;  %v8275_v39 = vld [vmem:[%s8771_s28 + $0x1140] ss:$8 sps:$4 sm:$0xff]   ;;  %v8280_v30 = vld [vmem:[%s8771_s28 + $0x1034] ss:$8 sps:$4 sm:$0xff]  }
 0x1fa   : > { %5910 = vmatpush2.bf16.msra.mxu0 %v8211_v41  ;;  %v8283_v41 = vld [vmem:[%s8771_s28 + $0x1134] ss:$8 sps:$4 sm:$0xff]  }
 0x1fb   : > { %5951 = vmatpush2.bf16.msra.mxu1 %v8214_v12  ;;  %5911 = vmatprep.subr.bf16.mxu0 %v8219_v42  ;;  %v8278_v12 = vld [vmem:[%s8771_s28 + $0x1030] ss:$8 sps:$4 sm:$0xff]  }
 0x1fc   : > { %5952 = vmatprep.subr.bf16.mxu1 %v8222_v43  ;;  %v8281_v42 = vld [vmem:[%s8771_s28 + $0x1130] ss:$8 sps:$4 sm:$0xff]   ;;  %v8286_v43 = vld [vmem:[%s8771_s28 + $0x1024] ss:$8 sps:$4 sm:$0xff]  }
 0x1fe   : > { %5912 = vmatpush2.bf16.msra.mxu0 %v8217_v45  ;;  %v8289_v45 = vld [vmem:[%s8771_s28 + $0x1124] ss:$8 sps:$4 sm:$0xff]  }
 0x1ff   : > { %5953 = vmatpush2.bf16.msra.mxu1 %v8220_v47  ;;  %5913 = vmatprep.subr.bf16.mxu0 %v8225_v22  ;;  %v8284_v47 = vld [vmem:[%s8771_s28 + $0x1020] ss:$8 sps:$4 sm:$0xff]  }
 0x200   : > { %5954 = vmatprep.subr.bf16.mxu1 %v8228_v48  ;;  %v8287_v22 = vld [vmem:[%s8771_s28 + $0x1120] ss:$8 sps:$4 sm:$0xff]   ;;  %v8292_v48 = vld [vmem:[%s8771_s28 + $0x1014] ss:$8 sps:$4 sm:$0xff]  }
 0x202   : > { %5914 = vmatpush2.bf16.msra.mxu0 %v8223_v51  ;;  %v8295_v51 = vld [vmem:[%s8771_s28 + $0x1114] ss:$8 sps:$4 sm:$0xff]  }
 0x203   : > { %5955 = vmatpush2.bf16.msra.mxu1 %v8226_v52  ;;  %5915 = vmatprep.subr.bf16.mxu0 %v8231_v25  ;;  %v8290_v52 = vld [vmem:[%s8771_s28 + $0x1010] ss:$8 sps:$4 sm:$0xff]  }
 0x204   : > { %5956 = vmatprep.subr.bf16.mxu1 %v8234_v26  ;;  %v8293_v25 = vld [vmem:[%s8771_s28 + $0x1110] ss:$8 sps:$4 sm:$0xff]   ;;  %v8298_v26 = vld [vmem:[%s8771_s28 + $0x1004] ss:$8 sps:$4 sm:$0xff]  }
 0x206   : > { %5916 = vmatpush2.bf16.msra.mxu0 %v8229_v53  ;;  %v8301_v53 = vld [vmem:[%s8771_s28 + $0x1104] ss:$8 sps:$4 sm:$0xff]  }
 0x207   : > { %5957 = vmatpush2.bf16.msra.mxu1 %v8232_v54  ;;  %5917 = vmatprep.subr.bf16.mxu0 %v8237_v55  ;;  %v8296_v54 = vld [vmem:[%s8771_s28 + $0x1000] ss:$8 sps:$4 sm:$0xff]  }
 0x208   : > { %5958 = vmatprep.subr.bf16.mxu1 %v8240_v16  ;;  %v8299_v55 = vld [vmem:[%s8771_s28 + $0x1100] ss:$8 sps:$4 sm:$0xff]   ;;  %v8304_v16 = vld [vmem:[%s8771_s28 + $0x10f4] ss:$8 sps:$4 sm:$0xff]  }
 0x20a   : > { %5918 = vmatpush2.bf16.msra.mxu0 %v8235_v59  ;;  %v8307_v59 = vld [vmem:[%s8771_s28 + $0x11f4] ss:$8 sps:$4 sm:$0xff]  }
 0x20b   : > { %5959 = vmatpush2.bf16.msra.mxu1 %v8238_v32  ;;  %5919 = vmatprep.subr.bf16.mxu0 %v8243_v60  ;;  %v8302_v32 = vld [vmem:[%s8771_s28 + $0x10f0] ss:$8 sps:$4 sm:$0xff]  }
 0x20c   : > { %5960 = vmatprep.subr.bf16.mxu1 %v8246_v61  ;;  %v8305_v60 = vld [vmem:[%s8771_s28 + $0x11f0] ss:$8 sps:$4 sm:$0xff]   ;;  %v8310_v61 = vld [vmem:[%s8771_s28 + $0x10e4] ss:$8 sps:$4 sm:$0xff]  }
 0x20e   : > { %5920 = vmatpush2.bf16.msra.mxu0 %v8241_v0  ;;  %v8313_v0 = vld [vmem:[%s8771_s28 + $0x11e4] ss:$8 sps:$4 sm:$0xff]  }
 0x20f   : > { %5961 = vmatpush2.bf16.msra.mxu1 %v8244_v1  ;;  %5921 = vmatprep.subr.bf16.mxu0 %v8249_v2  ;;  %v8308_v1 = vld [vmem:[%s8771_s28 + $0x10e0] ss:$8 sps:$4 sm:$0xff]  }
 0x210   : > { %5962 = vmatprep.subr.bf16.mxu1 %v8252_v3  ;;  %v8311_v2 = vld [vmem:[%s8771_s28 + $0x11e0] ss:$8 sps:$4 sm:$0xff]   ;;  %v8316_v3 = vld [vmem:[%s8771_s28 + $0x10d4] ss:$8 sps:$4 sm:$0xff]  }
 0x212   : > { %5922 = vmatpush2.bf16.msra.mxu0 %v8247_v46  ;;  %v8317_v46 = vld [vmem:[%s8771_s28 + $0x11d0] ss:$8 sps:$4 sm:$0xff]  }
 0x213   : > { %5963 = vmatpush2.bf16.msra.mxu1 %v8250_v8  ;;  %5973 = vmatprep.subr.bf16.mxu0 %v8256_v10  ;;  %v8322_v8 = vld [vmem:[%s8771_s28 + $0x10c4] ss:$8 sps:$4 sm:$0xff]  }
 0x214   : > { %6014 = vmatprep.subr.bf16.mxu1 %v8259_v36  ;;  %v8325_v10 = vld [vmem:[%s8771_s28 + $0x11c4] ss:$8 sps:$4 sm:$0xff]   ;;  %v8320_v36 = vld [vmem:[%s8771_s28 + $0x10c0] ss:$8 sps:$4 sm:$0xff]  }
 0x215   : > { %v5679_v18 = vpop.f32.mrf.mxu0  ;;  %5924 = vmatmul.mubr.bf16.vlgmr.msra.gmra.mxu0 %v1217_v6  ;;  %v8314_v6 = vld [vmem:[%s8771_s28 + $0x10d0] ss:$8 sps:$4 sm:$0xff]  }
 0x216   : > { %v5720_v19 = vpop.f32.mrf.mxu1  ;;  %5965 = vmatmul.mubr.bf16.vlgmr.msra.gmra.mxu1 %v1233_v11  ;;  %v5680_v20 = vadd.f32 %v5679_v18, %v9331_v5  ;;  %5974 = vmatpush1.bf16.msra.mxu0 %v8254_v13  ;;  %v8328_v11 = vld [vmem:[%s8771_s28 + $0x10b4] ss:$8 sps:$4 sm:$0xff]   ;;  %v1236_v18 = vcombine.high %v9380_v56, %v9380_v56  ;;  %v8338_v56 = vld [vmem:[%s8771_s28 + $0x1090] ss:$8 sps:$4 sm:$0xff]  }
 0x217   : > { %6015 = vmatpush1.bf16.msra.mxu1 %v8257_v14  ;;  %v5681_v58 = vpop.f32.mrf.mxu0  ;;  %5975 = vmatprep.subr.bf16.mxu0 %v8262_v40  ;;  %v8331_v13 = vld [vmem:[%s8771_s28 + $0x11b4] ss:$8 sps:$4 sm:$0xff]   ;;  %v8326_v14 = vld [vmem:[%s8771_s28 + $0x10b0] ss:$8 sps:$4 sm:$0xff]  }
 0x218   : > { %v5722_v24 = vpop.f32.mrf.mxu1  ;;  %6016 = vmatprep.subr.bf16.mxu1 %v8265_v15  ;;  %v5682_v63 = vadd.f32 %v5681_v58, %v9334_v9  ;;  %v9413_v7 = vadd.f32 %v5720_v19, %v5680_v20  ;;  %6005 = vmatprep.mubr.bf16.mxu0 %v1273_v49  ;;  %v8274_v9 = vld [vmem:[%s8771_s28 + $0x1044] ss:$8 sps:$4 sm:$0xff]   ;;  %v8323_v49 = vld [vmem:[%s8771_s28 + $0x11c0] ss:$8 sps:$4 sm:$0xff]   ;;  %v8329_v40 = vld [vmem:[%s8771_s28 + $0x11b0] ss:$8 sps:$4 sm:$0xff]   ;;  %v9468_v58 = vrot.slane %v1236_v18, %v8821_v50 }
 0x219   : > { %6046 = vmatprep.mubr.bf16.mxu1 %v1283_v17  ;;  %v5683_v5 = vpop.f32.mrf.mxu0  ;;  %v8334_v15 = vld [vmem:[%s8771_s28 + $0x10a4] ss:$8 sps:$4 sm:$0xff]   ;;  %v8332_v19 = vld [vmem:[%s8771_s28 + $0x10a0] ss:$8 sps:$4 sm:$0xff]   ;;  %v8403_v18 = vld [vmem:[%s8771_s28 + $0x13f4] ss:$8 sps:$4 sm:$0xff]  }
 0x21a   : > { %v5724_v29 = vpop.f32.mrf.mxu1  ;;  %v9415_v31 = vadd.f32 %v5722_v24, %v5682_v63  ;;  %5976 = vmatpush1.bf16.msra.mxu0 %v8260_v21  ;;  %v8337_v17 = vld [vmem:[%s8771_s28 + $0x11a4] ss:$8 sps:$4 sm:$0xff]   ;;  %v8335_v20 = vld [vmem:[%s8771_s28 + $0x11a0] ss:$8 sps:$4 sm:$0xff]   ;;  %v8340_v21 = vld [vmem:[%s8771_s28 + $0x1094] ss:$8 sps:$4 sm:$0xff]   ;;  %v1252_v63 = vcombine.high %v9468_v58, %v9468_v58  ;;  %v1259_v5 = vrot.slane %v9388_v62, %v8821_v50 }
 0x21b   : > { %6017 = vmatpush1.bf16.msra.mxu1 %v8263_v23  ;;  %v5684_v34 = vpop.f32.mrf.mxu0  ;;  %5977 = vmatprep.subr.bf16.mxu0 %v8268_v27  ;;  %v8343_v23 = vld [vmem:[%s8771_s28 + $0x1194] ss:$8 sps:$4 sm:$0xff]   ;;  %v8341_v24 = vld [vmem:[%s8771_s28 + $0x1190] ss:$8 sps:$4 sm:$0xff]   ;;  %v8346_v27 = vld [vmem:[%s8771_s28 + $0x1084] ss:$8 sps:$4 sm:$0xff]  }
 0x21c   : > { %6018 = vmatprep.subr.bf16.mxu1 %v8271_v28  ;;  %v5725_v37 = vpop.f32.mrf.mxu1  ;;  %v8349_v28 = vld [vmem:[%s8771_s28 + $0x1184] ss:$8 sps:$4 sm:$0xff]   ;;  %v8344_v29 = vld [vmem:[%s8771_s28 + $0x1080] ss:$8 sps:$4 sm:$0xff]   ;;  %v8355_v34 = vld [vmem:[%s8771_s28 + $0x1374] ss:$8 sps:$4 sm:$0xff]  }
 0x21d   : > { %v8350_v37 = vld [vmem:[%s8771_s28 + $0x1270] ss:$8 sps:$4 sm:$0xff]   ;;  %v8358_v62 = vld [vmem:[%s8771_s28 + $0x1264] ss:$8 sps:$4 sm:$0xff]  }
 0x21e   : > { %5978 = vmatpush1.bf16.msra.mxu0 %v8266_v33  ;;  %v8347_v33 = vld [vmem:[%s8771_s28 + $0x1180] ss:$8 sps:$4 sm:$0xff]  }
 0x21f   : > { %6019 = vmatpush1.bf16.msra.mxu1 %v8269_v57  ;;  %5979 = vmatprep.subr.bf16.mxu0 %v8274_v9  ;;  %v8352_v57 = vld [vmem:[%s8771_s28 + $0x1274] ss:$8 sps:$4 sm:$0xff]   ;;  %v1280_v9 = vrot.slane %v1252_v63, %v8821_v50  ;;  %v8410_v63 = vld [vmem:[%s8771_s28 + $0x12d0] ss:$8 sps:$4 sm:$0xff]  }
 0x220   : > { %6020 = vmatprep.subr.bf16.mxu1 %v8277_v35  ;;  %v1281_v35 = vcombine.high %v1259_v5, %v1259_v5 }
 0x222   : > { %5980 = vmatpush1.bf16.msra.mxu0 %v8272_v38  ;;  %v8353_v38 = vld [vmem:[%s8771_s28 + $0x1370] ss:$8 sps:$4 sm:$0xff]  }
 0x223   : > { %6021 = vmatpush1.bf16.msra.mxu1 %v8275_v39  ;;  %5981 = vmatprep.subr.bf16.mxu0 %v8280_v30  ;;  %v8361_v39 = vld [vmem:[%s8771_s28 + $0x1364] ss:$8 sps:$4 sm:$0xff]   ;;  %v1284_v30 = vcombine.high %v1280_v9, %v1280_v9 }
 0x224   : > { %6022 = vmatprep.subr.bf16.mxu1 %v8283_v41 }
 0x226   : > { %5982 = vmatpush1.bf16.msra.mxu0 %v8278_v12 }
 0x227   : > { %6023 = vmatpush1.bf16.msra.mxu1 %v8281_v42  ;;  %5983 = vmatprep.subr.bf16.mxu0 %v8286_v43  ;;  %v8356_v43 = vld [vmem:[%s8771_s28 + $0x1260] ss:$8 sps:$4 sm:$0xff]  }
 0x228   : > { %6024 = vmatprep.subr.bf16.mxu1 %v8289_v45  ;;  %v8359_v45 = vld [vmem:[%s8771_s28 + $0x1360] ss:$8 sps:$4 sm:$0xff]  }
 0x22a   : > { %5984 = vmatpush1.bf16.msra.mxu0 %v8284_v47 }
 0x22b   : > { %6025 = vmatpush1.bf16.msra.mxu1 %v8287_v22  ;;  %5985 = vmatprep.subr.bf16.mxu0 %v8292_v48  ;;  %v8364_v48 = vld [vmem:[%s8771_s28 + $0x1254] ss:$8 sps:$4 sm:$0xff]  }
 0x22c   : > { %6026 = vmatprep.subr.bf16.mxu1 %v8295_v51  ;;  %v8367_v51 = vld [vmem:[%s8771_s28 + $0x1354] ss:$8 sps:$4 sm:$0xff]  }
 0x22e   : > { %5986 = vmatpush1.bf16.msra.mxu0 %v8290_v52 }
 0x22f   : > { %6027 = vmatpush1.bf16.msra.mxu1 %v8293_v25  ;;  %5987 = vmatprep.subr.bf16.mxu0 %v8298_v26 }
 0x230   : > { %6028 = vmatprep.subr.bf16.mxu1 %v8301_v53 }
 0x232   : > { %5988 = vmatpush1.bf16.msra.mxu0 %v8296_v54  ;;  %v8362_v54 = vld [vmem:[%s8771_s28 + $0x1250] ss:$8 sps:$4 sm:$0xff]  }
 0x233   : > { %6029 = vmatpush1.bf16.msra.mxu1 %v8299_v55  ;;  %5989 = vmatprep.subr.bf16.mxu0 %v8304_v16  ;;  %v8365_v55 = vld [vmem:[%s8771_s28 + $0x1350] ss:$8 sps:$4 sm:$0xff]  }
 0x234   : > { %6030 = vmatprep.subr.bf16.mxu1 %v8307_v59  ;;  %v8373_v59 = vld [vmem:[%s8771_s28 + $0x1344] ss:$8 sps:$4 sm:$0xff]  }
 0x236   : > { %5990 = vmatpush2.bf16.msra.mxu0 %v8302_v32 }
 0x237   : > { %6031 = vmatpush2.bf16.msra.mxu1 %v8305_v60  ;;  %5991 = vmatprep.subr.bf16.mxu0 %v8310_v61  ;;  %v8368_v60 = vld [vmem:[%s8771_s28 + $0x1240] ss:$8 sps:$4 sm:$0xff]  }
 0x238   : > { %6032 = vmatprep.subr.bf16.mxu1 %v8313_v0  ;;  %v8371_v61 = vld [vmem:[%s8771_s28 + $0x1340] ss:$8 sps:$4 sm:$0xff]   ;;  %v8376_v0 = vld [vmem:[%s8771_s28 + $0x1234] ss:$8 sps:$4 sm:$0xff]  }
 0x23a   : > { %5992 = vmatpush2.bf16.msra.mxu0 %v8308_v1  ;;  %v8379_v1 = vld [vmem:[%s8771_s28 + $0x1334] ss:$8 sps:$4 sm:$0xff]  }
 0x23b   : > { %6033 = vmatpush2.bf16.msra.mxu1 %v8311_v2  ;;  %5993 = vmatprep.subr.bf16.mxu0 %v8316_v3  ;;  %v8374_v2 = vld [vmem:[%s8771_s28 + $0x1230] ss:$8 sps:$4 sm:$0xff]  }
 0x23c   : > { %6034 = vmatprep.subr.bf16.mxu1 %v8319_v4  ;;  %v8377_v3 = vld [vmem:[%s8771_s28 + $0x1330] ss:$8 sps:$4 sm:$0xff]   ;;  %v8382_v4 = vld [vmem:[%s8771_s28 + $0x1224] ss:$8 sps:$4 sm:$0xff]  }
 0x23e   : > { %5994 = vmatpush2.bf16.msra.mxu0 %v8314_v6  ;;  %v8385_v6 = vld [vmem:[%s8771_s28 + $0x1324] ss:$8 sps:$4 sm:$0xff]  }
 0x23f   : > { %6035 = vmatpush2.bf16.msra.mxu1 %v8317_v46  ;;  %5995 = vmatprep.subr.bf16.mxu0 %v8322_v8  ;;  %v8380_v46 = vld [vmem:[%s8771_s28 + $0x1220] ss:$8 sps:$4 sm:$0xff]  }
 0x240   : > { %6036 = vmatprep.subr.bf16.mxu1 %v8325_v10  ;;  %v8383_v8 = vld [vmem:[%s8771_s28 + $0x1320] ss:$8 sps:$4 sm:$0xff]   ;;  %v8388_v10 = vld [vmem:[%s8771_s28 + $0x1214] ss:$8 sps:$4 sm:$0xff]  }
 0x242   : > { %5996 = vmatpush2.bf16.msra.mxu0 %v8320_v36  ;;  %v8391_v36 = vld [vmem:[%s8771_s28 + $0x1314] ss:$8 sps:$4 sm:$0xff]  }
 0x243   : > { %6037 = vmatpush2.bf16.msra.mxu1 %v8323_v49  ;;  %5997 = vmatprep.subr.bf16.mxu0 %v8328_v11  ;;  %v8386_v49 = vld [vmem:[%s8771_s28 + $0x1210] ss:$8 sps:$4 sm:$0xff]  }
 0x244   : > { %6038 = vmatprep.subr.bf16.mxu1 %v8331_v13  ;;  %v8389_v11 = vld [vmem:[%s8771_s28 + $0x1310] ss:$8 sps:$4 sm:$0xff]   ;;  %v8394_v13 = vld [vmem:[%s8771_s28 + $0x1204] ss:$8 sps:$4 sm:$0xff]  }
 0x246   : > { %5998 = vmatpush2.bf16.msra.mxu0 %v8326_v14  ;;  %v8397_v14 = vld [vmem:[%s8771_s28 + $0x1304] ss:$8 sps:$4 sm:$0xff]  }
 0x247   : > { %6039 = vmatpush2.bf16.msra.mxu1 %v8329_v40  ;;  %5999 = vmatprep.subr.bf16.mxu0 %v8334_v15  ;;  %v8392_v40 = vld [vmem:[%s8771_s28 + $0x1200] ss:$8 sps:$4 sm:$0xff]  }
 0x248   : > { %6040 = vmatprep.subr.bf16.mxu1 %v8337_v17  ;;  %v8395_v15 = vld [vmem:[%s8771_s28 + $0x1300] ss:$8 sps:$4 sm:$0xff]   ;;  %v8400_v17 = vld [vmem:[%s8771_s28 + $0x12f4] ss:$8 sps:$4 sm:$0xff]  }
 0x24a   : > { %6000 = vmatpush2.bf16.msra.mxu0 %v8332_v19  ;;  %v8398_v19 = vld [vmem:[%s8771_s28 + $0x12f0] ss:$8 sps:$4 sm:$0xff]  }
 0x24b   : > { %6041 = vmatpush2.bf16.msra.mxu1 %v8335_v20  ;;  %6001 = vmatprep.subr.bf16.mxu0 %v8340_v21  ;;  %v8401_v20 = vld [vmem:[%s8771_s28 + $0x13f0] ss:$8 sps:$4 sm:$0xff]   ;;  %v8406_v21 = vld [vmem:[%s8771_s28 + $0x12e4] ss:$8 sps:$4 sm:$0xff]  }
 0x24c   : > { %6042 = vmatprep.subr.bf16.mxu1 %v8343_v23  ;;  %v8409_v23 = vld [vmem:[%s8771_s28 + $0x13e4] ss:$8 sps:$4 sm:$0xff]  }
 0x24e   : > { %6002 = vmatpush2.bf16.msra.mxu0 %v8338_v56  ;;  %v8404_v56 = vld [vmem:[%s8771_s28 + $0x12e0] ss:$8 sps:$4 sm:$0xff]  }
 0x24f   : > { %6043 = vmatpush2.bf16.msra.mxu1 %v8341_v24  ;;  %6003 = vmatprep.subr.bf16.mxu0 %v8346_v27  ;;  %v8407_v24 = vld [vmem:[%s8771_s28 + $0x13e0] ss:$8 sps:$4 sm:$0xff]   ;;  %v8412_v27 = vld [vmem:[%s8771_s28 + $0x12d4] ss:$8 sps:$4 sm:$0xff]  }
 0x250   : > { %6044 = vmatprep.subr.bf16.mxu1 %v8349_v28  ;;  %v8415_v28 = vld [vmem:[%s8771_s28 + $0x13d4] ss:$8 sps:$4 sm:$0xff]  }
 0x252   : > { %6004 = vmatpush2.bf16.msra.mxu0 %v8344_v29  ;;  %v8418_v29 = vld [vmem:[%s8771_s28 + $0x12c4] ss:$8 sps:$4 sm:$0xff]  }
 0x253   : > { %6045 = vmatpush2.bf16.msra.mxu1 %v8347_v33  ;;  %6055 = vmatprep.subr.bf16.mxu0 %v8352_v57  ;;  %v8421_v33 = vld [vmem:[%s8771_s28 + $0x13c4] ss:$8 sps:$4 sm:$0xff]   ;;  %v8416_v57 = vld [vmem:[%s8771_s28 + $0x12c0] ss:$8 sps:$4 sm:$0xff]  }
 0x254   : > { %6096 = vmatprep.subr.bf16.mxu1 %v8355_v34  ;;  %v8419_v34 = vld [vmem:[%s8771_s28 + $0x13c0] ss:$8 sps:$4 sm:$0xff]  }
 0x255   : > { %v5761_v41 = vpop.f32.mrf.mxu0  ;;  %6006 = vmatmul.mubr.bf16.vlgmr.msra.gmra.mxu0 %v1259_v5  ;;  %v8413_v5 = vld [vmem:[%s8771_s28 + $0x13d0] ss:$8 sps:$4 sm:$0xff]  }
 0x256   : > { %v5802_v12 = vpop.f32.mrf.mxu1  ;;  %6047 = vmatmul.mubr.bf16.vlgmr.msra.gmra.mxu1 %v1281_v35  ;;  %v5762_v42 = vadd.f32 %v5761_v41, %v9413_v7  ;;  %6056 = vmatpush1.bf16.msra.mxu0 %v8350_v37  ;;  %v8427_v35 = vld [vmem:[%s8771_s28 + $0x13b4] ss:$8 sps:$4 sm:$0xff]   ;;  %v8422_v37 = vld [vmem:[%s8771_s28 + $0x12b0] ss:$8 sps:$4 sm:$0xff]   ;;  %v8428_v41 = vld [vmem:[%s8771_s28 + $0x12a0] ss:$8 sps:$4 sm:$0xff]  }
 0x257   : > { %6097 = vmatpush1.bf16.msra.mxu1 %v8353_v38  ;;  %v5763_v47 = vpop.f32.mrf.mxu0  ;;  %6057 = vmatprep.subr.bf16.mxu0 %v8358_v62  ;;  %v8425_v38 = vld [vmem:[%s8771_s28 + $0x13b0] ss:$8 sps:$4 sm:$0xff]   ;;  %v8430_v62 = vld [vmem:[%s8771_s28 + $0x12a4] ss:$8 sps:$4 sm:$0xff]  }
 0x258   : > { %v5804_v22 = vpop.f32.mrf.mxu1  ;;  %6098 = vmatprep.subr.bf16.mxu1 %v8361_v39  ;;  %v5764_v52 = vadd.f32 %v5763_v47, %v9415_v31  ;;  %v9493_v25 = vadd.f32 %v5802_v12, %v5762_v42  ;;  %6087 = vmatprep.mubr.bf16.mxu0 %v1280_v9  ;;  %v8370_v31 = vld [vmem:[%s8771_s28 + $0x1244] ss:$8 sps:$4 sm:$0xff]   ;;  %v8424_v9 = vld [vmem:[%s8771_s28 + $0x12b4] ss:$8 sps:$4 sm:$0xff]   ;;  %v8431_v12 = vld [vmem:[%s8771_s28 + $0x13a0] ss:$8 sps:$4 sm:$0xff]  }
 0x259   : > { %6128 = vmatprep.mubr.bf16.mxu1 %v1284_v30  ;;  %v5765_v7 = vpop.f32.mrf.mxu0  ;;  %v8433_v39 = vld [vmem:[%s8771_s28 + $0x13a4] ss:$8 sps:$4 sm:$0xff]   ;;  %v8436_v42 = vld [vmem:[%s8771_s28 + $0x1294] ss:$8 sps:$4 sm:$0xff]   ;;  %v8434_v47 = vld [vmem:[%s8771_s28 + $0x1290] ss:$8 sps:$4 sm:$0xff]  }
 0x25a   : > { %v5806_v26 = vpop.f32.mrf.mxu1  ;;  %v9495_v53 = vadd.f32 %v5804_v22, %v5764_v52  ;;  %6058 = vmatpush1.bf16.msra.mxu0 %v8356_v43  ;;  %v9542_v30 = vld [vmem:[%s8766_s24 + $0x28] sm:$0xff]  ;;  %v8439_v43 = vld [vmem:[%s8771_s28 + $0x1394] ss:$8 sps:$4 sm:$0xff]   ;;  %v8437_v22 = vld [vmem:[%s8771_s28 + $0x1390] ss:$8 sps:$4 sm:$0xff]   ;;  %v1266_v7 = vrot.slane %v9468_v58, %v8821_v50 }
 0x25b   : > { %6099 = vmatpush1.bf16.msra.mxu1 %v8359_v45  ;;  %v5766_v16 = vpop.f32.mrf.mxu0  ;;  %6059 = vmatprep.subr.bf16.mxu0 %v8364_v48  ;;  %v9550_v45 = vrot.slane %v9542_v30, %v8821_v50  ;;  %v8442_v48 = vld [vmem:[%s8771_s28 + $0x1284] ss:$8 sps:$4 sm:$0xff]   ;;  %v8440_v26 = vld [vmem:[%s8771_s28 + $0x1280] ss:$8 sps:$4 sm:$0xff]  }
 0x25c   : > { %6100 = vmatprep.subr.bf16.mxu1 %v8367_v51  ;;  %v5807_v32 = vpop.f32.mrf.mxu1  ;;  %v8445_v51 = vld [vmem:[%s8771_s28 + $0x1384] ss:$8 sps:$4 sm:$0xff]   ;;  %v8452_v16 = vld [vmem:[%s8771_s28 + $0x1574] ss:$8 sps:$4 sm:$0xff]  }
 0x25d   : > { %v1300_v52 = vcombine.high %v9550_v45, %v9550_v45  ;;  %v8447_v32 = vld [vmem:[%s8771_s28 + $0x1470] ss:$8 sps:$4 sm:$0xff]   ;;  %v8455_v58 = vld [vmem:[%s8771_s28 + $0x1464] ss:$8 sps:$4 sm:$0xff]  }
 0x25e   : > { %6060 = vmatpush1.bf16.msra.mxu0 %v8362_v54  ;;  %v8443_v54 = vld [vmem:[%s8771_s28 + $0x1380] ss:$8 sps:$4 sm:$0xff]  }
 0x25f   : > { %6101 = vmatpush1.bf16.msra.mxu1 %v8365_v55  ;;  %6061 = vmatprep.subr.bf16.mxu0 %v8370_v31  ;;  %v8449_v55 = vld [vmem:[%s8771_s28 + $0x1474] ss:$8 sps:$4 sm:$0xff]   ;;  %v1322_v31 = vrot.slane %v1300_v52, %v8821_v50 }
 0x260   : > { %6102 = vmatprep.subr.bf16.mxu1 %v8373_v59  ;;  %v1282_v59 = vcombine.high %v1266_v7, %v1266_v7  ;;  %v8512_v52 = vld [vmem:[%s8771_s28 + $0x15d4] ss:$8 sps:$4 sm:$0xff]  }
 0x262   : > { %6062 = vmatpush1.bf16.msra.mxu0 %v8368_v60  ;;  %v8450_v60 = vld [vmem:[%s8771_s28 + $0x1570] ss:$8 sps:$4 sm:$0xff]  }
 0x263   : > { %6103 = vmatpush1.bf16.msra.mxu1 %v8371_v61  ;;  %6063 = vmatprep.subr.bf16.mxu0 %v8376_v0  ;;  %v8458_v61 = vld [vmem:[%s8771_s28 + $0x1564] ss:$8 sps:$4 sm:$0xff]   ;;  %v1332_v0 = vcombine.high %v1322_v31, %v1322_v31 }
 0x264   : > { %6104 = vmatprep.subr.bf16.mxu1 %v8379_v1 }
 0x266   : > { %6064 = vmatpush1.bf16.msra.mxu0 %v8374_v2 }
 0x267   : > { %6105 = vmatpush1.bf16.msra.mxu1 %v8377_v3  ;;  %6065 = vmatprep.subr.bf16.mxu0 %v8382_v4  ;;  %v8453_v4 = vld [vmem:[%s8771_s28 + $0x1460] ss:$8 sps:$4 sm:$0xff]  }
 0x268   : > { %6106 = vmatprep.subr.bf16.mxu1 %v8385_v6  ;;  %v8456_v6 = vld [vmem:[%s8771_s28 + $0x1560] ss:$8 sps:$4 sm:$0xff]  }
 0x26a   : > { %6066 = vmatpush1.bf16.msra.mxu0 %v8380_v46 }
 0x26b   : > { %6107 = vmatpush1.bf16.msra.mxu1 %v8383_v8  ;;  %6067 = vmatprep.subr.bf16.mxu0 %v8388_v10  ;;  %v8461_v10 = vld [vmem:[%s8771_s28 + $0x1454] ss:$8 sps:$4 sm:$0xff]  }
 0x26c   : > { %6108 = vmatprep.subr.bf16.mxu1 %v8391_v36  ;;  %v8464_v36 = vld [vmem:[%s8771_s28 + $0x1554] ss:$8 sps:$4 sm:$0xff]  }
 0x26e   : > { %6068 = vmatpush1.bf16.msra.mxu0 %v8386_v49 }
 0x26f   : > { %6109 = vmatpush1.bf16.msra.mxu1 %v8389_v11  ;;  %6069 = vmatprep.subr.bf16.mxu0 %v8394_v13 }
 0x270   : > { %6110 = vmatprep.subr.bf16.mxu1 %v8397_v14 }
 0x272   : > { %6070 = vmatpush1.bf16.msra.mxu0 %v8392_v40  ;;  %v8459_v40 = vld [vmem:[%s8771_s28 + $0x1450] ss:$8 sps:$4 sm:$0xff]  }
 0x273   : > { %6111 = vmatpush1.bf16.msra.mxu1 %v8395_v15  ;;  %6071 = vmatprep.subr.bf16.mxu0 %v8400_v17  ;;  %v8462_v15 = vld [vmem:[%s8771_s28 + $0x1550] ss:$8 sps:$4 sm:$0xff]  }
 0x274   : > { %6112 = vmatprep.subr.bf16.mxu1 %v8403_v18  ;;  %v8470_v18 = vld [vmem:[%s8771_s28 + $0x1544] ss:$8 sps:$4 sm:$0xff]  }
 0x276   : > { %6072 = vmatpush2.bf16.msra.mxu0 %v8398_v19 }
 0x277   : > { %6113 = vmatpush2.bf16.msra.mxu1 %v8401_v20  ;;  %6073 = vmatprep.subr.bf16.mxu0 %v8406_v21  ;;  %v8465_v20 = vld [vmem:[%s8771_s28 + $0x1440] ss:$8 sps:$4 sm:$0xff]  }
 0x278   : > { %6114 = vmatprep.subr.bf16.mxu1 %v8409_v23  ;;  %v8468_v21 = vld [vmem:[%s8771_s28 + $0x1540] ss:$8 sps:$4 sm:$0xff]   ;;  %v8473_v23 = vld [vmem:[%s8771_s28 + $0x1434] ss:$8 sps:$4 sm:$0xff]  }
 0x27a   : > { %6074 = vmatpush2.bf16.msra.mxu0 %v8404_v56  ;;  %v8476_v56 = vld [vmem:[%s8771_s28 + $0x1534] ss:$8 sps:$4 sm:$0xff]  }
 0x27b   : > { %6115 = vmatpush2.bf16.msra.mxu1 %v8407_v24  ;;  %6075 = vmatprep.subr.bf16.mxu0 %v8412_v27  ;;  %v8471_v24 = vld [vmem:[%s8771_s28 + $0x1430] ss:$8 sps:$4 sm:$0xff]  }
 0x27c   : > { %6116 = vmatprep.subr.bf16.mxu1 %v8415_v28  ;;  %v8474_v27 = vld [vmem:[%s8771_s28 + $0x1530] ss:$8 sps:$4 sm:$0xff]   ;;  %v8479_v28 = vld [vmem:[%s8771_s28 + $0x1424] ss:$8 sps:$4 sm:$0xff]  }
 0x27e   : > { %6076 = vmatpush2.bf16.msra.mxu0 %v8410_v63  ;;  %v8482_v63 = vld [vmem:[%s8771_s28 + $0x1524] ss:$8 sps:$4 sm:$0xff]  }
 0x27f   : > { %6117 = vmatpush2.bf16.msra.mxu1 %v8413_v5  ;;  %6077 = vmatprep.subr.bf16.mxu0 %v8418_v29  ;;  %v8477_v5 = vld [vmem:[%s8771_s28 + $0x1420] ss:$8 sps:$4 sm:$0xff]  }
 0x280   : > { %6118 = vmatprep.subr.bf16.mxu1 %v8421_v33  ;;  %v8480_v29 = vld [vmem:[%s8771_s28 + $0x1520] ss:$8 sps:$4 sm:$0xff]   ;;  %v8485_v33 = vld [vmem:[%s8771_s28 + $0x1414] ss:$8 sps:$4 sm:$0xff]  }
 0x282   : > { %6078 = vmatpush2.bf16.msra.mxu0 %v8416_v57  ;;  %v8488_v57 = vld [vmem:[%s8771_s28 + $0x1514] ss:$8 sps:$4 sm:$0xff]  }
 0x283   : > { %6119 = vmatpush2.bf16.msra.mxu1 %v8419_v34  ;;  %6079 = vmatprep.subr.bf16.mxu0 %v8424_v9  ;;  %v8483_v34 = vld [vmem:[%s8771_s28 + $0x1410] ss:$8 sps:$4 sm:$0xff]  }
 0x284   : > { %6120 = vmatprep.subr.bf16.mxu1 %v8427_v35  ;;  %v8486_v9 = vld [vmem:[%s8771_s28 + $0x1510] ss:$8 sps:$4 sm:$0xff]   ;;  %v8491_v35 = vld [vmem:[%s8771_s28 + $0x1404] ss:$8 sps:$4 sm:$0xff]  }
 0x286   : > { %6080 = vmatpush2.bf16.msra.mxu0 %v8422_v37  ;;  %v8494_v37 = vld [vmem:[%s8771_s28 + $0x1504] ss:$8 sps:$4 sm:$0xff]  }
 0x287   : > { %6121 = vmatpush2.bf16.msra.mxu1 %v8425_v38  ;;  %6081 = vmatprep.subr.bf16.mxu0 %v8430_v62  ;;  %v8489_v38 = vld [vmem:[%s8771_s28 + $0x1400] ss:$8 sps:$4 sm:$0xff]  }
 0x288   : > { %6122 = vmatprep.subr.bf16.mxu1 %v8433_v39  ;;  %v8492_v62 = vld [vmem:[%s8771_s28 + $0x1500] ss:$8 sps:$4 sm:$0xff]   ;;  %v8497_v39 = vld [vmem:[%s8771_s28 + $0x14f4] ss:$8 sps:$4 sm:$0xff]  }
 0x28a   : > { %6082 = vmatpush2.bf16.msra.mxu0 %v8428_v41  ;;  %v8500_v41 = vld [vmem:[%s8771_s28 + $0x15f4] ss:$8 sps:$4 sm:$0xff]  }
 0x28b   : > { %6123 = vmatpush2.bf16.msra.mxu1 %v8431_v12  ;;  %6083 = vmatprep.subr.bf16.mxu0 %v8436_v42  ;;  %v8495_v12 = vld [vmem:[%s8771_s28 + $0x14f0] ss:$8 sps:$4 sm:$0xff]  }
 0x28c   : > { %6124 = vmatprep.subr.bf16.mxu1 %v8439_v43  ;;  %v8498_v42 = vld [vmem:[%s8771_s28 + $0x15f0] ss:$8 sps:$4 sm:$0xff]   ;;  %v8503_v43 = vld [vmem:[%s8771_s28 + $0x14e4] ss:$8 sps:$4 sm:$0xff]  }
 0x28e   : > { %6084 = vmatpush2.bf16.msra.mxu0 %v8434_v47  ;;  %v8506_v47 = vld [vmem:[%s8771_s28 + $0x15e4] ss:$8 sps:$4 sm:$0xff]  }
 0x28f   : > { %6125 = vmatpush2.bf16.msra.mxu1 %v8437_v22  ;;  %6085 = vmatprep.subr.bf16.mxu0 %v8442_v48  ;;  %v8501_v22 = vld [vmem:[%s8771_s28 + $0x14e0] ss:$8 sps:$4 sm:$0xff]  }
 0x290   : > { %6126 = vmatprep.subr.bf16.mxu1 %v8445_v51  ;;  %v8504_v48 = vld [vmem:[%s8771_s28 + $0x15e0] ss:$8 sps:$4 sm:$0xff]   ;;  %v8509_v51 = vld [vmem:[%s8771_s28 + $0x14d4] ss:$8 sps:$4 sm:$0xff]  }
 0x292   : > { %6086 = vmatpush2.bf16.msra.mxu0 %v8440_v26  ;;  %v8510_v26 = vld [vmem:[%s8771_s28 + $0x15d0] ss:$8 sps:$4 sm:$0xff]  }
 0x293   : > { %6127 = vmatpush2.bf16.msra.mxu1 %v8443_v54  ;;  %6137 = vmatprep.subr.bf16.mxu0 %v8449_v55  ;;  %v8515_v54 = vld [vmem:[%s8771_s28 + $0x14c4] ss:$8 sps:$4 sm:$0xff]  }
 0x294   : > { %6178 = vmatprep.subr.bf16.mxu1 %v8452_v16  ;;  %v8518_v55 = vld [vmem:[%s8771_s28 + $0x15c4] ss:$8 sps:$4 sm:$0xff]   ;;  %v8513_v16 = vld [vmem:[%s8771_s28 + $0x14c0] ss:$8 sps:$4 sm:$0xff]  }
 0x295   : > { %v5843_v1 = vpop.f32.mrf.mxu0  ;;  %6088 = vmatmul.mubr.bf16.vlgmr.msra.gmra.mxu0 %v1266_v7  ;;  %v8507_v7 = vld [vmem:[%s8771_s28 + $0x14d0] ss:$8 sps:$4 sm:$0xff]  }
 0x296   : > { %v5884_v2 = vpop.f32.mrf.mxu1  ;;  %6129 = vmatmul.mubr.bf16.vlgmr.msra.gmra.mxu1 %v1282_v59  ;;  %v5844_v3 = vadd.f32 %v5843_v1, %v9493_v25  ;;  %6138 = vmatpush1.bf16.msra.mxu0 %v8447_v32  ;;  %v8521_v59 = vld [vmem:[%s8771_s28 + $0x14b4] ss:$8 sps:$4 sm:$0xff]   ;;  %v1285_v1 = vcombine.high %v9542_v30, %v9542_v30  ;;  %v8531_v30 = vld [vmem:[%s8771_s28 + $0x1490] ss:$8 sps:$4 sm:$0xff]  }
 0x297   : > { %6179 = vmatpush1.bf16.msra.mxu1 %v8450_v60  ;;  %v5845_v46 = vpop.f32.mrf.mxu0  ;;  %6139 = vmatprep.subr.bf16.mxu0 %v8455_v58  ;;  %v8524_v32 = vld [vmem:[%s8771_s28 + $0x15b4] ss:$8 sps:$4 sm:$0xff]   ;;  %v8519_v60 = vld [vmem:[%s8771_s28 + $0x14b0] ss:$8 sps:$4 sm:$0xff]  }
 0x298   : > { %v5886_v8 = vpop.f32.mrf.mxu1  ;;  %6180 = vmatprep.subr.bf16.mxu1 %v8458_v61  ;;  %v5846_v49 = vadd.f32 %v5845_v46, %v9495_v53  ;;  %v9575_v11 = vadd.f32 %v5884_v2, %v5844_v3  ;;  %6169 = vmatprep.mubr.bf16.mxu0 %v1322_v31  ;;  %v8467_v53 = vld [vmem:[%s8771_s28 + $0x1444] ss:$8 sps:$4 sm:$0xff]   ;;  %v8516_v31 = vld [vmem:[%s8771_s28 + $0x15c0] ss:$8 sps:$4 sm:$0xff]   ;;  %v8522_v58 = vld [vmem:[%s8771_s28 + $0x15b0] ss:$8 sps:$4 sm:$0xff]   ;;  %v9630_v46 = vrot.slane %v1285_v1, %v8821_v50 }
 0x299   : > { %6210 = vmatprep.mubr.bf16.mxu1 %v1332_v0  ;;  %v5847_v25 = vpop.f32.mrf.mxu0  ;;  %v8527_v61 = vld [vmem:[%s8771_s28 + $0x14a4] ss:$8 sps:$4 sm:$0xff]   ;;  %v8525_v2 = vld [vmem:[%s8771_s28 + $0x14a0] ss:$8 sps:$4 sm:$0xff]   ;;  %v8596_v1 = vld [vmem:[%s8771_s28 + $0x17f4] ss:$8 sps:$4 sm:$0xff]  }
 0x29a   : > { %v5888_v13 = vpop.f32.mrf.mxu1  ;;  %v9577_v14 = vadd.f32 %v5886_v8, %v5846_v49  ;;  %6140 = vmatpush1.bf16.msra.mxu0 %v8453_v4  ;;  %v8530_v0 = vld [vmem:[%s8771_s28 + $0x15a4] ss:$8 sps:$4 sm:$0xff]   ;;  %v8528_v3 = vld [vmem:[%s8771_s28 + $0x15a0] ss:$8 sps:$4 sm:$0xff]   ;;  %v8533_v4 = vld [vmem:[%s8771_s28 + $0x1494] ss:$8 sps:$4 sm:$0xff]   ;;  %v1301_v49 = vcombine.high %v9630_v46, %v9630_v46  ;;  %v1308_v25 = vrot.slane %v9550_v45, %v8821_v50 }
 0x29b   : > { %6181 = vmatpush1.bf16.msra.mxu1 %v8456_v6  ;;  %v5848_v17 = vpop.f32.mrf.mxu0  ;;  %6141 = vmatprep.subr.bf16.mxu0 %v8461_v10  ;;  %v8536_v6 = vld [vmem:[%s8771_s28 + $0x1594] ss:$8 sps:$4 sm:$0xff]   ;;  %v8534_v8 = vld [vmem:[%s8771_s28 + $0x1590] ss:$8 sps:$4 sm:$0xff]   ;;  %v8539_v10 = vld [vmem:[%s8771_s28 + $0x1484] ss:$8 sps:$4 sm:$0xff]  }
 0x29c   : > { %6182 = vmatprep.subr.bf16.mxu1 %v8464_v36  ;;  %v5889_v19 = vpop.f32.mrf.mxu1  ;;  %v8542_v36 = vld [vmem:[%s8771_s28 + $0x1584] ss:$8 sps:$4 sm:$0xff]   ;;  %v8537_v13 = vld [vmem:[%s8771_s28 + $0x1480] ss:$8 sps:$4 sm:$0xff]   ;;  %v8548_v17 = vld [vmem:[%s8771_s28 + $0x1774] ss:$8 sps:$4 sm:$0xff]  }
 0x29d   : > { %v8543_v19 = vld [vmem:[%s8771_s28 + $0x1670] ss:$8 sps:$4 sm:$0xff]   ;;  %v8551_v45 = vld [vmem:[%s8771_s28 + $0x1664] ss:$8 sps:$4 sm:$0xff]  }
 0x29e   : > { %6142 = vmatpush1.bf16.msra.mxu0 %v8459_v40  ;;  %v8540_v40 = vld [vmem:[%s8771_s28 + $0x1580] ss:$8 sps:$4 sm:$0xff]  }
 0x29f   : > { %6183 = vmatpush1.bf16.msra.mxu1 %v8462_v15  ;;  %6143 = vmatprep.subr.bf16.mxu0 %v8467_v53  ;;  %v8545_v15 = vld [vmem:[%s8771_s28 + $0x1674] ss:$8 sps:$4 sm:$0xff]   ;;  %v1329_v53 = vrot.slane %v1301_v49, %v8821_v50  ;;  %v8603_v49 = vld [vmem:[%s8771_s28 + $0x16d0] ss:$8 sps:$4 sm:$0xff]  }
 0x2a0   : > { %6184 = vmatprep.subr.bf16.mxu1 %v8470_v18  ;;  %v1330_v18 = vcombine.high %v1308_v25, %v1308_v25 }
 0x2a2   : > { %6144 = vmatpush1.bf16.msra.mxu0 %v8465_v20  ;;  %v8546_v20 = vld [vmem:[%s8771_s28 + $0x1770] ss:$8 sps:$4 sm:$0xff]  }
 0x2a3   : > { %6185 = vmatpush1.bf16.msra.mxu1 %v8468_v21  ;;  %6145 = vmatprep.subr.bf16.mxu0 %v8473_v23  ;;  %v8554_v21 = vld [vmem:[%s8771_s28 + $0x1764] ss:$8 sps:$4 sm:$0xff]   ;;  %v1333_v23 = vcombine.high %v1329_v53, %v1329_v53 }
 0x2a4   : > { %6186 = vmatprep.subr.bf16.mxu1 %v8476_v56 }
 0x2a6   : > { %6146 = vmatpush1.bf16.msra.mxu0 %v8471_v24 }
 0x2a7   : > { %6187 = vmatpush1.bf16.msra.mxu1 %v8474_v27  ;;  %6147 = vmatprep.subr.bf16.mxu0 %v8479_v28  ;;  %v8549_v28 = vld [vmem:[%s8771_s28 + $0x1660] ss:$8 sps:$4 sm:$0xff]  }
 0x2a8   : > { %6188 = vmatprep.subr.bf16.mxu1 %v8482_v63  ;;  %v8552_v63 = vld [vmem:[%s8771_s28 + $0x1760] ss:$8 sps:$4 sm:$0xff]  }
 0x2aa   : > { %6148 = vmatpush1.bf16.msra.mxu0 %v8477_v5 }
 0x2ab   : > { %6189 = vmatpush1.bf16.msra.mxu1 %v8480_v29  ;;  %6149 = vmatprep.subr.bf16.mxu0 %v8485_v33  ;;  %v8557_v33 = vld [vmem:[%s8771_s28 + $0x1654] ss:$8 sps:$4 sm:$0xff]  }
 0x2ac   : > { %6190 = vmatprep.subr.bf16.mxu1 %v8488_v57  ;;  %v8560_v57 = vld [vmem:[%s8771_s28 + $0x1754] ss:$8 sps:$4 sm:$0xff]  }
 0x2ae   : > { %6150 = vmatpush1.bf16.msra.mxu0 %v8483_v34 }
 0x2af   : > { %6191 = vmatpush1.bf16.msra.mxu1 %v8486_v9  ;;  %6151 = vmatprep.subr.bf16.mxu0 %v8491_v35 }
 0x2b0   : > { %6192 = vmatprep.subr.bf16.mxu1 %v8494_v37 }
 0x2b2   : > { %6152 = vmatpush1.bf16.msra.mxu0 %v8489_v38  ;;  %v8555_v38 = vld [vmem:[%s8771_s28 + $0x1650] ss:$8 sps:$4 sm:$0xff]  }
 0x2b3   : > { %6193 = vmatpush1.bf16.msra.mxu1 %v8492_v62  ;;  %6153 = vmatprep.subr.bf16.mxu0 %v8497_v39  ;;  %v8558_v62 = vld [vmem:[%s8771_s28 + $0x1750] ss:$8 sps:$4 sm:$0xff]  }
 0x2b4   : > { %6194 = vmatprep.subr.bf16.mxu1 %v8500_v41  ;;  %v8566_v41 = vld [vmem:[%s8771_s28 + $0x1744] ss:$8 sps:$4 sm:$0xff]  }
 0x2b6   : > { %6154 = vmatpush2.bf16.msra.mxu0 %v8495_v12 }
 0x2b7   : > { %6195 = vmatpush2.bf16.msra.mxu1 %v8498_v42  ;;  %6155 = vmatprep.subr.bf16.mxu0 %v8503_v43  ;;  %v8561_v42 = vld [vmem:[%s8771_s28 + $0x1640] ss:$8 sps:$4 sm:$0xff]  }
 0x2b8   : > { %6196 = vmatprep.subr.bf16.mxu1 %v8506_v47  ;;  %v8564_v43 = vld [vmem:[%s8771_s28 + $0x1740] ss:$8 sps:$4 sm:$0xff]   ;;  %v8569_v47 = vld [vmem:[%s8771_s28 + $0x1634] ss:$8 sps:$4 sm:$0xff]  }
 0x2ba   : > { %6156 = vmatpush2.bf16.msra.mxu0 %v8501_v22  ;;  %v8572_v22 = vld [vmem:[%s8771_s28 + $0x1734] ss:$8 sps:$4 sm:$0xff]  }
 0x2bb   : > { %6197 = vmatpush2.bf16.msra.mxu1 %v8504_v48  ;;  %6157 = vmatprep.subr.bf16.mxu0 %v8509_v51  ;;  %v8567_v48 = vld [vmem:[%s8771_s28 + $0x1630] ss:$8 sps:$4 sm:$0xff]  }
 0x2bc   : > { %6198 = vmatprep.subr.bf16.mxu1 %v8512_v52  ;;  %v8570_v51 = vld [vmem:[%s8771_s28 + $0x1730] ss:$8 sps:$4 sm:$0xff]   ;;  %v8575_v52 = vld [vmem:[%s8771_s28 + $0x1624] ss:$8 sps:$4 sm:$0xff]  }
 0x2be   : > { %6158 = vmatpush2.bf16.msra.mxu0 %v8507_v7  ;;  %v8578_v7 = vld [vmem:[%s8771_s28 + $0x1724] ss:$8 sps:$4 sm:$0xff]  }
 0x2bf   : > { %6199 = vmatpush2.bf16.msra.mxu1 %v8510_v26  ;;  %6159 = vmatprep.subr.bf16.mxu0 %v8515_v54  ;;  %v8573_v26 = vld [vmem:[%s8771_s28 + $0x1620] ss:$8 sps:$4 sm:$0xff]  }
 0x2c0   : > { %6200 = vmatprep.subr.bf16.mxu1 %v8518_v55  ;;  %v8576_v54 = vld [vmem:[%s8771_s28 + $0x1720] ss:$8 sps:$4 sm:$0xff]   ;;  %v8581_v55 = vld [vmem:[%s8771_s28 + $0x1614] ss:$8 sps:$4 sm:$0xff]  }
 0x2c2   : > { %6160 = vmatpush2.bf16.msra.mxu0 %v8513_v16  ;;  %v8584_v16 = vld [vmem:[%s8771_s28 + $0x1714] ss:$8 sps:$4 sm:$0xff]  }
 0x2c3   : > { %6201 = vmatpush2.bf16.msra.mxu1 %v8516_v31  ;;  %6161 = vmatprep.subr.bf16.mxu0 %v8521_v59  ;;  %v8579_v31 = vld [vmem:[%s8771_s28 + $0x1610] ss:$8 sps:$4 sm:$0xff]  }
 0x2c4   : > { %6202 = vmatprep.subr.bf16.mxu1 %v8524_v32  ;;  %v8582_v59 = vld [vmem:[%s8771_s28 + $0x1710] ss:$8 sps:$4 sm:$0xff]   ;;  %v8587_v32 = vld [vmem:[%s8771_s28 + $0x1604] ss:$8 sps:$4 sm:$0xff]  }
 0x2c6   : > { %6162 = vmatpush2.bf16.msra.mxu0 %v8519_v60  ;;  %v8590_v60 = vld [vmem:[%s8771_s28 + $0x1704] ss:$8 sps:$4 sm:$0xff]  }
 0x2c7   : > { %6203 = vmatpush2.bf16.msra.mxu1 %v8522_v58  ;;  %6163 = vmatprep.subr.bf16.mxu0 %v8527_v61  ;;  %v8585_v58 = vld [vmem:[%s8771_s28 + $0x1600] ss:$8 sps:$4 sm:$0xff]  }
 0x2c8   : > { %6204 = vmatprep.subr.bf16.mxu1 %v8530_v0  ;;  %v8588_v61 = vld [vmem:[%s8771_s28 + $0x1700] ss:$8 sps:$4 sm:$0xff]   ;;  %v8593_v0 = vld [vmem:[%s8771_s28 + $0x16f4] ss:$8 sps:$4 sm:$0xff]  }
 0x2ca   : > { %6164 = vmatpush2.bf16.msra.mxu0 %v8525_v2  ;;  %v8591_v2 = vld [vmem:[%s8771_s28 + $0x16f0] ss:$8 sps:$4 sm:$0xff]  }
 0x2cb   : > { %6205 = vmatpush2.bf16.msra.mxu1 %v8528_v3  ;;  %6165 = vmatprep.subr.bf16.mxu0 %v8533_v4  ;;  %v8594_v3 = vld [vmem:[%s8771_s28 + $0x17f0] ss:$8 sps:$4 sm:$0xff]   ;;  %v8599_v4 = vld [vmem:[%s8771_s28 + $0x16e4] ss:$8 sps:$4 sm:$0xff]  }
 0x2cc   : > { %6206 = vmatprep.subr.bf16.mxu1 %v8536_v6  ;;  %v8602_v6 = vld [vmem:[%s8771_s28 + $0x17e4] ss:$8 sps:$4 sm:$0xff]  }
 0x2ce   : > { %6166 = vmatpush2.bf16.msra.mxu0 %v8531_v30  ;;  %v8597_v30 = vld [vmem:[%s8771_s28 + $0x16e0] ss:$8 sps:$4 sm:$0xff]  }
 0x2cf   : > { %6207 = vmatpush2.bf16.msra.mxu1 %v8534_v8  ;;  %6167 = vmatprep.subr.bf16.mxu0 %v8539_v10  ;;  %v8600_v8 = vld [vmem:[%s8771_s28 + $0x17e0] ss:$8 sps:$4 sm:$0xff]   ;;  %v8605_v10 = vld [vmem:[%s8771_s28 + $0x16d4] ss:$8 sps:$4 sm:$0xff]  }
 0x2d0   : > { %6208 = vmatprep.subr.bf16.mxu1 %v8542_v36  ;;  %v8608_v36 = vld [vmem:[%s8771_s28 + $0x17d4] ss:$8 sps:$4 sm:$0xff]  }
 0x2d2   : > { %6168 = vmatpush2.bf16.msra.mxu0 %v8537_v13  ;;  %v8611_v13 = vld [vmem:[%s8771_s28 + $0x16c4] ss:$8 sps:$4 sm:$0xff]  }
 0x2d3   : > { %6209 = vmatpush2.bf16.msra.mxu1 %v8540_v40  ;;  %6219 = vmatprep.subr.bf16.mxu0 %v8545_v15  ;;  %v8614_v40 = vld [vmem:[%s8771_s28 + $0x17c4] ss:$8 sps:$4 sm:$0xff]   ;;  %v8609_v15 = vld [vmem:[%s8771_s28 + $0x16c0] ss:$8 sps:$4 sm:$0xff]  }
 0x2d4   : > { %6260 = vmatprep.subr.bf16.mxu1 %v8548_v17  ;;  %v8612_v17 = vld [vmem:[%s8771_s28 + $0x17c0] ss:$8 sps:$4 sm:$0xff]  }
 0x2d5   : > { %v5925_v56 = vpop.f32.mrf.mxu0  ;;  %6170 = vmatmul.mubr.bf16.vlgmr.msra.gmra.mxu0 %v1308_v25  ;;  %v8606_v25 = vld [vmem:[%s8771_s28 + $0x17d0] ss:$8 sps:$4 sm:$0xff]  }
 0x2d6   : > { %v5966_v24 = vpop.f32.mrf.mxu1  ;;  %6211 = vmatmul.mubr.bf16.vlgmr.msra.gmra.mxu1 %v1330_v18  ;;  %v5926_v27 = vadd.f32 %v5925_v56, %v9575_v11  ;;  %6220 = vmatpush1.bf16.msra.mxu0 %v8543_v19  ;;  %v8620_v18 = vld [vmem:[%s8771_s28 + $0x17b4] ss:$8 sps:$4 sm:$0xff]   ;;  %v8615_v19 = vld [vmem:[%s8771_s28 + $0x16b0] ss:$8 sps:$4 sm:$0xff]   ;;  %v8624_v56 = vld [vmem:[%s8771_s28 + $0x17a0] ss:$8 sps:$4 sm:$0xff]  }
 0x2d7   : > { %6261 = vmatpush1.bf16.msra.mxu1 %v8546_v20  ;;  %v5927_v5 = vpop.f32.mrf.mxu0  ;;  %6221 = vmatprep.subr.bf16.mxu0 %v8551_v45  ;;  %v8618_v20 = vld [vmem:[%s8771_s28 + $0x17b0] ss:$8 sps:$4 sm:$0xff]   ;;  %v8623_v45 = vld [vmem:[%s8771_s28 + $0x16a4] ss:$8 sps:$4 sm:$0xff]  }
 0x2d8   : > { %v5968_v29 = vpop.f32.mrf.mxu1  ;;  %6262 = vmatprep.subr.bf16.mxu1 %v8554_v21  ;;  %v5928_v34 = vadd.f32 %v5927_v5, %v9577_v14  ;;  %v9655_v9 = vadd.f32 %v5966_v24, %v5926_v27  ;;  %6251 = vmatprep.mubr.bf16.mxu0 %v1329_v53  ;;  %v8563_v14 = vld [vmem:[%s8771_s28 + $0x1644] ss:$8 sps:$4 sm:$0xff]   ;;  %v8617_v53 = vld [vmem:[%s8771_s28 + $0x16b4] ss:$8 sps:$4 sm:$0xff]  }
 0x2d9   : > { %6292 = vmatprep.mubr.bf16.mxu1 %v1333_v23  ;;  %v5929_v11 = vpop.f32.mrf.mxu0  ;;  %v8626_v21 = vld [vmem:[%s8771_s28 + $0x17a4] ss:$8 sps:$4 sm:$0xff]   ;;  %v8621_v23 = vld [vmem:[%s8771_s28 + $0x16a0] ss:$8 sps:$4 sm:$0xff]   ;;  %v8629_v24 = vld [vmem:[%s8771_s28 + $0x1694] ss:$8 sps:$4 sm:$0xff]  }
 0x2da   : > { %v5970_v35 = vpop.f32.mrf.mxu1  ;;  %v9657_v37 = vadd.f32 %v5968_v29, %v5928_v34  ;;  %6222 = vmatpush1.bf16.msra.mxu0 %v8549_v28  ;;  %v8632_v27 = vld [vmem:[%s8771_s28 + $0x1794] ss:$8 sps:$4 sm:$0xff]   ;;  %v8627_v28 = vld [vmem:[%s8771_s28 + $0x1690] ss:$8 sps:$4 sm:$0xff]   ;;  %v8635_v5 = vld [vmem:[%s8771_s28 + $0x1684] ss:$8 sps:$4 sm:$0xff]  }
 0x2db   : > { %6263 = vmatpush1.bf16.msra.mxu1 %v8552_v63  ;;  %v5930_v39 = vpop.f32.mrf.mxu0  ;;  %6223 = vmatprep.subr.bf16.mxu0 %v8557_v33  ;;  %v8630_v63 = vld [vmem:[%s8771_s28 + $0x1790] ss:$8 sps:$4 sm:$0xff]   ;;  %v8638_v29 = vld [vmem:[%s8771_s28 + $0x1784] ss:$8 sps:$4 sm:$0xff]   ;;  %v1315_v33 = vrot.slane %v9630_v46, %v8821_v50  ;;  %v8636_v34 = vld [vmem:[%s8771_s28 + $0x1780] ss:$8 sps:$4 sm:$0xff]  }
 0x2dc   : > { %6264 = vmatprep.subr.bf16.mxu1 %v8560_v57  ;;  %v5971_v12 = vpop.f32.mrf.mxu1  ;;  %v8633_v57 = vld [vmem:[%s8771_s28 + $0x1680] ss:$8 sps:$4 sm:$0xff]   ;;  %v8642_v11 = vld [vmem:[%s8771_s28 + $0x1874] ss:$8 sps:$4 sm:$0xff]  }
 0x2dd   : > { %v1331_v35 = vcombine.high %v1315_v33, %v1315_v33  ;;  %v8718_v12 = vmov 0  }
 0x2de   : > { %6224 = vmatpush1.bf16.msra.mxu0 %v8555_v38  ;;  %v8640_v38 = vld [vmem:[%s8771_s28 + $0x1870] ss:$8 sps:$4 sm:$0xff]  }
 0x2df   : > { %6265 = vmatpush1.bf16.msra.mxu1 %v8558_v62  ;;  %6225 = vmatprep.subr.bf16.mxu0 %v8563_v14  ;;  %v8645_v62 = vld [vmem:[%s8771_s28 + $0x1864] ss:$8 sps:$4 sm:$0xff]  }
 0x2e0   : > { %6266 = vmatprep.subr.bf16.mxu1 %v8566_v41  ;;  %v8643_v41 = vld [vmem:[%s8771_s28 + $0x1860] ss:$8 sps:$4 sm:$0xff]  }
 0x2e2   : > { %6226 = vmatpush1.bf16.msra.mxu0 %v8561_v42 }
 0x2e3   : > { %6267 = vmatpush1.bf16.msra.mxu1 %v8564_v43  ;;  %6227 = vmatprep.subr.bf16.mxu0 %v8569_v47  ;;  %v8648_v47 = vld [vmem:[%s8771_s28 + $0x1854] ss:$8 sps:$4 sm:$0xff]  }
 0x2e4   : > { %6268 = vmatprep.subr.bf16.mxu1 %v8572_v22 }
 0x2e6   : > { %6228 = vmatpush1.bf16.msra.mxu0 %v8567_v48 }
 0x2e7   : > { %6269 = vmatpush1.bf16.msra.mxu1 %v8570_v51  ;;  %6229 = vmatprep.subr.bf16.mxu0 %v8575_v52 }
 0x2e8   : > { %6270 = vmatprep.subr.bf16.mxu1 %v8578_v7 }
 0x2ea   : > { %6230 = vmatpush1.bf16.msra.mxu0 %v8573_v26 }
 0x2eb   : > { %6271 = vmatpush1.bf16.msra.mxu1 %v8576_v54  ;;  %6231 = vmatprep.subr.bf16.mxu0 %v8581_v55  ;;  %v8651_v54 = vld [vmem:[%s8771_s28 + $0x1844] ss:$8 sps:$4 sm:$0xff]  }
 0x2ec   : > { %6272 = vmatprep.subr.bf16.mxu1 %v8584_v16  ;;  %v8649_v16 = vld [vmem:[%s8771_s28 + $0x1840] ss:$8 sps:$4 sm:$0xff]  }
 0x2ee   : > { %6232 = vmatpush1.bf16.msra.mxu0 %v8579_v31  ;;  %v8652_v31 = vld [vmem:[%s8771_s28 + $0x1830] ss:$8 sps:$4 sm:$0xff]  }
 0x2ef   : > { %6273 = vmatpush1.bf16.msra.mxu1 %v8582_v59  ;;  %6233 = vmatprep.subr.bf16.mxu0 %v8587_v32  ;;  %v8657_v59 = vld [vmem:[%s8771_s28 + $0x1824] ss:$8 sps:$4 sm:$0xff]   ;;  %v8655_v32 = vld [vmem:[%s8771_s28 + $0x1820] ss:$8 sps:$4 sm:$0xff]  }
 0x2f0   : > { %6274 = vmatprep.subr.bf16.mxu1 %v8590_v60  ;;  %v8660_v60 = vld [vmem:[%s8771_s28 + $0x1814] ss:$8 sps:$4 sm:$0xff]  }
 0x2f2   : > { %6234 = vmatpush1.bf16.msra.mxu0 %v8585_v58  ;;  %v8658_v58 = vld [vmem:[%s8771_s28 + $0x1810] ss:$8 sps:$4 sm:$0xff]  }
 0x2f3   : > { %6275 = vmatpush1.bf16.msra.mxu1 %v8588_v61  ;;  %6235 = vmatprep.subr.bf16.mxu0 %v8593_v0  ;;  %v8663_v61 = vld [vmem:[%s8771_s28 + $0x1804] ss:$8 sps:$4 sm:$0xff]   ;;  %v8661_v0 = vld [vmem:[%s8771_s28 + $0x1800] ss:$8 sps:$4 sm:$0xff]  }
 0x2f4   : > { %6276 = vmatprep.subr.bf16.mxu1 %v8596_v1  ;;  %v6633_v1 = vld.sshfl [vmem:[%s8766_s24 + $0x30] sm:$0x1 pattern:$0x75316420] }
 0x2f6   : > { %6236 = vmatpush2.bf16.msra.mxu0 %v8591_v2  ;;  %v1347_v2 = vrot.slane %v6633_v1, %v8821_v50 }
 0x2f7   : > { %6277 = vmatpush2.bf16.msra.mxu1 %v8594_v3  ;;  %6237 = vmatprep.subr.bf16.mxu0 %v8599_v4 }
 0x2f8   : > { %6278 = vmatprep.subr.bf16.mxu1 %v8602_v6 }
 0x2fa   : > { %6238 = vmatpush2.bf16.msra.mxu0 %v8597_v30 }
 0x2fb   : > { %6279 = vmatpush2.bf16.msra.mxu1 %v8600_v8  ;;  %6239 = vmatprep.subr.bf16.mxu0 %v8605_v10 }
 0x2fc   : > { %6280 = vmatprep.subr.bf16.mxu1 %v8608_v36 }
 0x2fe   : > { %6240 = vmatpush2.bf16.msra.mxu0 %v8603_v49 }
 0x2ff   : > { %6281 = vmatpush2.bf16.msra.mxu1 %v8606_v25  ;;  %6241 = vmatprep.subr.bf16.mxu0 %v8611_v13 }
 0x300   : > { %6282 = vmatprep.subr.bf16.mxu1 %v8614_v40 }
 0x302   : > { %6242 = vmatpush2.bf16.msra.mxu0 %v8609_v15 }
 0x303   : > { %6283 = vmatpush2.bf16.msra.mxu1 %v8612_v17  ;;  %6243 = vmatprep.subr.bf16.mxu0 %v8617_v53 }
 0x304   : > { %6284 = vmatprep.subr.bf16.mxu1 %v8620_v18 }
 0x306   : > { %6244 = vmatpush2.bf16.msra.mxu0 %v8615_v19 }
 0x307   : > { %6285 = vmatpush2.bf16.msra.mxu1 %v8618_v20  ;;  %6245 = vmatprep.subr.bf16.mxu0 %v8623_v45 }
 0x308   : > { %6286 = vmatprep.subr.bf16.mxu1 %v8626_v21 }
 0x30a   : > { %6246 = vmatpush2.bf16.msra.mxu0 %v8621_v23 }
 0x30b   : > { %6287 = vmatpush2.bf16.msra.mxu1 %v8624_v56  ;;  %6247 = vmatprep.subr.bf16.mxu0 %v8629_v24 }
 0x30c   : > { %6288 = vmatprep.subr.bf16.mxu1 %v8632_v27 }
 0x30e   : > { %6248 = vmatpush2.bf16.msra.mxu0 %v8627_v28 }
 0x30f   : > { %6289 = vmatpush2.bf16.msra.mxu1 %v8630_v63  ;;  %6249 = vmatprep.subr.bf16.mxu0 %v8635_v5 }
 0x310   : > { %6290 = vmatprep.subr.bf16.mxu1 %v8638_v29 }
 0x312   : > { %6250 = vmatpush2.bf16.msra.mxu0 %v8633_v57 }
 0x313   : > { %6291 = vmatpush2.bf16.msra.mxu1 %v8636_v34  ;;  %6301 = vmatprep.subr.bf16.mxu0 %v8642_v11 }
 0x315   : > { %v6007_v39 = vpop.f32.mrf.mxu0  ;;  %6252 = vmatmul.mubr.bf16.vlgmr.msra.gmra.mxu0 %v1315_v33 }
 0x316   : > { %v6048_v14 = vpop.f32.mrf.mxu1  ;;  %6293 = vmatmul.mubr.bf16.vlgmr.msra.gmra.mxu1 %v1331_v35  ;;  %v6008_v46 = vadd.f32 %v6007_v39, %v9655_v9  ;;  %6302 = vmatpush1.bf16.msra.mxu0 %v8640_v38  ;;  %v8646_v9 = vld [vmem:[%s8771_s28 + $0x1850] ss:$8 sps:$4 sm:$0xff]   ;;  %v8719_v35 = vmov 1983009808  }
 0x317   : > { %6333 = vmatprep.mubr.bf16.mxu0 %v8718_v12  ;;  %v6009_v42 = vpop.f32.mrf.mxu0  ;;  %6303 = vmatprep.subr.bf16.mxu0 %v8645_v62  ;;  %v6346_v38 = vunpack.c.l.s4 %v8719_v35 }
 0x318   : > { %v6050_v43 = vpop.f32.mrf.mxu1  ;;  %v6010_v22 = vadd.f32 %v6009_v42, %v9657_v37  ;;  %v6049_v48 = vadd.f32 %v6048_v14, %v6008_v46  ;;  %v8654_v37 = vld [vmem:[%s8771_s28 + $0x1834] ss:$8 sps:$4 sm:$0xff]  }
 0x319   : > { %v6011_v51 = vpop.f32.mrf.mxu0  ;;  %v6347_v14 = vunpack.c.0.s8 %v6346_v38 }
 0x31a   : > { %v6052_v52 = vpop.f32.mrf.mxu1  ;;  %v6051_v7 = vadd.f32 %v6050_v43, %v6010_v22  ;;  %6304 = vmatpush1.bf16.msra.mxu0 %v8643_v41 }
 0x31b   : > { %v6012_v26 = vpop.f32.mrf.mxu0  ;;  %6305 = vmatprep.subr.bf16.mxu0 %v8648_v47  ;;  %v6350_v22 = vsub.s32 %v6347_v14, %v8813_v44  ;;  %v241_v52 = vld [vmem:[#allocation2] sm:$0xf] }
 0x31c   : > { %v6053_v55 = vpop.f32.mrf.mxu1 }
 0x31e   : > { %6306 = vmatpush1.bf16.msra.mxu0 %v8646_v9 }
 0x31f   : > { %6307 = vmatprep.subr.bf16.mxu0 %v8651_v54 }
 0x322   : > { %6308 = vmatpush1.bf16.msra.mxu0 %v8649_v16 }
 0x323   : > { %6309 = vmatprep.subr.bf16.mxu0 %v8654_v37 }
 0x326   : > { %6310 = vmatpush1.bf16.msra.mxu0 %v8652_v31 }
 0x327   : > { %6311 = vmatprep.subr.bf16.mxu0 %v8657_v59 }
 0x32a   : > { %6312 = vmatpush1.bf16.msra.mxu0 %v8655_v32 }
 0x32b   : > { %6313 = vmatprep.subr.bf16.mxu0 %v8660_v60 }
 0x32e   : > { %6314 = vmatpush1.bf16.msra.mxu0 %v8658_v58 }
 0x32f   : > { %6315 = vmatprep.subr.bf16.mxu0 %v8663_v61 }
 0x332   : > { %6316 = vmatpush1.bf16.msra.mxu0 %v8661_v0 }
 0x335   : > { %6334 = vmatmul.mubr.bf16.vlgmr.msra.gmra.mxu0 %v1347_v2 }
 0x355   : > { %v6089_v3 = vpop.f32.mrf.mxu0 }
 0x356   : > { %v6130_v4 = vpop.f32.mrf.mxu1  ;;  %v6090_v6 = vadd.f32 %v6089_v3, %v6049_v48 }
 0x357   : > { %v6091_v30 = vpop.f32.mrf.mxu0 }
 0x358   : > { %v6132_v8 = vpop.f32.mrf.mxu1  ;;  %v6092_v10 = vadd.f32 %v6091_v30, %v6051_v7  ;;  %v6131_v36 = vadd.f32 %v6130_v4, %v6090_v6 }
 0x359   : > { %v6093_v49 = vpop.f32.mrf.mxu0 }
 0x35a   : > { %v6134_v25 = vpop.f32.mrf.mxu1  ;;  %v6133_v13 = vadd.f32 %v6132_v8, %v6092_v10 }
 0x35b   : > { %v6094_v40 = vpop.f32.mrf.mxu0 }
 0x35c   : > { %v6135_v15 = vpop.f32.mrf.mxu1 }
 0x395   : > { %v6171_v17 = vpop.f32.mrf.mxu0 }
 0x396   : > { %v6212_v53 = vpop.f32.mrf.mxu1  ;;  %v6172_v18 = vadd.f32 %v6171_v17, %v6131_v36 }
 0x397   : > { %v6173_v19 = vpop.f32.mrf.mxu0 }
 0x398   : > { %v6214_v20 = vpop.f32.mrf.mxu1  ;;  %v6174_v50 = vadd.f32 %v6173_v19, %v6133_v13  ;;  %v6213_v45 = vadd.f32 %v6212_v53, %v6172_v18 }
 0x399   : > { %v6175_v21 = vpop.f32.mrf.mxu0 }
 0x39a   : > { %v6216_v23 = vpop.f32.mrf.mxu1  ;;  %v6215_v56 = vadd.f32 %v6214_v20, %v6174_v50 }
 0x39b   : > { %v6176_v24 = vpop.f32.mrf.mxu0 }
 0x39c   : > { %v6217_v27 = vpop.f32.mrf.mxu1 }
 0x3d5   : > { %v6253_v28 = vpop.f32.mrf.mxu0 }
 0x3d6   : > { %v6294_v63 = vpop.f32.mrf.mxu1  ;;  %v6254_v62 = vadd.f32 %v6253_v28, %v6213_v45 }
 0x3d7   : > { %v6255_v5 = vpop.f32.mrf.mxu0 }
 0x3d8   : > { %v6296_v29 = vpop.f32.mrf.mxu1  ;;  %v6256_v39 = vadd.f32 %v6255_v5, %v6215_v56  ;;  %v6295_v41 = vadd.f32 %v6294_v63, %v6254_v62 }
 0x3d9   : > { %v6257_v33 = vpop.f32.mrf.mxu0 }
 0x3da   : > { %v6298_v57 = vpop.f32.mrf.mxu1  ;;  %v6297_v12 = vadd.f32 %v6296_v29, %v6256_v39 }
 0x3db   : > { %v6258_v34 = vpop.f32.mrf.mxu0 }
 0x3dc   : > { %v6299_v11 = vpop.f32.mrf.mxu1 }
 0x3f5   : > { %v6335_v46 = vpop.f32.mrf.mxu0 }
 0x3f6   : > { %v6336_v43 = vadd.f32 %v6335_v46, %v6295_v41 }
 0x3f7   : > { %v6337_v42 = vpop.f32.mrf.mxu0 }
 0x3f8   : > { %v6338_v47 = vadd.f32 %v6337_v42, %v6297_v12 }
 0x3f9   : > { %v6339_v48 = vpop.f32.mrf.mxu0 }
 0x3fa   : > { %v6344_v51 = vcombine.low %v6336_v43, %v6338_v47 }
 0x3fb   : > { %v6340_v7 = vpop.f32.mrf.mxu0 }
 0x3fc   : > { %v6351_v9 = vrot.slane %v6344_v51, %v6350_v22  ;;  %6358 = sbr.rel (%p7418_p6) target bundleno = 1260 (0x4ec), region = 48 }
 0x3fe   : > { %v6353_v26 = vadd.f32 %v6351_v9, %v241_v52 }
 0x400   : > { %6354 = vst [vmem:[#allocation2] sm:$0xf] %v6353_v26 }
 0x401   : > { %v8664_v54 = vld [vmem:[%s9811_s3 + $0x78] sm:$0xff]   ;;  %v8666_v16 = vld [vmem:[%s9811_s3 + $0x70] sm:$0xff]   ;;  %v8668_v31 = vld [vmem:[%s9811_s3 + $0x68] sm:$0xff]   ;;  %v6364_v61 = vsub.s32 0, %v8813_v44  ;;  %v6368_v0 = vsub.s32 1, %v8813_v44 }
 0x402   : > { %v8665_v55 = vld [vmem:[%s9811_s3 + $0x38] sm:$0xff]   ;;  %7441 = vmatprep.subr.bf16.mxu0 %v8664_v54  ;;  %v8667_v37 = vld [vmem:[%s9811_s3 + $0x30] sm:$0xff]   ;;  %v8669_v59 = vld [vmem:[%s9811_s3 + $0x28] sm:$0xff]  }
 0x403   : > { %7442 = vmatpush3.bf16.msra.mxu0 %v8665_v55  ;;  %v8670_v32 = vld [vmem:[%s9811_s3 + $0x60] sm:$0xff]   ;;  %v8672_v58 = vld [vmem:[%s9811_s3 + $0x58] sm:$0xff]   ;;  %v8674_v2 = vld [vmem:[%s9811_s3 + $0x50] sm:$0xff]  }
 0x404   : > { %7443 = vmatprep.subr.bf16.mxu0 %v8666_v16  ;;  %v8671_v60 = vld [vmem:[%s9811_s3 + $0x20] sm:$0xff]   ;;  %v8673_v1 = vld [vmem:[%s9811_s3 + $0x18] sm:$0xff]   ;;  %v8675_v44 = vld [vmem:[%s9811_s3 + $0x10] sm:$0xff]  }
 0x405   : > { %v6360_v3 = vld [vmem:[%s9810_s2] sm:$0x3]  ;;  %v8676_v8 = vld [vmem:[%s9811_s3 + $0x48] sm:$0xff]  }
 0x406   : > { %v6365_v4 = vrot.slane %v6360_v3, %v6364_v61  ;;  %v6369_v6 = vrot.slane %v6360_v3, %v6368_v0  ;;  %v8677_v49 = vld [vmem:[%s9811_s3 + $0x8] sm:$0xff]   ;;  %v8678_v13 = vld [vmem:[%s9811_s3 + $0x40] sm:$0xff]  }
 0x407   : > { %7444 = vmatpush3.bf16.msra.mxu0 %v8667_v37  ;;  %v6359_v10 = vld [vmem:[#allocation2] sm:$0xf] }
 0x408   : > { %7445 = vmatprep.subr.bf16.mxu0 %v8668_v31  ;;  %v6370_v30 = vcombine.low %v6365_v4, %v6369_v6  ;;  %v8679_v15 = vld [vmem:[%s9811_s3] sm:$0xff]  }
 0x409   : > { %v7419_v50 = vld [vmem:[%s9812_s4] ss:$0 sm:$0xff] }
 0x40a   : > { %v6377_v36 = vrot.slane %v6370_v30, %v6350_v22 }
 0x40b   : > { %7446 = vmatpush3.bf16.msra.mxu0 %v8669_v59 }
 0x40c   : > { %7447 = vmatprep.subr.bf16.mxu0 %v8670_v32  ;;  %v6379_v25 = vadd.f32 %v6377_v36, %v6359_v10 }
 0x40e   : > { %v6380_v40 = vmax.f32 %v6379_v25, 0.0 }
 0x40f   : > { %7448 = vmatpush3.bf16.msra.mxu0 %v8671_v60 }
 0x410   : > { %7449 = vmatprep.subr.bf16.mxu0 %v8672_v58  ;;  %v6388_v17 = vrot.slane %v6380_v40, %v6350_v22 }
 0x412   : > { %v6389_v53 = vcombine.high %v6388_v17, %v6388_v17  ;;  %v6392_v18 = vpack.c.bf16 %v6388_v17, %v6388_v17 }
 0x413   : > { %7450 = vmatpush3.bf16.msra.mxu0 %v8673_v1 }
 0x414   : > { %7451 = vmatprep.subr.bf16.mxu0 %v8674_v2  ;;  %v6393_v19 = vpack.c.bf16 %v6389_v53, %v6389_v53 }
 0x416   : > { %6561 = vmatprep.mubr.bf16.mxu0 %v6393_v19 }
 0x417   : > { %7452 = vmatpush3.bf16.msra.mxu0 %v8675_v44 }
 0x418   : > { %7453 = vmatprep.subr.bf16.mxu0 %v8676_v8 }
 0x41b   : > { %7454 = vmatpush3.bf16.msra.mxu0 %v8677_v49 }
 0x41c   : > { %7455 = vmatprep.subr.bf16.mxu0 %v8678_v13 }
 0x41f   : > { %7456 = vmatpush3.bf16.msra.mxu0 %v8679_v15 }
 0x422   : > { %6562 = vmatmul.mubr.bf16.vlgmr.msra.gmra.mxu0 %v6392_v18 }
 0x4e2   : > { %v7457_v20 = vpop.f32.mrf.mxu0 }
 0x4e4   : > { %v7458_v45 = vpop.f32.mrf.mxu0 }
 0x4e5   : > { %v7459_v21 = vadd.f32 %v7458_v45, %v7457_v20 }
 0x4e6   : > { %v7460_v23 = vpop.f32.mrf.mxu0 }
 0x4e7   : > { %v6564_v56 = vadd.f32 %v7459_v21, %v7419_v50 }
 0x4e8   : > { %v7461_v24 = vpop.f32.mrf.mxu0 }
 0x4e9   : > { %v6569_v27 = vmax.f32 %v6564_v56, 0.0 }
 0x4eb   : > { %6570 = vst [vmem:[#allocation3] sm:$0x3] %v6569_v27 }
 0x4ec PF: > { %p7467_p7 = scmp.eq.s32.totalorder %s8757_s19, 3  ;;  %s8720_s17 = smov [#allocation3]  }
 0x4ed   : > { %s6578_s20 = sshll.u32 %s8720_s17, 4  ;;  %s6579_s20 = int_to_ptr.vmem [resolvable:$true] %s6578_s20 }
 0x4ee   : > { %s8680_s21 = scalar_lea.vmem %s6579_s20, 32  ;;  %p8687_p11 = scmp.lt.s32.totalorder %s6579_s20, %s6579_s20 }
 0x4ef   : > { %p8681_p8 = scmp.ne.s32.totalorder %s6579_s20, %s8680_s21  ;;  %p8688_p12 = scmp.lt.s32.totalorder %s8680_s21, %s8680_s21 }
 0x4f1   : > { %p8682_p9 = pnand %p8681_p8, %p7467_p7  ;;  %p8689_p13 = por %p8688_p12, %p8687_p11 }
 0x4f3   : > { %p8683_p10 = pneg %p8682_p9 }
 0x4f5   : > { %p8690_p0 = pnand %p8689_p13, %p8683_p10 }
 0x4f7   : > { %8693 = shalt.err (!%p8690_p0)
}
 0x4f8   : > { %7464 = dma.vmem_to_hbm [thread:$0]  (%p7467_p7), %s6579_s20, 32, %s9813_s5, [#allocation4]  }
 0x4f9   : > { %8709 = dma.done.wait (%p7467_p7), [#allocation4], 32  }
 0x4fa   : > { %8711 = vsyncadd (%p7467_p7), [#allocation4], 4294967264 }
 0x4fb PF: > { %s16_s18 = sadd.s32 1, %s8714_s18  }
 0x4fc   : > { %p13_p1 = scmp.ge.s32.totalorder %s16_s18, 6  }
 0x4fe   :  { %15 = sbr.rel (!%p13_p1) target bundleno = 1 (0x1), region = 78 }
 0x503   :  { %6591 = vsyncpa [#allocation4], 1 }
 0x504   :  { %6593 = vsyncpa [#allocation4 + $0x1], 1 }

</bundles_post_ra>
